<compile_context>
chip_gen: v5e
topology: v5e:2x2
jax: 0.10.0
libtpu: 0.0.40
codegen_flags: <defaults>
</compile_context>

<pallas_src>
import jax
import jax.numpy as jnp
from jax.experimental import pallas as pl
from jax.experimental.pallas import tpu as pltpu

D = 768            # hidden size hardcoded in the module (amr_linear: 768*2 -> 768)
EMB = 768          # emb_dim
NCLS = 2           # final_linear output features
NCLS_PAD = 128     # pad final projection to one full lane width


def _round_up(x, m):
    return (x + m - 1) // m * m


def _cdiv(a, b):
    return (a + b - 1) // b


def _choose_bm(B, target=512):
    """Batch chunk: multiple of 16 (bf16 packing), ~target rows, minimal pad,
    even chunk count when chunked (keeps both v7x TensorCores busy)."""
    B = max(int(B), 1)
    n = max(1, _cdiv(B, target))
    if n > 1 and n % 2 == 1:
        n += 1
    return _round_up(_cdiv(B, n), 16)


def infusion_kernel(q_ref, a_ref, txt_ref,
                    w_amr_q_ref, w_amr_a_ref, b_amr_ref,
                    w_lin_txt_ref, w_lin_amr_ref, b_lin_ref,
                    w_fin_ref, b_fin_ref,
                    out_ref):
    # Layer 1: amr = tanh(amr_linear(cat(qamr, aamr)))   (dropout = identity)
    # Concat eliminated: W_amr split into q/a halves, accumulated in f32.
    acc1 = jnp.dot(q_ref[...], w_amr_q_ref[...], preferred_element_type=jnp.float32)
    acc1 = acc1 + jnp.dot(a_ref[...], w_amr_a_ref[...],
                          preferred_element_type=jnp.float32)
    h_amr = jnp.tanh(acc1.astype(jnp.bfloat16) + b_amr_ref[...])   # bf16 VPU/EUP

    # Layer 2: h = tanh(linear(cat(text_embedding, amr_embedding)))
    acc2 = jnp.dot(txt_ref[...], w_lin_txt_ref[...],
                   preferred_element_type=jnp.float32)
    acc2 = acc2 + jnp.dot(h_amr, w_lin_amr_ref[...],
                          preferred_element_type=jnp.float32)
    h = jnp.tanh(acc2.astype(jnp.bfloat16) + b_lin_ref[...])

    # Layer 3: logits = final_linear(h)   (output padded to 128 lanes, f32)
    out_ref[...] = (jnp.dot(h, w_fin_ref[...], preferred_element_type=jnp.float32)
                    + b_fin_ref[...])


def _const_spec(shape):
    # Constant block index -> the weight stays resident in VMEM across grid
    # steps; Buffered(1) drops the (useless) second pipeline buffer.
    idx = lambda i: (0, 0)
    try:
        return pl.BlockSpec(shape, idx, pipeline_mode=pl.Buffered(1))
    except (TypeError, AttributeError):
        return pl.BlockSpec(shape, idx)


@jax.jit
def amr_infusion_mul_forward(text_emb, qamr_emb, aamr_emb, kernel_params):
    """Fused 'infusion'/'concat' forward.  f32 activations in, bf16 inside,
    f32 MXU accumulation, f32 logits out."""
    (w_amr_q, w_amr_a, b_amr,
     w_lin_txt, w_lin_amr, b_lin,
     w_fin_pad, b_fin_pad) = kernel_params

    B = text_emb.shape[0]
    BM = _choose_bm(B)
    Bp = _round_up(B, BM)

    q = qamr_emb.astype(jnp.bfloat16)
    a = aamr_emb.astype(jnp.bfloat16)
    txt = text_emb.astype(jnp.bfloat16)
    if Bp != B:
        pad = ((0, Bp - B), (0, 0))
        q, a, txt = jnp.pad(q, pad), jnp.pad(a, pad), jnp.pad(txt, pad)

    n_chunks = Bp // BM
    act_spec = pl.BlockSpec((BM, D), lambda i: (i, 0))

    out_pad = pl.pallas_call(
        infusion_kernel,
        out_shape=jax.ShapeDtypeStruct((Bp, NCLS_PAD), jnp.float32),
        grid=(n_chunks,),
        in_specs=[
            act_spec,                        # qamr embedding  (bf16)
            act_spec,                        # aamr embedding  (bf16)
            act_spec,                        # text pooler emb (bf16)
            _const_spec((D, D)),             # W_amr[:, :768]  (bf16)
            _const_spec((D, D)),             # W_amr[:, 768:]  (bf16)
            _const_spec((1, D)),             # b_amr           (bf16)
            _const_spec((D, EMB)),           # W_lin (text half, bf16)
            _const_spec((D, EMB)),           # W_lin (amr half,  bf16)
            _const_spec((1, EMB)),           # b_lin           (bf16)
            _const_spec((EMB, NCLS_PAD)),    # W_fin padded    (bf16)
            _const_spec((1, NCLS_PAD)),      # b_fin padded    (f32)
        ],
        out_specs=pl.BlockSpec((BM, NCLS_PAD), lambda i: (i, 0)),
        compiler_params=pltpu.CompilerParams(
            dimension_semantics=("parallel",),   # shard chunks over v7x's 2 TCs
            vmem_limit_bytes=24 * 1024 * 1024,   # ~10 MiB footprint at BM=512
        ),
    )(q, a, txt,
      w_amr_q, w_amr_a, b_amr,
      w_lin_txt, w_lin_amr, b_lin,
      w_fin_pad, b_fin_pad)

    return out_pad[:B, :NCLS]


def init_params(key):
    """Deterministic f32 init mirroring the PyTorch parameter shapes.

    PyTorch shapes:
      amr_linear  : W (768, 1536), b (768,)
      linear      : W (emb_dim, concat_emb_dim) = (768, 1536), b (768,)
      final_linear: W (2, emb_dim) = (2, 768),  b (2,)
    """
    ks = jax.random.split(key, 6)
    s = 0.02
    return dict(
        w_amr=jax.random.normal(ks[0], (D, 2 * D), jnp.float32) * s,
        b_amr=jax.random.normal(ks[1], (D,), jnp.float32) * s,
        w_lin=jax.random.normal(ks[2], (EMB, 2 * D), jnp.float32) * s,
        b_lin=jax.random.normal(ks[3], (EMB,), jnp.float32) * s,
        w_fin=jax.random.normal(ks[4], (NCLS, EMB), jnp.float32) * s,
        b_fin=jax.random.normal(ks[5], (NCLS,), jnp.float32) * s,
    )


def prepare_kernel_params(p):
    """Transpose to [in,out], split the K=1536 weights into q/a and text/amr
    halves (kills both concats), cast to bf16, pad the final proj to 128 lanes."""
    w_amr_t = p["w_amr"].T            # (1536, 768): rows 0..767 -> qamr, 768.. -> aamr
    w_lin_t = p["w_lin"].T            # (1536, 768): rows 0..767 -> text, 768.. -> amr
    w_amr_q = w_amr_t[:D].astype(jnp.bfloat16)
    w_amr_a = w_amr_t[D:].astype(jnp.bfloat16)
    w_lin_txt = w_lin_t[:D].astype(jnp.bfloat16)
    w_lin_amr = w_lin_t[D:].astype(jnp.bfloat16)
    w_fin_pad = (jnp.zeros((EMB, NCLS_PAD), jnp.float32)
                 .at[:, :NCLS].set(p["w_fin"].T)).astype(jnp.bfloat16)
    b_fin_pad = jnp.zeros((1, NCLS_PAD), jnp.float32).at[0, :NCLS].set(p["b_fin"])
    return (w_amr_q, w_amr_a, p["b_amr"].reshape(1, D).astype(jnp.bfloat16),
            w_lin_txt, w_lin_amr, p["b_lin"].reshape(1, EMB).astype(jnp.bfloat16),
            w_fin_pad, b_fin_pad)


def reference_forward(text_emb, qamr_emb, aamr_emb, p):
    """Pure-JAX f32 reference mirroring the PyTorch graph (dropout = identity)."""
    amr = jnp.concatenate([qamr_emb, aamr_emb], axis=1)
    amr = jnp.tanh(amr @ p["w_amr"].T + p["b_amr"])
    cat = jnp.concatenate([text_emb, amr], axis=1)
    h = jnp.tanh(cat @ p["w_lin"].T + p["b_lin"])
    return h @ p["w_fin"].T + p["b_fin"]


# TODO(synk): 'co_attn_res' / 'co_attn_res_v2' branches use nn.MultiheadAttention
# over 2-D (unbatched) embeddings and the BERT last_hidden_state; only the
# 'concat' infusion branch is implemented here.  The external text/AMR encoders
# are likewise outside the kernel; a cross-pallas_call weight-prefetch (P10)
# overlapping the one-shot ~4.7 MiB weight DMA with those encoders is a
# wrapper-level follow-up, not done here.

if __name__ == "__main__":
    key = jax.random.PRNGKey(0)
    k_text, k_q, k_a, k_params = jax.random.split(key, 4)

    B = 2
    # Stand-ins for text_model.pooler_output and amr_model.encode outputs.
    text_emb = jax.random.normal(k_text, (B, D), jnp.float32)
    qamr_emb = jax.random.normal(k_q, (B, D), jnp.float32)
    aamr_emb = jax.random.normal(k_a, (B, D), jnp.float32)

    params = init_params(k_params)
    kernel_params = prepare_kernel_params(params)

    logits = amr_infusion_mul_forward(text_emb, qamr_emb, aamr_emb, kernel_params)
    jax.block_until_ready(logits)

    ref = reference_forward(text_emb, qamr_emb, aamr_emb, params)
    assert logits.shape == (B, NCLS)
    # bf16 weights/activations/tanh vs f32 reference: loosened tolerance is
    # expected quantization error, not a bug.
    assert jnp.allclose(logits, ref, atol=5e-2, rtol=5e-2), (
        float(jnp.max(jnp.abs(logits - ref))))

    print("KERNEL_OK")
</pallas_src>

<mosaic_0001>
module attributes {stable_mosaic.version = 11 : i64} {
  func.func @infusion_kernel(%arg0: i32, %arg1: memref<16x768xbf16, #tpu.memory_space<vmem>>, %arg2: memref<16x768xbf16, #tpu.memory_space<vmem>>, %arg3: memref<16x768xbf16, #tpu.memory_space<vmem>>, %arg4: memref<768x768xbf16, #tpu.memory_space<vmem>>, %arg5: memref<768x768xbf16, #tpu.memory_space<vmem>>, %arg6: memref<1x768xbf16, #tpu.memory_space<vmem>>, %arg7: memref<768x768xbf16, #tpu.memory_space<vmem>>, %arg8: memref<768x768xbf16, #tpu.memory_space<vmem>>, %arg9: memref<1x768xbf16, #tpu.memory_space<vmem>>, %arg10: memref<768x128xbf16, #tpu.memory_space<vmem>>, %arg11: memref<1x128xf32, #tpu.memory_space<vmem>>, %arg12: memref<16x128xf32, #tpu.memory_space<vmem>>) attributes {dimension_semantics = [#tpu.dimension_semantics<parallel>], iteration_bounds = array<i64: 1>, scalar_prefetch = 0 : i64, scratch_operands = 0 : i64, tpu.core_type = #tpu.core_type<tc>, window_params = [{transform_indices = @transform_0, window_bounds = array<i64: 16, 768>}, {transform_indices = @transform_1, window_bounds = array<i64: 16, 768>}, {transform_indices = @transform_2, window_bounds = array<i64: 16, 768>}, {pipeline_mode = #tpu.pipeline_mode<synchronous>, transform_indices = @transform_3, window_bounds = array<i64: 768, 768>}, {pipeline_mode = #tpu.pipeline_mode<synchronous>, transform_indices = @transform_4, window_bounds = array<i64: 768, 768>}, {pipeline_mode = #tpu.pipeline_mode<synchronous>, transform_indices = @transform_5, window_bounds = array<i64: 1, 768>}, {pipeline_mode = #tpu.pipeline_mode<synchronous>, transform_indices = @transform_6, window_bounds = array<i64: 768, 768>}, {pipeline_mode = #tpu.pipeline_mode<synchronous>, transform_indices = @transform_7, window_bounds = array<i64: 768, 768>}, {pipeline_mode = #tpu.pipeline_mode<synchronous>, transform_indices = @transform_8, window_bounds = array<i64: 1, 768>}, {pipeline_mode = #tpu.pipeline_mode<synchronous>, transform_indices = @transform_9, window_bounds = array<i64: 768, 128>}, {pipeline_mode = #tpu.pipeline_mode<synchronous>, transform_indices = @transform_10, window_bounds = array<i64: 1, 128>}, {transform_indices = @transform_11, window_bounds = array<i64: 16, 128>}]} {
    %c0 = arith.constant 0 : index
    %c0_0 = arith.constant 0 : index
    %0 = vector.load %arg1[%c0, %c0_0] : memref<16x768xbf16, #tpu.memory_space<vmem>>, vector<16x768xbf16>
    %c0_1 = arith.constant 0 : index
    %c0_2 = arith.constant 0 : index
    %1 = vector.load %arg4[%c0_1, %c0_2] : memref<768x768xbf16, #tpu.memory_space<vmem>>, vector<768x768xbf16>
    %cst = arith.constant dense<0.000000e+00> : vector<16x768xf32>
    %2 = tpu.matmul %0, %1, %cst {dimension_numbers = #tpu.dot_dimension_numbers<[1], [0], [0], [1], [0, 0, 1, 1], [], []>} : vector<16x768xbf16>, vector<768x768xbf16>, vector<16x768xf32> -> vector<16x768xf32>
    %c0_3 = arith.constant 0 : index
    %c0_4 = arith.constant 0 : index
    %3 = vector.load %arg2[%c0_3, %c0_4] : memref<16x768xbf16, #tpu.memory_space<vmem>>, vector<16x768xbf16>
    %c0_5 = arith.constant 0 : index
    %c0_6 = arith.constant 0 : index
    %4 = vector.load %arg5[%c0_5, %c0_6] : memref<768x768xbf16, #tpu.memory_space<vmem>>, vector<768x768xbf16>
    %cst_7 = arith.constant dense<0.000000e+00> : vector<16x768xf32>
    %5 = tpu.matmul %3, %4, %cst_7 {dimension_numbers = #tpu.dot_dimension_numbers<[1], [0], [0], [1], [0, 0, 1, 1], [], []>} : vector<16x768xbf16>, vector<768x768xbf16>, vector<16x768xf32> -> vector<16x768xf32>
    %6 = arith.addf %2, %5 : vector<16x768xf32>
    %7 = arith.truncf %6 : vector<16x768xf32> to vector<16x768xbf16>
    %c0_8 = arith.constant 0 : index
    %c0_9 = arith.constant 0 : index
    %8 = vector.load %arg6[%c0_8, %c0_9] : memref<1x768xbf16, #tpu.memory_space<vmem>>, vector<1x768xbf16>
    %9 = vector.broadcast %8 : vector<1x768xbf16> to vector<16x768xbf16>
    %10 = arith.addf %7, %9 : vector<16x768xbf16>
    %11 = math.tanh %10 : vector<16x768xbf16>
    %c0_10 = arith.constant 0 : index
    %c0_11 = arith.constant 0 : index
    %12 = vector.load %arg3[%c0_10, %c0_11] : memref<16x768xbf16, #tpu.memory_space<vmem>>, vector<16x768xbf16>
    %c0_12 = arith.constant 0 : index
    %c0_13 = arith.constant 0 : index
    %13 = vector.load %arg7[%c0_12, %c0_13] : memref<768x768xbf16, #tpu.memory_space<vmem>>, vector<768x768xbf16>
    %cst_14 = arith.constant dense<0.000000e+00> : vector<16x768xf32>
    %14 = tpu.matmul %12, %13, %cst_14 {dimension_numbers = #tpu.dot_dimension_numbers<[1], [0], [0], [1], [0, 0, 1, 1], [], []>} : vector<16x768xbf16>, vector<768x768xbf16>, vector<16x768xf32> -> vector<16x768xf32>
    %c0_15 = arith.constant 0 : index
    %c0_16 = arith.constant 0 : index
    %15 = vector.load %arg8[%c0_15, %c0_16] : memref<768x768xbf16, #tpu.memory_space<vmem>>, vector<768x768xbf16>
    %cst_17 = arith.constant dense<0.000000e+00> : vector<16x768xf32>
    %16 = tpu.matmul %11, %15, %cst_17 {dimension_numbers = #tpu.dot_dimension_numbers<[1], [0], [0], [1], [0, 0, 1, 1], [], []>} : vector<16x768xbf16>, vector<768x768xbf16>, vector<16x768xf32> -> vector<16x768xf32>
    %17 = arith.addf %14, %16 : vector<16x768xf32>
    %18 = arith.truncf %17 : vector<16x768xf32> to vector<16x768xbf16>
    %c0_18 = arith.constant 0 : index
    %c0_19 = arith.constant 0 : index
    %19 = vector.load %arg9[%c0_18, %c0_19] : memref<1x768xbf16, #tpu.memory_space<vmem>>, vector<1x768xbf16>
    %20 = vector.broadcast %19 : vector<1x768xbf16> to vector<16x768xbf16>
    %21 = arith.addf %18, %20 : vector<16x768xbf16>
    %22 = math.tanh %21 : vector<16x768xbf16>
    %c0_20 = arith.constant 0 : index
    %c0_21 = arith.constant 0 : index
    %23 = vector.load %arg10[%c0_20, %c0_21] : memref<768x128xbf16, #tpu.memory_space<vmem>>, vector<768x128xbf16>
    %cst_22 = arith.constant dense<0.000000e+00> : vector<16x128xf32>
    %24 = tpu.matmul %22, %23, %cst_22 {dimension_numbers = #tpu.dot_dimension_numbers<[1], [0], [0], [1], [0, 0, 1, 1], [], []>} : vector<16x768xbf16>, vector<768x128xbf16>, vector<16x128xf32> -> vector<16x128xf32>
    %c0_23 = arith.constant 0 : index
    %c0_24 = arith.constant 0 : index
    %25 = vector.load %arg11[%c0_23, %c0_24] : memref<1x128xf32, #tpu.memory_space<vmem>>, vector<1x128xf32>
    %26 = vector.broadcast %25 : vector<1x128xf32> to vector<16x128xf32>
    %27 = arith.addf %24, %26 : vector<16x128xf32>
    %c0_25 = arith.constant 0 : index
    %c0_26 = arith.constant 0 : index
    %28 = vector.load %arg12[%c0_25, %c0_26] : memref<16x128xf32, #tpu.memory_space<vmem>>, vector<16x128xf32>
    tpu.vector_store %arg12[%c0_25, %c0_26], %27 {strides = array<i32>} : memref<16x128xf32, #tpu.memory_space<vmem>>, vector<16x128xf32>,
    return
  }
  func.func @transform_0(%arg0: i32) -> (i32, i32) {
    %c0_i32 = arith.constant 0 : i32
    %c0_i32_0 = arith.constant 0 : i32
    return %arg0, %c0_i32 : i32, i32
  }
  func.func @transform_1(%arg0: i32) -> (i32, i32) {
    %c0_i32 = arith.constant 0 : i32
    %c0_i32_0 = arith.constant 0 : i32
    return %arg0, %c0_i32 : i32, i32
  }
  func.func @transform_2(%arg0: i32) -> (i32, i32) {
    %c0_i32 = arith.constant 0 : i32
    %c0_i32_0 = arith.constant 0 : i32
    return %arg0, %c0_i32 : i32, i32
  }
  func.func @transform_3(%arg0: i32) -> (i32, i32) {
    %c0_i32 = arith.constant 0 : i32
    %c0_i32_0 = arith.constant 0 : i32
    %c0_i32_1 = arith.constant 0 : i32
    return %c0_i32, %c0_i32_0 : i32, i32
  }
  func.func @transform_4(%arg0: i32) -> (i32, i32) {
    %c0_i32 = arith.constant 0 : i32
    %c0_i32_0 = arith.constant 0 : i32
    %c0_i32_1 = arith.constant 0 : i32
    return %c0_i32, %c0_i32_0 : i32, i32
  }
  func.func @transform_5(%arg0: i32) -> (i32, i32) {
    %c0_i32 = arith.constant 0 : i32
    %c0_i32_0 = arith.constant 0 : i32
    %c0_i32_1 = arith.constant 0 : i32
    return %c0_i32, %c0_i32_0 : i32, i32
  }
  func.func @transform_6(%arg0: i32) -> (i32, i32) {
    %c0_i32 = arith.constant 0 : i32
    %c0_i32_0 = arith.constant 0 : i32
    %c0_i32_1 = arith.constant 0 : i32
    return %c0_i32, %c0_i32_0 : i32, i32
  }
  func.func @transform_7(%arg0: i32) -> (i32, i32) {
    %c0_i32 = arith.constant 0 : i32
    %c0_i32_0 = arith.constant 0 : i32
    %c0_i32_1 = arith.constant 0 : i32
    return %c0_i32, %c0_i32_0 : i32, i32
  }
  func.func @transform_8(%arg0: i32) -> (i32, i32) {
    %c0_i32 = arith.constant 0 : i32
    %c0_i32_0 = arith.constant 0 : i32
    %c0_i32_1 = arith.constant 0 : i32
    return %c0_i32, %c0_i32_0 : i32, i32
  }
  func.func @transform_9(%arg0: i32) -> (i32, i32) {
    %c0_i32 = arith.constant 0 : i32
    %c0_i32_0 = arith.constant 0 : i32
    %c0_i32_1 = arith.constant 0 : i32
    return %c0_i32, %c0_i32_0 : i32, i32
  }
  func.func @transform_10(%arg0: i32) -> (i32, i32) {
    %c0_i32 = arith.constant 0 : i32
    %c0_i32_0 = arith.constant 0 : i32
    %c0_i32_1 = arith.constant 0 : i32
    return %c0_i32, %c0_i32_0 : i32, i32
  }
  func.func @transform_11(%arg0: i32) -> (i32, i32) {
    %c0_i32 = arith.constant 0 : i32
    %c0_i32_0 = arith.constant 0 : i32
    return %arg0, %c0_i32 : i32, i32
  }
}

</mosaic_0001>

<bundles_post_ra>
// kernel: amr_infusion_mul_forward.1
= control target key start
LH: loop header
LB: loop body
LE: loop exit
PB: predicated region body
PF: predicated region fallthrough
CT: control target
= control target key end

     0   :  { %16 = vsyncpa [#allocation3], 0  ;;  %s17149_s0 = inlined_call_operand.vmem [shape: bf16[16,768], index: 0, kind: input, shape index: {}]   ;;  %s17150_s1 = inlined_call_operand.vmem [shape: bf16[16,768], index: 1, kind: input, shape index: {}]   ;;  %s17151_s2 = inlined_call_operand.vmem [shape: bf16[16,768], index: 2, kind: input, shape index: {}]   ;;  %s17152_s3 = inlined_call_operand.hbm [shape: bf16[768,768], index: 3, kind: input, shape index: {}]   ;;  %s17153_s4 = inlined_call_operand.hbm [shape: bf16[768,768], index: 4, kind: input, shape index: {}]   ;;  %s17154_s5 = inlined_call_operand.hbm [shape: bf16[1,768], index: 5, kind: input, shape index: {}]   ;;  %s17155_s6 = inlined_call_operand.hbm [shape: bf16[768,768], index: 6, kind: input, shape index: {}]   ;;  %s17156_s7 = inlined_call_operand.hbm [shape: bf16[768,768], index: 7, kind: input, shape index: {}]   ;;  %s17157_s8 = inlined_call_operand.hbm [shape: bf16[1,768], index: 8, kind: input, shape index: {}]   ;;  %s17158_s9 = inlined_call_operand.hbm [shape: bf16[768,128], index: 9, kind: input, shape index: {}]   ;;  %s17159_s10 = inlined_call_operand.hbm [shape: f32[1,128], index: 10, kind: input, shape index: {}]   ;;  %s17160_s11 = inlined_call_operand.vmem [shape: f32[16,128], index: 11, kind: output, shape index: {}]  }
   0x1   :  { %17 = vsyncpa [#allocation5], 0 }
   0x2   :  { %18 = vsyncpa [#allocation8], 0 }
   0x3   :  { %19 = vsyncpa [#allocation11], 0 }
   0x4   :  { %20 = vsyncpa [#allocation14], 0  ;;  %s44_s19 = sshll.u32 %s17153_s4, 4  ;;  %s16227_s20 = smov [#allocation4]   ;;  %s45_s19 = int_to_ptr.hbm [resolvable:$true] %s44_s19 }
   0x5   :  { %s46_s21 = sshll.u32 %s16227_s20, 4  ;;  %s68_s24 = sshll.u32 %s17155_s6, 4  ;;  %s47_s21 = int_to_ptr.vmem [resolvable:$true] %s46_s21  ;;  %s69_s24 = int_to_ptr.hbm [resolvable:$true] %s68_s24 }
   0x6   :  { %s16228_s25 = smov 384   ;;  %s16229_s26 = smov 24  }
   0x7   :  { %52 = dma.hbm_to_vmem [thread:$0]  %s45_s19, 36864, %s47_s21, [#allocation5], %s16228_s25, %s16228_s25, %s16229_s26  }
   0x8   :  { %s16230_s27 = smov [#allocation7]   ;;  %s95_s4 = sshll.u32 %s17157_s8, 4  ;;  %s96_s4 = int_to_ptr.hbm [resolvable:$true] %s95_s4 }
   0x9   :  { %s70_s28 = sshll.u32 %s16230_s27, 4  ;;  %s31_s13 = sshll.u32 %s17152_s3, 4  ;;  %s71_s28 = int_to_ptr.vmem [resolvable:$true] %s70_s28  ;;  %s32_s13 = int_to_ptr.hbm [resolvable:$true] %s31_s13 }
   0xa   :  { %76 = dma.hbm_to_vmem [thread:$0]  %s69_s24, 36864, %s71_s28, [#allocation8], %s16228_s25, %s16228_s25, %s16229_s26  }
   0xb   :  { %s16231_s14 = smov [#allocation10]   ;;  %s16232_s16 = smov [#allocation2]  }
   0xc   :  { %s97_s15 = sshll.u32 %s16231_s14, 4  ;;  %s33_s17 = sshll.u32 %s16232_s16, 4  ;;  %s98_s15 = int_to_ptr.vmem [resolvable:$true] %s97_s15  ;;  %s34_s17 = int_to_ptr.vmem [resolvable:$true] %s33_s17 }
   0xd   :  { %100 = dma.hbm_to_vmem [thread:$0]  %s96_s4, 96, %s98_s15, [#allocation11]  }
   0xe   :  { %s58_s8 = sshll.u32 %s17154_s5, 4  ;;  %s81_s3 = sshll.u32 %s17156_s7, 4  ;;  %s59_s8 = int_to_ptr.hbm [resolvable:$true] %s58_s8  ;;  %s82_s3 = int_to_ptr.hbm [resolvable:$true] %s81_s3 }
   0xf   :  { %39 = dma.hbm_to_vmem [thread:$0]  %s32_s13, 36864, %s34_s17, [#allocation3], %s16228_s25, %s16228_s25, %s16229_s26  }
  0x10   :  { %s16233_s22 = smov [#allocation6]   ;;  %s16234_s24 = smov [#allocation9]  }
  0x11   :  { %s60_s23 = sshll.u32 %s16233_s22, 4  ;;  %s83_s27 = sshll.u32 %s16234_s24, 4  ;;  %s61_s23 = int_to_ptr.vmem [resolvable:$true] %s60_s23  ;;  %s84_s27 = int_to_ptr.vmem [resolvable:$true] %s83_s27 }
  0x12   :  { %63 = dma.hbm_to_vmem [thread:$0]  %s59_s8, 96, %s61_s23, [#allocation5]  }
  0x13   :  { %s105_s5 = sshll.u32 %s17158_s9, 4  ;;  %s16235_s30 = smov [#allocation12]   ;;  %s106_s5 = int_to_ptr.hbm [resolvable:$true] %s105_s5 }
  0x14   :  { %89 = dma.hbm_to_vmem [thread:$0]  %s82_s3, 36864, %s84_s27, [#allocation8], %s16228_s25, %s16228_s25, %s16229_s26  }
  0x15   :  { %s107_s4 = sshll.u32 %s16235_s30, 4  ;;  %s119_s12 = sshll.u32 %s17159_s10, 4  ;;  %s108_s4 = int_to_ptr.vmem [resolvable:$true] %s107_s4  ;;  %s120_s12 = int_to_ptr.hbm [resolvable:$true] %s119_s12 }
  0x16   :  { %s16236_s13 = smov 64   ;;  %s16237_s14 = smov 4  }
  0x17   :  { %113 = dma.hbm_to_vmem [thread:$0]  %s106_s5, 6144, %s108_s4, [#allocation11], %s16236_s13, %s16236_s13, %s16237_s14  }
  0x18   :  { %s16238_s15 = smov [#allocation13]  }
  0x19   :  { %s121_s16 = sshll.u32 %s16238_s15, 4  ;;  %s122_s16 = int_to_ptr.vmem [resolvable:$true] %s121_s16 }
  0x1a   :  { %124 = dma.hbm_to_vmem [thread:$0]  %s120_s12, 16, %s122_s16, [#allocation14]  }
  0x1b   :  { %16217 = dma.done.wait [#allocation3], 36864  }
  0x1c   :  { %16218 = vsyncadd [#allocation3], 4294930432 }
  0x1d   :  { %16219 = dma.done.wait [#allocation5], 36960  }
  0x1e   :  { %16220 = vsyncadd [#allocation5], 4294930336 }
  0x1f   :  { %16221 = dma.done.wait [#allocation8], 73728  }
  0x20   :  { %16222 = vsyncadd [#allocation8], 4294893568 }
  0x21   :  { %16223 = dma.done.wait [#allocation11], 6240  }
  0x22   :  { %16224 = vsyncadd [#allocation11], 4294961056 }
  0x23   :  { %16225 = dma.done.wait [#allocation14], 16  }
  0x24   :  { %16226 = vsyncadd [#allocation14], 4294967280  ;;  %v10068_v0 = vld [vmem:[#allocation4 + $0x150] sm:$0xf]  ;;  %v15091_v1 = vld [vmem:[#allocation4 + $0x164] sm:$0xf0] }
  0x25   :  { %v10260_v2 = vld [vmem:[#allocation4 + $0x2d0] sm:$0xf]  ;;  %v10069_v3 = vor.u32 %v15091_v1, %v10068_v0  ;;  %v15139_v4 = vld [vmem:[#allocation4 + $0x2e4] sm:$0xf0]  ;;  %v10044_v11 = vld [vmem:[#allocation4 + $0x120] sm:$0xf] }
  0x26   :  { %v10452_v5 = vld [vmem:[#allocation4 + $0x450] sm:$0xf]  ;;  %v15187_v6 = vld [vmem:[#allocation4 + $0x464] sm:$0xf0]  ;;  %v10261_v7 = vor.u32 %v15139_v4, %v10260_v2  ;;  %v15085_v13 = vld [vmem:[#allocation4 + $0x134] sm:$0xf0] }
  0x27   :  { %v10453_v8 = vor.u32 %v15187_v6, %v10452_v5  ;;  %v10644_v9 = vld [vmem:[#allocation4 + $0x5d0] sm:$0xf]  ;;  %v15235_v10 = vld [vmem:[#allocation4 + $0x5e4] sm:$0xf0]  ;;  %2215 = vmatpush.bf16.msra.mxu0 %v10069_v3  ;;  %v10236_v14 = vld [vmem:[#allocation4 + $0x2a0] sm:$0xf]  ;;  %v10045_v16 = vor.u32 %v15085_v13, %v10044_v11 }
  0x28   :  { %v10645_v12 = vor.u32 %v15235_v10, %v10644_v9  ;;  %v15133_v15 = vld [vmem:[#allocation4 + $0x2b4] sm:$0xf0]  ;;  %2229 = vmatpush.bf16.msra.mxu1 %v10261_v7  ;;  %v10428_v18 = vld [vmem:[#allocation4 + $0x420] sm:$0xf]  ;;  %v10020_v23 = vld [vmem:[#allocation4 + $0xf0] sm:$0xf] }
  0x29   :  { %2243 = vmatpush.bf16.msra.mxu2 %v10453_v8  ;;  %v10237_v17 = vor.u32 %v15133_v15, %v10236_v14  ;;  %v15181_v19 = vld [vmem:[#allocation4 + $0x434] sm:$0xf0]  ;;  %v10620_v20 = vld [vmem:[#allocation4 + $0x5a0] sm:$0xf]  ;;  %v15079_v24 = vld [vmem:[#allocation4 + $0x104] sm:$0xf0] }
  0x2a   :  { %2257 = vmatpush.bf16.msra.mxu3 %v10645_v12  ;;  %v10429_v21 = vor.u32 %v15181_v19, %v10428_v18  ;;  %v15229_v22 = vld [vmem:[#allocation4 + $0x5b4] sm:$0xf0]  ;;  %v10212_v26 = vld [vmem:[#allocation4 + $0x270] sm:$0xf]  ;;  %v15127_v27 = vld [vmem:[#allocation4 + $0x284] sm:$0xf0]  ;;  %v10021_v29 = vor.u32 %v15079_v24, %v10020_v23 }
  0x2b   :  { %v10621_v25 = vor.u32 %v15229_v22, %v10620_v20  ;;  %v10404_v28 = vld [vmem:[#allocation4 + $0x3f0] sm:$0xf]  ;;  %2216 = vmatpush.bf16.msra.mxu0 %v10045_v16  ;;  %v15175_v30 = vld [vmem:[#allocation4 + $0x404] sm:$0xf0]  ;;  %v10213_v33 = vor.u32 %v15127_v27, %v10212_v26  ;;  %v9996_v35 = vld [vmem:[#allocation4 + $0xc0] sm:$0xf] }
  0x2c   :  { %v10596_v31 = vld [vmem:[#allocation4 + $0x570] sm:$0xf]  ;;  %v15223_v32 = vld [vmem:[#allocation4 + $0x584] sm:$0xf0]  ;;  %2230 = vmatpush.bf16.msra.mxu1 %v10237_v17  ;;  %v10405_v34 = vor.u32 %v15175_v30, %v10404_v28  ;;  %v15073_v36 = vld [vmem:[#allocation4 + $0xd4] sm:$0xf0] }
  0x2d   :  { %2244 = vmatpush.bf16.msra.mxu2 %v10429_v21  ;;  %v10188_v37 = vld [vmem:[#allocation4 + $0x240] sm:$0xf]  ;;  %v10597_v38 = vor.u32 %v15223_v32, %v10596_v31  ;;  %v15121_v39 = vld [vmem:[#allocation4 + $0x254] sm:$0xf0]  ;;  %v9997_v44 = vor.u32 %v15073_v36, %v9996_v35  ;;  %v9972_v47 = vld [vmem:[#allocation4 + $0x90] sm:$0xf] }
  0x2e   :  { %2258 = vmatpush.bf16.msra.mxu3 %v10621_v25  ;;  %v10380_v40 = vld [vmem:[#allocation4 + $0x3c0] sm:$0xf]  ;;  %v15169_v41 = vld [vmem:[#allocation4 + $0x3d4] sm:$0xf0]  ;;  %v10189_v45 = vor.u32 %v15121_v39, %v10188_v37  ;;  %v15067_v48 = vld [vmem:[#allocation4 + $0xa4] sm:$0xf0] }
  0x2f   :  { %v10572_v42 = vld [vmem:[#allocation4 + $0x540] sm:$0xf]  ;;  %v15217_v43 = vld [vmem:[#allocation4 + $0x554] sm:$0xf0]  ;;  %2217 = vmatpush.bf16.msra.mxu0 %v10021_v29  ;;  %v10381_v46 = vor.u32 %v15169_v41, %v10380_v40  ;;  %v10164_v49 = vld [vmem:[#allocation4 + $0x210] sm:$0xf]  ;;  %v9973_v56 = vor.u32 %v15067_v48, %v9972_v47 }
  0x30   :  { %2231 = vmatpush.bf16.msra.mxu1 %v10213_v33  ;;  %v10573_v50 = vor.u32 %v15217_v43, %v10572_v42  ;;  %v15115_v51 = vld [vmem:[#allocation4 + $0x224] sm:$0xf0]  ;;  %v10356_v52 = vld [vmem:[#allocation4 + $0x390] sm:$0xf]  ;;  %v9948_v59 = vld [vmem:[#allocation4 + $0x60] sm:$0xf] }
  0x31   :  { %2245 = vmatpush.bf16.msra.mxu2 %v10405_v34  ;;  %v15163_v53 = vld [vmem:[#allocation4 + $0x3a4] sm:$0xf0]  ;;  %v10548_v54 = vld [vmem:[#allocation4 + $0x510] sm:$0xf]  ;;  %v10165_v57 = vor.u32 %v15115_v51, %v10164_v49  ;;  %v15061_v60 = vld [vmem:[#allocation4 + $0x74] sm:$0xf0] }
  0x32   :  { %2259 = vmatpush.bf16.msra.mxu3 %v10597_v38  ;;  %v15211_v55 = vld [vmem:[#allocation4 + $0x524] sm:$0xf0]  ;;  %v10357_v58 = vor.u32 %v15163_v53, %v10356_v52  ;;  %v10140_v61 = vld [vmem:[#allocation4 + $0x1e0] sm:$0xf]  ;;  %v15109_v63 = vld [vmem:[#allocation4 + $0x1f4] sm:$0xf0]  ;;  %v9949_v4 = vor.u32 %v15061_v60, %v9948_v59 }
  0x33   :  { %2218 = vmatpush.bf16.msra.mxu0 %v9997_v44  ;;  %v10549_v62 = vor.u32 %v15211_v55, %v10548_v54  ;;  %v10332_v0 = vld [vmem:[#allocation4 + $0x360] sm:$0xf]  ;;  %v15157_v1 = vld [vmem:[#allocation4 + $0x374] sm:$0xf0]  ;;  %v10141_v5 = vor.u32 %v15109_v63, %v10140_v61  ;;  %v9924_v7 = vld [vmem:[#allocation4 + $0x30] sm:$0xf] }
  0x34   :  { %2232 = vmatpush.bf16.msra.mxu1 %v10189_v45  ;;  %v10524_v2 = vld [vmem:[#allocation4 + $0x4e0] sm:$0xf]  ;;  %v15205_v3 = vld [vmem:[#allocation4 + $0x4f4] sm:$0xf0]  ;;  %v10333_v6 = vor.u32 %v15157_v1, %v10332_v0  ;;  %v15055_v8 = vld [vmem:[#allocation4 + $0x44] sm:$0xf0] }
  0x35   :  { %2246 = vmatpush.bf16.msra.mxu2 %v10381_v46  ;;  %v10116_v9 = vld [vmem:[#allocation4 + $0x1b0] sm:$0xf]  ;;  %v10525_v10 = vor.u32 %v15205_v3, %v10524_v2  ;;  %v15103_v11 = vld [vmem:[#allocation4 + $0x1c4] sm:$0xf0]  ;;  %v9925_v16 = vor.u32 %v15055_v8, %v9924_v7  ;;  %v9900_v17 = vld [vmem:[#allocation4] sm:$0xf] }
  0x36   :  { %2260 = vmatpush.bf16.msra.mxu3 %v10573_v50  ;;  %v10308_v12 = vld [vmem:[#allocation4 + $0x330] sm:$0xf]  ;;  %v15151_v13 = vld [vmem:[#allocation4 + $0x344] sm:$0xf0]  ;;  %v15049_v18 = vld [vmem:[#allocation4 + $0x14] sm:$0xf0]  ;;  %v10117_v19 = vor.u32 %v15103_v11, %v10116_v9 }
  0x37   :  { %2219 = vmatpush.bf16.msra.mxu0 %v9973_v56  ;;  %v10500_v14 = vld [vmem:[#allocation4 + $0x4b0] sm:$0xf]  ;;  %v15199_v15 = vld [vmem:[#allocation4 + $0x4c4] sm:$0xf0]  ;;  %v10309_v20 = vor.u32 %v15151_v13, %v10308_v12  ;;  %v10092_v21 = vld [vmem:[#allocation4 + $0x180] sm:$0xf]  ;;  %v9901_v31 = vor.u32 %v15049_v18, %v9900_v17 }
  0x38   :  { %2233 = vmatpush.bf16.msra.mxu1 %v10165_v57  ;;  %v15097_v22 = vld [vmem:[#allocation4 + $0x194] sm:$0xf0]  ;;  %v10284_v23 = vld [vmem:[#allocation4 + $0x300] sm:$0xf]  ;;  %v10501_v24 = vor.u32 %v15199_v15, %v10500_v14  ;;  %v10836_v28 = vld [vmem:[#allocation4 + $0x750] sm:$0xf] }
  0x39   :  { %2247 = vmatpush.bf16.msra.mxu2 %v10357_v58  ;;  %v15145_v25 = vld [vmem:[#allocation4 + $0x314] sm:$0xf0]  ;;  %v10476_v26 = vld [vmem:[#allocation4 + $0x480] sm:$0xf]  ;;  %v15283_v29 = vld [vmem:[#allocation4 + $0x764] sm:$0xf0]  ;;  %v10093_v35 = vor.u32 %v15097_v22, %v10092_v21 }
  0x3a   :  { %2261 = vmatpush.bf16.msra.mxu3 %v10549_v62  ;;  %v15193_v27 = vld [vmem:[#allocation4 + $0x494] sm:$0xf0]  ;;  %v11028_v30 = vld [vmem:[#allocation4 + $0x8d0] sm:$0xf]  ;;  %v15331_v32 = vld [vmem:[#allocation4 + $0x8e4] sm:$0xf0]  ;;  %v10285_v36 = vor.u32 %v15145_v25, %v10284_v23  ;;  %v10837_v40 = vor.u32 %v15283_v29, %v10836_v28 }
  0x3b   :  { %2220 = vmatpush.bf16.msra.mxu0 %v9949_v4  ;;  %v15088_v33 = vld [vmem:[#allocation4 + $0x154] sm:$0xf]  ;;  %v10070_v34 = vld [vmem:[#allocation4 + $0x168] sm:$0xf0]  ;;  %v10477_v39 = vor.u32 %v15193_v27, %v10476_v26  ;;  %v10812_v41 = vld [vmem:[#allocation4 + $0x720] sm:$0xf]  ;;  %v11029_v42 = vor.u32 %v15331_v32, %v11028_v30 }
  0x3c   :  { %2234 = vmatpush.bf16.msra.mxu1 %v10141_v5  ;;  %v15136_v37 = vld [vmem:[#allocation4 + $0x2d4] sm:$0xf]  ;;  %v10262_v38 = vld [vmem:[#allocation4 + $0x2e8] sm:$0xf0]  ;;  %v10073_v43 = vor.u32 %v15088_v33, %v10070_v34  ;;  %v15277_v44 = vld [vmem:[#allocation4 + $0x734] sm:$0xf0] }
  0x3d   :  { %2248 = vmatpush.bf16.msra.mxu2 %v10333_v6  ;;  %v11004_v45 = vld [vmem:[#allocation4 + $0x8a0] sm:$0xf]  ;;  %v15325_v46 = vld [vmem:[#allocation4 + $0x8b4] sm:$0xf0]  ;;  %v10265_v47 = vor.u32 %v15136_v37, %v10262_v38  ;;  %v15082_v48 = vld [vmem:[#allocation4 + $0x124] sm:$0xf]  ;;  %v10813_v54 = vor.u32 %v15277_v44, %v10812_v41 }
  0x3e   :  { %2262 = vmatpush.bf16.msra.mxu3 %v10525_v10  ;;  %v10046_v49 = vld [vmem:[#allocation4 + $0x138] sm:$0xf0]  ;;  %v15130_v50 = vld [vmem:[#allocation4 + $0x2a4] sm:$0xf]  ;;  %v9876_v52 = vld [vmem:[%s17150_s1] sm:$0xf]  ;;  %v11005_v59 = vor.u32 %v15325_v46, %v11004_v45 }
  0x3f   :  { %2221 = vmatpush.bf16.msra.mxu0 %v9925_v16  ;;  %v10238_v51 = vld [vmem:[#allocation4 + $0x2b8] sm:$0xf0]  ;;  %v15043_v53 = vld [vmem:[%s17150_s1 + $0x14] sm:$0xf0]  ;;  %v15271_v56 = vld [vmem:[#allocation4 + $0x704] sm:$0xf0]  ;;  %v10049_v60 = vor.u32 %v15082_v48, %v10046_v49 }
  0x40   :  { %2235 = vmatpush.bf16.msra.mxu1 %v10117_v19  ;;  %v10788_v55 = vld [vmem:[#allocation4 + $0x6f0] sm:$0xf]  ;;  %v16341_v58 = vor.u32 %v15043_v53, %v9876_v52  ;;  %v15319_v61 = vld [vmem:[#allocation4 + $0x884] sm:$0xf0]  ;;  %v15076_v62 = vld [vmem:[#allocation4 + $0xf4] sm:$0xf]  ;;  %v10241_v0 = vor.u32 %v15130_v50, %v10238_v51 }
  0x41   :  { %2249 = vmatpush.bf16.msra.mxu2 %v10309_v20  ;;  %v10980_v57 = vld [vmem:[#allocation4 + $0x870] sm:$0xf]  ;;  %v10022_v63 = vld [vmem:[#allocation4 + $0x108] sm:$0xf0]  ;;  %v15124_v1 = vld [vmem:[#allocation4 + $0x274] sm:$0xf]  ;;  %v10789_v8 = vor.u32 %v15271_v56, %v10788_v55 }
  0x42   :  { %2263 = vmatpush.bf16.msra.mxu3 %v10501_v24  ;;  %v15040_v2 = vld [vmem:[%s17150_s1 + $0x4] sm:$0xf]  ;;  %v9878_v3 = vld [vmem:[%s17150_s1 + $0x18] sm:$0xf0]  ;;  %v10214_v4 = vld [vmem:[#allocation4 + $0x288] sm:$0xf0]  ;;  %v10981_v12 = vor.u32 %v15319_v61, %v10980_v57  ;;  %v10025_v13 = vor.u32 %v15076_v62, %v10022_v63 }
  0x43   :  { %2222 = vmatpush.bf16.msra.mxu0 %v9901_v31  ;;  %v16350_v5 = vor.u32 %v15040_v2, %v9878_v3  ;;  %v9884_v6 = vld [vmem:[%s17150_s1 + $0x8] sm:$0xf]  ;;  %v15044_v7 = vld [vmem:[%s17150_s1 + $0x1c] sm:$0xf0]  ;;  %v15070_v16 = vld [vmem:[#allocation4 + $0xc4] sm:$0xf]  ;;  %v10217_v17 = vor.u32 %v15124_v1, %v10214_v4 }
  0x44   :  { %2236 = vmatpush.bf16.msra.mxu1 %v10093_v35  ;;  %v10764_v9 = vld [vmem:[#allocation4 + $0x6c0] sm:$0xf]  ;;  %v15265_v10 = vld [vmem:[#allocation4 + $0x6d4] sm:$0xf0]  ;;  %v16358_v11 = vor.u32 %v15044_v7, %v9884_v6  ;;  %v9998_v18 = vld [vmem:[#allocation4 + $0xd8] sm:$0xf0] }
  0x45   :  { %2250 = vmatpush.bf16.msra.mxu2 %v10285_v36  ;;  %v10956_v14 = vld [vmem:[#allocation4 + $0x840] sm:$0xf]  ;;  %v15313_v15 = vld [vmem:[#allocation4 + $0x854] sm:$0xf0]  ;;  %v15041_v19 = vld [vmem:[%s17150_s1 + $0xc] sm:$0xf]  ;;  %v10765_v24 = vor.u32 %v15265_v10, %v10764_v9  ;;  %v10001_v26 = vor.u32 %v15070_v16, %v9998_v18 }
  0x46   :  { %2264 = vmatpush.bf16.msra.mxu3 %v10477_v39  ;;  %2223 = vmatmul.bf16.vlgmr.msra.gmra.mxu0 %v16341_v58  ;;  %v9886_v20 = vld [vmem:[%s17150_s1 + $0x20] sm:$0xf0]  ;;  %v15118_v21 = vld [vmem:[#allocation4 + $0x244] sm:$0xf]  ;;  %v10957_v25 = vor.u32 %v15313_v15, %v10956_v14  ;;  %v10740_v27 = vld [vmem:[#allocation4 + $0x690] sm:$0xf] }
  0x47   :  { %2271 = vmatpush.bf16.msrb.mxu0 %v10837_v40  ;;  %2237 = vmatmul.bf16.vlgmr.msra.gmra.mxu1 %v16350_v5  ;;  %v10190_v22 = vld [vmem:[#allocation4 + $0x258] sm:$0xf0]  ;;  %v16368_v23 = vor.u32 %v15041_v19, %v9886_v20  ;;  %v15259_v28 = vld [vmem:[#allocation4 + $0x6a4] sm:$0xf0]  ;;  %v10932_v29 = vld [vmem:[#allocation4 + $0x810] sm:$0xf] }
  0x48   :  { %2285 = vmatpush.bf16.msrb.mxu1 %v11029_v42  ;;  %2251 = vmatmul.bf16.vlgmr.msra.gmra.mxu2 %v16358_v11  ;;  %v10193_v30 = vor.u32 %v15118_v21, %v10190_v22  ;;  %v15307_v31 = vld [vmem:[#allocation4 + $0x824] sm:$0xf0]  ;;  %v15064_v32 = vld [vmem:[#allocation4 + $0x94] sm:$0xf]  ;;  %v9974_v33 = vld [vmem:[#allocation4 + $0xa8] sm:$0xf0]  ;;  %v10741_v36 = vor.u32 %v15259_v28, %v10740_v27 }
  0x49   :  { %2299 = vmatpush.bf16.msrb.mxu2 %v10073_v43  ;;  %v15112_v34 = vld [vmem:[#allocation4 + $0x214] sm:$0xf]  ;;  %v10166_v35 = vld [vmem:[#allocation4 + $0x228] sm:$0xf0]  ;;  %2265 = vmatmul.bf16.vlgmr.msra.gmra.mxu3 %v16368_v23  ;;  %v10933_v37 = vor.u32 %v15307_v31, %v10932_v29  ;;  %v9977_v38 = vor.u32 %v15064_v32, %v9974_v33  ;;  %v10716_v39 = vld [vmem:[#allocation4 + $0x660] sm:$0xf] }
  0x4a   :  { %2313 = vmatpush.bf16.msrb.mxu3 %v10265_v47  ;;  %v15253_v40 = vld [vmem:[#allocation4 + $0x674] sm:$0xf0]  ;;  %v10908_v41 = vld [vmem:[#allocation4 + $0x7e0] sm:$0xf]  ;;  %v10169_v42 = vor.u32 %v15112_v34, %v10166_v35  ;;  %v15058_v44 = vld [vmem:[#allocation4 + $0x64] sm:$0xf] }
  0x4b   :  { %2272 = vmatpush.bf16.msrb.mxu0 %v10813_v54  ;;  %v15301_v43 = vld [vmem:[#allocation4 + $0x7f4] sm:$0xf0]  ;;  %v9950_v45 = vld [vmem:[#allocation4 + $0x78] sm:$0xf0]  ;;  %v15106_v46 = vld [vmem:[#allocation4 + $0x1e4] sm:$0xf]  ;;  %v10717_v48 = vor.u32 %v15253_v40, %v10716_v39 }
  0x4c   :  { %2286 = vmatpush.bf16.msrb.mxu1 %v11005_v59  ;;  %v10142_v47 = vld [vmem:[#allocation4 + $0x1f8] sm:$0xf0]  ;;  %v10909_v49 = vor.u32 %v15301_v43, %v10908_v41  ;;  %v9953_v50 = vor.u32 %v15058_v44, %v9950_v45  ;;  %v10692_v51 = vld [vmem:[#allocation4 + $0x630] sm:$0xf]  ;;  %v15247_v52 = vld [vmem:[#allocation4 + $0x644] sm:$0xf0] }
  0x4d   :  { %2300 = vmatpush.bf16.msrb.mxu2 %v10049_v60  ;;  %v10884_v53 = vld [vmem:[#allocation4 + $0x7b0] sm:$0xf]  ;;  %v10145_v54 = vor.u32 %v15106_v46, %v10142_v47  ;;  %v15295_v55 = vld [vmem:[#allocation4 + $0x7c4] sm:$0xf0]  ;;  %v15052_v56 = vld [vmem:[#allocation4 + $0x34] sm:$0xf]  ;;  %v10693_v61 = vor.u32 %v15247_v52, %v10692_v51 }
  0x4e   :  { %2314 = vmatpush.bf16.msrb.mxu3 %v10241_v0  ;;  %v9926_v57 = vld [vmem:[#allocation4 + $0x48] sm:$0xf0]  ;;  %v15100_v59 = vld [vmem:[#allocation4 + $0x1b4] sm:$0xf]  ;;  %v10668_v62 = vld [vmem:[#allocation4 + $0x600] sm:$0xf]  ;;  %v10885_v1 = vor.u32 %v15295_v55, %v10884_v53 }
  0x4f   :  { %2273 = vmatpush.bf16.msrb.mxu0 %v10789_v8  ;;  %v10118_v60 = vld [vmem:[#allocation4 + $0x1c8] sm:$0xf0]  ;;  %v15241_v63 = vld [vmem:[#allocation4 + $0x614] sm:$0xf0]  ;;  %v10860_v0 = vld [vmem:[#allocation4 + $0x780] sm:$0xf]  ;;  %v9929_v2 = vor.u32 %v15052_v56, %v9926_v57 }
  0x50   :  { %2287 = vmatpush.bf16.msrb.mxu1 %v10981_v12  ;;  %v15289_v3 = vld [vmem:[#allocation4 + $0x794] sm:$0xf0]  ;;  %v15046_v4 = vld [vmem:[#allocation4 + $0x4] sm:$0xf]  ;;  %v9902_v6 = vld [vmem:[#allocation4 + $0x18] sm:$0xf0]  ;;  %v10121_v7 = vor.u32 %v15100_v59, %v10118_v60  ;;  %v10669_v15 = vor.u32 %v15241_v63, %v10668_v62 }
  0x51   :  { %2301 = vmatpush.bf16.msrb.mxu2 %v10025_v13  ;;  %v15094_v8 = vld [vmem:[#allocation4 + $0x184] sm:$0xf]  ;;  %v10094_v9 = vld [vmem:[#allocation4 + $0x198] sm:$0xf0]  ;;  %v15184_v10 = vld [vmem:[#allocation4 + $0x454] sm:$0xf]  ;;  %v10861_v19 = vor.u32 %v15289_v3, %v10860_v0  ;;  %v9905_v20 = vor.u32 %v15046_v4, %v9902_v6 }
  0x52   :  { %2315 = vmatpush.bf16.msrb.mxu3 %v10217_v17  ;;  %v10454_v12 = vld [vmem:[#allocation4 + $0x468] sm:$0xf0]  ;;  %v15232_v13 = vld [vmem:[#allocation4 + $0x5d4] sm:$0xf]  ;;  %v9892_v22 = vld [vmem:[%s17150_s1 + $0x10] sm:$0xf] }
  0x53   :  { %2274 = vmatpush.bf16.msrb.mxu0 %v10765_v24  ;;  %v10646_v14 = vld [vmem:[#allocation4 + $0x5e8] sm:$0xf0]  ;;  %v15280_v16 = vld [vmem:[#allocation4 + $0x754] sm:$0xf]  ;;  %v15045_v24 = vld [vmem:[%s17150_s1 + $0x24] sm:$0xf0] }
  0x54   :  { %2288 = vmatpush.bf16.msrb.mxu1 %v10957_v25  ;;  %v10838_v17 = vld [vmem:[#allocation4 + $0x768] sm:$0xf0]  ;;  %v15328_v18 = vld [vmem:[#allocation4 + $0x8d4] sm:$0xf]  ;;  %v10097_v25 = vor.u32 %v15094_v8, %v10094_v9  ;;  %v9894_v28 = vld [vmem:[%s17150_s1 + $0x28] sm:$0xf0]  ;;  %v10649_v29 = vor.u32 %v15232_v13, %v10646_v14  ;;  %v16383_v35 = vor.u32 %v15045_v24, %v9892_v22 }
  0x55   :  { %2302 = vmatpush.bf16.msrb.mxu2 %v10001_v26  ;;  %v11030_v21 = vld [vmem:[#allocation4 + $0x8e8] sm:$0xf0]  ;;  %v10457_v26 = vor.u32 %v15184_v10, %v10454_v12  ;;  %v15178_v31 = vld [vmem:[#allocation4 + $0x424] sm:$0xf]  ;;  %v10430_v32 = vld [vmem:[#allocation4 + $0x438] sm:$0xf0] }
  0x56   :  { %2316 = vmatpush.bf16.msrb.mxu3 %v10193_v30  ;;  %v15042_v27 = vld [vmem:[%s17150_s1 + $0x14] sm:$0xf]  ;;  %v10841_v30 = vor.u32 %v15280_v16, %v10838_v17  ;;  %v15226_v33 = vld [vmem:[#allocation4 + $0x5a4] sm:$0xf]  ;;  %v11033_v34 = vor.u32 %v15328_v18, %v11030_v21  ;;  %v11006_v41 = vld [vmem:[#allocation4 + $0x8b8] sm:$0xf0] }
  0x57   :  { %2275 = vmatpush.bf16.msrb.mxu0 %v10741_v36  ;;  %v10622_v36 = vld [vmem:[#allocation4 + $0x5b8] sm:$0xf0]  ;;  %v16385_v39 = vor.u32 %v15042_v27, %v9894_v28  ;;  %v15322_v40 = vld [vmem:[#allocation4 + $0x8a4] sm:$0xf]  ;;  %v15172_v45 = vld [vmem:[#allocation4 + $0x3f4] sm:$0xf] }
  0x58   :  { %2289 = vmatpush.bf16.msrb.mxu1 %v10933_v37  ;;  %v15274_v37 = vld [vmem:[#allocation4 + $0x724] sm:$0xf]  ;;  %v10625_v43 = vor.u32 %v15226_v33, %v10622_v36  ;;  %v10406_v46 = vld [vmem:[#allocation4 + $0x408] sm:$0xf0]  ;;  %v15220_v47 = vld [vmem:[#allocation4 + $0x574] sm:$0xf] }
  0x59   :  { %2303 = vmatpush.bf16.msrb.mxu2 %v9977_v38  ;;  %v10814_v38 = vld [vmem:[#allocation4 + $0x738] sm:$0xf0]  ;;  %v10790_v51 = vld [vmem:[#allocation4 + $0x708] sm:$0xf0]  ;;  %v15316_v52 = vld [vmem:[#allocation4 + $0x874] sm:$0xf] }
  0x5a   :  { %2317 = vmatpush.bf16.msrb.mxu3 %v10169_v42  ;;  %v10433_v42 = vor.u32 %v15178_v31, %v10430_v32  ;;  %v10817_v44 = vor.u32 %v15274_v37, %v10814_v38  ;;  %v10982_v53 = vld [vmem:[#allocation4 + $0x888] sm:$0xf0]  ;;  %v15166_v57 = vld [vmem:[#allocation4 + $0x3c4] sm:$0xf]  ;;  %v10382_v59 = vld [vmem:[#allocation4 + $0x3d8] sm:$0xf0] }
  0x5b   :  { %2276 = vmatpush.bf16.msrb.mxu0 %v10717_v48  ;;  %v11009_v48 = vor.u32 %v15322_v40, %v11006_v41  ;;  %v15214_v60 = vld [vmem:[#allocation4 + $0x544] sm:$0xf]  ;;  %v10574_v62 = vld [vmem:[#allocation4 + $0x558] sm:$0xf0]  ;;  %v10385_v3 = vor.u32 %v15166_v57, %v10382_v59  ;;  %v10358_v8 = vld [vmem:[#allocation4 + $0x3a8] sm:$0xf0] }
  0x5c   :  { %2290 = vmatpush.bf16.msrb.mxu1 %v10909_v49  ;;  %v10598_v49 = vld [vmem:[#allocation4 + $0x588] sm:$0xf0]  ;;  %v15262_v63 = vld [vmem:[#allocation4 + $0x6c4] sm:$0xf]  ;;  %v10766_v0 = vld [vmem:[#allocation4 + $0x6d8] sm:$0xf0]  ;;  %v10577_v4 = vor.u32 %v15214_v60, %v10574_v62 }
  0x5d   :  { %2304 = vmatpush.bf16.msrb.mxu2 %v9953_v50  ;;  %v15268_v50 = vld [vmem:[#allocation4 + $0x6f4] sm:$0xf]  ;;  %v10601_v55 = vor.u32 %v15220_v47, %v10598_v49  ;;  %v10769_v6 = vor.u32 %v15262_v63, %v10766_v0  ;;  %v10550_v12 = vld [vmem:[#allocation4 + $0x528] sm:$0xf0]  ;;  %v10334_v21 = vld [vmem:[#allocation4 + $0x378] sm:$0xf0] }
  0x5e   :  { %2318 = vmatpush.bf16.msrb.mxu3 %v10145_v54  ;;  %v10409_v54 = vor.u32 %v15172_v45, %v10406_v46  ;;  %v10793_v56 = vor.u32 %v15268_v50, %v10790_v51  ;;  %v15208_v9 = vld [vmem:[#allocation4 + $0x514] sm:$0xf]  ;;  %v10742_v14 = vld [vmem:[#allocation4 + $0x6a8] sm:$0xf0]  ;;  %v15202_v22 = vld [vmem:[#allocation4 + $0x4e4] sm:$0xf] }
  0x5f   :  { %2277 = vmatpush.bf16.msrb.mxu0 %v10693_v61  ;;  %v10985_v61 = vor.u32 %v15316_v52, %v10982_v53  ;;  %v15256_v13 = vld [vmem:[#allocation4 + $0x694] sm:$0xf]  ;;  %v10934_v16 = vld [vmem:[#allocation4 + $0x828] sm:$0xf0]  ;;  %v10553_v18 = vor.u32 %v15208_v9, %v10550_v12  ;;  %v10718_v27 = vld [vmem:[#allocation4 + $0x678] sm:$0xf0] }
  0x60   :  { %2291 = vmatpush.bf16.msrb.mxu1 %v10885_v1  ;;  %v15310_v1 = vld [vmem:[#allocation4 + $0x844] sm:$0xf]  ;;  %v15148_v33 = vld [vmem:[#allocation4 + $0x334] sm:$0xf]  ;;  %v10502_v38 = vld [vmem:[#allocation4 + $0x4c8] sm:$0xf0] }
  0x61   :  { %2305 = vmatpush.bf16.msrb.mxu2 %v9929_v2  ;;  %v10958_v2 = vld [vmem:[#allocation4 + $0x858] sm:$0xf0]  ;;  %v15298_v28 = vld [vmem:[#allocation4 + $0x7e4] sm:$0xf]  ;;  %v15196_v36 = vld [vmem:[#allocation4 + $0x4b4] sm:$0xf] }
  0x62   :  { %2319 = vmatpush.bf16.msrb.mxu3 %v10121_v7  ;;  %v15160_v7 = vld [vmem:[#allocation4 + $0x394] sm:$0xf]  ;;  %v10961_v10 = vor.u32 %v15310_v1, %v10958_v2  ;;  %v10694_v41 = vld [vmem:[#allocation4 + $0x648] sm:$0xf0]  ;;  %v15142_v45 = vld [vmem:[#allocation4 + $0x304] sm:$0xf] }
  0x63   :  { %2278 = vmatpush.bf16.msrb.mxu0 %v10669_v15  ;;  %v15304_v15 = vld [vmem:[#allocation4 + $0x814] sm:$0xf]  ;;  %v10361_v17 = vor.u32 %v15160_v7, %v10358_v8  ;;  %v10286_v46 = vld [vmem:[#allocation4 + $0x318] sm:$0xf0]  ;;  %v15190_v47 = vld [vmem:[#allocation4 + $0x484] sm:$0xf] }
  0x64   :  { %2292 = vmatpush.bf16.msrb.mxu1 %v10861_v19  ;;  %v10745_v19 = vor.u32 %v15256_v13, %v10742_v14  ;;  %v10937_v24 = vor.u32 %v15304_v15, %v10934_v16  ;;  %v15244_v40 = vld [vmem:[#allocation4 + $0x634] sm:$0xf]  ;;  %v10478_v50 = vld [vmem:[#allocation4 + $0x498] sm:$0xf0]  ;;  %v15238_v51 = vld [vmem:[#allocation4 + $0x604] sm:$0xf]  ;;  %v10289_v60 = vor.u32 %v15142_v45, %v10286_v46 }
  0x65   :  { %2306 = vmatpush.bf16.msrb.mxu2 %v9905_v20  ;;  %v15154_v20 = vld [vmem:[#allocation4 + $0x364] sm:$0xf]  ;;  %v10697_v49 = vor.u32 %v15244_v40, %v10694_v41  ;;  %v10670_v52 = vld [vmem:[#allocation4 + $0x618] sm:$0xf0]  ;;  %v15092_v57 = vld [vmem:[#allocation4 + $0x16c] sm:$0xf0]  ;;  %v10481_v0 = vor.u32 %v15190_v47, %v10478_v50 }
  0x66   :  { %2320 = vmatpush.bf16.msrb.mxu3 %v10097_v25  ;;  %2279 = vmatmul.bf16.vlgmr.msrb.gmra.mxu0 %v16383_v35  ;;  %v10526_v25 = vld [vmem:[#allocation4 + $0x4f8] sm:$0xf0]  ;;  %v10268_v59 = vld [vmem:[#allocation4 + $0x2d8] sm:$0xf]  ;;  %v15188_v63 = vld [vmem:[#allocation4 + $0x46c] sm:$0xf0]  ;;  %v10673_v1 = vor.u32 %v15238_v51, %v10670_v52 }
  0x67   :  { %2327 = vmatpush.bf16.msra.mxu0 %v10457_v26  ;;  %2293 = vmatmul.bf16.vlgmr.msrb.gmra.mxu1 %v16385_v39  ;;  %v15250_v26 = vld [vmem:[#allocation4 + $0x664] sm:$0xf]  ;;  %v10529_v31 = vor.u32 %v15202_v22, %v10526_v25  ;;  %v10460_v62 = vld [vmem:[#allocation4 + $0x458] sm:$0xf]  ;;  %v10052_v9 = vld [vmem:[#allocation4 + $0x128] sm:$0xf] }
  0x68   :  { %2341 = vmatpush.bf16.msra.mxu1 %v10649_v29  ;;  %2307 = vmatmul.bf16.vlgmr.msrb.gmra.mxu2 %v16341_v58  ;;  %v10910_v29 = vld [vmem:[#allocation4 + $0x7f8] sm:$0xf0]  ;;  %v10721_v32 = vor.u32 %v15250_v26, %v10718_v27  ;;  %v10652_v2 = vld [vmem:[#allocation4 + $0x5d8] sm:$0xf]  ;;  %v10461_v8 = vor.u32 %v15188_v63, %v10460_v62  ;;  %v10244_v12 = vld [vmem:[#allocation4 + $0x2a8] sm:$0xf] }
  0x69   :  { %2355 = vmatpush.bf16.msra.mxu2 %v10841_v30  ;;  %2321 = vmatmul.bf16.vlgmr.msrb.gmra.mxu3 %v16350_v5  ;;  %v10337_v30 = vor.u32 %v15154_v20, %v10334_v21  ;;  %v10913_v37 = vor.u32 %v15298_v28, %v10910_v29  ;;  %v15134_v14 = vld [vmem:[#allocation4 + $0x2bc] sm:$0xf0]  ;;  %v10436_v15 = vld [vmem:[#allocation4 + $0x428] sm:$0xf]  ;;  %v10028_v22 = vld [vmem:[#allocation4 + $0xf8] sm:$0xf] }
  0x6a   :  { %2369 = vmatpush.bf16.msra.mxu3 %v11033_v34  ;;  %v10310_v34 = vld [vmem:[#allocation4 + $0x348] sm:$0xf0]  ;;  %v15182_v16 = vld [vmem:[#allocation4 + $0x43c] sm:$0xf0]  ;;  %v10245_v20 = vor.u32 %v15134_v14, %v10244_v12  ;;  %v10220_v25 = vld [vmem:[#allocation4 + $0x278] sm:$0xf] }
  0x6b   :  { %2328 = vmatpush.bf16.msra.mxu0 %v10433_v42  ;;  %v15292_v42 = vld [vmem:[#allocation4 + $0x7b4] sm:$0xf]  ;;  %v10437_v21 = vor.u32 %v15182_v16, %v10436_v15  ;;  %v15128_v27 = vld [vmem:[#allocation4 + $0x28c] sm:$0xf0]  ;;  %v10412_v28 = vld [vmem:[#allocation4 + $0x3f8] sm:$0xf] }
  0x6c   :  { %2342 = vmatpush.bf16.msra.mxu1 %v10625_v43  ;;  %v10886_v43 = vld [vmem:[#allocation4 + $0x7c8] sm:$0xf0]  ;;  %v15176_v29 = vld [vmem:[#allocation4 + $0x40c] sm:$0xf0]  ;;  %v15122_v41 = vld [vmem:[#allocation4 + $0x25c] sm:$0xf0] }
  0x6d   :  { %2356 = vmatpush.bf16.msra.mxu2 %v10817_v44  ;;  %v10313_v44 = vor.u32 %v15148_v33, %v10310_v34  ;;  %v10889_v53 = vor.u32 %v15292_v42, %v10886_v43  ;;  %v10221_v33 = vor.u32 %v15128_v27, %v10220_v25  ;;  %v10413_v34 = vor.u32 %v15176_v29, %v10412_v28  ;;  %v10388_v42 = vld [vmem:[#allocation4 + $0x3c8] sm:$0xf]  ;;  %v15170_v43 = vld [vmem:[#allocation4 + $0x3dc] sm:$0xf0]  ;;  %v15068_v50 = vld [vmem:[#allocation4 + $0xac] sm:$0xf0] }
  0x6e   :  { %2370 = vmatpush.bf16.msra.mxu3 %v11009_v48  ;;  %v10505_v48 = vor.u32 %v15196_v36, %v10502_v38  ;;  %v10004_v36 = vld [vmem:[#allocation4 + $0xc8] sm:$0xf]  ;;  %v15218_v45 = vld [vmem:[#allocation4 + $0x55c] sm:$0xf0]  ;;  %v10172_v51 = vld [vmem:[#allocation4 + $0x218] sm:$0xf] }
  0x6f   :  { %2329 = vmatpush.bf16.msra.mxu0 %v10409_v54  ;;  %v15286_v54 = vld [vmem:[#allocation4 + $0x784] sm:$0xf]  ;;  %v10196_v38 = vld [vmem:[#allocation4 + $0x248] sm:$0xf]  ;;  %v15062_v63 = vld [vmem:[#allocation4 + $0x7c] sm:$0xf0] }
  0x70   :  { %2343 = vmatpush.bf16.msra.mxu1 %v10601_v55  ;;  %v10862_v55 = vld [vmem:[#allocation4 + $0x798] sm:$0xf0]  ;;  %v10197_v47 = vor.u32 %v15122_v41, %v10196_v38  ;;  %v9956_v62 = vld [vmem:[#allocation4 + $0x68] sm:$0xf]  ;;  %v9932_v12 = vld [vmem:[#allocation4 + $0x38] sm:$0xf] }
  0x71   :  { %2357 = vmatpush.bf16.msra.mxu2 %v10793_v56  ;;  %v10076_v56 = vld [vmem:[#allocation4 + $0x158] sm:$0xf]  ;;  %v15104_v16 = vld [vmem:[#allocation4 + $0x1cc] sm:$0xf0]  ;;  %v10100_v27 = vld [vmem:[#allocation4 + $0x188] sm:$0xf] }
  0x72   :  { %2371 = vmatpush.bf16.msra.mxu3 %v10985_v61  ;;  %v15140_v61 = vld [vmem:[#allocation4 + $0x2ec] sm:$0xf0]  ;;  %v10124_v14 = vld [vmem:[#allocation4 + $0x1b8] sm:$0xf]  ;;  %v15098_v28 = vld [vmem:[#allocation4 + $0x19c] sm:$0xf0] }
  0x73   :  { %2330 = vmatpush.bf16.msra.mxu0 %v10385_v3  ;;  %v15236_v3 = vld [vmem:[#allocation4 + $0x5ec] sm:$0xf0]  ;;  %v10269_v7 = vor.u32 %v15140_v61, %v10268_v59  ;;  %v10125_v25 = vor.u32 %v15104_v16, %v10124_v14  ;;  %v10292_v29 = vld [vmem:[#allocation4 + $0x308] sm:$0xf]  ;;  %v15089_v41 = vld [vmem:[#allocation4 + $0x15c] sm:$0xf] }
  0x74   :  { %2344 = vmatpush.bf16.msra.mxu1 %v10577_v4  ;;  %v10865_v4 = vor.u32 %v15286_v54, %v10862_v55  ;;  %v10653_v13 = vor.u32 %v15236_v3, %v10652_v2  ;;  %v10364_v54 = vld [vmem:[#allocation4 + $0x398] sm:$0xf]  ;;  %v15164_v55 = vld [vmem:[#allocation4 + $0x3ac] sm:$0xf0]  ;;  %v15110_v2 = vld [vmem:[#allocation4 + $0x1fc] sm:$0xf0] }
  0x75   :  { %2358 = vmatpush.bf16.msra.mxu2 %v10769_v6  ;;  %v10077_v6 = vor.u32 %v15092_v57, %v10076_v56  ;;  %v10556_v56 = vld [vmem:[#allocation4 + $0x518] sm:$0xf]  ;;  %v15212_v57 = vld [vmem:[#allocation4 + $0x52c] sm:$0xf0]  ;;  %v10365_v61 = vor.u32 %v15164_v55, %v10364_v54  ;;  %v10340_v3 = vld [vmem:[#allocation4 + $0x368] sm:$0xf] }
  0x76   :  { %2372 = vmatpush.bf16.msra.mxu3 %v10961_v10  ;;  %v15086_v10 = vld [vmem:[#allocation4 + $0x13c] sm:$0xf0]  ;;  %v10772_v14 = vld [vmem:[#allocation4 + $0x6c8] sm:$0xf] }
  0x77   :  { %2331 = vmatpush.bf16.msra.mxu0 %v10361_v17  ;;  %v10628_v17 = vld [vmem:[#allocation4 + $0x5a8] sm:$0xf]  ;;  %v15326_v55 = vld [vmem:[#allocation4 + $0x8bc] sm:$0xf0] }
  0x78   :  { %2345 = vmatpush.bf16.msra.mxu1 %v10553_v18  ;;  %v15230_v18 = vld [vmem:[#allocation4 + $0x5bc] sm:$0xf0]  ;;  %v10964_v16 = vld [vmem:[#allocation4 + $0x848] sm:$0xf] }
  0x79   :  { %2359 = vmatpush.bf16.msra.mxu2 %v10745_v19  ;;  %v10053_v19 = vor.u32 %v15086_v10, %v10052_v9  ;;  %v10629_v26 = vor.u32 %v15230_v18, %v10628_v17  ;;  %v10316_v17 = vld [vmem:[#allocation4 + $0x338] sm:$0xf]  ;;  %v15152_v18 = vld [vmem:[#allocation4 + $0x34c] sm:$0xf0] }
  0x7a   :  { %2373 = vmatpush.bf16.msra.mxu3 %v10937_v24  ;;  %v15080_v24 = vld [vmem:[#allocation4 + $0x10c] sm:$0xf0] }
  0x7b   :  { %2332 = vmatpush.bf16.msra.mxu0 %v10337_v30  ;;  %v10604_v30 = vld [vmem:[#allocation4 + $0x578] sm:$0xf] }
  0x7c   :  { %2346 = vmatpush.bf16.msra.mxu1 %v10529_v31  ;;  %v15224_v31 = vld [vmem:[#allocation4 + $0x58c] sm:$0xf0] }
  0x7d   :  { %2360 = vmatpush.bf16.msra.mxu2 %v10721_v32  ;;  %v10029_v32 = vor.u32 %v15080_v24, %v10028_v22  ;;  %v10605_v40 = vor.u32 %v15224_v31, %v10604_v30  ;;  %v9908_v22 = vld [vmem:[#allocation4 + $0x8] sm:$0xf]  ;;  %v15050_v24 = vld [vmem:[#allocation4 + $0x1c] sm:$0xf0] }
  0x7e   :  { %2374 = vmatpush.bf16.msra.mxu3 %v10913_v37  ;;  %v15074_v37 = vld [vmem:[#allocation4 + $0xdc] sm:$0xf0]  ;;  %v9909_v38 = vor.u32 %v15050_v24, %v9908_v22  ;;  %v10198_v22 = vld [vmem:[#allocation4 + $0x260] sm:$0xf0] }
  0x7f   :  { %2333 = vmatpush.bf16.msra.mxu0 %v10313_v44  ;;  %v10580_v44 = vld [vmem:[#allocation4 + $0x548] sm:$0xf]  ;;  %v10005_v46 = vor.u32 %v15074_v37, %v10004_v36  ;;  %v15146_v31 = vld [vmem:[#allocation4 + $0x31c] sm:$0xf0]  ;;  %v15284_v36 = vld [vmem:[#allocation4 + $0x76c] sm:$0xf0] }
  0x80   :  { %2347 = vmatpush.bf16.msra.mxu1 %v10505_v48  ;;  %v10389_v48 = vor.u32 %v15170_v43, %v10388_v42  ;;  %v10581_v52 = vor.u32 %v15218_v45, %v10580_v44  ;;  %v11036_v37 = vld [vmem:[#allocation4 + $0x8d8] sm:$0xf]  ;;  %v10078_v42 = vld [vmem:[#allocation4 + $0x170] sm:$0xf0]  ;;  %v10101_v43 = vor.u32 %v15098_v28, %v10100_v27  ;;  %v10293_v44 = vor.u32 %v15146_v31, %v10292_v29  ;;  %v15137_v45 = vld [vmem:[#allocation4 + $0x2dc] sm:$0xf] }
  0x81   :  { %2361 = vmatpush.bf16.msra.mxu2 %v10697_v49  ;;  %v9980_v49 = vld [vmem:[#allocation4 + $0x98] sm:$0xf]  ;;  %v15260_v28 = vld [vmem:[#allocation4 + $0x6ac] sm:$0xf0] }
  0x82   :  { %2375 = vmatpush.bf16.msra.mxu3 %v10889_v53  ;;  %v15116_v53 = vld [vmem:[#allocation4 + $0x22c] sm:$0xf0]  ;;  %v9981_v59 = vor.u32 %v15068_v50, %v9980_v49  ;;  %v10081_v50 = vor.u32 %v15089_v41, %v10078_v42  ;;  %v10748_v27 = vld [vmem:[#allocation4 + $0x698] sm:$0xf]  ;;  %v10724_v41 = vld [vmem:[#allocation4 + $0x668] sm:$0xf] }
  0x83   :  { %2334 = vmatpush.bf16.msra.mxu0 %v10289_v60  ;;  %v10173_v60 = vor.u32 %v15116_v53, %v10172_v51  ;;  %v10820_v51 = vld [vmem:[#allocation4 + $0x728] sm:$0xf]  ;;  %v10940_v29 = vld [vmem:[#allocation4 + $0x818] sm:$0xf]  ;;  %v15308_v31 = vld [vmem:[#allocation4 + $0x82c] sm:$0xf0] }
  0x84   :  { %2348 = vmatpush.bf16.msra.mxu1 %v10481_v0  ;;  %v10148_v0 = vld [vmem:[#allocation4 + $0x1e8] sm:$0xf]  ;;  %v15254_v42 = vld [vmem:[#allocation4 + $0x67c] sm:$0xf0] }
  0x85   :  { %2362 = vmatpush.bf16.msra.mxu2 %v10673_v1  ;;  %v10557_v1 = vor.u32 %v15212_v57, %v10556_v56  ;;  %v10149_v9 = vor.u32 %v15110_v2, %v10148_v0  ;;  %v11012_v53 = vld [vmem:[#allocation4 + $0x8a8] sm:$0xf]  ;;  %v15083_v56 = vld [vmem:[#allocation4 + $0x12c] sm:$0xf]  ;;  %v10054_v57 = vld [vmem:[#allocation4 + $0x140] sm:$0xf0] }
  0x86   :  { %2376 = vmatpush.bf16.msra.mxu3 %v10865_v4  ;;  %2335 = vmatmul.bf16.vlgmr.msra.gmra.mxu0 %v16358_v11  ;;  %v15158_v4 = vld [vmem:[#allocation4 + $0x37c] sm:$0xf0]  ;;  %v10796_v0 = vld [vmem:[#allocation4 + $0x6f8] sm:$0xf] }
  0x87   :  { %2383 = vmatpush.bf16.msrb.mxu0 %v10077_v6  ;;  %2349 = vmatmul.bf16.vlgmr.msra.gmra.mxu1 %v16368_v23  ;;  %v10532_v6 = vld [vmem:[#allocation4 + $0x4e8] sm:$0xf]  ;;  %v10341_v10 = vor.u32 %v15158_v4, %v10340_v3  ;;  %v10988_v2 = vld [vmem:[#allocation4 + $0x878] sm:$0xf]  ;;  %v15320_v4 = vld [vmem:[#allocation4 + $0x88c] sm:$0xf0] }
  0x88   :  { %2397 = vmatpush.bf16.msrb.mxu1 %v10269_v7  ;;  %2363 = vmatmul.bf16.vlgmr.msra.gmra.mxu2 %v16383_v35  ;;  %v15206_v7 = vld [vmem:[#allocation4 + $0x4fc] sm:$0xf0] }
  0x89   :  { %2411 = vmatpush.bf16.msrb.mxu2 %v10461_v8  ;;  %2377 = vmatmul.bf16.vlgmr.msra.gmra.mxu3 %v16385_v39  ;;  %v9957_v8 = vor.u32 %v15062_v63, %v9956_v62  ;;  %v10533_v15 = vor.u32 %v15206_v7, %v10532_v6  ;;  %v11013_v62 = vor.u32 %v15326_v55, %v11012_v53  ;;  %v15077_v6 = vld [vmem:[#allocation4 + $0xfc] sm:$0xf]  ;;  %v10030_v7 = vld [vmem:[#allocation4 + $0x110] sm:$0xf0]  ;;  %v10700_v53 = vld [vmem:[#allocation4 + $0x638] sm:$0xf] }
  0x8a   :  { %2425 = vmatpush.bf16.msrb.mxu3 %v10653_v13  ;;  %v15056_v13 = vld [vmem:[#allocation4 + $0x4c] sm:$0xf0]  ;;  %v10057_v63 = vor.u32 %v15083_v56, %v10054_v57  ;;  %v10892_v55 = vld [vmem:[#allocation4 + $0x7b8] sm:$0xf] }
  0x8b   :  { %2384 = vmatpush.bf16.msrb.mxu0 %v10053_v19  ;;  %v10508_v19 = vld [vmem:[#allocation4 + $0x4b8] sm:$0xf]  ;;  %v15296_v57 = vld [vmem:[#allocation4 + $0x7cc] sm:$0xf0] }
  0x8c   :  { %2398 = vmatpush.bf16.msrb.mxu1 %v10245_v20  ;;  %v15200_v20 = vld [vmem:[#allocation4 + $0x4cc] sm:$0xf0] }
  0x8d   :  { %2412 = vmatpush.bf16.msrb.mxu2 %v10437_v21  ;;  %v9933_v21 = vor.u32 %v15056_v13, %v9932_v12  ;;  %v10509_v30 = vor.u32 %v15200_v20, %v10508_v19  ;;  %v10989_v12 = vor.u32 %v15320_v4, %v10988_v2  ;;  %v10033_v13 = vor.u32 %v15077_v6, %v10030_v7  ;;  %v15071_v19 = vld [vmem:[#allocation4 + $0xcc] sm:$0xf]  ;;  %v10006_v20 = vld [vmem:[#allocation4 + $0xe0] sm:$0xf0]  ;;  %v10868_v4 = vld [vmem:[#allocation4 + $0x788] sm:$0xf] }
  0x8e   :  { %2426 = vmatpush.bf16.msrb.mxu3 %v10629_v26  ;;  %v10317_v26 = vor.u32 %v15152_v18, %v10316_v17  ;;  %v15314_v18 = vld [vmem:[#allocation4 + $0x85c] sm:$0xf0]  ;;  %v10893_v2 = vor.u32 %v15296_v57, %v10892_v55  ;;  %v15047_v7 = vld [vmem:[#allocation4 + $0xc] sm:$0xf] }
  0x8f   :  { %2385 = vmatpush.bf16.msrb.mxu0 %v10029_v32  ;;  %v10484_v32 = vld [vmem:[#allocation4 + $0x488] sm:$0xf]  ;;  %v15290_v6 = vld [vmem:[#allocation4 + $0x79c] sm:$0xf0]  ;;  %v15167_v55 = vld [vmem:[#allocation4 + $0x3cc] sm:$0xf] }
  0x90   :  { %2399 = vmatpush.bf16.msrb.mxu1 %v10221_v33  ;;  %v15194_v33 = vld [vmem:[#allocation4 + $0x49c] sm:$0xf0]  ;;  %v15215_v57 = vld [vmem:[#allocation4 + $0x54c] sm:$0xf] }
  0x91   :  { %2413 = vmatpush.bf16.msrb.mxu2 %v10413_v34  ;;  %v10844_v34 = vld [vmem:[#allocation4 + $0x758] sm:$0xf] }
  0x92   :  { %2427 = vmatpush.bf16.msrb.mxu3 %v10605_v40  ;;  %v15332_v40 = vld [vmem:[#allocation4 + $0x8ec] sm:$0xf0] }
  0x93   :  { %2386 = vmatpush.bf16.msrb.mxu0 %v10005_v46  ;;  %v10270_v46 = vld [vmem:[#allocation4 + $0x2f0] sm:$0xf0]  ;;  %v11037_v49 = vor.u32 %v15332_v40, %v11036_v37  ;;  %v10749_v37 = vor.u32 %v15260_v28, %v10748_v27 }
  0x94   :  { %2400 = vmatpush.bf16.msrb.mxu1 %v10197_v47  ;;  %v10485_v47 = vor.u32 %v15194_v33, %v10484_v32  ;;  %v10273_v54 = vor.u32 %v15137_v45, %v10270_v46  ;;  %v15065_v32 = vld [vmem:[#allocation4 + $0x9c] sm:$0xf]  ;;  %v9982_v33 = vld [vmem:[#allocation4 + $0xb0] sm:$0xf0]  ;;  %v15302_v45 = vld [vmem:[#allocation4 + $0x7fc] sm:$0xf0] }
  0x95   :  { %2414 = vmatpush.bf16.msrb.mxu2 %v10389_v48  ;;  %v10845_v48 = vor.u32 %v15284_v36, %v10844_v34  ;;  %v15113_v34 = vld [vmem:[#allocation4 + $0x21c] sm:$0xf]  ;;  %v10174_v36 = vld [vmem:[#allocation4 + $0x230] sm:$0xf0]  ;;  %v9985_v40 = vor.u32 %v15065_v32, %v9982_v33  ;;  %v15059_v46 = vld [vmem:[#allocation4 + $0x6c] sm:$0xf] }
  0x96   :  { %2428 = vmatpush.bf16.msrb.mxu3 %v10581_v52  ;;  %v15278_v52 = vld [vmem:[#allocation4 + $0x73c] sm:$0xf0]  ;;  %v10630_v33 = vld [vmem:[#allocation4 + $0x5c0] sm:$0xf0] }
  0x97   :  { %2387 = vmatpush.bf16.msrb.mxu0 %v9981_v59  ;;  %v15131_v59 = vld [vmem:[#allocation4 + $0x2ac] sm:$0xf] }
  0x98   :  { %2401 = vmatpush.bf16.msrb.mxu1 %v10173_v60  ;;  %v10246_v60 = vld [vmem:[#allocation4 + $0x2c0] sm:$0xf0] }
  0x99   :  { %2415 = vmatpush.bf16.msrb.mxu2 %v10365_v61  ;;  %v10821_v61 = vor.u32 %v15278_v52, %v10820_v51  ;;  %v10249_v3 = vor.u32 %v15131_v59, %v10246_v60  ;;  %v15053_v59 = vld [vmem:[#allocation4 + $0x3c] sm:$0xf]  ;;  %v9934_v60 = vld [vmem:[#allocation4 + $0x50] sm:$0xf0] }
  0x9a   :  { %2429 = vmatpush.bf16.msrb.mxu3 %v10557_v1  ;;  %v15272_v1 = vld [vmem:[#allocation4 + $0x70c] sm:$0xf0] }
  0x9b   :  { %2388 = vmatpush.bf16.msrb.mxu0 %v9957_v8  ;;  %v15125_v8 = vld [vmem:[#allocation4 + $0x27c] sm:$0xf] }
  0x9c   :  { %2402 = vmatpush.bf16.msrb.mxu1 %v10149_v9  ;;  %v10222_v9 = vld [vmem:[#allocation4 + $0x290] sm:$0xf0] }
  0x9d   :  { %2416 = vmatpush.bf16.msrb.mxu2 %v10341_v10  ;;  %v10797_v10 = vor.u32 %v15272_v1, %v10796_v0  ;;  %v10225_v17 = vor.u32 %v15125_v8, %v10222_v9  ;;  %v10676_v0 = vld [vmem:[#allocation4 + $0x608] sm:$0xf]  ;;  %v15242_v1 = vld [vmem:[#allocation4 + $0x61c] sm:$0xf0]  ;;  %v9910_v9 = vld [vmem:[#allocation4 + $0x20] sm:$0xf0] }
  0x9e   :  { %2430 = vmatpush.bf16.msrb.mxu3 %v10533_v15  ;;  %v15266_v15 = vld [vmem:[#allocation4 + $0x6dc] sm:$0xf0] }
  0x9f   :  { %2389 = vmatpush.bf16.msrb.mxu0 %v9933_v21  ;;  %v15119_v21 = vld [vmem:[#allocation4 + $0x24c] sm:$0xf]  ;;  %v10773_v24 = vor.u32 %v15266_v15, %v10772_v14  ;;  %v10462_v14 = vld [vmem:[#allocation4 + $0x470] sm:$0xf0]  ;;  %v15233_v15 = vld [vmem:[#allocation4 + $0x5dc] sm:$0xf] }
  0xa0   :  { %2403 = vmatpush.bf16.msrb.mxu1 %v10125_v25  ;;  %v10965_v25 = vor.u32 %v15314_v18, %v10964_v16  ;;  %v10677_v16 = vor.u32 %v15242_v1, %v10676_v0  ;;  %v15281_v18 = vld [vmem:[#allocation4 + $0x75c] sm:$0xf]  ;;  %v10966_v0 = vld [vmem:[#allocation4 + $0x860] sm:$0xf0] }
  0xa1   :  { %2417 = vmatpush.bf16.msrb.mxu2 %v10317_v26  ;;  %v10009_v26 = vor.u32 %v15071_v19, %v10006_v20  ;;  %v10846_v19 = vld [vmem:[#allocation4 + $0x770] sm:$0xf0]  ;;  %v10869_v20 = vor.u32 %v15290_v6, %v10868_v4  ;;  %v15161_v4 = vld [vmem:[#allocation4 + $0x39c] sm:$0xf] }
  0xa2   :  { %2431 = vmatpush.bf16.msrb.mxu3 %v10509_v30  ;;  %v10201_v30 = vor.u32 %v15119_v21, %v10198_v22  ;;  %v9913_v21 = vor.u32 %v15047_v7, %v9910_v9  ;;  %v15329_v22 = vld [vmem:[#allocation4 + $0x8dc] sm:$0xf]  ;;  %v10849_v28 = vor.u32 %v15281_v18, %v10846_v19  ;;  %v10366_v6 = vld [vmem:[#allocation4 + $0x3b0] sm:$0xf0] }
  0xa3   :  { %2390 = vmatpush.bf16.msrb.mxu0 %v9909_v38  ;;  %v10941_v38 = vor.u32 %v15308_v31, %v10940_v29  ;;  %v15179_v29 = vld [vmem:[#allocation4 + $0x42c] sm:$0xf]  ;;  %v15209_v7 = vld [vmem:[#allocation4 + $0x51c] sm:$0xf]  ;;  %v10558_v9 = vld [vmem:[#allocation4 + $0x530] sm:$0xf0] }
  0xa4   :  { %2404 = vmatpush.bf16.msrb.mxu1 %v10101_v43  ;;  %v10916_v43 = vld [vmem:[#allocation4 + $0x7e8] sm:$0xf]  ;;  %v15227_v31 = vld [vmem:[#allocation4 + $0x5ac] sm:$0xf]  ;;  %v10561_v19 = vor.u32 %v15209_v7, %v10558_v9  ;;  %v15237_v9 = vld [vmem:[#allocation4 + $0x5f4] sm:$0xf0] }
  0xa5   :  { %2418 = vmatpush.bf16.msrb.mxu2 %v10293_v44  ;;  %v10177_v44 = vor.u32 %v15113_v34, %v10174_v36  ;;  %v10917_v51 = vor.u32 %v15302_v45, %v10916_v43  ;;  %v15275_v34 = vld [vmem:[#allocation4 + $0x72c] sm:$0xf]  ;;  %v10822_v36 = vld [vmem:[#allocation4 + $0x740] sm:$0xf0]  ;;  %v15173_v43 = vld [vmem:[#allocation4 + $0x3fc] sm:$0xf] }
  0xa6   :  { %2432 = vmatpush.bf16.msrb.mxu3 %v10485_v47  ;;  %2391 = vmatmul.bf16.vlgmr.msrb.gmra.mxu0 %v16341_v58  ;;  %v9958_v47 = vld [vmem:[#allocation4 + $0x80] sm:$0xf0]  ;;  %v15221_v45 = vld [vmem:[#allocation4 + $0x57c] sm:$0xf] }
  0xa7   :  { %2439 = vmatpush.bf16.msra.mxu0 %v10845_v48  ;;  %2405 = vmatmul.bf16.vlgmr.msrb.gmra.mxu1 %v16350_v5  ;;  %v15107_v48 = vld [vmem:[#allocation4 + $0x1ec] sm:$0xf]  ;;  %v9961_v52 = vor.u32 %v15059_v46, %v9958_v47  ;;  %v10606_v47 = vld [vmem:[#allocation4 + $0x590] sm:$0xf0] }
  0xa8   :  { %2453 = vmatpush.bf16.msra.mxu1 %v11037_v49  ;;  %2419 = vmatmul.bf16.vlgmr.msrb.gmra.mxu2 %v16358_v11  ;;  %v10150_v49 = vld [vmem:[#allocation4 + $0x200] sm:$0xf0] }
  0xa9   :  { %2467 = vmatpush.bf16.msra.mxu2 %v10081_v50  ;;  %2433 = vmatmul.bf16.vlgmr.msrb.gmra.mxu3 %v16368_v23  ;;  %v10725_v50 = vor.u32 %v15254_v42, %v10724_v41  ;;  %v10153_v56 = vor.u32 %v15107_v48, %v10150_v49  ;;  %v10633_v41 = vor.u32 %v15227_v31, %v10630_v33  ;;  %v15269_v48 = vld [vmem:[#allocation4 + $0x6fc] sm:$0xf]  ;;  %v10798_v49 = vld [vmem:[#allocation4 + $0x710] sm:$0xf0] }
  0xaa   :  { %2481 = vmatpush.bf16.msra.mxu3 %v10273_v54  ;;  %v15248_v54 = vld [vmem:[#allocation4 + $0x64c] sm:$0xf0]  ;;  %v10825_v42 = vor.u32 %v15275_v34, %v10822_v36  ;;  %v15149_v34 = vld [vmem:[#allocation4 + $0x33c] sm:$0xf]  ;;  %v10318_v36 = vld [vmem:[#allocation4 + $0x350] sm:$0xf0] }
  0xab   :  { %2440 = vmatpush.bf16.msra.mxu0 %v10821_v61  ;;  %v15101_v61 = vld [vmem:[#allocation4 + $0x1bc] sm:$0xf] }
  0xac   :  { %2454 = vmatpush.bf16.msra.mxu1 %v11013_v62  ;;  %v10126_v62 = vld [vmem:[#allocation4 + $0x1d0] sm:$0xf0] }
  0xad   :  { %2468 = vmatpush.bf16.msra.mxu2 %v10057_v63  ;;  %v10701_v63 = vor.u32 %v15248_v54, %v10700_v53  ;;  %v10129_v8 = vor.u32 %v15101_v61, %v10126_v62  ;;  %v10609_v53 = vor.u32 %v15221_v45, %v10606_v47  ;;  %v10801_v54 = vor.u32 %v15269_v48, %v10798_v49  ;;  %v15263_v61 = vld [vmem:[#allocation4 + $0x6cc] sm:$0xf]  ;;  %v10774_v62 = vld [vmem:[#allocation4 + $0x6e0] sm:$0xf0]  ;;  %v10894_v45 = vld [vmem:[#allocation4 + $0x7d0] sm:$0xf0] }
  0xae   :  { %2482 = vmatpush.bf16.msra.mxu3 %v10249_v3  ;;  %v9937_v3 = vor.u32 %v15053_v59, %v9934_v60  ;;  %v10582_v60 = vld [vmem:[#allocation4 + $0x560] sm:$0xf0]  ;;  %v10321_v47 = vor.u32 %v15149_v34, %v10318_v36  ;;  %v15143_v48 = vld [vmem:[#allocation4 + $0x30c] sm:$0xf]  ;;  %v15129_v34 = vld [vmem:[#allocation4 + $0x294] sm:$0xf0] }
  0xaf   :  { %2441 = vmatpush.bf16.msra.mxu0 %v10797_v10  ;;  %v15095_v10 = vld [vmem:[#allocation4 + $0x18c] sm:$0xf]  ;;  %v10294_v49 = vld [vmem:[#allocation4 + $0x320] sm:$0xf0]  ;;  %v10420_v36 = vld [vmem:[#allocation4 + $0x400] sm:$0xf] }
  0xb0   :  { %2455 = vmatpush.bf16.msra.mxu1 %v10989_v12  ;;  %v10102_v12 = vld [vmem:[#allocation4 + $0x1a0] sm:$0xf0] }
  0xb1   :  { %2469 = vmatpush.bf16.msra.mxu2 %v10033_v13  ;;  %v15185_v13 = vld [vmem:[#allocation4 + $0x45c] sm:$0xf] }
  0xb2   :  { %2483 = vmatpush.bf16.msra.mxu3 %v10225_v17  ;;  %v10654_v17 = vld [vmem:[#allocation4 + $0x5f0] sm:$0xf0] }
  0xb3   :  { %2442 = vmatpush.bf16.msra.mxu0 %v10773_v24  ;;  %v11038_v24 = vld [vmem:[#allocation4 + $0x8f0] sm:$0xf0]  ;;  %v10657_v27 = vor.u32 %v15233_v15, %v10654_v17  ;;  %v10369_v17 = vor.u32 %v15161_v4, %v10366_v6  ;;  %v15189_v4 = vld [vmem:[#allocation4 + $0x474] sm:$0xf0] }
  0xb4   :  { %2456 = vmatpush.bf16.msra.mxu1 %v10965_v25  ;;  %v10105_v25 = vor.u32 %v15095_v10, %v10102_v12  ;;  %v11041_v32 = vor.u32 %v15329_v22, %v11038_v24  ;;  %v15257_v10 = vld [vmem:[#allocation4 + $0x69c] sm:$0xf]  ;;  %v10750_v12 = vld [vmem:[#allocation4 + $0x6b0] sm:$0xf0]  ;;  %v10342_v22 = vld [vmem:[#allocation4 + $0x380] sm:$0xf0] }
  0xb5   :  { %2470 = vmatpush.bf16.msra.mxu2 %v10009_v26  ;;  %v10465_v26 = vor.u32 %v15185_v13, %v10462_v14  ;;  %v15305_v13 = vld [vmem:[#allocation4 + $0x81c] sm:$0xf]  ;;  %v10942_v14 = vld [vmem:[#allocation4 + $0x830] sm:$0xf0]  ;;  %v15203_v24 = vld [vmem:[#allocation4 + $0x4ec] sm:$0xf] }
  0xb6   :  { %2484 = vmatpush.bf16.msra.mxu3 %v10201_v30  ;;  %v10438_v30 = vld [vmem:[#allocation4 + $0x440] sm:$0xf0] }
  0xb7   :  { %2443 = vmatpush.bf16.msra.mxu0 %v10749_v37  ;;  %v15323_v37 = vld [vmem:[#allocation4 + $0x8ac] sm:$0xf] }
  0xb8   :  { %2457 = vmatpush.bf16.msra.mxu1 %v10941_v38  ;;  %v11014_v38 = vld [vmem:[#allocation4 + $0x8c0] sm:$0xf0] }
  0xb9   :  { %2471 = vmatpush.bf16.msra.mxu2 %v9985_v40  ;;  %v10441_v40 = vor.u32 %v15179_v29, %v10438_v30  ;;  %v11017_v46 = vor.u32 %v15323_v37, %v11014_v38  ;;  %v15299_v29 = vld [vmem:[#allocation4 + $0x7ec] sm:$0xf]  ;;  %v10918_v30 = vld [vmem:[#allocation4 + $0x800] sm:$0xf0]  ;;  %v15197_v37 = vld [vmem:[#allocation4 + $0x4bc] sm:$0xf] }
  0xba   :  { %2485 = vmatpush.bf16.msra.mxu3 %v10177_v44  ;;  %v10414_v44 = vld [vmem:[#allocation4 + $0x410] sm:$0xf0]  ;;  %v10921_v38 = vor.u32 %v15299_v29, %v10918_v30  ;;  %v10036_v30 = vld [vmem:[#allocation4 + $0x100] sm:$0xf] }
  0xbb   :  { %2444 = vmatpush.bf16.msra.mxu0 %v10725_v50  ;;  %v15317_v50 = vld [vmem:[#allocation4 + $0x87c] sm:$0xf] }
  0xbc   :  { %2458 = vmatpush.bf16.msra.mxu1 %v10917_v51  ;;  %v10990_v51 = vld [vmem:[#allocation4 + $0x890] sm:$0xf0] }
  0xbd   :  { %2472 = vmatpush.bf16.msra.mxu2 %v9961_v52  ;;  %v10417_v52 = vor.u32 %v15173_v43, %v10414_v44  ;;  %v10993_v59 = vor.u32 %v15317_v50, %v10990_v51  ;;  %v15293_v44 = vld [vmem:[#allocation4 + $0x7bc] sm:$0xf] }
  0xbe   :  { %2486 = vmatpush.bf16.msra.mxu3 %v10153_v56  ;;  %v10390_v56 = vld [vmem:[#allocation4 + $0x3e0] sm:$0xf0] }
  0xbf   :  { %2445 = vmatpush.bf16.msra.mxu0 %v10701_v63  ;;  %v15311_v63 = vld [vmem:[#allocation4 + $0x84c] sm:$0xf]  ;;  %v10393_v1 = vor.u32 %v15167_v55, %v10390_v56  ;;  %v10897_v55 = vor.u32 %v15293_v44, %v10894_v45  ;;  %v10678_v56 = vld [vmem:[#allocation4 + $0x620] sm:$0xf0]  ;;  %v10012_v44 = vld [vmem:[#allocation4 + $0xd0] sm:$0xf] }
  0xc0   :  { %2459 = vmatpush.bf16.msra.mxu1 %v10893_v2  ;;  %v10585_v2 = vor.u32 %v15215_v57, %v10582_v60  ;;  %v15287_v57 = vld [vmem:[#allocation4 + $0x78c] sm:$0xf]  ;;  %v15075_v45 = vld [vmem:[#allocation4 + $0xe4] sm:$0xf0] }
  0xc1   :  { %2473 = vmatpush.bf16.msra.mxu2 %v9937_v3  ;;  %v10777_v3 = vor.u32 %v15263_v61, %v10774_v62  ;;  %v10084_v61 = vld [vmem:[#allocation4 + $0x160] sm:$0xf]  ;;  %v15093_v62 = vld [vmem:[#allocation4 + $0x174] sm:$0xf0] }
  0xc2   :  { %2487 = vmatpush.bf16.msra.mxu3 %v10129_v8  ;;  %v10969_v8 = vor.u32 %v15311_v63, %v10966_v0  ;;  %v10276_v63 = vld [vmem:[#allocation4 + $0x2e0] sm:$0xf] }
  0xc3   :  { %2446 = vmatpush.bf16.msra.mxu0 %v10677_v16  ;;  %v2224_v15 = vpop.f32.mrf.mxu0 }
  0xc4   :  { %2460 = vmatpush.bf16.msra.mxu1 %v10869_v20  ;;  %v2238_v16 = vpop.f32.mrf.mxu1  ;;  %v10753_v20 = vor.u32 %v15257_v10, %v10750_v12  ;;  %v10085_v12 = vor.u32 %v15093_v62, %v10084_v61  ;;  %v9988_v62 = vld [vmem:[#allocation4 + $0xa0] sm:$0xf] }
  0xc5   :  { %2474 = vmatpush.bf16.msra.mxu2 %v9913_v21  ;;  %v2239_v18 = vadd.f32 %v2238_v16, %v2224_v15  ;;  %v15155_v21 = vld [vmem:[#allocation4 + $0x36c] sm:$0xf]  ;;  %v10060_v16 = vld [vmem:[#allocation4 + $0x130] sm:$0xf] }
  0xc6   :  { %2488 = vmatpush.bf16.msra.mxu3 %v10105_v25  ;;  %2447 = vmatmul.bf16.vlgmr.msra.gmra.mxu0 %v16383_v35  ;;  %v10945_v25 = vor.u32 %v15305_v13, %v10942_v14  ;;  %v10345_v31 = vor.u32 %v15155_v21, %v10342_v22  ;;  %v10444_v21 = vld [vmem:[#allocation4 + $0x430] sm:$0xf]  ;;  %v15183_v22 = vld [vmem:[#allocation4 + $0x444] sm:$0xf0] }
  0xc7   :  { %2495 = vmatpush.bf16.msrb.mxu0 %v10465_v26  ;;  %2461 = vmatmul.bf16.vlgmr.msra.gmra.mxu1 %v16385_v39  ;;  %v10534_v26 = vld [vmem:[#allocation4 + $0x500] sm:$0xf0]  ;;  %v10445_v29 = vor.u32 %v15183_v22, %v10444_v21  ;;  %v10540_v21 = vld [vmem:[#allocation4 + $0x4f0] sm:$0xf]  ;;  %v15207_v22 = vld [vmem:[#allocation4 + $0x504] sm:$0xf0] }
  0xc8   :  { %2509 = vmatpush.bf16.msrb.mxu1 %v10657_v27  ;;  %2475 = vmatmul.bf16.vlgmr.msra.gmra.mxu2 %v16341_v58  ;;  %v15251_v27 = vld [vmem:[#allocation4 + $0x66c] sm:$0xf] }
  0xc9   :  { %2523 = vmatpush.bf16.msrb.mxu2 %v10849_v28  ;;  %2489 = vmatmul.bf16.vlgmr.msra.gmra.mxu3 %v16350_v5  ;;  %v10726_v28 = vld [vmem:[#allocation4 + $0x680] sm:$0xf0] }
  0xca   :  { %2537 = vmatpush.bf16.msrb.mxu3 %v11041_v32  ;;  %v10537_v32 = vor.u32 %v15203_v24, %v10534_v26  ;;  %v10729_v33 = vor.u32 %v15251_v27, %v10726_v28  ;;  %v10636_v24 = vld [vmem:[#allocation4 + $0x5b0] sm:$0xf] }
  0xcb   :  { %2496 = vmatpush.bf16.msrb.mxu0 %v10441_v40  ;;  %v10510_v40 = vld [vmem:[#allocation4 + $0x4d0] sm:$0xf0]  ;;  %v2252_v43 = vpop.f32.mrf.mxu2  ;;  %v16405_v15 = vpop.f32.mrf.mxu0 }
  0xcc   :  { %2510 = vmatpush.bf16.msrb.mxu1 %v10633_v41  ;;  %v15245_v41 = vld [vmem:[#allocation4 + $0x63c] sm:$0xf]  ;;  %v10513_v50 = vor.u32 %v15197_v37, %v10510_v40  ;;  %v2266_v60 = vpop.f32.mrf.mxu3  ;;  %v16407_v26 = vpop.f32.mrf.mxu1  ;;  %v15177_v37 = vld [vmem:[#allocation4 + $0x414] sm:$0xf0] }
  0xcd   :  { %2524 = vmatpush.bf16.msrb.mxu2 %v10825_v42  ;;  %v10702_v42 = vld [vmem:[#allocation4 + $0x650] sm:$0xf0]  ;;  %v15225_v40 = vld [vmem:[#allocation4 + $0x594] sm:$0xf0] }
  0xce   :  { %2538 = vmatpush.bf16.msrb.mxu3 %v11017_v46  ;;  %v2253_v46 = vadd.f32 %v2252_v43, %v2239_v18  ;;  %v10705_v51 = vor.u32 %v15245_v41, %v10702_v42  ;;  %v10252_v18 = vld [vmem:[#allocation4 + $0x2b0] sm:$0xf]  ;;  %v10421_v43 = vor.u32 %v15177_v37, %v10420_v36  ;;  %v15105_v36 = vld [vmem:[#allocation4 + $0x1d4] sm:$0xf0]  ;;  %v10324_v37 = vld [vmem:[#allocation4 + $0x340] sm:$0xf] }
  0xcf   :  { %2497 = vmatpush.bf16.msrb.mxu0 %v10417_v52  ;;  %v15191_v52 = vld [vmem:[#allocation4 + $0x48c] sm:$0xf] }
  0xd0   :  { %2511 = vmatpush.bf16.msrb.mxu1 %v10609_v53  ;;  %v10486_v53 = vld [vmem:[#allocation4 + $0x4a0] sm:$0xf0]  ;;  %v16403_v0 = vadd.f32 %v2266_v60, %v2253_v46  ;;  %v10204_v46 = vld [vmem:[#allocation4 + $0x250] sm:$0xf] }
  0xd1   :  { %2525 = vmatpush.bf16.msrb.mxu2 %v10801_v54  ;;  %v15239_v54 = vld [vmem:[#allocation4 + $0x60c] sm:$0xf]  ;;  %v10489_v6 = vor.u32 %v15191_v52, %v10486_v53  ;;  %v10588_v53 = vld [vmem:[#allocation4 + $0x550] sm:$0xf] }
  0xd2   :  { %2539 = vmatpush.bf16.msrb.mxu3 %v10993_v59  ;;  %v10870_v59 = vld [vmem:[#allocation4 + $0x7a0] sm:$0xf0]  ;;  %v10681_v7 = vor.u32 %v15239_v54, %v10678_v56  ;;  %v15219_v54 = vld [vmem:[#allocation4 + $0x564] sm:$0xf0] }
  0xd3   :  { %2498 = vmatpush.bf16.msrb.mxu0 %v10393_v1  ;;  %v10297_v1 = vor.u32 %v15143_v48, %v10294_v49  ;;  %v10873_v10 = vor.u32 %v15287_v57, %v10870_v59  ;;  %v15123_v48 = vld [vmem:[#allocation4 + $0x264] sm:$0xf0]  ;;  %v10396_v49 = vld [vmem:[#allocation4 + $0x3d0] sm:$0xf]  ;;  %v10013_v57 = vor.u32 %v15075_v45, %v10012_v44 }
  0xd4   :  { %2512 = vmatpush.bf16.msrb.mxu1 %v10585_v2  ;;  %v15141_v2 = vld [vmem:[#allocation4 + $0x2f4] sm:$0xf0]  ;;  %v10205_v59 = vor.u32 %v15123_v48, %v10204_v46  ;;  %v15051_v44 = vld [vmem:[#allocation4 + $0x24] sm:$0xf0] }
  0xd5   :  { %2526 = vmatpush.bf16.msrb.mxu2 %v10777_v3  ;;  %v10468_v3 = vld [vmem:[#allocation4 + $0x460] sm:$0xf]  ;;  %v10277_v13 = vor.u32 %v15141_v2, %v10276_v63  ;;  %v15069_v63 = vld [vmem:[#allocation4 + $0xb4] sm:$0xf0]  ;;  %v10589_v2 = vor.u32 %v15219_v54, %v10588_v53  ;;  %v15099_v48 = vld [vmem:[#allocation4 + $0x1a4] sm:$0xf0] }
  0xd6   :  { %2540 = vmatpush.bf16.msrb.mxu3 %v10969_v8  ;;  %v10660_v8 = vld [vmem:[#allocation4 + $0x5e0] sm:$0xf]  ;;  %v10469_v14 = vor.u32 %v15189_v4, %v10468_v3  ;;  %v15117_v4 = vld [vmem:[#allocation4 + $0x234] sm:$0xf0]  ;;  %v10492_v53 = vld [vmem:[#allocation4 + $0x490] sm:$0xf] }
  0xd7   :  { %2499 = vmatpush.bf16.msrb.mxu0 %v10369_v17  ;;  %v15087_v17 = vld [vmem:[#allocation4 + $0x144] sm:$0xf0] }
  0xd8   :  { %2513 = vmatpush.bf16.msrb.mxu1 %v10561_v19  ;;  %v10661_v19 = vor.u32 %v15237_v9, %v10660_v8  ;;  %v10061_v27 = vor.u32 %v15087_v17, %v10060_v16  ;;  %v10564_v8 = vld [vmem:[#allocation4 + $0x520] sm:$0xf]  ;;  %v15213_v9 = vld [vmem:[#allocation4 + $0x534] sm:$0xf0]  ;;  %v10156_v16 = vld [vmem:[#allocation4 + $0x1f0] sm:$0xf] }
  0xd9   :  { %2527 = vmatpush.bf16.msrb.mxu2 %v10753_v20  ;;  %v15135_v20 = vld [vmem:[#allocation4 + $0x2c4] sm:$0xf0]  ;;  %v10565_v17 = vor.u32 %v15213_v9, %v10564_v8 }
  0xda   :  { %2541 = vmatpush.bf16.msrb.mxu3 %v10945_v25  ;;  %v15231_v25 = vld [vmem:[#allocation4 + $0x5c4] sm:$0xf0]  ;;  %v10253_v28 = vor.u32 %v15135_v20, %v10252_v18 }
  0xdb   :  { %2500 = vmatpush.bf16.msrb.mxu0 %v10345_v31  ;;  %v15081_v31 = vld [vmem:[#allocation4 + $0x114] sm:$0xf0]  ;;  %v15111_v18 = vld [vmem:[#allocation4 + $0x204] sm:$0xf0] }
  0xdc   :  { %2514 = vmatpush.bf16.msrb.mxu1 %v10537_v32  ;;  %v10228_v32 = vld [vmem:[#allocation4 + $0x280] sm:$0xf]  ;;  %v10037_v41 = vor.u32 %v15081_v31, %v10036_v30  ;;  %v15159_v20 = vld [vmem:[#allocation4 + $0x384] sm:$0xf0] }
  0xdd   :  { %2528 = vmatpush.bf16.msrb.mxu2 %v10729_v33  ;;  %v10637_v33 = vor.u32 %v15231_v25, %v10636_v24  ;;  %v10229_v42 = vor.u32 %v15129_v34, %v10228_v32  ;;  %v9940_v31 = vld [vmem:[#allocation4 + $0x40] sm:$0xf]  ;;  %v15057_v32 = vld [vmem:[#allocation4 + $0x54] sm:$0xf0]  ;;  %v10541_v34 = vor.u32 %v15207_v22, %v10540_v21  ;;  %v15195_v54 = vld [vmem:[#allocation4 + $0x4a4] sm:$0xf0] }
  0xde   :  { %2542 = vmatpush.bf16.msrb.mxu3 %v10921_v38  ;;  %v10612_v38 = vld [vmem:[#allocation4 + $0x580] sm:$0xf]  ;;  %v10254_v21 = vld [vmem:[#allocation4 + $0x2c8] sm:$0xf0] }
  0xdf   :  { %2501 = vmatpush.bf16.msrb.mxu0 %v10321_v47  ;;  %v10613_v47 = vor.u32 %v15225_v40, %v10612_v38  ;;  %v15153_v38 = vld [vmem:[#allocation4 + $0x354] sm:$0xf0]  ;;  %v10516_v40 = vld [vmem:[#allocation4 + $0x4c0] sm:$0xf] }
  0xe0   :  { %2515 = vmatpush.bf16.msrb.mxu1 %v10513_v50  ;;  %v15171_v50 = vld [vmem:[#allocation4 + $0x3e4] sm:$0xf0]  ;;  %v10325_v46 = vor.u32 %v15153_v38, %v10324_v37  ;;  %v15126_v37 = vld [vmem:[#allocation4 + $0x284] sm:$0xf]  ;;  %v10230_v38 = vld [vmem:[#allocation4 + $0x298] sm:$0xf0] }
  0xe1   :  { %2529 = vmatpush.bf16.msrb.mxu2 %v10705_v51  ;;  %v16413_v51 = vpop.f32.mrf.mxu2  ;;  %v10397_v60 = vor.u32 %v15171_v50, %v10396_v49  ;;  %v10300_v49 = vld [vmem:[#allocation4 + $0x310] sm:$0xf] }
  0xe2   :  { %2543 = vmatpush.bf16.msrb.mxu3 %v10897_v55  ;;  %v16415_v55 = vpop.f32.mrf.mxu3 }
  0xe3   :  { %2502 = vmatpush.bf16.msrb.mxu0 %v10297_v1  ;;  %v2280_v52 = vpop.f32.mrf.mxu0  ;;  %v10180_v1 = vld [vmem:[#allocation4 + $0x220] sm:$0xf] }
  0xe4   :  { %2516 = vmatpush.bf16.msrb.mxu1 %v10489_v6  ;;  %v2281_v56 = vadd.f32 %v2280_v52, %v16403_v0  ;;  %v2294_v61 = vpop.f32.mrf.mxu1  ;;  %v10372_v6 = vld [vmem:[#allocation4 + $0x3a0] sm:$0xf]  ;;  %v9989_v0 = vor.u32 %v15069_v63, %v9988_v62  ;;  %v15147_v52 = vld [vmem:[#allocation4 + $0x324] sm:$0xf0]  ;;  %v15090_v62 = vld [vmem:[#allocation4 + $0x164] sm:$0xf] }
  0xe5   :  { %2530 = vmatpush.bf16.msrb.mxu2 %v10681_v7  ;;  %v15165_v7 = vld [vmem:[#allocation4 + $0x3b4] sm:$0xf0]  ;;  %v10086_v63 = vld [vmem:[#allocation4 + $0x178] sm:$0xf0] }
  0xe6   :  { %2544 = vmatpush.bf16.msrb.mxu3 %v10873_v10  ;;  %2503 = vmatmul.bf16.vlgmr.msrb.gmra.mxu0 %v16358_v11  ;;  %v16418_v3 = vadd.f32 %v2294_v61, %v2281_v56  ;;  %v10181_v10 = vor.u32 %v15117_v4, %v10180_v1  ;;  %v10852_v56 = vld [vmem:[#allocation4 + $0x760] sm:$0xf]  ;;  %v15333_v61 = vld [vmem:[#allocation4 + $0x8f4] sm:$0xf0]  ;;  %v15138_v4 = vld [vmem:[#allocation4 + $0x2e4] sm:$0xf] }
  0xe7   :  { %2551 = vmatpush.bf16.msra.mxu0 %v10085_v12  ;;  %2517 = vmatmul.bf16.vlgmr.msrb.gmra.mxu1 %v16368_v23  ;;  %v10373_v12 = vor.u32 %v15165_v7, %v10372_v6  ;;  %v10278_v6 = vld [vmem:[#allocation4 + $0x2f8] sm:$0xf0]  ;;  %v10493_v7 = vor.u32 %v15195_v54, %v10492_v53  ;;  %v15120_v54 = vld [vmem:[#allocation4 + $0x254] sm:$0xf] }
  0xe8   :  { %2565 = vmatpush.bf16.msra.mxu1 %v10277_v13  ;;  %2531 = vmatmul.bf16.vlgmr.msrb.gmra.mxu2 %v16383_v35  ;;  %v9964_v13 = vld [vmem:[#allocation4 + $0x70] sm:$0xf] }
  0xe9   :  { %2579 = vmatpush.bf16.msra.mxu2 %v10469_v14  ;;  %2545 = vmatmul.bf16.vlgmr.msrb.gmra.mxu3 %v16385_v39  ;;  %v15063_v14 = vld [vmem:[#allocation4 + $0x84] sm:$0xf0] }
  0xea   :  { %2593 = vmatpush.bf16.msra.mxu3 %v10661_v19  ;;  %v10348_v19 = vld [vmem:[#allocation4 + $0x370] sm:$0xf] }
  0xeb   :  { %2552 = vmatpush.bf16.msra.mxu0 %v10061_v27  ;;  %v2308_v24 = vpop.f32.mrf.mxu2  ;;  %v9965_v27 = vor.u32 %v15063_v14, %v9964_v13  ;;  %v10349_v30 = vor.u32 %v15159_v20, %v10348_v19  ;;  %v11020_v13 = vld [vmem:[#allocation4 + $0x8b0] sm:$0xf]  ;;  %v10281_v14 = vor.u32 %v15138_v4, %v10278_v6  ;;  %v16422_v19 = vpop.f32.mrf.mxu0  ;;  %v15132_v20 = vld [vmem:[#allocation4 + $0x2b4] sm:$0xf] }
  0xec   :  { %2566 = vmatpush.bf16.msra.mxu1 %v10253_v28  ;;  %v2322_v25 = vpop.f32.mrf.mxu3 }
  0xed   :  { %2580 = vmatpush.bf16.msra.mxu2 %v10445_v29  ;;  %v16420_v28 = vadd.f32 %v2322_v25, %v2308_v24  ;;  %v10157_v29 = vor.u32 %v15111_v18, %v10156_v16  ;;  %v15327_v16 = vld [vmem:[#allocation4 + $0x8c4] sm:$0xf0]  ;;  %v10062_v18 = vld [vmem:[#allocation4 + $0x148] sm:$0xf0]  ;;  %v16424_v24 = vpop.f32.mrf.mxu1 }
  0xee   :  { %2594 = vmatpush.bf16.msra.mxu3 %v10637_v33  ;;  %v10132_v33 = vld [vmem:[#allocation4 + $0x1c0] sm:$0xf]  ;;  %v11021_v25 = vor.u32 %v15327_v16, %v11020_v13  ;;  %v15255_v16 = vld [vmem:[#allocation4 + $0x684] sm:$0xf0] }
  0xef   :  { %2553 = vmatpush.bf16.msra.mxu0 %v10037_v41  ;;  %v15201_v41 = vld [vmem:[#allocation4 + $0x4d4] sm:$0xf0]  ;;  %v10133_v45 = vor.u32 %v15105_v36, %v10132_v33  ;;  %v10038_v36 = vld [vmem:[#allocation4 + $0x118] sm:$0xf0] }
  0xf0   :  { %2567 = vmatpush.bf16.msra.mxu1 %v10229_v42  ;;  %v9941_v42 = vor.u32 %v15057_v32, %v9940_v31  ;;  %v10517_v50 = vor.u32 %v15201_v41, %v10516_v40  ;;  %v10996_v31 = vld [vmem:[#allocation4 + $0x880] sm:$0xf]  ;;  %v10257_v32 = vor.u32 %v15132_v20, %v10254_v21  ;;  %v15321_v33 = vld [vmem:[#allocation4 + $0x894] sm:$0xf0]  ;;  %v15303_v21 = vld [vmem:[#allocation4 + $0x804] sm:$0xf0] }
  0xf1   :  { %2581 = vmatpush.bf16.msra.mxu2 %v10421_v43  ;;  %v9916_v43 = vld [vmem:[#allocation4 + $0x10] sm:$0xf] }
  0xf2   :  { %2595 = vmatpush.bf16.msra.mxu3 %v10613_v47  ;;  %v10108_v47 = vld [vmem:[#allocation4 + $0x190] sm:$0xf] }
  0xf3   :  { %2554 = vmatpush.bf16.msra.mxu0 %v10013_v57  ;;  %v15285_v57 = vld [vmem:[#allocation4 + $0x774] sm:$0xf0]  ;;  %v10109_v1 = vor.u32 %v15099_v48, %v10108_v47  ;;  %v16429_v41 = vpop.f32.mrf.mxu2  ;;  %v10233_v47 = vor.u32 %v15126_v37, %v10230_v38  ;;  %v10708_v37 = vld [vmem:[#allocation4 + $0x640] sm:$0xf] }
  0xf4   :  { %2568 = vmatpush.bf16.msra.mxu1 %v10205_v59  ;;  %v11044_v59 = vld [vmem:[#allocation4 + $0x8e0] sm:$0xf]  ;;  %v10853_v8 = vor.u32 %v15285_v57, %v10852_v56  ;;  %v16432_v48 = vpop.f32.mrf.mxu3  ;;  %v10206_v56 = vld [vmem:[#allocation4 + $0x268] sm:$0xf0]  ;;  %v15249_v38 = vld [vmem:[#allocation4 + $0x654] sm:$0xf0] }
  0xf5   :  { %2582 = vmatpush.bf16.msra.mxu2 %v10397_v60  ;;  %v9917_v60 = vor.u32 %v15051_v44, %v9916_v43  ;;  %v11045_v9 = vor.u32 %v15333_v61, %v11044_v59  ;;  %v10780_v44 = vld [vmem:[#allocation4 + $0x6d0] sm:$0xf]  ;;  %v10209_v4 = vor.u32 %v15120_v54, %v10206_v56 }
  0xf6   :  { %2596 = vmatpush.bf16.msra.mxu3 %v10589_v2  ;;  %v10301_v2 = vor.u32 %v15147_v52, %v10300_v49  ;;  %v15315_v49 = vld [vmem:[#allocation4 + $0x864] sm:$0xf0]  ;;  %v10014_v52 = vld [vmem:[#allocation4 + $0xe8] sm:$0xf0]  ;;  %v10876_v56 = vld [vmem:[#allocation4 + $0x790] sm:$0xf] }
  0xf7   :  { %2555 = vmatpush.bf16.msra.mxu0 %v9989_v0  ;;  %v10089_v0 = vor.u32 %v15090_v62, %v10086_v63  ;;  %v10756_v63 = vld [vmem:[#allocation4 + $0x6a0] sm:$0xf] }
  0xf8   :  { %2569 = vmatpush.bf16.msra.mxu1 %v10181_v10  ;;  %v10828_v10 = vld [vmem:[#allocation4 + $0x730] sm:$0xf] }
  0xf9   :  { %2583 = vmatpush.bf16.msra.mxu2 %v10373_v12  ;;  %v15279_v12 = vld [vmem:[#allocation4 + $0x744] sm:$0xf0] }
  0xfa   :  { %2597 = vmatpush.bf16.msra.mxu3 %v10565_v17  ;;  %v15084_v17 = vld [vmem:[#allocation4 + $0x134] sm:$0xf]  ;;  %v10829_v22 = vor.u32 %v15279_v12, %v10828_v10  ;;  %v10182_v10 = vld [vmem:[#allocation4 + $0x238] sm:$0xf0] }
  0xfb   :  { %2556 = vmatpush.bf16.msra.mxu0 %v9965_v27  ;;  %v10065_v27 = vor.u32 %v15084_v17, %v10062_v18  ;;  %v10924_v17 = vld [vmem:[#allocation4 + $0x7f0] sm:$0xf] }
  0xfc   :  { %2570 = vmatpush.bf16.msra.mxu1 %v10157_v29  ;;  %v10804_v29 = vld [vmem:[#allocation4 + $0x700] sm:$0xf] }
  0xfd   :  { %2584 = vmatpush.bf16.msra.mxu2 %v10349_v30  ;;  %v15273_v30 = vld [vmem:[#allocation4 + $0x714] sm:$0xf0] }
  0xfe   :  { %2598 = vmatpush.bf16.msra.mxu3 %v10541_v34  ;;  %v15078_v34 = vld [vmem:[#allocation4 + $0x104] sm:$0xf]  ;;  %v10805_v40 = vor.u32 %v15273_v30, %v10804_v29  ;;  %v15108_v29 = vld [vmem:[#allocation4 + $0x1f4] sm:$0xf]  ;;  %v10158_v30 = vld [vmem:[#allocation4 + $0x208] sm:$0xf0] }
  0xff   :  { %2557 = vmatpush.bf16.msra.mxu0 %v9941_v42  ;;  %v10997_v42 = vor.u32 %v15321_v33, %v10996_v31  ;;  %v10041_v43 = vor.u32 %v15078_v34, %v10038_v36  ;;  %v10925_v34 = vor.u32 %v15303_v21, %v10924_v17  ;;  %v15228_v21 = vld [vmem:[#allocation4 + $0x5b4] sm:$0xf] }
 0x100   :  { %2571 = vmatpush.bf16.msra.mxu1 %v10133_v45  ;;  %v15267_v45 = vld [vmem:[#allocation4 + $0x6e4] sm:$0xf0] }
 0x101   :  { %2585 = vmatpush.bf16.msra.mxu2 %v10325_v46  ;;  %v10972_v46 = vld [vmem:[#allocation4 + $0x850] sm:$0xf]  ;;  %v10781_v59 = vor.u32 %v15267_v45, %v10780_v44  ;;  %v15054_v44 = vld [vmem:[#allocation4 + $0x44] sm:$0xf]  ;;  %v9942_v45 = vld [vmem:[#allocation4 + $0x58] sm:$0xf0] }
 0x102   :  { %2599 = vmatpush.bf16.msra.mxu3 %v10517_v50  ;;  %v15072_v50 = vld [vmem:[#allocation4 + $0xd4] sm:$0xf]  ;;  %v9945_v54 = vor.u32 %v15054_v44, %v9942_v45  ;;  %v10614_v45 = vld [vmem:[#allocation4 + $0x598] sm:$0xf0] }
 0x103   :  { %2558 = vmatpush.bf16.msra.mxu0 %v9917_v60  ;;  %v2336_v53 = vpop.f32.mrf.mxu0  ;;  %v10973_v60 = vor.u32 %v15315_v49, %v10972_v46  ;;  %v10017_v61 = vor.u32 %v15072_v50, %v10014_v52  ;;  %v15102_v46 = vld [vmem:[#allocation4 + $0x1c4] sm:$0xf]  ;;  %v10709_v49 = vor.u32 %v15249_v38, %v10708_v37  ;;  %v10684_v50 = vld [vmem:[#allocation4 + $0x610] sm:$0xf]  ;;  %v15243_v52 = vld [vmem:[#allocation4 + $0x624] sm:$0xf0] }
 0x104   :  { %2572 = vmatpush.bf16.msra.mxu1 %v10109_v1  ;;  %v2337_v57 = vadd.f32 %v2336_v53, %v16420_v28  ;;  %v2350_v62 = vpop.f32.mrf.mxu1  ;;  %v15261_v1 = vld [vmem:[#allocation4 + $0x6b4] sm:$0xf0] }
 0x105   :  { %2586 = vmatpush.bf16.msra.mxu2 %v10301_v2  ;;  %v10948_v2 = vld [vmem:[#allocation4 + $0x820] sm:$0xf]  ;;  %v10757_v12 = vor.u32 %v15261_v1, %v10756_v63  ;;  %v10110_v63 = vld [vmem:[#allocation4 + $0x1a8] sm:$0xf0]  ;;  %v15186_v1 = vld [vmem:[#allocation4 + $0x464] sm:$0xf] }
 0x106   :  { %2600 = vmatpush.bf16.msra.mxu3 %v10493_v7  ;;  %2559 = vmatmul.bf16.vlgmr.msra.gmra.mxu0 %v16341_v58  ;;  %v2351_v6 = vadd.f32 %v2350_v62, %v2337_v57  ;;  %v15309_v7 = vld [vmem:[#allocation4 + $0x834] sm:$0xf0]  ;;  %v15291_v57 = vld [vmem:[#allocation4 + $0x7a4] sm:$0xf0]  ;;  %v15096_v62 = vld [vmem:[#allocation4 + $0x194] sm:$0xf] }
 0x107   :  { %2607 = vmatpush.bf16.msrb.mxu0 %v10853_v8  ;;  %2573 = vmatmul.bf16.vlgmr.msra.gmra.mxu1 %v16350_v5  ;;  %v15066_v8 = vld [vmem:[#allocation4 + $0xa4] sm:$0xf]  ;;  %v10949_v28 = vor.u32 %v15309_v7, %v10948_v2  ;;  %v10470_v2 = vld [vmem:[#allocation4 + $0x478] sm:$0xf0] }
 0x108   :  { %2621 = vmatpush.bf16.msrb.mxu1 %v11045_v9  ;;  %2587 = vmatmul.bf16.vlgmr.msra.gmra.mxu2 %v16358_v11  ;;  %v9990_v9 = vld [vmem:[#allocation4 + $0xb8] sm:$0xf0] }
 0x109   :  { %2635 = vmatpush.bf16.msrb.mxu2 %v10089_v0  ;;  %2601 = vmatmul.bf16.vlgmr.msra.gmra.mxu3 %v16368_v23  ;;  %v15114_v0 = vld [vmem:[#allocation4 + $0x224] sm:$0xf]  ;;  %v9993_v13 = vor.u32 %v15066_v8, %v9990_v9  ;;  %v10662_v7 = vld [vmem:[#allocation4 + $0x5f8] sm:$0xf0] }
 0x10a   :  { %2649 = vmatpush.bf16.msrb.mxu3 %v10281_v14  ;;  %v10732_v14 = vld [vmem:[#allocation4 + $0x670] sm:$0xf]  ;;  %v10185_v18 = vor.u32 %v15114_v0, %v10182_v10  ;;  %v15282_v8 = vld [vmem:[#allocation4 + $0x764] sm:$0xf]  ;;  %v10854_v9 = vld [vmem:[#allocation4 + $0x778] sm:$0xf0]  ;;  %v10877_v0 = vor.u32 %v15291_v57, %v10876_v56 }
 0x10b   :  { %2608 = vmatpush.bf16.msrb.mxu0 %v10829_v22  ;;  %v2364_v20 = vpop.f32.mrf.mxu2  ;;  %v15060_v22 = vld [vmem:[#allocation4 + $0x74] sm:$0xf]  ;;  %v10857_v17 = vor.u32 %v15282_v8, %v10854_v9  ;;  %v10398_v57 = vld [vmem:[#allocation4 + $0x3e8] sm:$0xf0] }
 0x10c   :  { %2622 = vmatpush.bf16.msrb.mxu1 %v11021_v25  ;;  %v9966_v25 = vld [vmem:[#allocation4 + $0x88] sm:$0xf0]  ;;  %v2378_v31 = vpop.f32.mrf.mxu3  ;;  %v15168_v56 = vld [vmem:[#allocation4 + $0x3d4] sm:$0xf] }
 0x10d   :  { %2636 = vmatpush.bf16.msrb.mxu2 %v10065_v27  ;;  %v2365_v27 = vadd.f32 %v2364_v20, %v2351_v6  ;;  %v9969_v36 = vor.u32 %v15060_v22, %v9966_v25  ;;  %v10685_v6 = vor.u32 %v15243_v52, %v10684_v50  ;;  %v10446_v20 = vld [vmem:[#allocation4 + $0x448] sm:$0xf0]  ;;  %v10998_v50 = vld [vmem:[#allocation4 + $0x898] sm:$0xf0] }
 0x10e   :  { %2650 = vmatpush.bf16.msrb.mxu3 %v10257_v32  ;;  %v10733_v32 = vor.u32 %v15255_v16, %v10732_v14  ;;  %v10473_v14 = vor.u32 %v15186_v1, %v10470_v2  ;;  %v10638_v25 = vld [vmem:[#allocation4 + $0x5c8] sm:$0xf0] }
 0x10f   :  { %2609 = vmatpush.bf16.msrb.mxu0 %v10805_v40  ;;  %v16435_v33 = vadd.f32 %v2378_v31, %v2365_v27  ;;  %v10900_v40 = vld [vmem:[#allocation4 + $0x7c0] sm:$0xf]  ;;  %v15276_v27 = vld [vmem:[#allocation4 + $0x734] sm:$0xf]  ;;  %v11022_v31 = vld [vmem:[#allocation4 + $0x8c8] sm:$0xf0]  ;;  %v10641_v37 = vor.u32 %v15228_v21, %v10638_v25 }
 0x110   :  { %2623 = vmatpush.bf16.msrb.mxu1 %v10997_v42  ;;  %v10161_v42 = vor.u32 %v15108_v29, %v10158_v30  ;;  %v10830_v29 = vld [vmem:[#allocation4 + $0x748] sm:$0xf0]  ;;  %v15324_v30 = vld [vmem:[#allocation4 + $0x8b4] sm:$0xf] }
 0x111   :  { %2637 = vmatpush.bf16.msrb.mxu2 %v10041_v43  ;;  %v15297_v43 = vld [vmem:[#allocation4 + $0x7d4] sm:$0xf0]  ;;  %v10833_v38 = vor.u32 %v15276_v27, %v10830_v29  ;;  %v11025_v44 = vor.u32 %v15324_v30, %v11022_v31  ;;  %v10782_v1 = vld [vmem:[#allocation4 + $0x6e8] sm:$0xf0]  ;;  %v15156_v27 = vld [vmem:[#allocation4 + $0x374] sm:$0xf] }
 0x112   :  { %2651 = vmatpush.bf16.msrb.mxu3 %v10233_v47  ;;  %v10134_v47 = vld [vmem:[#allocation4 + $0x1d8] sm:$0xf0]  ;;  %v10901_v53 = vor.u32 %v15297_v43, %v10900_v40  ;;  %v15174_v40 = vld [vmem:[#allocation4 + $0x404] sm:$0xf]  ;;  %v10350_v29 = vld [vmem:[#allocation4 + $0x388] sm:$0xf0] }
 0x113   :  { %2610 = vmatpush.bf16.msrb.mxu0 %v10781_v59  ;;  %v15048_v59 = vld [vmem:[#allocation4 + $0x14] sm:$0xf]  ;;  %v15222_v43 = vld [vmem:[#allocation4 + $0x584] sm:$0xf] }
 0x114   :  { %2624 = vmatpush.bf16.msrb.mxu1 %v10973_v60  ;;  %v10137_v60 = vor.u32 %v15102_v46, %v10134_v47  ;;  %v15270_v46 = vld [vmem:[#allocation4 + $0x704] sm:$0xf]  ;;  %v10806_v47 = vld [vmem:[#allocation4 + $0x718] sm:$0xf0]  ;;  %v16447_v2 = vpop.f32.mrf.mxu3  ;;  %v15204_v30 = vld [vmem:[#allocation4 + $0x4f4] sm:$0xf] }
 0x115   :  { %2638 = vmatpush.bf16.msrb.mxu2 %v10017_v61  ;;  %v9918_v61 = vld [vmem:[#allocation4 + $0x28] sm:$0xf0] }
 0x116   :  { %2652 = vmatpush.bf16.msrb.mxu3 %v10209_v4  ;;  %v15234_v4 = vld [vmem:[#allocation4 + $0x5e4] sm:$0xf]  ;;  %v9921_v10 = vor.u32 %v15048_v59, %v9918_v61  ;;  %v15216_v59 = vld [vmem:[#allocation4 + $0x554] sm:$0xf] }
 0x117   :  { %2611 = vmatpush.bf16.msrb.mxu0 %v10757_v12  ;;  %v15330_v12 = vld [vmem:[#allocation4 + $0x8e4] sm:$0xf]  ;;  %v10665_v16 = vor.u32 %v15234_v4, %v10662_v7  ;;  %v10974_v4 = vld [vmem:[#allocation4 + $0x868] sm:$0xf0] }
 0x118   :  { %2625 = vmatpush.bf16.msrb.mxu1 %v10949_v28  ;;  %v11046_v28 = vld [vmem:[#allocation4 + $0x8f8] sm:$0xf0] }
 0x119   :  { %2639 = vmatpush.bf16.msrb.mxu2 %v9993_v13  ;;  %v10113_v13 = vor.u32 %v15096_v62, %v10110_v63  ;;  %v11049_v22 = vor.u32 %v15330_v12, %v11046_v28  ;;  %v10590_v62 = vld [vmem:[#allocation4 + $0x568] sm:$0xf0]  ;;  %v15264_v63 = vld [vmem:[#allocation4 + $0x6d4] sm:$0xf]  ;;  %v15210_v12 = vld [vmem:[#allocation4 + $0x524] sm:$0xf] }
 0x11a   :  { %2653 = vmatpush.bf16.msrb.mxu3 %v10185_v18  ;;  %v15180_v18 = vld [vmem:[#allocation4 + $0x434] sm:$0xf]  ;;  %v10593_v8 = vor.u32 %v15216_v59, %v10590_v62  ;;  %v10785_v9 = vor.u32 %v15264_v63, %v10782_v1  ;;  %v15246_v59 = vld [vmem:[#allocation4 + $0x644] sm:$0xf]  ;;  %v10902_v63 = vld [vmem:[#allocation4 + $0x7d8] sm:$0xf0] }
 0x11b   :  { %2612 = vmatpush.bf16.msrb.mxu0 %v10733_v32  ;;  %v16437_v32 = vpop.f32.mrf.mxu0  ;;  %v15294_v62 = vld [vmem:[#allocation4 + $0x7c4] sm:$0xf] }
 0x11c   :  { %2626 = vmatpush.bf16.msrb.mxu1 %v10925_v34  ;;  %v16439_v34 = vpop.f32.mrf.mxu1 }
 0x11d   :  { %2640 = vmatpush.bf16.msrb.mxu2 %v9969_v36  ;;  %v10449_v36 = vor.u32 %v15180_v18, %v10446_v20  ;;  %v15306_v18 = vld [vmem:[#allocation4 + $0x824] sm:$0xf]  ;;  %v10950_v20 = vld [vmem:[#allocation4 + $0x838] sm:$0xf0] }
 0x11e   :  { %2654 = vmatpush.bf16.msrb.mxu3 %v10161_v42  ;;  %v10422_v42 = vld [vmem:[#allocation4 + $0x418] sm:$0xf0]  ;;  %v10953_v31 = vor.u32 %v15306_v18, %v10950_v20  ;;  %v14845_v18 = vld [vmem:[#allocation2 + $0x2e4] sm:$0xf0]  ;;  %v11628_v20 = vld [vmem:[#allocation2 + $0x450] sm:$0xf] }
 0x11f   :  { %2613 = vmatpush.bf16.msrb.mxu0 %v10709_v49  ;;  %v15318_v49 = vld [vmem:[#allocation4 + $0x884] sm:$0xf]  ;;  %v10425_v52 = vor.u32 %v15174_v40, %v10422_v42  ;;  %v15300_v42 = vld [vmem:[#allocation4 + $0x7f4] sm:$0xf] }
 0x120   :  { %2627 = vmatpush.bf16.msrb.mxu1 %v10901_v53  ;;  %v10617_v53 = vor.u32 %v15222_v43, %v10614_v45  ;;  %v11001_v61 = vor.u32 %v15318_v49, %v10998_v50  ;;  %v10926_v43 = vld [vmem:[#allocation4 + $0x808] sm:$0xf0]  ;;  %v10353_v45 = vor.u32 %v15156_v27, %v10350_v29  ;;  %v15150_v50 = vld [vmem:[#allocation4 + $0x344] sm:$0xf]  ;;  %v11820_v27 = vld [vmem:[#allocation2 + $0x5d0] sm:$0xf] }
 0x121   :  { %2641 = vmatpush.bf16.msrb.mxu2 %v9945_v54  ;;  %v10809_v54 = vor.u32 %v15270_v46, %v10806_v47  ;;  %v14941_v29 = vld [vmem:[#allocation2 + $0x5e4] sm:$0xf0] }
 0x122   :  { %2655 = vmatpush.bf16.msrb.mxu3 %v10137_v60  ;;  %v16445_v60 = vpop.f32.mrf.mxu2 }
 0x123   :  { %2614 = vmatpush.bf16.msrb.mxu0 %v10685_v6  ;;  %v2392_v6 = vpop.f32.mrf.mxu0 }
 0x124   :  { %2628 = vmatpush.bf16.msrb.mxu1 %v10877_v0  ;;  %v2406_v7 = vpop.f32.mrf.mxu1  ;;  %v15162_v0 = vld [vmem:[#allocation4 + $0x3a4] sm:$0xf] }
 0x125   :  { %2642 = vmatpush.bf16.msrb.mxu2 %v9921_v10  ;;  %v10374_v10 = vld [vmem:[#allocation4 + $0x3b8] sm:$0xf0]  ;;  %v2407_v28 = vadd.f32 %v2406_v7, %v2392_v6  ;;  %v15192_v7 = vld [vmem:[#allocation4 + $0x494] sm:$0xf] }
 0x126   :  { %2656 = vmatpush.bf16.msrb.mxu3 %v10113_v13  ;;  %2615 = vmatmul.bf16.vlgmr.msrb.gmra.mxu0 %v16383_v35  ;;  %v10377_v21 = vor.u32 %v15162_v0, %v10374_v10  ;;  %v10905_v0 = vor.u32 %v15294_v62, %v10902_v63  ;;  %v10686_v10 = vld [vmem:[#allocation4 + $0x628] sm:$0xf0]  ;;  %v11388_v62 = vld [vmem:[#allocation2 + $0x270] sm:$0xf] }
 0x127   :  { %2663 = vmatpush.bf16.msra.mxu0 %v10473_v14  ;;  %2629 = vmatmul.bf16.vlgmr.msrb.gmra.mxu1 %v16385_v39  ;;  %v10566_v14 = vld [vmem:[#allocation4 + $0x538] sm:$0xf0] }
 0x128   :  { %2677 = vmatpush.bf16.msra.mxu1 %v10665_v16  ;;  %2643 = vmatmul.bf16.vlgmr.msrb.gmra.mxu2 %v16341_v58  ;;  %v15312_v58 = vld [vmem:[#allocation4 + $0x854] sm:$0xf]  ;;  %v15258_v16 = vld [vmem:[#allocation4 + $0x6a4] sm:$0xf] }
 0x129   :  { %2691 = vmatpush.bf16.msra.mxu2 %v10857_v17  ;;  %2657 = vmatmul.bf16.vlgmr.msrb.gmra.mxu3 %v16350_v5  ;;  %v10401_v5 = vor.u32 %v15168_v56, %v10398_v57  ;;  %v10977_v13 = vor.u32 %v15312_v58, %v10974_v4  ;;  %v10758_v17 = vld [vmem:[#allocation4 + $0x6b8] sm:$0xf0]  ;;  %v10929_v56 = vor.u32 %v15300_v42, %v10926_v43  ;;  %v15144_v58 = vld [vmem:[#allocation4 + $0x314] sm:$0xf]  ;;  %v10302_v4 = vld [vmem:[#allocation4 + $0x328] sm:$0xf0] }
 0x12a   :  { %2705 = vmatpush.bf16.msra.mxu3 %v11049_v22  ;;  %v10569_v22 = vor.u32 %v15210_v12, %v10566_v14  ;;  %v10761_v25 = vor.u32 %v15258_v16, %v10758_v17  ;;  %v10518_v57 = vld [vmem:[#allocation4 + $0x4d8] sm:$0xf0]  ;;  %v15288_v12 = vld [vmem:[#allocation4 + $0x794] sm:$0xf]  ;;  %v14797_v14 = vld [vmem:[#allocation2 + $0x164] sm:$0xf0]  ;;  %v10305_v17 = vor.u32 %v15144_v58, %v10302_v4 }
 0x12b   :  { %2664 = vmatpush.bf16.msra.mxu0 %v10449_v36  ;;  %v10542_v36 = vld [vmem:[#allocation4 + $0x508] sm:$0xf0]  ;;  %v2420_v40 = vpop.f32.mrf.mxu2  ;;  %v11436_v16 = vld [vmem:[#allocation2 + $0x2d0] sm:$0xf]  ;;  %v14791_v42 = vld [vmem:[#allocation2 + $0x134] sm:$0xf0] }
 0x12c   :  { %2678 = vmatpush.bf16.msra.mxu1 %v10641_v37  ;;  %v15252_v37 = vld [vmem:[#allocation4 + $0x674] sm:$0xf]  ;;  %v2434_v46 = vpop.f32.mrf.mxu3  ;;  %v10545_v47 = vor.u32 %v15204_v30, %v10542_v36  ;;  %v11437_v36 = vor.u32 %v14845_v18, %v11436_v16  ;;  %v11412_v43 = vld [vmem:[#allocation2 + $0x2a0] sm:$0xf]  ;;  %v11580_v58 = vld [vmem:[#allocation2 + $0x3f0] sm:$0xf] }
 0x12d   :  { %2692 = vmatpush.bf16.msra.mxu2 %v10833_v38  ;;  %v10734_v38 = vld [vmem:[#allocation4 + $0x688] sm:$0xf0]  ;;  %v14881_v4 = vld [vmem:[#allocation2 + $0x404] sm:$0xf0]  ;;  %v11748_v16 = vld [vmem:[#allocation2 + $0x540] sm:$0xf] }
 0x12e   :  { %2706 = vmatpush.bf16.msra.mxu3 %v11025_v44  ;;  %v2421_v44 = vadd.f32 %v2420_v40, %v2407_v28  ;;  %v10737_v49 = vor.u32 %v15252_v37, %v10734_v38  ;;  %v10878_v28 = vld [vmem:[#allocation4 + $0x7a8] sm:$0xf0]  ;;  %v16451_v38 = vpop.f32.mrf.mxu0  ;;  %v11220_v40 = vld [vmem:[#allocation2 + $0x120] sm:$0xf] }
 0x12f   :  { %2665 = vmatpush.bf16.msra.mxu0 %v10425_v52  ;;  %v10326_v52 = vld [vmem:[#allocation4 + $0x358] sm:$0xf0]  ;;  %v10881_v30 = vor.u32 %v15288_v12, %v10878_v28  ;;  %v14827_v28 = vld [vmem:[#allocation2 + $0x254] sm:$0xf0] }
 0x130   :  { %2679 = vmatpush.bf16.msra.mxu1 %v10617_v53  ;;  %v15198_v53 = vld [vmem:[#allocation4 + $0x4c4] sm:$0xf]  ;;  %v10329_v1 = vor.u32 %v15150_v50, %v10326_v52  ;;  %v14935_v50 = vld [vmem:[#allocation2 + $0x5b4] sm:$0xf0]  ;;  %v16453_v52 = vpop.f32.mrf.mxu1 }
 0x131   :  { %2693 = vmatpush.bf16.msra.mxu2 %v10809_v54  ;;  %v16449_v54 = vadd.f32 %v2434_v46, %v2421_v44  ;;  %v11821_v44 = vor.u32 %v14941_v29, %v11820_v27  ;;  %v11604_v46 = vld [vmem:[#allocation2 + $0x420] sm:$0xf]  ;;  %v11148_v27 = vld [vmem:[#allocation2 + $0x90] sm:$0xf]  ;;  %v14773_v29 = vld [vmem:[#allocation2 + $0xa4] sm:$0xf0] }
 0x132   :  { %2707 = vmatpush.bf16.msra.mxu3 %v11001_v61  ;;  %v10710_v61 = vld [vmem:[#allocation4 + $0x658] sm:$0xf0] }
 0x133   :  { %2666 = vmatpush.bf16.msra.mxu0 %v10401_v5  ;;  %v10521_v5 = vor.u32 %v15198_v53, %v10518_v57  ;;  %v10713_v6 = vor.u32 %v15246_v59, %v10710_v61  ;;  %v11221_v53 = vor.u32 %v14791_v42, %v11220_v40  ;;  %v11196_v59 = vld [vmem:[#allocation2 + $0xf0] sm:$0xf]  ;;  %v14785_v61 = vld [vmem:[#allocation2 + $0x104] sm:$0xf0] }
 0x134   :  { %2680 = vmatpush.bf16.msra.mxu1 %v10593_v8  ;;  %v10494_v8 = vld [vmem:[#allocation4 + $0x4a8] sm:$0xf0]  ;;  %v11532_v40 = vld [vmem:[#allocation2 + $0x390] sm:$0xf]  ;;  %v14869_v42 = vld [vmem:[#allocation2 + $0x3a4] sm:$0xf0] }
 0x135   :  { %2694 = vmatpush.bf16.msra.mxu2 %v10785_v9  ;;  %v15240_v9 = vld [vmem:[#allocation4 + $0x614] sm:$0xf] }
 0x136   :  { %2708 = vmatpush.bf16.msra.mxu3 %v10977_v13  ;;  %v11244_v13 = vld [vmem:[#allocation2 + $0x150] sm:$0xf] }
 0x137   :  { %2667 = vmatpush.bf16.msra.mxu0 %v10377_v21  ;;  %v14893_v21 = vld [vmem:[#allocation2 + $0x464] sm:$0xf0] }
 0x138   :  { %2681 = vmatpush.bf16.msra.mxu1 %v10569_v22  ;;  %v10497_v22 = vor.u32 %v15192_v7, %v10494_v8  ;;  %v11629_v37 = vor.u32 %v14893_v21, %v11628_v20  ;;  %v11197_v7 = vor.u32 %v14785_v61, %v11196_v59  ;;  %v14863_v59 = vld [vmem:[#allocation2 + $0x374] sm:$0xf0]  ;;  %v11700_v61 = vld [vmem:[#allocation2 + $0x4e0] sm:$0xf] }
 0x139   :  { %2695 = vmatpush.bf16.msra.mxu2 %v10761_v25  ;;  %v10689_v25 = vor.u32 %v15240_v9, %v10686_v10  ;;  %v11581_v9 = vor.u32 %v14881_v4, %v11580_v58  ;;  %v11364_v10 = vld [vmem:[#allocation2 + $0x240] sm:$0xf]  ;;  %v11100_v4 = vld [vmem:[#allocation2 + $0x30] sm:$0xf] }
 0x13a   :  { %2709 = vmatpush.bf16.msra.mxu3 %v10953_v31  ;;  %v11245_v31 = vor.u32 %v14797_v14, %v11244_v13  ;;  %v11556_v13 = vld [vmem:[#allocation2 + $0x3c0] sm:$0xf]  ;;  %v16459_v14 = vpop.f32.mrf.mxu2  ;;  %v11365_v21 = vor.u32 %v14827_v28, %v11364_v10  ;;  %v11484_v10 = vld [vmem:[#allocation2 + $0x330] sm:$0xf] }
 0x13b   :  { %2668 = vmatpush.bf16.msra.mxu0 %v10353_v45  ;;  %v14839_v45 = vld [vmem:[#allocation2 + $0x2b4] sm:$0xf0]  ;;  %17161 = vst [vmem:[#allocation20_spill] sm:$0xff] %v16459_v14  ;;  %v11676_v28 = vld [vmem:[#allocation2 + $0x4b0] sm:$0xf] }
 0x13c   :  { %2682 = vmatpush.bf16.msra.mxu1 %v10545_v47  ;;  %v14887_v47 = vld [vmem:[#allocation2 + $0x434] sm:$0xf0]  ;;  %v14790_v14 = vld [vmem:[#allocation2 + $0x134] sm:$0xf] }
 0x13d   :  { %2696 = vmatpush.bf16.msra.mxu2 %v10737_v49  ;;  %v11796_v49 = vld [vmem:[#allocation2 + $0x5a0] sm:$0xf]  ;;  %v11605_v57 = vor.u32 %v14887_v47, %v11604_v46  ;;  %v11533_v46 = vor.u32 %v14869_v42, %v11532_v40  ;;  %v12204_v40 = vld [vmem:[#allocation2 + $0x8d0] sm:$0xf]  ;;  %v15037_v42 = vld [vmem:[#allocation2 + $0x8e4] sm:$0xf0] }
 0x13e   :  { %2710 = vmatpush.bf16.msra.mxu3 %v10929_v56  ;;  %v11413_v56 = vor.u32 %v14839_v45, %v11412_v43  ;;  %v11797_v63 = vor.u32 %v14935_v50, %v11796_v49  ;;  %v11724_v43 = vld [vmem:[#allocation2 + $0x510] sm:$0xf]  ;;  %v11124_v47 = vld [vmem:[#allocation2 + $0x60] sm:$0xf]  ;;  %v14767_v49 = vld [vmem:[#allocation2 + $0x74] sm:$0xf0] }
 0x13f   :  { %2669 = vmatpush.bf16.msra.mxu0 %v10329_v1  ;;  %v14833_v1 = vld [vmem:[#allocation2 + $0x284] sm:$0xf0]  ;;  %v11316_v50 = vld [vmem:[#allocation2 + $0x1e0] sm:$0xf]  ;;  %v11125_v58 = vor.u32 %v14767_v49, %v11124_v47  ;;  %v11052_v47 = vld [vmem:[%s17149_s0] sm:$0xf] }
 0x140   :  { %2683 = vmatpush.bf16.msra.mxu1 %v10521_v5  ;;  %v11772_v5 = vld [vmem:[#allocation2 + $0x570] sm:$0xf]  ;;  %v11389_v8 = vor.u32 %v14833_v1, %v11388_v62  ;;  %v14911_v62 = vld [vmem:[#allocation2 + $0x4f4] sm:$0xf0] }
 0x141   :  { %2697 = vmatpush.bf16.msra.mxu2 %v10713_v6  ;;  %v14929_v6 = vld [vmem:[#allocation2 + $0x584] sm:$0xf0]  ;;  %v14749_v49 = vld [vmem:[%s17149_s0 + $0x14] sm:$0xf0] }
 0x142   :  { %2711 = vmatpush.bf16.msra.mxu3 %v10905_v0  ;;  %v11172_v0 = vld [vmem:[#allocation2 + $0xc0] sm:$0xf]  ;;  %v11773_v12 = vor.u32 %v14929_v6, %v11772_v5 }
 0x143   :  { %2670 = vmatpush.bf16.msra.mxu0 %v10305_v17  ;;  %v14923_v17 = vld [vmem:[#allocation2 + $0x554] sm:$0xf0] }
 0x144   :  { %2684 = vmatpush.bf16.msra.mxu1 %v10497_v22 }
 0x145   :  { %2698 = vmatpush.bf16.msra.mxu2 %v10689_v25  ;;  %v2462_v25 = vpop.f32.mrf.mxu1 }
 0x146   :  { %2712 = vmatpush.bf16.msra.mxu3 %v10881_v30  ;;  %2671 = vmatmul.bf16.vlgmr.msra.gmra.mxu0 %v16358_v11  ;;  %v14779_v11 = vld [vmem:[#allocation2 + $0xd4] sm:$0xf0]  ;;  %v11340_v30 = vld [vmem:[#allocation2 + $0x210] sm:$0xf] }
 0x147   :  { %4189 = vmatpush.bf16.msrb.mxu0 %v11245_v31  ;;  %2685 = vmatmul.bf16.vlgmr.msra.gmra.mxu1 %v16368_v23  ;;  %v2448_v23 = vpop.f32.mrf.mxu0  ;;  %v11173_v20 = vor.u32 %v14779_v11, %v11172_v0  ;;  %v11749_v31 = vor.u32 %v14923_v17, %v11748_v16  ;;  %v14809_v0 = vld [vmem:[#allocation2 + $0x1c4] sm:$0xf0]  ;;  %v11701_v11 = vor.u32 %v14911_v62, %v11700_v61  ;;  %v11268_v17 = vld [vmem:[#allocation2 + $0x180] sm:$0xf] }
 0x148   :  { %4203 = vmatpush.bf16.msrb.mxu1 %v11437_v36  ;;  %2699 = vmatmul.bf16.vlgmr.msra.gmra.mxu2 %v16383_v35  ;;  %v14875_v35 = vld [vmem:[#allocation2 + $0x3d4] sm:$0xf0]  ;;  %v2449_v18 = vadd.f32 %v2448_v23, %v16449_v54  ;;  %v11149_v54 = vor.u32 %v14773_v29, %v11148_v27  ;;  %v11652_v27 = vld [vmem:[#allocation2 + $0x480] sm:$0xf] }
 0x149   :  { %4217 = vmatpush.bf16.msrb.mxu2 %v11629_v37  ;;  %2713 = vmatmul.bf16.vlgmr.msra.gmra.mxu3 %v16385_v39  ;;  %v16461_v39 = vpop.f32.mrf.mxu3  ;;  %v11557_v22 = vor.u32 %v14875_v35, %v11556_v13  ;;  %v14821_v37 = vld [vmem:[#allocation2 + $0x224] sm:$0xf0]  ;;  %v11076_v35 = vld [vmem:[#allocation2] sm:$0xf]  ;;  %v14755_v23 = vld [vmem:[#allocation2 + $0x14] sm:$0xf0] }
 0x14a   :  { %4231 = vmatpush.bf16.msrb.mxu3 %v11821_v44  ;;  %17162 = vst [vmem:[#allocation21_spill] sm:$0xff] %v16461_v39  ;;  %v16464_v36 = vadd.f32 %v2462_v25, %v2449_v18  ;;  %v14917_v44 = vld [vmem:[#allocation2 + $0x524] sm:$0xf0]  ;;  %v11341_v45 = vor.u32 %v14821_v37, %v11340_v30  ;;  %v14803_v18 = vld [vmem:[#allocation2 + $0x194] sm:$0xf0] }
 0x14b   :  { %4190 = vmatpush.bf16.msrb.mxu0 %v11221_v53  ;;  %v11725_v53 = vor.u32 %v14917_v44, %v11724_v43  ;;  %v14905_v13 = vld [vmem:[#allocation2 + $0x4c4] sm:$0xf0]  ;;  %v14899_v29 = vld [vmem:[#allocation2 + $0x494] sm:$0xf0]  ;;  %v12012_v30 = vld [vmem:[#allocation2 + $0x750] sm:$0xf] }
 0x14c   :  { %4204 = vmatpush.bf16.msrb.mxu1 %v11413_v56  ;;  %17163 = vst [vmem:[#allocation22_spill] sm:$0xff] %v16464_v36  ;;  %v14815_v56 = vld [vmem:[#allocation2 + $0x1f4] sm:$0xf0]  ;;  %v14989_v37 = vld [vmem:[#allocation2 + $0x764] sm:$0xf0]  ;;  %v11653_v61 = vor.u32 %v14899_v29, %v11652_v27 }
 0x14d   :  { %4218 = vmatpush.bf16.msrb.mxu2 %v11605_v57  ;;  %v11508_v57 = vld [vmem:[#allocation2 + $0x360] sm:$0xf]  ;;  %v11317_v6 = vor.u32 %v14815_v56, %v11316_v50  ;;  %v14794_v43 = vld [vmem:[#allocation2 + $0x154] sm:$0xf]  ;;  %v11246_v44 = vld [vmem:[#allocation2 + $0x168] sm:$0xf0]  ;;  %v11269_v50 = vor.u32 %v14803_v18, %v11268_v17  ;;  %v12013_v62 = vor.u32 %v14989_v37, %v12012_v30 }
 0x14e   :  { %4232 = vmatpush.bf16.msrb.mxu3 %v11797_v63  ;;  %v2476_v63 = vpop.f32.mrf.mxu2  ;;  %v11060_v56 = vld [vmem:[%s17149_s0 + $0x8] sm:$0xf]  ;;  %v11414_v17 = vld [vmem:[#allocation2 + $0x2b8] sm:$0xf0]  ;;  %v11964_v27 = vld [vmem:[#allocation2 + $0x6f0] sm:$0xf] }
 0x14f   :  { %4191 = vmatpush.bf16.msrb.mxu0 %v11197_v7  ;;  %v11509_v7 = vor.u32 %v14863_v59, %v11508_v57  ;;  %v14750_v57 = vld [vmem:[%s17149_s0 + $0x1c] sm:$0xf0]  ;;  %v14746_v59 = vld [vmem:[%s17149_s0 + $0x4] sm:$0xf]  ;;  %v14977_v29 = vld [vmem:[#allocation2 + $0x704] sm:$0xf0] }
 0x150   :  { %4205 = vmatpush.bf16.msrb.mxu1 %v11389_v8  ;;  %v14761_v8 = vld [vmem:[#allocation2 + $0x44] sm:$0xf0]  ;;  %v12156_v30 = vld [vmem:[#allocation2 + $0x870] sm:$0xf] }
 0x151   :  { %4219 = vmatpush.bf16.msrb.mxu2 %v11581_v9  ;;  %v2490_v1 = vpop.f32.mrf.mxu3  ;;  %v11292_v9 = vld [vmem:[#allocation2 + $0x1b0] sm:$0xf]  ;;  %v11101_v16 = vor.u32 %v14761_v8, %v11100_v4  ;;  %v12205_v4 = vor.u32 %v15037_v42, %v12204_v40  ;;  %v14983_v8 = vld [vmem:[#allocation2 + $0x734] sm:$0xf0]  ;;  %v15025_v37 = vld [vmem:[#allocation2 + $0x884] sm:$0xf0] }
 0x152   :  { %4233 = vmatpush.bf16.msrb.mxu3 %v11773_v12  ;;  %v16466_v5 = vadd.f32 %v2490_v1, %v2476_v63  ;;  %v14857_v12 = vld [vmem:[#allocation2 + $0x344] sm:$0xf0]  ;;  %v11054_v63 = vld [vmem:[%s17149_s0 + $0x18] sm:$0xf0]  ;;  %v14747_v1 = vld [vmem:[%s17149_s0 + $0xc] sm:$0xf] }
 0x153   :  { %4192 = vmatpush.bf16.msrb.mxu0 %v11173_v20  ;;  %v11460_v20 = vld [vmem:[#allocation2 + $0x300] sm:$0xf]  ;;  %v11485_v25 = vor.u32 %v14857_v12, %v11484_v10  ;;  %v15031_v10 = vld [vmem:[#allocation2 + $0x8b4] sm:$0xf0]  ;;  %v14788_v12 = vld [vmem:[#allocation2 + $0x124] sm:$0xf] }
 0x154   :  { %4206 = vmatpush.bf16.msrb.mxu1 %v11365_v21  ;;  %v14851_v21 = vld [vmem:[#allocation2 + $0x314] sm:$0xf0]  ;;  %v14782_v40 = vld [vmem:[#allocation2 + $0xf4] sm:$0xf]  ;;  %v11198_v42 = vld [vmem:[#allocation2 + $0x108] sm:$0xf0] }
 0x155   :  { %4220 = vmatpush.bf16.msrb.mxu2 %v11557_v22  ;;  %v11293_v22 = vor.u32 %v14809_v0, %v11292_v9  ;;  %v12180_v9 = vld [vmem:[#allocation2 + $0x8a0] sm:$0xf] }
 0x156   :  { %4234 = vmatpush.bf16.msrb.mxu3 %v11749_v31  ;;  %v11677_v31 = vor.u32 %v14905_v13, %v11676_v28  ;;  %v11222_v28 = vld [vmem:[#allocation2 + $0x138] sm:$0xf0]  ;;  %v16494_v13 = vpop.f32.mrf.mxu0 }
 0x157   :  { %4193 = vmatpush.bf16.msrb.mxu0 %v11149_v54  ;;  %v14842_v54 = vld [vmem:[#allocation2 + $0x2d4] sm:$0xf]  ;;  %17164 = vst [vmem:[#allocation23_spill] sm:$0xff] %v16494_v13  ;;  %v14991_v13 = vld [vmem:[#allocation2 + $0x774] sm:$0xf0] }
 0x158   :  { %4207 = vmatpush.bf16.msrb.mxu1 %v11341_v45  ;;  %v11077_v45 = vor.u32 %v14755_v23, %v11076_v35  ;;  %v16496_v35 = vor.u32 %v14750_v57, %v11060_v56  ;;  %v16498_v23 = vor.u32 %v14746_v59, %v11054_v63  ;;  %v15019_v59 = vld [vmem:[#allocation2 + $0x854] sm:$0xf0] }
 0x159   :  { %4221 = vmatpush.bf16.msrb.mxu2 %v11533_v46  ;;  %v11438_v46 = vld [vmem:[#allocation2 + $0x2e8] sm:$0xf0]  ;;  %v16510_v57 = vpop.f32.mrf.mxu3 }
 0x15a   :  { %4235 = vmatpush.bf16.msrb.mxu3 %v11725_v53  ;;  %v11461_v53 = vor.u32 %v14851_v21, %v11460_v20  ;;  %v11441_v0 = vor.u32 %v14842_v54, %v11438_v46  ;;  %v16502_v21 = vpop.f32.mrf.mxu1  ;;  %v11965_v54 = vor.u32 %v14977_v29, %v11964_v27  ;;  %v12157_v46 = vor.u32 %v15025_v37, %v12156_v30  ;;  %v11342_v27 = vld [vmem:[#allocation2 + $0x228] sm:$0xf0]  ;;  %v14959_v37 = vld [vmem:[#allocation2 + $0x674] sm:$0xf0] }
 0x15b   :  { %4194 = vmatpush.bf16.msrb.mxu0 %v11125_v58  ;;  %v11062_v58 = vld [vmem:[%s17149_s0 + $0x20] sm:$0xf0]  ;;  %17165 = vst [vmem:[#allocation24_spill] sm:$0xff] %v16502_v21  ;;  %v11612_v21 = vld [vmem:[#allocation2 + $0x428] sm:$0xf] }
 0x15c   :  { %4208 = vmatpush.bf16.msrb.mxu1 %v11317_v6  ;;  %v11249_v6 = vor.u32 %v14794_v43, %v11246_v44  ;;  %v16500_v18 = vor.u32 %v14747_v1, %v11062_v58  ;;  %v14830_v43 = vld [vmem:[#allocation2 + $0x274] sm:$0xf]  ;;  %v11390_v44 = vld [vmem:[#allocation2 + $0x288] sm:$0xf0]  ;;  %17167 = vst [vmem:[#allocation26_spill] sm:$0xff] %v16510_v57 }
 0x15d   :  { %4222 = vmatpush.bf16.msrb.mxu2 %v11509_v7  ;;  %v11988_v7 = vld [vmem:[#allocation2 + $0x720] sm:$0xf]  ;;  %v11393_v56 = vor.u32 %v14830_v43, %v11390_v44  ;;  %v14824_v1 = vld [vmem:[#allocation2 + $0x244] sm:$0xf]  ;;  %v11366_v58 = vld [vmem:[#allocation2 + $0x258] sm:$0xf0] }
 0x15e   :  { %4236 = vmatpush.bf16.msrb.mxu3 %v11701_v11  ;;  %v16492_v11 = vor.u32 %v14749_v49, %v11052_v47  ;;  %v11989_v20 = vor.u32 %v14983_v8, %v11988_v7  ;;  %v11201_v47 = vor.u32 %v14782_v40, %v11198_v42  ;;  %v11940_v49 = vld [vmem:[#allocation2 + $0x6c0] sm:$0xf]  ;;  %v15007_v44 = vld [vmem:[#allocation2 + $0x7f4] sm:$0xf0]  ;;  %v12004_v57 = vld [vmem:[#allocation2 + $0x730] sm:$0xf] }
 0x15f   :  { %4195 = vmatpush.bf16.msrb.mxu0 %v11101_v16  ;;  %v14836_v16 = vld [vmem:[#allocation2 + $0x2a4] sm:$0xf]  ;;  %v12084_v40 = vld [vmem:[#allocation2 + $0x7e0] sm:$0xf] }
 0x160   :  { %4209 = vmatpush.bf16.msrb.mxu1 %v11293_v22  ;;  %v12181_v22 = vor.u32 %v15031_v10, %v12180_v9  ;;  %v14965_v10 = vld [vmem:[#allocation2 + $0x6a4] sm:$0xf0] }
 0x161   :  { %4223 = vmatpush.bf16.msrb.mxu2 %v11485_v25  ;;  %v11225_v25 = vor.u32 %v14788_v12, %v11222_v28  ;;  %v12108_v12 = vld [vmem:[#allocation2 + $0x810] sm:$0xf]  ;;  %v11369_v28 = vor.u32 %v14824_v1, %v11366_v58  ;;  %v14953_v1 = vld [vmem:[#allocation2 + $0x644] sm:$0xf0] }
 0x162   :  { %4237 = vmatpush.bf16.msrb.mxu3 %v11677_v31  ;;  %v11417_v31 = vor.u32 %v14836_v16, %v11414_v17  ;;  %v15013_v17 = vld [vmem:[#allocation2 + $0x824] sm:$0xf0]  ;;  %v12060_v58 = vld [vmem:[#allocation2 + $0x7b0] sm:$0xf] }
 0x163   :  { %4196 = vmatpush.bf16.msrb.mxu0 %v11077_v45  ;;  %v16508_v45 = vpop.f32.mrf.mxu2  ;;  %v2504_v63 = vpop.f32.mrf.mxu0 }
 0x164   :  { %4210 = vmatpush.bf16.msrb.mxu1 %v11269_v50  ;;  %17166 = vst [vmem:[#allocation25_spill] sm:$0xff] %v16508_v45  ;;  %v14971_v50 = vld [vmem:[#allocation2 + $0x6d4] sm:$0xf0]  ;;  %v2518_v9 = vpop.f32.mrf.mxu1  ;;  %v14985_v45 = vld [vmem:[#allocation2 + $0x744] sm:$0xf0] }
 0x165   :  { %4224 = vmatpush.bf16.msrb.mxu2 %v11461_v53  ;;  %v12132_v53 = vld [vmem:[#allocation2 + $0x840] sm:$0xf] }
 0x166   :  { %4238 = vmatpush.bf16.msrb.mxu3 %v11653_v61  ;;  %4197 = vmatmul.bf16.vlgmr.msrb.gmra.mxu0 %v16492_v11  ;;  %v14776_v61 = vld [vmem:[#allocation2 + $0xc4] sm:$0xf]  ;;  %v12133_v7 = vor.u32 %v15019_v59, %v12132_v53 }
 0x167   :  { %4245 = vmatpush.bf16.msra.mxu0 %v12013_v62  ;;  %4211 = vmatmul.bf16.vlgmr.msrb.gmra.mxu1 %v16498_v23  ;;  %v11174_v62 = vld [vmem:[#allocation2 + $0xd8] sm:$0xf0] }
 0x168   :  { %4259 = vmatpush.bf16.msra.mxu1 %v12205_v4  ;;  %4225 = vmatmul.bf16.vlgmr.msrb.gmra.mxu2 %v16496_v35  ;;  %v2505_v4 = vadd.f32 %v2504_v63, %v16466_v5  ;;  %v11177_v8 = vor.u32 %v14776_v61, %v11174_v62  ;;  %v12109_v5 = vor.u32 %v15013_v17, %v12108_v12  ;;  %v11868_v63 = vld [vmem:[#allocation2 + $0x630] sm:$0xf]  ;;  %v11844_v12 = vld [vmem:[#allocation2 + $0x600] sm:$0xf] }
 0x169   :  { %4273 = vmatpush.bf16.msra.mxu2 %v11249_v6  ;;  %4239 = vmatmul.bf16.vlgmr.msrb.gmra.mxu3 %v16500_v18  ;;  %v11941_v6 = vor.u32 %v14971_v50, %v11940_v49  ;;  %v14812_v49 = vld [vmem:[#allocation2 + $0x1e4] sm:$0xf]  ;;  %v11318_v50 = vld [vmem:[#allocation2 + $0x1f8] sm:$0xf0]  ;;  %v12085_v61 = vor.u32 %v15007_v44, %v12084_v40  ;;  %v14938_v40 = vld [vmem:[#allocation2 + $0x5d4] sm:$0xf] }
 0x16a   :  { %4287 = vmatpush.bf16.msra.mxu3 %v11441_v0  ;;  %v11916_v0 = vld [vmem:[#allocation2 + $0x690] sm:$0xf]  ;;  %v2519_v16 = vadd.f32 %v2518_v9, %v2505_v4  ;;  %v11321_v4 = vor.u32 %v14812_v49, %v11318_v50  ;;  %v14806_v9 = vld [vmem:[#allocation2 + $0x1b4] sm:$0xf]  ;;  %v12206_v50 = vld [vmem:[#allocation2 + $0x8e8] sm:$0xf0] }
 0x16b   :  { %4246 = vmatpush.bf16.msra.mxu0 %v11989_v20  ;;  %v14770_v20 = vld [vmem:[#allocation2 + $0x94] sm:$0xf]  ;;  %v11917_v29 = vor.u32 %v14965_v10, %v11916_v0  ;;  %v2532_v43 = vpop.f32.mrf.mxu2  ;;  %v11294_v0 = vld [vmem:[#allocation2 + $0x1c8] sm:$0xf0]  ;;  %v11869_v10 = vor.u32 %v14953_v1, %v11868_v63  ;;  %v11070_v1 = vld [vmem:[%s17149_s0 + $0x28] sm:$0xf0] }
 0x16c   :  { %4260 = vmatpush.bf16.msra.mxu1 %v12181_v22  ;;  %v11150_v22 = vld [vmem:[#allocation2 + $0xa8] sm:$0xf0]  ;;  %v2546_v53 = vpop.f32.mrf.mxu3  ;;  %v14986_v44 = vld [vmem:[#allocation2 + $0x754] sm:$0xf] }
 0x16d   :  { %4274 = vmatpush.bf16.msra.mxu2 %v11225_v25  ;;  %v14818_v25 = vld [vmem:[#allocation2 + $0x214] sm:$0xf]  ;;  %v11153_v30 = vor.u32 %v14770_v20, %v11150_v22  ;;  %v14995_v22 = vld [vmem:[#allocation2 + $0x794] sm:$0xf0]  ;;  %v14748_v63 = vld [vmem:[%s17149_s0 + $0x14] sm:$0xf] }
 0x16e   :  { %4288 = vmatpush.bf16.msra.mxu3 %v11417_v31  ;;  %v11892_v31 = vld [vmem:[#allocation2 + $0x660] sm:$0xf]  ;;  %v11345_v42 = vor.u32 %v14818_v25, %v11342_v27  ;;  %v14752_v25 = vld [vmem:[#allocation2 + $0x4] sm:$0xf]  ;;  %v11078_v27 = vld [vmem:[#allocation2 + $0x18] sm:$0xf0] }
 0x16f   :  { %4247 = vmatpush.bf16.msra.mxu0 %v11965_v54  ;;  %v14764_v54 = vld [vmem:[#allocation2 + $0x64] sm:$0xf]  ;;  %v11081_v49 = vor.u32 %v14752_v25, %v11078_v27  ;;  %v16533_v25 = vpop.f32.mrf.mxu1 }
 0x170   :  { %4261 = vmatpush.bf16.msra.mxu1 %v12157_v46  ;;  %v11126_v46 = vld [vmem:[#allocation2 + $0x78] sm:$0xf0]  ;;  %17170 = vst [vmem:[#allocation29_spill] sm:$0xff] %v16533_v25  ;;  %v12028_v25 = vld [vmem:[#allocation2 + $0x760] sm:$0xf] }
 0x171   :  { %4275 = vmatpush.bf16.msra.mxu2 %v11201_v47  ;;  %v2533_v47 = vadd.f32 %v2532_v43, %v2519_v16  ;;  %v11129_v62 = vor.u32 %v14764_v54, %v11126_v46  ;;  %v12036_v16 = vld [vmem:[#allocation2 + $0x780] sm:$0xf]  ;;  %v12014_v54 = vld [vmem:[#allocation2 + $0x768] sm:$0xf0]  ;;  %v15034_v46 = vld [vmem:[#allocation2 + $0x8d4] sm:$0xf] }
 0x172   :  { %4289 = vmatpush.bf16.msra.mxu3 %v11393_v56  ;;  %v11893_v56 = vor.u32 %v14959_v37, %v11892_v31  ;;  %v14890_v31 = vld [vmem:[#allocation2 + $0x454] sm:$0xf]  ;;  %v11630_v37 = vld [vmem:[#allocation2 + $0x468] sm:$0xf0] }
 0x173   :  { %4248 = vmatpush.bf16.msra.mxu0 %v11941_v6  ;;  %v16513_v59 = vadd.f32 %v2546_v53, %v2533_v47  ;;  %v15001_v6 = vld [vmem:[#allocation2 + $0x7c4] sm:$0xf0]  ;;  %v12037_v47 = vor.u32 %v14995_v22, %v12036_v16  ;;  %v16529_v16 = vor.u32 %v14748_v63, %v11070_v1  ;;  %v16531_v22 = vpop.f32.mrf.mxu0  ;;  %v11750_v1 = vld [vmem:[#allocation2 + $0x558] sm:$0xf0] }
 0x174   :  { %4262 = vmatpush.bf16.msra.mxu1 %v12133_v7  ;;  %v14758_v7 = vld [vmem:[#allocation2 + $0x34] sm:$0xf]  ;;  %v12061_v17 = vor.u32 %v15001_v6, %v12060_v58  ;;  %v11068_v53 = vld [vmem:[%s17149_s0 + $0x10] sm:$0xf]  ;;  %v14884_v6 = vld [vmem:[#allocation2 + $0x424] sm:$0xf] }
 0x175   :  { %4276 = vmatpush.bf16.msra.mxu2 %v11177_v8  ;;  %17168 = vst [vmem:[#allocation27_spill] sm:$0xff] %v16513_v59  ;;  %v11102_v8 = vld [vmem:[#allocation2 + $0x48] sm:$0xf0]  ;;  %v14901_v59 = vld [vmem:[#allocation2 + $0x4a4] sm:$0xf0] }
 0x176   :  { %4290 = vmatpush.bf16.msra.mxu3 %v11369_v28  ;;  %v14947_v28 = vld [vmem:[#allocation2 + $0x614] sm:$0xf0]  ;;  %v11105_v20 = vor.u32 %v14758_v7, %v11102_v8  ;;  %v11606_v7 = vld [vmem:[#allocation2 + $0x438] sm:$0xf0]  ;;  %v14932_v8 = vld [vmem:[#allocation2 + $0x5a4] sm:$0xf] }
 0x177   :  { %4249 = vmatpush.bf16.msra.mxu0 %v11917_v29  ;;  %v11297_v29 = vor.u32 %v14806_v9, %v11294_v0  ;;  %v11845_v43 = vor.u32 %v14947_v28, %v11844_v12  ;;  %v12209_v9 = vor.u32 %v15034_v46, %v12206_v50  ;;  %v14980_v12 = vld [vmem:[#allocation2 + $0x724] sm:$0xf]  ;;  %v11990_v28 = vld [vmem:[#allocation2 + $0x738] sm:$0xf0]  ;;  %17169 = vst [vmem:[#allocation28_spill] sm:$0xff] %v16531_v22 }
 0x178   :  { %4263 = vmatpush.bf16.msra.mxu1 %v12109_v5  ;;  %v14800_v5 = vld [vmem:[#allocation2 + $0x184] sm:$0xf]  ;;  %v11609_v27 = vor.u32 %v14884_v6, %v11606_v7  ;;  %v12158_v46 = vld [vmem:[#allocation2 + $0x888] sm:$0xf0]  ;;  %v16541_v6 = vpop.f32.mrf.mxu3 }
 0x179   :  { %4277 = vmatpush.bf16.msra.mxu2 %v11153_v30  ;;  %v11270_v30 = vld [vmem:[#allocation2 + $0x198] sm:$0xf0]  ;;  %17172 = vst [vmem:[#allocation31_spill] sm:$0xff] %v16541_v6  ;;  %v15016_v7 = vld [vmem:[#allocation2 + $0x844] sm:$0xf] }
 0x17a   :  { %4291 = vmatpush.bf16.msra.mxu3 %v11345_v42  ;;  %v11822_v42 = vld [vmem:[#allocation2 + $0x5e8] sm:$0xf0]  ;;  %v14792_v6 = vld [vmem:[#allocation2 + $0x13c] sm:$0xf0] }
 0x17b   :  { %4250 = vmatpush.bf16.msra.mxu0 %v11893_v56  ;;  %v14751_v56 = vld [vmem:[%s17149_s0 + $0x24] sm:$0xf0]  ;;  %v11825_v58 = vor.u32 %v14938_v40, %v11822_v42  ;;  %v11774_v42 = vld [vmem:[#allocation2 + $0x588] sm:$0xf0] }
 0x17c   :  { %4264 = vmatpush.bf16.msra.mxu1 %v12085_v61  ;;  %v11273_v61 = vor.u32 %v14800_v5, %v11270_v30  ;;  %v16527_v0 = vor.u32 %v14751_v56, %v11068_v53  ;;  %v11993_v5 = vor.u32 %v14980_v12, %v11990_v28  ;;  %v14878_v30 = vld [vmem:[#allocation2 + $0x3f4] sm:$0xf]  ;;  %v14872_v53 = vld [vmem:[#allocation2 + $0x3c4] sm:$0xf]  ;;  %v11558_v56 = vld [vmem:[#allocation2 + $0x3d8] sm:$0xf0] }
 0x17d   :  { %4278 = vmatpush.bf16.msra.mxu2 %v11129_v62  ;;  %v11633_v62 = vor.u32 %v14890_v31, %v11630_v37  ;;  %v11582_v31 = vld [vmem:[#allocation2 + $0x408] sm:$0xf0]  ;;  %v14926_v37 = vld [vmem:[#allocation2 + $0x574] sm:$0xf] }
 0x17e   :  { %4292 = vmatpush.bf16.msra.mxu3 %v11321_v4  ;;  %v12017_v4 = vor.u32 %v14986_v44, %v12014_v54  ;;  %v11966_v44 = vld [vmem:[#allocation2 + $0x708] sm:$0xf0]  ;;  %v15022_v54 = vld [vmem:[#allocation2 + $0x874] sm:$0xf] }
 0x17f   :  { %4251 = vmatpush.bf16.msra.mxu0 %v11869_v10  ;;  %v11798_v10 = vld [vmem:[#allocation2 + $0x5b8] sm:$0xf0]  ;;  %v12161_v63 = vor.u32 %v15022_v54, %v12158_v46 }
 0x180   :  { %4265 = vmatpush.bf16.msra.mxu1 %v12061_v17  ;;  %v15028_v17 = vld [vmem:[#allocation2 + $0x8a4] sm:$0xf] }
 0x181   :  { %4279 = vmatpush.bf16.msra.mxu2 %v11105_v20  ;;  %v12182_v20 = vld [vmem:[#allocation2 + $0x8b8] sm:$0xf0] }
 0x182   :  { %4293 = vmatpush.bf16.msra.mxu3 %v11297_v29  ;;  %v11801_v29 = vor.u32 %v14932_v8, %v11798_v10  ;;  %v12185_v40 = vor.u32 %v15028_v17, %v12182_v20  ;;  %v12134_v8 = vld [vmem:[#allocation2 + $0x858] sm:$0xf0]  ;;  %v14866_v20 = vld [vmem:[#allocation2 + $0x394] sm:$0xf] }
 0x183   :  { %4252 = vmatpush.bf16.msra.mxu0 %v11845_v43  ;;  %v14974_v43 = vld [vmem:[#allocation2 + $0x6f4] sm:$0xf]  ;;  %v2560_v10 = vpop.f32.mrf.mxu0 }
 0x184   :  { %4266 = vmatpush.bf16.msra.mxu1 %v12037_v47  ;;  %v11585_v47 = vor.u32 %v14878_v30, %v11582_v31  ;;  %v11969_v50 = vor.u32 %v14974_v43, %v11966_v44  ;;  %v2574_v12 = vpop.f32.mrf.mxu1  ;;  %v12137_v30 = vor.u32 %v15016_v7, %v12134_v8  ;;  %v11726_v31 = vld [vmem:[#allocation2 + $0x528] sm:$0xf0] }
 0x185   :  { %4280 = vmatpush.bf16.msra.mxu2 %v11081_v49  ;;  %v11777_v49 = vor.u32 %v14926_v37, %v11774_v42  ;;  %v14962_v37 = vld [vmem:[#allocation2 + $0x694] sm:$0xf]  ;;  %v12110_v43 = vld [vmem:[#allocation2 + $0x828] sm:$0xf0] }
 0x186   :  { %4294 = vmatpush.bf16.msra.mxu3 %v11273_v61  ;;  %4253 = vmatmul.bf16.vlgmr.msra.gmra.mxu0 %v16527_v0  ;;  %v14920_v61 = vld [vmem:[#allocation2 + $0x544] sm:$0xf]  ;;  %v15010_v42 = vld [vmem:[#allocation2 + $0x814] sm:$0xf] }
 0x187   :  { %4301 = vmatpush.bf16.msrb.mxu0 %v11633_v62  ;;  %4267 = vmatmul.bf16.vlgmr.msra.gmra.mxu1 %v16529_v16  ;;  %v16539_v62 = vpop.f32.mrf.mxu2  ;;  %v11753_v28 = vor.u32 %v14920_v61, %v11750_v1  ;;  %v14956_v61 = vld [vmem:[#allocation2 + $0x664] sm:$0xf] }
 0x188   :  { %4315 = vmatpush.bf16.msrb.mxu1 %v11825_v58  ;;  %4281 = vmatmul.bf16.vlgmr.msra.gmra.mxu2 %v16492_v11  ;;  %17171 = vst [vmem:[#allocation30_spill] sm:$0xff] %v16539_v62  ;;  %v14968_v58 = vld [vmem:[#allocation2 + $0x6c4] sm:$0xf] }
 0x189   :  { %4329 = vmatpush.bf16.msrb.mxu2 %v12017_v4  ;;  %4295 = vmatmul.bf16.vlgmr.msra.gmra.mxu3 %v16498_v23  ;;  %v11942_v4 = vld [vmem:[#allocation2 + $0x6d8] sm:$0xf0] }
 0x18a   :  { %4343 = vmatpush.bf16.msrb.mxu3 %v12209_v9  ;;  %v11561_v9 = vor.u32 %v14872_v53, %v11558_v56  ;;  %v11945_v17 = vor.u32 %v14968_v58, %v11942_v4  ;;  %v12113_v53 = vor.u32 %v15010_v42, %v12110_v43  ;;  %v11702_v56 = vld [vmem:[#allocation2 + $0x4f8] sm:$0xf0]  ;;  %v15004_v58 = vld [vmem:[#allocation2 + $0x7e4] sm:$0xf]  ;;  %v12062_v42 = vld [vmem:[#allocation2 + $0x7c8] sm:$0xf0] }
 0x18b   :  { %4302 = vmatpush.bf16.msrb.mxu0 %v11609_v27  ;;  %v11534_v27 = vld [vmem:[#allocation2 + $0x3a8] sm:$0xf0]  ;;  %v12086_v4 = vld [vmem:[#allocation2 + $0x7f8] sm:$0xf0]  ;;  %v14848_v43 = vld [vmem:[#allocation2 + $0x304] sm:$0xf] }
 0x18c   :  { %4316 = vmatpush.bf16.msrb.mxu1 %v11801_v29  ;;  %v14914_v29 = vld [vmem:[#allocation2 + $0x514] sm:$0xf]  ;;  %v11537_v44 = vor.u32 %v14866_v20, %v11534_v27 }
 0x18d   :  { %4330 = vmatpush.bf16.msrb.mxu2 %v11993_v5  ;;  %v2575_v5 = vadd.f32 %v2574_v12, %v2560_v10  ;;  %v11729_v54 = vor.u32 %v14914_v29, %v11726_v31  ;;  %v14902_v20 = vld [vmem:[#allocation2 + $0x4b4] sm:$0xf]  ;;  %v12089_v29 = vor.u32 %v15004_v58, %v12086_v4  ;;  %v14798_v58 = vld [vmem:[#allocation2 + $0x16c] sm:$0xf0]  ;;  %v11444_v4 = vld [vmem:[#allocation2 + $0x2d8] sm:$0xf] }
 0x18e   :  { %4344 = vmatpush.bf16.msrb.mxu3 %v12185_v40  ;;  %v11918_v40 = vld [vmem:[#allocation2 + $0x6a8] sm:$0xf0]  ;;  %v14950_v31 = vld [vmem:[#allocation2 + $0x634] sm:$0xf] }
 0x18f   :  { %4303 = vmatpush.bf16.msrb.mxu0 %v11585_v47  ;;  %v11921_v46 = vor.u32 %v14962_v37, %v11918_v40  ;;  %v14860_v47 = vld [vmem:[#allocation2 + $0x364] sm:$0xf]  ;;  %v2588_v1 = vpop.f32.mrf.mxu2  ;;  %v11870_v37 = vld [vmem:[#allocation2 + $0x648] sm:$0xf0]  ;;  %v14998_v40 = vld [vmem:[#allocation2 + $0x7b4] sm:$0xf] }
 0x190   :  { %4317 = vmatpush.bf16.msrb.mxu1 %v11777_v49  ;;  %v11510_v49 = vld [vmem:[#allocation2 + $0x378] sm:$0xf0]  ;;  %v2589_v7 = vadd.f32 %v2588_v1, %v2575_v5  ;;  %v11252_v1 = vld [vmem:[#allocation2 + $0x158] sm:$0xf] }
 0x191   :  { %4331 = vmatpush.bf16.msrb.mxu2 %v11969_v50  ;;  %v14908_v50 = vld [vmem:[#allocation2 + $0x4e4] sm:$0xf]  ;;  %v11513_v8 = vor.u32 %v14860_v47, %v11510_v49  ;;  %v11654_v49 = vld [vmem:[#allocation2 + $0x498] sm:$0xf0] }
 0x192   :  { %4345 = vmatpush.bf16.msrb.mxu3 %v12161_v63  ;;  %v11894_v63 = vld [vmem:[#allocation2 + $0x678] sm:$0xf0]  ;;  %v11705_v10 = vor.u32 %v14908_v50, %v11702_v56  ;;  %v14896_v47 = vld [vmem:[#allocation2 + $0x484] sm:$0xf]  ;;  %v12065_v56 = vor.u32 %v14998_v40, %v12062_v42  ;;  %v16545_v40 = vpop.f32.mrf.mxu0  ;;  %v11228_v42 = vld [vmem:[#allocation2 + $0x128] sm:$0xf] }
 0x193   :  { %4304 = vmatpush.bf16.msrb.mxu0 %v11561_v9  ;;  %v2602_v9 = vpop.f32.mrf.mxu3  ;;  %v11897_v12 = vor.u32 %v14956_v61, %v11894_v63  ;;  %v14944_v50 = vld [vmem:[#allocation2 + $0x604] sm:$0xf]  ;;  %v12038_v63 = vld [vmem:[#allocation2 + $0x798] sm:$0xf0]  ;;  %17173 = vst [vmem:[#allocation32_spill] sm:$0xff] %v16545_v40 }
 0x194   :  { %4318 = vmatpush.bf16.msrb.mxu1 %v11753_v28  ;;  %v14854_v28 = vld [vmem:[#allocation2 + $0x334] sm:$0xf]  ;;  %v16543_v27 = vadd.f32 %v2602_v9, %v2589_v7  ;;  %v14992_v61 = vld [vmem:[#allocation2 + $0x784] sm:$0xf]  ;;  %v11636_v9 = vld [vmem:[#allocation2 + $0x458] sm:$0xf] }
 0x195   :  { %4332 = vmatpush.bf16.msrb.mxu2 %v11945_v17  ;;  %v11486_v17 = vld [vmem:[#allocation2 + $0x348] sm:$0xf0]  ;;  %v11230_v40 = vld [vmem:[#allocation2 + $0x140] sm:$0xf0] }
 0x196   :  { %4346 = vmatpush.bf16.msrb.mxu3 %v12137_v30  ;;  %v11678_v30 = vld [vmem:[#allocation2 + $0x4c8] sm:$0xf0]  ;;  %v11489_v5 = vor.u32 %v14854_v28, %v11486_v17  ;;  %v14894_v28 = vld [vmem:[#allocation2 + $0x46c] sm:$0xf0]  ;;  %v11828_v17 = vld [vmem:[#allocation2 + $0x5d8] sm:$0xf] }
 0x197   :  { %4305 = vmatpush.bf16.msrb.mxu0 %v11537_v44  ;;  %v11462_v44 = vld [vmem:[#allocation2 + $0x318] sm:$0xf0] }
 0x198   :  { %4319 = vmatpush.bf16.msrb.mxu1 %v11729_v54  ;;  %v11681_v54 = vor.u32 %v14902_v20, %v11678_v30  ;;  %v11465_v7 = vor.u32 %v14848_v43, %v11462_v44  ;;  %v14942_v20 = vld [vmem:[#allocation2 + $0x5ec] sm:$0xf0]  ;;  %v11253_v30 = vor.u32 %v14798_v58, %v11252_v1  ;;  %v14840_v44 = vld [vmem:[#allocation2 + $0x2bc] sm:$0xf0]  ;;  %v11396_v1 = vld [vmem:[#allocation2 + $0x278] sm:$0xf] }
 0x199   :  { %4333 = vmatpush.bf16.msrb.mxu2 %v11921_v46  ;;  %v11873_v46 = vor.u32 %v14950_v31, %v11870_v37  ;;  %v11637_v37 = vor.u32 %v14894_v28, %v11636_v9  ;;  %v11829_v43 = vor.u32 %v14942_v20, %v11828_v17  ;;  %v11780_v9 = vld [vmem:[#allocation2 + $0x578] sm:$0xf]  ;;  %v14780_v17 = vld [vmem:[#allocation2 + $0xdc] sm:$0xf0]  ;;  %v11372_v20 = vld [vmem:[#allocation2 + $0x248] sm:$0xf] }
 0x19a   :  { %4347 = vmatpush.bf16.msrb.mxu3 %v12113_v53  ;;  %v11846_v53 = vld [vmem:[#allocation2 + $0x618] sm:$0xf0] }
 0x19b   :  { %4306 = vmatpush.bf16.msrb.mxu0 %v11513_v8  ;;  %v14846_v8 = vld [vmem:[#allocation2 + $0x2ec] sm:$0xf0] }
 0x19c   :  { %4320 = vmatpush.bf16.msrb.mxu1 %v11705_v10  ;;  %v11657_v10 = vor.u32 %v14896_v47, %v11654_v49  ;;  %v11445_v31 = vor.u32 %v14846_v8, %v11444_v4  ;;  %v14936_v47 = vld [vmem:[#allocation2 + $0x5bc] sm:$0xf0]  ;;  %v16547_v49 = vpop.f32.mrf.mxu1  ;;  %v14834_v4 = vld [vmem:[#allocation2 + $0x28c] sm:$0xf0] }
 0x19d   :  { %4334 = vmatpush.bf16.msrb.mxu2 %v11897_v12  ;;  %v11849_v12 = vor.u32 %v14944_v50, %v11846_v53  ;;  %17174 = vst [vmem:[#allocation33_spill] sm:$0xff] %v16547_v49  ;;  %v11229_v50 = vor.u32 %v14792_v6, %v11228_v42  ;;  %v14882_v8 = vld [vmem:[#allocation2 + $0x40c] sm:$0xf0]  ;;  %v11397_v28 = vor.u32 %v14834_v4, %v11396_v1  ;;  %v16553_v42 = vpop.f32.mrf.mxu2  ;;  %v11348_v1 = vld [vmem:[#allocation2 + $0x218] sm:$0xf] }
 0x19e   :  { %4348 = vmatpush.bf16.msrb.mxu3 %v12089_v29  ;;  %v12041_v29 = vor.u32 %v14992_v61, %v12038_v63  ;;  %v11204_v61 = vld [vmem:[#allocation2 + $0xf8] sm:$0xf]  ;;  %v14786_v63 = vld [vmem:[#allocation2 + $0x10c] sm:$0xf0]  ;;  %17175 = vst [vmem:[#allocation34_spill] sm:$0xff] %v16553_v42 }
 0x19f   :  { %4307 = vmatpush.bf16.msrb.mxu0 %v11489_v5  ;;  %v11420_v5 = vld [vmem:[#allocation2 + $0x2a8] sm:$0xf]  ;;  %v14930_v6 = vld [vmem:[#allocation2 + $0x58c] sm:$0xf0]  ;;  %v14984_v42 = vld [vmem:[#allocation2 + $0x73c] sm:$0xf0] }
 0x1a0   :  { %4321 = vmatpush.bf16.msrb.mxu1 %v11681_v54  ;;  %v14888_v54 = vld [vmem:[#allocation2 + $0x43c] sm:$0xf0]  ;;  %v12188_v49 = vld [vmem:[#allocation2 + $0x8a8] sm:$0xf] }
 0x1a1   :  { %4335 = vmatpush.bf16.msrb.mxu2 %v11873_v46  ;;  %v11804_v46 = vld [vmem:[#allocation2 + $0x5a8] sm:$0xf]  ;;  %v11613_v53 = vor.u32 %v14888_v54, %v11612_v21  ;;  %v11205_v21 = vor.u32 %v14786_v63, %v11204_v61  ;;  %v16555_v54 = vpop.f32.mrf.mxu3  ;;  %v11156_v61 = vld [vmem:[#allocation2 + $0x98] sm:$0xf]  ;;  %v14774_v63 = vld [vmem:[#allocation2 + $0xac] sm:$0xf0] }
 0x1a2   :  { %4349 = vmatpush.bf16.msrb.mxu3 %v12065_v56  ;;  %v11421_v56 = vor.u32 %v14840_v44, %v11420_v5  ;;  %v11805_v58 = vor.u32 %v14936_v47, %v11804_v46  ;;  %v14924_v44 = vld [vmem:[#allocation2 + $0x55c] sm:$0xf0]  ;;  %17176 = vst [vmem:[#allocation35_spill] sm:$0xff] %v16555_v54  ;;  %v11254_v54 = vld [vmem:[#allocation2 + $0x170] sm:$0xf0] }
 0x1a3   :  { %4308 = vmatpush.bf16.msrb.mxu0 %v11465_v7  ;;  %v11588_v7 = vld [vmem:[#allocation2 + $0x3f8] sm:$0xf]  ;;  %v2616_v5 = vpop.f32.mrf.mxu0 }
 0x1a4   :  { %4322 = vmatpush.bf16.msrb.mxu1 %v11657_v10  ;;  %v11589_v10 = vor.u32 %v14882_v8, %v11588_v7  ;;  %v2617_v46 = vadd.f32 %v2616_v5, %v16543_v27  ;;  %v14822_v7 = vld [vmem:[#allocation2 + $0x22c] sm:$0xf0]  ;;  %v11540_v8 = vld [vmem:[#allocation2 + $0x398] sm:$0xf]  ;;  %v11157_v27 = vor.u32 %v14774_v63, %v11156_v61  ;;  %v11708_v5 = vld [vmem:[#allocation2 + $0x4e8] sm:$0xf] }
 0x1a5   :  { %4336 = vmatpush.bf16.msrb.mxu2 %v11849_v12  ;;  %v11180_v12 = vld [vmem:[#allocation2 + $0xc8] sm:$0xf]  ;;  %v11108_v61 = vld [vmem:[#allocation2 + $0x38] sm:$0xf]  ;;  %v14762_v63 = vld [vmem:[#allocation2 + $0x4c] sm:$0xf0] }
 0x1a6   :  { %4350 = vmatpush.bf16.msrb.mxu3 %v12041_v29  ;;  %4309 = vmatmul.bf16.vlgmr.msrb.gmra.mxu0 %v16496_v35  ;;  %v11781_v29 = vor.u32 %v14930_v6, %v11780_v9  ;;  %v11181_v47 = vor.u32 %v14780_v17, %v11180_v12  ;;  %v14870_v9 = vld [vmem:[#allocation2 + $0x3ac] sm:$0xf0]  ;;  %v11732_v6 = vld [vmem:[#allocation2 + $0x518] sm:$0xf]  ;;  %v11132_v12 = vld [vmem:[#allocation2 + $0x68] sm:$0xf] }
 0x1a7   :  { %4357 = vmatpush.bf16.msra.mxu0 %v11253_v30  ;;  %4323 = vmatmul.bf16.vlgmr.msrb.gmra.mxu1 %v16500_v18  ;;  %v14828_v30 = vld [vmem:[#allocation2 + $0x25c] sm:$0xf0] }
 0x1a8   :  { %4371 = vmatpush.bf16.msra.mxu1 %v11445_v31  ;;  %4337 = vmatmul.bf16.vlgmr.msrb.gmra.mxu2 %v16527_v0  ;;  %v11564_v31 = vld [vmem:[#allocation2 + $0x3c8] sm:$0xf]  ;;  %v14768_v17 = vld [vmem:[#allocation2 + $0x7c] sm:$0xf0] }
 0x1a9   :  { %4385 = vmatpush.bf16.msra.mxu2 %v11637_v37  ;;  %4351 = vmatmul.bf16.vlgmr.msrb.gmra.mxu3 %v16529_v16  ;;  %v14876_v37 = vld [vmem:[#allocation2 + $0x3dc] sm:$0xf0] }
 0x1aa   :  { %4399 = vmatpush.bf16.msra.mxu3 %v11829_v43  ;;  %v11756_v43 = vld [vmem:[#allocation2 + $0x548] sm:$0xf] }
 0x1ab   :  { %4358 = vmatpush.bf16.msra.mxu0 %v11229_v50  ;;  %v11373_v50 = vor.u32 %v14828_v30, %v11372_v20  ;;  %v11324_v20 = vld [vmem:[#allocation2 + $0x1e8] sm:$0xf]  ;;  %v16562_v62 = vpop.f32.mrf.mxu0 }
 0x1ac   :  { %4372 = vmatpush.bf16.msra.mxu1 %v11421_v56  ;;  %v11565_v56 = vor.u32 %v14876_v37, %v11564_v31  ;;  %v11516_v31 = vld [vmem:[#allocation2 + $0x368] sm:$0xf]  ;;  %v14864_v37 = vld [vmem:[#allocation2 + $0x37c] sm:$0xf0]  ;;  %17178 = vst [vmem:[#allocation37_spill] sm:$0xff] %v16562_v62 }
 0x1ad   :  { %4386 = vmatpush.bf16.msra.mxu2 %v11613_v53  ;;  %v2630_v53 = vpop.f32.mrf.mxu1  ;;  %v11998_v62 = vld [vmem:[#allocation2 + $0x740] sm:$0xf0] }
 0x1ae   :  { %4400 = vmatpush.bf16.msra.mxu3 %v11805_v58  ;;  %v11757_v58 = vor.u32 %v14924_v44, %v11756_v43  ;;  %v16558_v4 = vadd.f32 %v2630_v53, %v2617_v46  ;;  %v14912_v43 = vld [vmem:[#allocation2 + $0x4fc] sm:$0xf0]  ;;  %v2644_v44 = vpop.f32.mrf.mxu2  ;;  %v2658_v46 = vpop.f32.mrf.mxu3  ;;  %v11133_v53 = vor.u32 %v14768_v17, %v11132_v12  ;;  %v11276_v17 = vld [vmem:[#allocation2 + $0x188] sm:$0xf] }
 0x1af   :  { %4359 = vmatpush.bf16.msra.mxu0 %v11205_v21  ;;  %v14918_v21 = vld [vmem:[#allocation2 + $0x52c] sm:$0xf0]  ;;  %v14756_v12 = vld [vmem:[#allocation2 + $0x1c] sm:$0xf0] }
 0x1b0   :  { %4373 = vmatpush.bf16.msra.mxu1 %v11397_v28  ;;  %17177 = vst [vmem:[#allocation36_spill] sm:$0xff] %v16558_v4  ;;  %v11349_v28 = vor.u32 %v14822_v7, %v11348_v1  ;;  %v11733_v30 = vor.u32 %v14918_v21, %v11732_v6  ;;  %v11300_v1 = vld [vmem:[#allocation2 + $0x1b8] sm:$0xf]  ;;  %v14810_v7 = vld [vmem:[#allocation2 + $0x1cc] sm:$0xf0]  ;;  %v11109_v4 = vor.u32 %v14762_v63, %v11108_v61 }
 0x1b1   :  { %4387 = vmatpush.bf16.msra.mxu2 %v11589_v10  ;;  %v11541_v10 = vor.u32 %v14870_v9, %v11540_v8  ;;  %v11492_v8 = vld [vmem:[#allocation2 + $0x338] sm:$0xf]  ;;  %v14858_v9 = vld [vmem:[#allocation2 + $0x34c] sm:$0xf0]  ;;  %v14795_v63 = vld [vmem:[#allocation2 + $0x15c] sm:$0xf] }
 0x1b2   :  { %4401 = vmatpush.bf16.msra.mxu3 %v11781_v29  ;;  %v14816_v29 = vld [vmem:[#allocation2 + $0x1fc] sm:$0xf0]  ;;  %v11684_v6 = vld [vmem:[#allocation2 + $0x4b8] sm:$0xf]  ;;  %v14906_v21 = vld [vmem:[#allocation2 + $0x4cc] sm:$0xf0] }
 0x1b3   :  { %4360 = vmatpush.bf16.msra.mxu0 %v11181_v47  ;;  %v16560_v47 = vadd.f32 %v2658_v46, %v2644_v44  ;;  %v14990_v44 = vld [vmem:[#allocation2 + $0x76c] sm:$0xf0]  ;;  %v12212_v46 = vld [vmem:[#allocation2 + $0x8d8] sm:$0xf] }
 0x1b4   :  { %4374 = vmatpush.bf16.msra.mxu1 %v11373_v50  ;;  %v11325_v50 = vor.u32 %v14816_v29, %v11324_v20  ;;  %v14804_v20 = vld [vmem:[#allocation2 + $0x19c] sm:$0xf0]  ;;  %v11468_v29 = vld [vmem:[#allocation2 + $0x308] sm:$0xf]  ;;  %v15038_v61 = vld [vmem:[#allocation2 + $0x8ec] sm:$0xf0] }
 0x1b5   :  { %4388 = vmatpush.bf16.msra.mxu2 %v11565_v56  ;;  %v11517_v56 = vor.u32 %v14864_v37, %v11516_v31  ;;  %v11685_v31 = vor.u32 %v14906_v21, %v11684_v6  ;;  %v11660_v37 = vld [vmem:[#allocation2 + $0x488] sm:$0xf]  ;;  %v11257_v6 = vor.u32 %v14795_v63, %v11254_v54 }
 0x1b6   :  { %4402 = vmatpush.bf16.msra.mxu3 %v11757_v58  ;;  %v11709_v58 = vor.u32 %v14912_v43, %v11708_v5  ;;  %v14900_v5 = vld [vmem:[#allocation2 + $0x49c] sm:$0xf0]  ;;  %v12020_v43 = vld [vmem:[#allocation2 + $0x758] sm:$0xf]  ;;  %v11996_v21 = vld [vmem:[#allocation2 + $0x728] sm:$0xf] }
 0x1b7   :  { %4361 = vmatpush.bf16.msra.mxu0 %v11157_v27  ;;  %v11084_v27 = vld [vmem:[#allocation2 + $0x8] sm:$0xf] }
 0x1b8   :  { %4375 = vmatpush.bf16.msra.mxu1 %v11349_v28  ;;  %v11301_v28 = vor.u32 %v14810_v7, %v11300_v1  ;;  %v14843_v1 = vld [vmem:[#allocation2 + $0x2dc] sm:$0xf]  ;;  %v11446_v7 = vld [vmem:[#allocation2 + $0x2f0] sm:$0xf0] }
 0x1b9   :  { %4389 = vmatpush.bf16.msra.mxu2 %v11541_v10  ;;  %v11493_v10 = vor.u32 %v14858_v9, %v11492_v8  ;;  %v12021_v8 = vor.u32 %v14990_v44, %v12020_v43  ;;  %v12213_v9 = vor.u32 %v15038_v61, %v12212_v46  ;;  %v15026_v43 = vld [vmem:[#allocation2 + $0x88c] sm:$0xf0]  ;;  %v14783_v44 = vld [vmem:[#allocation2 + $0xfc] sm:$0xf]  ;;  %v11206_v46 = vld [vmem:[#allocation2 + $0x110] sm:$0xf0] }
 0x1ba   :  { %4403 = vmatpush.bf16.msra.mxu3 %v11733_v30  ;;  %v14852_v30 = vld [vmem:[#allocation2 + $0x31c] sm:$0xf0]  ;;  %v11209_v63 = vor.u32 %v14783_v44, %v11206_v46  ;;  %v14771_v44 = vld [vmem:[#allocation2 + $0x9c] sm:$0xf]  ;;  %v11158_v46 = vld [vmem:[#allocation2 + $0xb0] sm:$0xf0] }
 0x1bb   :  { %4362 = vmatpush.bf16.msra.mxu0 %v11133_v53  ;;  %v11085_v53 = vor.u32 %v14756_v12, %v11084_v27  ;;  %v15032_v27 = vld [vmem:[#allocation2 + $0x8bc] sm:$0xf0]  ;;  %v14789_v12 = vld [vmem:[#allocation2 + $0x12c] sm:$0xf] }
 0x1bc   :  { %4376 = vmatpush.bf16.msra.mxu1 %v11325_v50  ;;  %v11277_v50 = vor.u32 %v14804_v20, %v11276_v17  ;;  %v11997_v17 = vor.u32 %v14984_v42, %v11996_v21  ;;  %v16564_v20 = vpop.f32.mrf.mxu1  ;;  %v12189_v54 = vor.u32 %v15032_v27, %v12188_v49  ;;  %v14831_v42 = vld [vmem:[#allocation2 + $0x27c] sm:$0xf]  ;;  %v16570_v49 = vpop.f32.mrf.mxu2  ;;  %v11374_v27 = vld [vmem:[#allocation2 + $0x260] sm:$0xf0] }
 0x1bd   :  { %4390 = vmatpush.bf16.msra.mxu2 %v11517_v56  ;;  %v11469_v56 = vor.u32 %v14852_v30, %v11468_v29  ;;  %17179 = vst [vmem:[#allocation38_spill] sm:$0xff] %v16564_v20  ;;  %v11233_v29 = vor.u32 %v14789_v12, %v11230_v40  ;;  %v14978_v30 = vld [vmem:[#allocation2 + $0x70c] sm:$0xf0]  ;;  %v11614_v20 = vld [vmem:[#allocation2 + $0x440] sm:$0xf0] }
 0x1be   :  { %4404 = vmatpush.bf16.msra.mxu3 %v11709_v58  ;;  %v11661_v58 = vor.u32 %v14900_v5, %v11660_v37  ;;  %v12164_v37 = vld [vmem:[#allocation2 + $0x878] sm:$0xf]  ;;  %17180 = vst [vmem:[#allocation39_spill] sm:$0xff] %v16570_v49  ;;  %v11668_v49 = vld [vmem:[#allocation2 + $0x490] sm:$0xf] }
 0x1bf   :  { %4363 = vmatpush.bf16.msra.mxu0 %v11109_v4  ;;  %v11449_v4 = vor.u32 %v14843_v1, %v11446_v7  ;;  %v12165_v61 = vor.u32 %v15026_v43, %v12164_v37  ;;  %v12140_v1 = vld [vmem:[#allocation2 + $0x848] sm:$0xf]  ;;  %v15014_v43 = vld [vmem:[#allocation2 + $0x82c] sm:$0xf0] }
 0x1c0   :  { %4377 = vmatpush.bf16.msra.mxu1 %v11301_v28  ;;  %v14837_v28 = vld [vmem:[#allocation2 + $0x2ac] sm:$0xf] }
 0x1c1   :  { %4391 = vmatpush.bf16.msra.mxu2 %v11493_v10  ;;  %v11422_v10 = vld [vmem:[#allocation2 + $0x2c0] sm:$0xf0] }
 0x1c2   :  { %4405 = vmatpush.bf16.msra.mxu3 %v11685_v31  ;;  %v11972_v31 = vld [vmem:[#allocation2 + $0x6f8] sm:$0xf]  ;;  %v11425_v5 = vor.u32 %v14837_v28, %v11422_v10 }
 0x1c3   :  { %4364 = vmatpush.bf16.msra.mxu0 %v11085_v53  ;;  %v11398_v53 = vld [vmem:[#allocation2 + $0x290] sm:$0xf0]  ;;  %v11973_v40 = vor.u32 %v14978_v30, %v11972_v31  ;;  %v2672_v21 = vpop.f32.mrf.mxu0  ;;  %v14966_v31 = vld [vmem:[#allocation2 + $0x6ac] sm:$0xf0]  ;;  %v12116_v30 = vld [vmem:[#allocation2 + $0x818] sm:$0xf] }
 0x1c4   :  { %4378 = vmatpush.bf16.msra.mxu1 %v11277_v50  ;;  %v11948_v50 = vld [vmem:[#allocation2 + $0x6c8] sm:$0xf]  ;;  %v11401_v7 = vor.u32 %v14831_v42, %v11398_v53  ;;  %v2673_v12 = vadd.f32 %v2672_v21, %v16560_v47  ;;  %v14819_v42 = vld [vmem:[#allocation2 + $0x21c] sm:$0xf]  ;;  %v11350_v53 = vld [vmem:[#allocation2 + $0x230] sm:$0xf0]  ;;  %v12117_v47 = vor.u32 %v15014_v43, %v12116_v30 }
 0x1c5   :  { %4392 = vmatpush.bf16.msra.mxu2 %v11469_v56  ;;  %v14972_v56 = vld [vmem:[#allocation2 + $0x6dc] sm:$0xf0]  ;;  %v12068_v30 = vld [vmem:[#allocation2 + $0x7b8] sm:$0xf]  ;;  %v15002_v43 = vld [vmem:[#allocation2 + $0x7cc] sm:$0xf0] }
 0x1c6   :  { %4406 = vmatpush.bf16.msra.mxu3 %v11661_v58  ;;  %4365 = vmatmul.bf16.vlgmr.msra.gmra.mxu0 %v16492_v11  ;;  %v16572_v58 = vpop.f32.mrf.mxu3  ;;  %v11949_v28 = vor.u32 %v14972_v56, %v11948_v50  ;;  %v14960_v50 = vld [vmem:[#allocation2 + $0x67c] sm:$0xf0]  ;;  %v12092_v56 = vld [vmem:[#allocation2 + $0x7e8] sm:$0xf] }
 0x1c7   :  { %4413 = vmatpush.bf16.msrb.mxu0 %v12021_v8  ;;  %4379 = vmatmul.bf16.vlgmr.msra.gmra.mxu1 %v16498_v23  ;;  %17181 = vst [vmem:[#allocation40_spill] sm:$0xff] %v16572_v58  ;;  %v15020_v8 = vld [vmem:[#allocation2 + $0x85c] sm:$0xf0]  ;;  %v14853_v58 = vld [vmem:[#allocation2 + $0x324] sm:$0xf0] }
 0x1c8   :  { %4427 = vmatpush.bf16.msrb.mxu1 %v12213_v9  ;;  %4393 = vmatmul.bf16.vlgmr.msra.gmra.mxu2 %v16496_v35  ;;  %v14777_v9 = vld [vmem:[#allocation2 + $0xcc] sm:$0xf]  ;;  %v12141_v10 = vor.u32 %v15020_v8, %v12140_v1  ;;  %v11353_v1 = vor.u32 %v14819_v42, %v11350_v53  ;;  %v11302_v42 = vld [vmem:[#allocation2 + $0x1d0] sm:$0xf0] }
 0x1c9   :  { %4441 = vmatpush.bf16.msrb.mxu2 %v11257_v6  ;;  %4407 = vmatmul.bf16.vlgmr.msra.gmra.mxu3 %v16500_v18  ;;  %v11182_v6 = vld [vmem:[#allocation2 + $0xe0] sm:$0xf0] }
 0x1ca   :  { %4455 = vmatpush.bf16.msrb.mxu3 %v11449_v4  ;;  %v14825_v4 = vld [vmem:[#allocation2 + $0x24c] sm:$0xf] }
 0x1cb   :  { %4414 = vmatpush.bf16.msrb.mxu0 %v11997_v17  ;;  %v11185_v17 = vor.u32 %v14777_v9, %v11182_v6  ;;  %v11377_v37 = vor.u32 %v14825_v4, %v11374_v27  ;;  %v2700_v8 = vpop.f32.mrf.mxu2  ;;  %v14765_v9 = vld [vmem:[#allocation2 + $0x6c] sm:$0xf]  ;;  %v11134_v6 = vld [vmem:[#allocation2 + $0x80] sm:$0xf0] }
 0x1cc   :  { %4428 = vmatpush.bf16.msrb.mxu1 %v12189_v54  ;;  %v2686_v54 = vpop.f32.mrf.mxu1  ;;  %v14813_v4 = vld [vmem:[#allocation2 + $0x1ec] sm:$0xf]  ;;  %v11326_v27 = vld [vmem:[#allocation2 + $0x200] sm:$0xf0] }
 0x1cd   :  { %4442 = vmatpush.bf16.msrb.mxu2 %v11233_v29  ;;  %v11924_v29 = vld [vmem:[#allocation2 + $0x698] sm:$0xf] }
 0x1ce   :  { %4456 = vmatpush.bf16.msrb.mxu3 %v11425_v5  ;;  %v2687_v5 = vadd.f32 %v2686_v54, %v2673_v12  ;;  %v2714_v12 = vpop.f32.mrf.mxu3  ;;  %v11137_v54 = vor.u32 %v14765_v9, %v11134_v6  ;;  %v14801_v9 = vld [vmem:[#allocation2 + $0x18c] sm:$0xf]  ;;  %v11278_v6 = vld [vmem:[#allocation2 + $0x1a0] sm:$0xf0] }
 0x1cf   :  { %4415 = vmatpush.bf16.msrb.mxu0 %v11973_v40  ;;  %v11925_v40 = vor.u32 %v14966_v31, %v11924_v29  ;;  %v11876_v29 = vld [vmem:[#allocation2 + $0x638] sm:$0xf]  ;;  %v14954_v31 = vld [vmem:[#allocation2 + $0x64c] sm:$0xf0] }
 0x1d0   :  { %4429 = vmatpush.bf16.msrb.mxu1 %v12165_v61  ;;  %v11161_v61 = vor.u32 %v14771_v44, %v11158_v46  ;;  %v2701_v21 = vadd.f32 %v2700_v8, %v2687_v5  ;;  %v14759_v44 = vld [vmem:[#allocation2 + $0x3c] sm:$0xf]  ;;  %v11110_v46 = vld [vmem:[#allocation2 + $0x50] sm:$0xf0]  ;;  %v11877_v53 = vor.u32 %v14954_v31, %v11876_v29  ;;  %v14753_v8 = vld [vmem:[#allocation2 + $0xc] sm:$0xf] }
 0x1d1   :  { %4443 = vmatpush.bf16.msrb.mxu2 %v11209_v63  ;;  %v11900_v63 = vld [vmem:[#allocation2 + $0x668] sm:$0xf]  ;;  %v14807_v5 = vld [vmem:[#allocation2 + $0x1bc] sm:$0xf]  ;;  %v12022_v31 = vld [vmem:[#allocation2 + $0x770] sm:$0xf0] }
 0x1d2   :  { %4457 = vmatpush.bf16.msrb.mxu3 %v11401_v7  ;;  %v15008_v7 = vld [vmem:[#allocation2 + $0x7fc] sm:$0xf0]  ;;  %v14987_v29 = vld [vmem:[#allocation2 + $0x75c] sm:$0xf] }
 0x1d3   :  { %4416 = vmatpush.bf16.msrb.mxu0 %v11949_v28  ;;  %v11901_v28 = vor.u32 %v14960_v50, %v11900_v63  ;;  %v14948_v63 = vld [vmem:[#allocation2 + $0x61c] sm:$0xf0]  ;;  %v12044_v50 = vld [vmem:[#allocation2 + $0x788] sm:$0xf] }
 0x1d4   :  { %4430 = vmatpush.bf16.msrb.mxu1 %v12141_v10  ;;  %v16575_v10 = vadd.f32 %v2714_v12, %v2701_v21  ;;  %v14891_v21 = vld [vmem:[#allocation2 + $0x45c] sm:$0xf] }
 0x1d5   :  { %4444 = vmatpush.bf16.msrb.mxu2 %v11185_v17  ;;  %v12093_v17 = vor.u32 %v15008_v7, %v12092_v56  ;;  %v14996_v56 = vld [vmem:[#allocation2 + $0x79c] sm:$0xf0]  ;;  %v11305_v7 = vor.u32 %v14807_v5, %v11302_v42  ;;  %v12025_v5 = vor.u32 %v14987_v29, %v12022_v31  ;;  %v14885_v42 = vld [vmem:[#allocation2 + $0x42c] sm:$0xf]  ;;  %v11566_v31 = vld [vmem:[#allocation2 + $0x3e0] sm:$0xf0] }
 0x1d6   :  { %4458 = vmatpush.bf16.msrb.mxu3 %v11377_v37  ;;  %17182 = vst [vmem:[#allocation41_spill] sm:$0xff] %v16575_v10  ;;  %v11329_v37 = vor.u32 %v14813_v4, %v11326_v27  ;;  %v11638_v4 = vld [vmem:[#allocation2 + $0x470] sm:$0xf0]  ;;  %v14939_v27 = vld [vmem:[#allocation2 + $0x5dc] sm:$0xf] }
 0x1d7   :  { %4417 = vmatpush.bf16.msrb.mxu0 %v11925_v40  ;;  %v11852_v40 = vld [vmem:[#allocation2 + $0x608] sm:$0xf]  ;;  %v14933_v10 = vld [vmem:[#allocation2 + $0x5ac] sm:$0xf] }
 0x1d8   :  { %4431 = vmatpush.bf16.msrb.mxu1 %v12117_v47  ;;  %v12069_v47 = vor.u32 %v15002_v43, %v12068_v30  ;;  %v11853_v12 = vor.u32 %v14948_v63, %v11852_v40  ;;  %v15035_v30 = vld [vmem:[#allocation2 + $0x8dc] sm:$0xf]  ;;  %v12214_v43 = vld [vmem:[#allocation2 + $0x8f0] sm:$0xf0]  ;;  %v11806_v40 = vld [vmem:[#allocation2 + $0x5c0] sm:$0xf0] }
 0x1d9   :  { %4445 = vmatpush.bf16.msrb.mxu2 %v11161_v61  ;;  %v11113_v61 = vor.u32 %v14759_v44, %v11110_v46  ;;  %v11641_v44 = vor.u32 %v14891_v21, %v11638_v4  ;;  %v14981_v63 = vld [vmem:[#allocation2 + $0x72c] sm:$0xf]  ;;  %v11782_v21 = vld [vmem:[#allocation2 + $0x590] sm:$0xf0]  ;;  %v14975_v4 = vld [vmem:[#allocation2 + $0x6fc] sm:$0xf] }
 0x1da   :  { %4459 = vmatpush.bf16.msrb.mxu3 %v11353_v1  ;;  %v11086_v1 = vld [vmem:[#allocation2 + $0x20] sm:$0xf0]  ;;  %v14873_v29 = vld [vmem:[#allocation2 + $0x3cc] sm:$0xf] }
 0x1db   :  { %4418 = vmatpush.bf16.msrb.mxu0 %v11901_v28  ;;  %v11830_v28 = vld [vmem:[#allocation2 + $0x5f0] sm:$0xf0] }
 0x1dc   :  { %4432 = vmatpush.bf16.msrb.mxu1 %v12093_v17  ;;  %v12045_v17 = vor.u32 %v14996_v56, %v12044_v50  ;;  %v11833_v46 = vor.u32 %v14939_v27, %v11830_v28  ;;  %v11617_v50 = vor.u32 %v14885_v42, %v11614_v20  ;;  %v11809_v56 = vor.u32 %v14933_v10, %v11806_v40  ;;  %v11974_v27 = vld [vmem:[#allocation2 + $0x710] sm:$0xf0]  ;;  %v14867_v40 = vld [vmem:[#allocation2 + $0x39c] sm:$0xf] }
 0x1dd   :  { %4446 = vmatpush.bf16.msrb.mxu2 %v11137_v54  ;;  %v11089_v54 = vor.u32 %v14753_v8, %v11086_v1  ;;  %v12001_v8 = vor.u32 %v14981_v63, %v11998_v62  ;;  %v11590_v1 = vld [vmem:[#allocation2 + $0x410] sm:$0xf0]  ;;  %v11977_v28 = vor.u32 %v14975_v4, %v11974_v27  ;;  %v14861_v4 = vld [vmem:[#allocation2 + $0x36c] sm:$0xf]  ;;  %v11518_v27 = vld [vmem:[#allocation2 + $0x380] sm:$0xf0] }
 0x1de   :  { %4460 = vmatpush.bf16.msrb.mxu3 %v11329_v37  ;;  %v11281_v37 = vor.u32 %v14801_v9, %v11278_v6  ;;  %v14927_v9 = vld [vmem:[#allocation2 + $0x57c] sm:$0xf]  ;;  %v12166_v20 = vld [vmem:[#allocation2 + $0x890] sm:$0xf0] }
 0x1df   :  { %4419 = vmatpush.bf16.msrb.mxu0 %v11877_v53  ;;  %v12217_v53 = vor.u32 %v15035_v30, %v12214_v43  ;;  %v11785_v10 = vor.u32 %v14927_v9, %v11782_v21  ;;  %v11758_v30 = vld [vmem:[#allocation2 + $0x560] sm:$0xf0]  ;;  %v14969_v43 = vld [vmem:[#allocation2 + $0x6cc] sm:$0xf]  ;;  %v11542_v63 = vld [vmem:[#allocation2 + $0x3b0] sm:$0xf0] }
 0x1e0   :  { %4433 = vmatpush.bf16.msrb.mxu1 %v12069_v47  ;;  %v15029_v47 = vld [vmem:[#allocation2 + $0x8ac] sm:$0xf]  ;;  %v11545_v9 = vor.u32 %v14867_v40, %v11542_v63  ;;  %v14999_v40 = vld [vmem:[#allocation2 + $0x7bc] sm:$0xf]  ;;  %v12070_v63 = vld [vmem:[#allocation2 + $0x7d0] sm:$0xf0] }
 0x1e1   :  { %4447 = vmatpush.bf16.msrb.mxu2 %v11113_v61  ;;  %v12190_v61 = vld [vmem:[#allocation2 + $0x8c0] sm:$0xf0] }
 0x1e2   :  { %4461 = vmatpush.bf16.msrb.mxu3 %v11305_v7  ;;  %v14879_v7 = vld [vmem:[#allocation2 + $0x3fc] sm:$0xf]  ;;  %v12193_v6 = vor.u32 %v15029_v47, %v12190_v61 }
 0x1e3   :  { %4420 = vmatpush.bf16.msrb.mxu0 %v11853_v12  ;;  %v15023_v12 = vld [vmem:[#allocation2 + $0x87c] sm:$0xf]  ;;  %v11593_v62 = vor.u32 %v14879_v7, %v11590_v1  ;;  %v12118_v1 = vld [vmem:[#allocation2 + $0x830] sm:$0xf0] }
 0x1e4   :  { %4434 = vmatpush.bf16.msrb.mxu1 %v12045_v17  ;;  %v14921_v17 = vld [vmem:[#allocation2 + $0x54c] sm:$0xf]  ;;  %v14915_v47 = vld [vmem:[#allocation2 + $0x51c] sm:$0xf] }
 0x1e5   :  { %4448 = vmatpush.bf16.msrb.mxu2 %v11089_v54  ;;  %v12169_v54 = vor.u32 %v15023_v12, %v12166_v20  ;;  %v11761_v42 = vor.u32 %v14921_v17, %v11758_v30  ;;  %v15011_v7 = vld [vmem:[#allocation2 + $0x81c] sm:$0xf]  ;;  %v14909_v12 = vld [vmem:[#allocation2 + $0x4ec] sm:$0xf]  ;;  %v11521_v17 = vor.u32 %v14861_v4, %v11518_v27  ;;  %v12046_v27 = vld [vmem:[#allocation2 + $0x7a0] sm:$0xf0] }
 0x1e6   :  { %4462 = vmatpush.bf16.msrb.mxu3 %v11281_v37  ;;  %4421 = vmatmul.bf16.vlgmr.msrb.gmra.mxu0 %v16527_v0  ;;  %v11950_v37 = vld [vmem:[#allocation2 + $0x6e0] sm:$0xf0]  ;;  %v12121_v20 = vor.u32 %v15011_v7, %v12118_v1  ;;  %v14897_v7 = vld [vmem:[#allocation2 + $0x48c] sm:$0xf] }
 0x1e7   :  { %4469 = vmatpush.bf16.msra.mxu0 %v11641_v44  ;;  %4435 = vmatmul.bf16.vlgmr.msrb.gmra.mxu1 %v16529_v16  ;;  %v15017_v44 = vld [vmem:[#allocation2 + $0x84c] sm:$0xf]  ;;  %v11662_v1 = vld [vmem:[#allocation2 + $0x4a0] sm:$0xf0] }
 0x1e8   :  { %4483 = vmatpush.bf16.msra.mxu1 %v11833_v46  ;;  %4449 = vmatmul.bf16.vlgmr.msrb.gmra.mxu2 %v16492_v11  ;;  %v12142_v46 = vld [vmem:[#allocation2 + $0x860] sm:$0xf0]  ;;  %v14993_v4 = vld [vmem:[#allocation2 + $0x78c] sm:$0xf] }
 0x1e9   :  { %4497 = vmatpush.bf16.msra.mxu2 %v12025_v5  ;;  %4463 = vmatmul.bf16.vlgmr.msrb.gmra.mxu3 %v16498_v23  ;;  %v11569_v5 = vor.u32 %v14873_v29, %v11566_v31  ;;  %v12145_v61 = vor.u32 %v15017_v44, %v12142_v46  ;;  %v15005_v29 = vld [vmem:[#allocation2 + $0x7ec] sm:$0xf]  ;;  %v12094_v31 = vld [vmem:[#allocation2 + $0x800] sm:$0xf0]  ;;  %v14903_v44 = vld [vmem:[#allocation2 + $0x4bc] sm:$0xf] }
 0x1ea   :  { %4511 = vmatpush.bf16.msra.mxu3 %v12217_v53  ;;  %v11953_v53 = vor.u32 %v14969_v43, %v11950_v37  ;;  %v14855_v43 = vld [vmem:[#allocation2 + $0x33c] sm:$0xf]  ;;  %v11494_v37 = vld [vmem:[#allocation2 + $0x350] sm:$0xf0]  ;;  %v12097_v46 = vor.u32 %v15005_v29, %v12094_v31  ;;  %v14847_v29 = vld [vmem:[#allocation2 + $0x2f4] sm:$0xf0] }
 0x1eb   :  { %4470 = vmatpush.bf16.msra.mxu0 %v11617_v50  ;;  %v11734_v50 = vld [vmem:[#allocation2 + $0x530] sm:$0xf0]  ;;  %v11644_v31 = vld [vmem:[#allocation2 + $0x460] sm:$0xf] }
 0x1ec   :  { %4484 = vmatpush.bf16.msra.mxu1 %v11809_v56  ;;  %v14963_v56 = vld [vmem:[#allocation2 + $0x69c] sm:$0xf] }
 0x1ed   :  { %4498 = vmatpush.bf16.msra.mxu2 %v12001_v8  ;;  %v11926_v8 = vld [vmem:[#allocation2 + $0x6b0] sm:$0xf0] }
 0x1ee   :  { %4512 = vmatpush.bf16.msra.mxu3 %v12193_v6  ;;  %v11737_v6 = vor.u32 %v14915_v47, %v11734_v50  ;;  %v11929_v21 = vor.u32 %v14963_v56, %v11926_v8  ;;  %v11497_v47 = vor.u32 %v14855_v43, %v11494_v37  ;;  %v11470_v50 = vld [vmem:[#allocation2 + $0x320] sm:$0xf0]  ;;  %v11836_v43 = vld [vmem:[#allocation2 + $0x5e0] sm:$0xf]  ;;  %v14943_v37 = vld [vmem:[#allocation2 + $0x5f4] sm:$0xf0] }
 0x1ef   :  { %4471 = vmatpush.bf16.msra.mxu0 %v11593_v62  ;;  %v11710_v62 = vld [vmem:[#allocation2 + $0x500] sm:$0xf0] }
 0x1f0   :  { %4485 = vmatpush.bf16.msra.mxu1 %v11785_v10  ;;  %v14957_v10 = vld [vmem:[#allocation2 + $0x66c] sm:$0xf] }
 0x1f1   :  { %4499 = vmatpush.bf16.msra.mxu2 %v11977_v28  ;;  %v11902_v28 = vld [vmem:[#allocation2 + $0x680] sm:$0xf0] }
 0x1f2   :  { %4513 = vmatpush.bf16.msra.mxu3 %v12169_v54  ;;  %v11713_v54 = vor.u32 %v14909_v12, %v11710_v62  ;;  %v11905_v30 = vor.u32 %v14957_v10, %v11902_v28  ;;  %v16581_v12 = vpop.f32.mrf.mxu0  ;;  %v14799_v62 = vld [vmem:[#allocation2 + $0x174] sm:$0xf0]  ;;  %v11452_v10 = vld [vmem:[#allocation2 + $0x2e0] sm:$0xf] }
 0x1f3   :  { %4472 = vmatpush.bf16.msra.mxu0 %v11569_v5  ;;  %v11686_v5 = vld [vmem:[#allocation2 + $0x4d0] sm:$0xf0]  ;;  %17183 = vst [vmem:[#allocation42_spill] sm:$0xff] %v16581_v12  ;;  %v11620_v12 = vld [vmem:[#allocation2 + $0x430] sm:$0xf] }
 0x1f4   :  { %4486 = vmatpush.bf16.msra.mxu1 %v11761_v42  ;;  %v14951_v42 = vld [vmem:[#allocation2 + $0x63c] sm:$0xf]  ;;  %v11689_v56 = vor.u32 %v14903_v44, %v11686_v5  ;;  %v16583_v44 = vpop.f32.mrf.mxu1 }
 0x1f5   :  { %4500 = vmatpush.bf16.msra.mxu2 %v11953_v53  ;;  %v11878_v53 = vld [vmem:[#allocation2 + $0x650] sm:$0xf0]  ;;  %17184 = vst [vmem:[#allocation43_spill] sm:$0xff] %v16583_v44  ;;  %v14913_v44 = vld [vmem:[#allocation2 + $0x504] sm:$0xf0] }
 0x1f6   :  { %4514 = vmatpush.bf16.msra.mxu3 %v12145_v61  ;;  %v14849_v61 = vld [vmem:[#allocation2 + $0x30c] sm:$0xf]  ;;  %v11881_v8 = vor.u32 %v14951_v42, %v11878_v53  ;;  %v11453_v42 = vor.u32 %v14847_v29, %v11452_v10  ;;  %v11404_v10 = vld [vmem:[#allocation2 + $0x280] sm:$0xf]  ;;  %v14835_v29 = vld [vmem:[#allocation2 + $0x294] sm:$0xf0] }
 0x1f7   :  { %4473 = vmatpush.bf16.msra.mxu0 %v11545_v9  ;;  %v14945_v9 = vld [vmem:[#allocation2 + $0x60c] sm:$0xf]  ;;  %v11473_v28 = vor.u32 %v14849_v61, %v11470_v50  ;;  %v11837_v61 = vor.u32 %v14943_v37, %v11836_v43  ;;  %v14841_v50 = vld [vmem:[#allocation2 + $0x2c4] sm:$0xf0]  ;;  %v11405_v37 = vor.u32 %v14835_v29, %v11404_v10  ;;  %v11356_v10 = vld [vmem:[#allocation2 + $0x220] sm:$0xf] }
 0x1f8   :  { %4487 = vmatpush.bf16.msra.mxu1 %v11737_v6  ;;  %v12073_v6 = vor.u32 %v14999_v40, %v12070_v63  ;;  %v11236_v40 = vld [vmem:[#allocation2 + $0x130] sm:$0xf]  ;;  %v14793_v63 = vld [vmem:[#allocation2 + $0x144] sm:$0xf0]  ;;  %v14823_v29 = vld [vmem:[#allocation2 + $0x234] sm:$0xf0] }
 0x1f9   :  { %4501 = vmatpush.bf16.msra.mxu2 %v11929_v21  ;;  %v11854_v21 = vld [vmem:[#allocation2 + $0x620] sm:$0xf0] }
 0x1fa   :  { %4515 = vmatpush.bf16.msra.mxu3 %v12121_v20  ;;  %v11260_v20 = vld [vmem:[#allocation2 + $0x160] sm:$0xf] }
 0x1fb   :  { %4474 = vmatpush.bf16.msra.mxu0 %v11521_v17  ;;  %v14895_v17 = vld [vmem:[#allocation2 + $0x474] sm:$0xf0]  ;;  %v11261_v5 = vor.u32 %v14799_v62, %v11260_v20  ;;  %v11212_v20 = vld [vmem:[#allocation2 + $0x100] sm:$0xf] }
 0x1fc   :  { %4488 = vmatpush.bf16.msra.mxu1 %v11713_v54  ;;  %v11665_v54 = vor.u32 %v14897_v7, %v11662_v1  ;;  %v11645_v53 = vor.u32 %v14895_v17, %v11644_v31  ;;  %v14937_v7 = vld [vmem:[#allocation2 + $0x5c4] sm:$0xf0]  ;;  %v16585_v1 = vpop.f32.mrf.mxu2  ;;  %v14787_v62 = vld [vmem:[#allocation2 + $0x114] sm:$0xf0]  ;;  %v11596_v31 = vld [vmem:[#allocation2 + $0x400] sm:$0xf]  ;;  %v16594_v43 = vpop.f32.mrf.mxu1 }
 0x1fd   :  { %4502 = vmatpush.bf16.msra.mxu2 %v11905_v30  ;;  %v11857_v30 = vor.u32 %v14945_v9, %v11854_v21  ;;  %17185 = vst [vmem:[#allocation44_spill] sm:$0xff] %v16585_v1  ;;  %v11237_v9 = vor.u32 %v14793_v63, %v11236_v40  ;;  %v16589_v21 = vpop.f32.mrf.mxu0  ;;  %v14883_v17 = vld [vmem:[#allocation2 + $0x414] sm:$0xf0]  ;;  %v14829_v63 = vld [vmem:[#allocation2 + $0x264] sm:$0xf0] }
 0x1fe   :  { %4516 = vmatpush.bf16.msra.mxu3 %v12097_v46  ;;  %v12049_v46 = vor.u32 %v14993_v4, %v12046_v27  ;;  %v11716_v1 = vld [vmem:[#allocation2 + $0x4f0] sm:$0xf] }
 0x1ff   :  { %4475 = vmatpush.bf16.msra.mxu0 %v11497_v47  ;;  %v11428_v47 = vld [vmem:[#allocation2 + $0x2b0] sm:$0xf] }
 0x200   :  { %4489 = vmatpush.bf16.msra.mxu1 %v11689_v56  ;;  %v14889_v56 = vld [vmem:[#allocation2 + $0x444] sm:$0xf0]  ;;  %v11429_v4 = vor.u32 %v14841_v50, %v11428_v47  ;;  %v11572_v47 = vld [vmem:[#allocation2 + $0x3d0] sm:$0xf] }
 0x201   :  { %4503 = vmatpush.bf16.msra.mxu2 %v11881_v8  ;;  %v11812_v8 = vld [vmem:[#allocation2 + $0x5b0] sm:$0xf]  ;;  %v11621_v27 = vor.u32 %v14889_v56, %v11620_v12  ;;  %v11213_v12 = vor.u32 %v14787_v62, %v11212_v20  ;;  %v14925_v56 = vld [vmem:[#allocation2 + $0x564] sm:$0xf0]  ;;  %v11164_v20 = vld [vmem:[#allocation2 + $0xa0] sm:$0xf] }
 0x202   :  { %4517 = vmatpush.bf16.msra.mxu3 %v12073_v6  ;;  %v16587_v6 = vpop.f32.mrf.mxu3  ;;  %v11764_v50 = vld [vmem:[#allocation2 + $0x550] sm:$0xf]  ;;  %v14775_v62 = vld [vmem:[#allocation2 + $0xb4] sm:$0xf0] }
 0x203   :  { %4476 = vmatpush.bf16.msra.mxu0 %v11473_v28  ;;  %17186 = vst [vmem:[#allocation45_spill] sm:$0xff] %v16587_v6  ;;  %v11813_v28 = vor.u32 %v14937_v7, %v11812_v8  ;;  %v14919_v6 = vld [vmem:[#allocation2 + $0x534] sm:$0xf0] }
 0x204   :  { %4490 = vmatpush.bf16.msra.mxu1 %v11665_v54  ;;  %v11788_v54 = vld [vmem:[#allocation2 + $0x580] sm:$0xf]  ;;  %v16597_v8 = vpop.f32.mrf.mxu2 }
 0x205   :  { %4504 = vmatpush.bf16.msra.mxu2 %v11857_v30  ;;  %v14931_v30 = vld [vmem:[#allocation2 + $0x594] sm:$0xf0] }
 0x206   :  { %4518 = vmatpush.bf16.msra.mxu3 %v12049_v46  ;;  %4477 = vmatmul.bf16.vlgmr.msra.gmra.mxu0 %v16496_v35  ;;  %v11597_v46 = vor.u32 %v14883_v17, %v11596_v31  ;;  %v11789_v40 = vor.u32 %v14931_v30, %v11788_v54  ;;  %v11548_v31 = vld [vmem:[#allocation2 + $0x3a0] sm:$0xf]  ;;  %v14871_v17 = vld [vmem:[#allocation2 + $0x3b4] sm:$0xf0]  ;;  %v16601_v54 = vpop.f32.mrf.mxu0 }
 0x207   :  { %4525 = vmatpush.bf16.msrb.mxu0 %v11261_v5  ;;  %4491 = vmatmul.bf16.vlgmr.msra.gmra.mxu1 %v16500_v18  ;;  %v11188_v5 = vld [vmem:[#allocation2 + $0xd0] sm:$0xf]  ;;  %v11740_v30 = vld [vmem:[#allocation2 + $0x520] sm:$0xf] }
 0x208   :  { %4539 = vmatpush.bf16.msrb.mxu1 %v11453_v42  ;;  %4505 = vmatmul.bf16.vlgmr.msra.gmra.mxu2 %v16527_v0  ;;  %v14781_v42 = vld [vmem:[#allocation2 + $0xe4] sm:$0xf0] }
 0x209   :  { %4553 = vmatpush.bf16.msrb.mxu2 %v11645_v53  ;;  %4519 = vmatmul.bf16.vlgmr.msra.gmra.mxu3 %v16529_v16  ;;  %v11380_v53 = vld [vmem:[#allocation2 + $0x250] sm:$0xf]  ;;  %v11189_v7 = vor.u32 %v14781_v42, %v11188_v5  ;;  %v11165_v5 = vor.u32 %v14775_v62, %v11164_v20  ;;  %v11116_v20 = vld [vmem:[#allocation2 + $0x40] sm:$0xf]  ;;  %v14763_v62 = vld [vmem:[#allocation2 + $0x54] sm:$0xf0] }
 0x20a   :  { %4567 = vmatpush.bf16.msrb.mxu3 %v11837_v61  ;;  %v14877_v61 = vld [vmem:[#allocation2 + $0x3e4] sm:$0xf0]  ;;  %v11140_v42 = vld [vmem:[#allocation2 + $0x70] sm:$0xf] }
 0x20b   :  { %4526 = vmatpush.bf16.msrb.mxu0 %v11237_v9  ;;  %v16599_v9 = vpop.f32.mrf.mxu3 }
 0x20c   :  { %4540 = vmatpush.bf16.msrb.mxu1 %v11429_v4  ;;  %v11381_v4 = vor.u32 %v14829_v63, %v11380_v53  ;;  %v14769_v53 = vld [vmem:[#allocation2 + $0x84] sm:$0xf0]  ;;  %v11332_v63 = vld [vmem:[#allocation2 + $0x1f0] sm:$0xf] }
 0x20d   :  { %4554 = vmatpush.bf16.msrb.mxu2 %v11621_v27  ;;  %v11573_v27 = vor.u32 %v14877_v61, %v11572_v47  ;;  %v11741_v47 = vor.u32 %v14919_v6, %v11740_v30  ;;  %v14817_v61 = vld [vmem:[#allocation2 + $0x204] sm:$0xf0]  ;;  %v11500_v6 = vld [vmem:[#allocation2 + $0x340] sm:$0xf] }
 0x20e   :  { %4568 = vmatpush.bf16.msrb.mxu3 %v11813_v28  ;;  %v11765_v28 = vor.u32 %v14925_v56, %v11764_v50  ;;  %v11524_v50 = vld [vmem:[#allocation2 + $0x370] sm:$0xf]  ;;  %v14865_v56 = vld [vmem:[#allocation2 + $0x384] sm:$0xf0] }
 0x20f   :  { %4527 = vmatpush.bf16.msrb.mxu0 %v11213_v12  ;;  %v4699_v12 = vld [vmem:[#allocation6] sm:$0x3f] }
 0x210   :  { %4541 = vmatpush.bf16.msrb.mxu1 %v11405_v37  ;;  %4701 = vst [vmem:[#allocation1] ss:$9 sm:$0xff] %v4699_v12  ;;  %v11357_v37 = vor.u32 %v14823_v29, %v11356_v10  ;;  %v11308_v10 = vld [vmem:[#allocation2 + $0x1c0] sm:$0xf]  ;;  %v16605_v29 = vpop.f32.mrf.mxu2  ;;  %v16609_v12 = vpop.f32.mrf.mxu0 }
 0x211   :  { %4555 = vmatpush.bf16.msrb.mxu2 %v11597_v46  ;;  %v11549_v46 = vor.u32 %v14871_v17, %v11548_v31  ;;  %v11717_v31 = vor.u32 %v14913_v44, %v11716_v1  ;;  %v14859_v17 = vld [vmem:[#allocation2 + $0x354] sm:$0xf0]  ;;  %v11476_v44 = vld [vmem:[#allocation2 + $0x310] sm:$0xf] }
 0x212   :  { %4569 = vmatpush.bf16.msrb.mxu3 %v11789_v40  ;;  %v16603_v40 = vpop.f32.mrf.mxu1 }
 0x213   :  { %4528 = vmatpush.bf16.msrb.mxu0 %v11189_v7  ;;  %v11141_v7 = vor.u32 %v14769_v53, %v11140_v42  ;;  %v16607_v30 = vpop.f32.mrf.mxu3  ;;  %v14907_v42 = vld [vmem:[#allocation2 + $0x4d4] sm:$0xf0]  ;;  %v14757_v53 = vld [vmem:[#allocation2 + $0x24] sm:$0xf0] }
 0x214   :  { %4542 = vmatpush.bf16.msrb.mxu1 %v11381_v4  ;;  %v11333_v4 = vor.u32 %v14817_v61, %v11332_v63  ;;  %v11501_v61 = vor.u32 %v14859_v17, %v11500_v6  ;;  %v14844_v6 = vld [vmem:[#allocation2 + $0x2e4] sm:$0xf]  ;;  %v11454_v17 = vld [vmem:[#allocation2 + $0x2f8] sm:$0xf0] }
 0x215   :  { %4556 = vmatpush.bf16.msrb.mxu2 %v11573_v27  ;;  %v11525_v27 = vor.u32 %v14865_v56, %v11524_v50  ;;  %v11284_v50 = vld [vmem:[#allocation2 + $0x190] sm:$0xf] }
 0x216   :  { %4570 = vmatpush.bf16.msrb.mxu3 %v11765_v28  ;;  %v14811_v28 = vld [vmem:[#allocation2 + $0x1d4] sm:$0xf0] }
 0x217   :  { %4529 = vmatpush.bf16.msrb.mxu0 %v11165_v5  ;;  %v11692_v5 = vld [vmem:[#allocation2 + $0x4c0] sm:$0xf]  ;;  %v11309_v63 = vor.u32 %v14811_v28, %v11308_v10  ;;  %v11477_v28 = vor.u32 %v14853_v58, %v11476_v44  ;;  %v14838_v58 = vld [vmem:[#allocation2 + $0x2b4] sm:$0xf]  ;;  %v14979_v44 = vld [vmem:[#allocation2 + $0x714] sm:$0xf0] }
 0x218   :  { %4543 = vmatpush.bf16.msrb.mxu1 %v11357_v37  ;;  %v11117_v37 = vor.u32 %v14763_v62, %v11116_v20  ;;  %v11693_v56 = vor.u32 %v14907_v42, %v11692_v5  ;;  %v15039_v62 = vld [vmem:[#allocation2 + $0x8f4] sm:$0xf0]  ;;  %v4282_v36 = vpop.f32.mrf.mxu2  ;;  %v12029_v5 = vor.u32 %v14991_v13, %v12028_v25  ;;  %v4199_v13 = vadd.f32 %v16589_v21, %v16418_v3 }
 0x219   :  { %4557 = vmatpush.bf16.msrb.mxu2 %v11549_v46  ;;  %v11092_v46 = vld [vmem:[#allocation2 + $0x10] sm:$0xf]  ;;  %v4283_v3 = vadd.f32 %v4282_v36, %v16435_v33 }
 0x21a   :  { %4571 = vmatpush.bf16.msrb.mxu3 %v11741_v47  ;;  %v14805_v47 = vld [vmem:[#allocation2 + $0x1a4] sm:$0xf0]  ;;  %v16611_v1 = vpop.f32.mrf.mxu1  ;;  %v11093_v20 = vor.u32 %v14757_v53, %v11092_v46  ;;  %v11457_v46 = vor.u32 %v14844_v6, %v11454_v17  ;;  %v12148_v6 = vld [vmem:[#allocation2 + $0x850] sm:$0xf] }
 0x21b   :  { %4530 = vmatpush.bf16.msrb.mxu0 %v11141_v7  ;;  %v12220_v7 = vld [vmem:[#allocation2 + $0x8e0] sm:$0xf]  ;;  %v11285_v10 = vor.u32 %v14805_v47, %v11284_v50  ;;  %v4296_v42 = vpop.f32.mrf.mxu3  ;;  %v15033_v53 = vld [vmem:[#allocation2 + $0x8c4] sm:$0xf0]  ;;  %v11430_v50 = vld [vmem:[#allocation2 + $0x2c8] sm:$0xf0] }
 0x21c   :  { %4544 = vmatpush.bf16.msrb.mxu1 %v11333_v4  ;;  %v14796_v4 = vld [vmem:[#allocation2 + $0x164] sm:$0xf]  ;;  %v12221_v39 = vor.u32 %v15039_v62, %v12220_v7  ;;  %v11980_v47 = vld [vmem:[#allocation2 + $0x700] sm:$0xf]  ;;  %v15027_v62 = vld [vmem:[#allocation2 + $0x894] sm:$0xf0] }
 0x21d   :  { %4558 = vmatpush.bf16.msrb.mxu2 %v11525_v27  ;;  %v11262_v27 = vld [vmem:[#allocation2 + $0x178] sm:$0xf0] }
 0x21e   :  { %4572 = vmatpush.bf16.msrb.mxu3 %v11717_v31  ;;  %v11669_v31 = vor.u32 %v14901_v59, %v11668_v49  ;;  %v11265_v22 = vor.u32 %v14796_v4, %v11262_v27  ;;  %v12005_v59 = vor.u32 %v14985_v45, %v12004_v57  ;;  %v14784_v4 = vld [vmem:[#allocation2 + $0x104] sm:$0xf]  ;;  %v11214_v27 = vld [vmem:[#allocation2 + $0x118] sm:$0xf0]  ;;  %v4213_v45 = vadd.f32 %v16594_v43, %v4199_v13  ;;  %v11190_v43 = vld [vmem:[#allocation2 + $0xe8] sm:$0xf0] }
 0x21f   :  { %4531 = vmatpush.bf16.msrb.mxu0 %v11117_v37  ;;  %v12196_v37 = vld [vmem:[#allocation2 + $0x8b0] sm:$0xf]  ;;  %v11981_v57 = vor.u32 %v14979_v44, %v11980_v47  ;;  %v11217_v21 = vor.u32 %v14784_v4, %v11214_v27  ;;  %v12124_v47 = vld [vmem:[#allocation2 + $0x820] sm:$0xf]  ;;  %v11166_v4 = vld [vmem:[#allocation2 + $0xb8] sm:$0xf0] }
 0x220   :  { %4545 = vmatpush.bf16.msrb.mxu1 %v11309_v63  ;;  %v11238_v63 = vld [vmem:[#allocation2 + $0x148] sm:$0xf0]  ;;  %v12197_v25 = vor.u32 %v15033_v53, %v12196_v37  ;;  %v4227_v33 = vadd.f32 %v16597_v8, %v4213_v45  ;;  %v16626_v36 = vpop.f32.mrf.mxu2  ;;  %v4297_v37 = vadd.f32 %v4296_v42, %v4283_v3  ;;  %v14820_v27 = vld [vmem:[#allocation2 + $0x224] sm:$0xf]  ;;  %v11358_v3 = vld [vmem:[#allocation2 + $0x238] sm:$0xf0] }
 0x221   :  { %4559 = vmatpush.bf16.msrb.mxu2 %v11501_v61  ;;  %v16613_v61 = vpop.f32.mrf.mxu0  ;;  %v11241_v49 = vor.u32 %v14790_v14, %v11238_v63  ;;  %v11406_v14 = vld [vmem:[#allocation2 + $0x298] sm:$0xf0]  ;;  %v14826_v63 = vld [vmem:[#allocation2 + $0x254] sm:$0xf] }
 0x222   :  { %4573 = vmatpush.bf16.msrb.mxu3 %v11693_v56  ;;  %v12172_v56 = vld [vmem:[#allocation2 + $0x880] sm:$0xf]  ;;  %v16617_v7 = vpop.f32.mrf.mxu1  ;;  %v4241_v44 = vadd.f32 %v16599_v9, %v4227_v33  ;;  %v12100_v9 = vld [vmem:[#allocation2 + $0x7f0] sm:$0xf]  ;;  %v15009_v33 = vld [vmem:[#allocation2 + $0x804] sm:$0xf0] }
 0x223   :  { %4532 = vmatpush.bf16.msrb.mxu0 %v11093_v20  ;;  %v11433_v20 = vor.u32 %v14838_v58, %v11430_v50  ;;  %v11382_v58 = vld [vmem:[#allocation2 + $0x268] sm:$0xf0] }
 0x224   :  { %4546 = vmatpush.bf16.msrb.mxu1 %v11285_v10  ;;  %v11956_v10 = vld [vmem:[#allocation2 + $0x6d0] sm:$0xf] }
 0x225   :  { %4560 = vmatpush.bf16.msrb.mxu2 %v11477_v28  ;;  %v14973_v28 = vld [vmem:[#allocation2 + $0x6e4] sm:$0xf0] }
 0x226   :  { %4574 = vmatpush.bf16.msrb.mxu3 %v11669_v31  ;;  %4533 = vmatmul.bf16.vlgmr.msrb.gmra.mxu0 %v16492_v11  ;;  %v15021_v31 = vld [vmem:[#allocation2 + $0x864] sm:$0xf0]  ;;  %v11957_v50 = vor.u32 %v14973_v28, %v11956_v10  ;;  %v11361_v28 = vor.u32 %v14820_v27, %v11358_v3 }
 0x227   :  { %4581 = vmatpush.bf16.msra.mxu0 %v12029_v5  ;;  %4547 = vmatmul.bf16.vlgmr.msrb.gmra.mxu1 %v16498_v23  ;;  %v14778_v5 = vld [vmem:[#allocation2 + $0xd4] sm:$0xf]  ;;  %v14961_v10 = vld [vmem:[#allocation2 + $0x684] sm:$0xf0] }
 0x228   :  { %4595 = vmatpush.bf16.msra.mxu1 %v12221_v39  ;;  %4561 = vmatmul.bf16.vlgmr.msrb.gmra.mxu2 %v16496_v35  ;;  %v14832_v39 = vld [vmem:[#allocation2 + $0x284] sm:$0xf]  ;;  %v11193_v8 = vor.u32 %v14778_v5, %v11190_v43  ;;  %v14949_v27 = vld [vmem:[#allocation2 + $0x624] sm:$0xf0] }
 0x229   :  { %4609 = vmatpush.bf16.msra.mxu2 %v11265_v22  ;;  %4575 = vmatmul.bf16.vlgmr.msrb.gmra.mxu3 %v16500_v18  ;;  %v12173_v22 = vor.u32 %v15027_v62, %v12172_v56  ;;  %v11409_v17 = vor.u32 %v14832_v39, %v11406_v14  ;;  %v4310_v53 = vpop.f32.mrf.mxu0  ;;  %v11385_v56 = vor.u32 %v14826_v63, %v11382_v58  ;;  %v14772_v62 = vld [vmem:[#allocation2 + $0xa4] sm:$0xf] }
 0x22a   :  { %4623 = vmatpush.bf16.msra.mxu3 %v11457_v46  ;;  %v16628_v46 = vpop.f32.mrf.mxu3  ;;  %v4311_v13 = vadd.f32 %v4310_v53, %v4297_v37  ;;  %v4324_v42 = vpop.f32.mrf.mxu1  ;;  %v4255_v39 = vadd.f32 %v16609_v12, %v4241_v44  ;;  %v14814_v37 = vld [vmem:[#allocation2 + $0x1f4] sm:$0xf]  ;;  %v11334_v12 = vld [vmem:[#allocation2 + $0x208] sm:$0xf0]  ;;  %v14760_v44 = vld [vmem:[#allocation2 + $0x44] sm:$0xf] }
 0x22b   :  { %4582 = vmatpush.bf16.msra.mxu0 %v12005_v59  ;;  %v12149_v59 = vor.u32 %v15021_v31, %v12148_v6  ;;  %v4338_v6 = vpop.f32.mrf.mxu2  ;;  %v11142_v31 = vld [vmem:[#allocation2 + $0x88] sm:$0xf0] }
 0x22c   :  { %4596 = vmatpush.bf16.msra.mxu1 %v12197_v25  ;;  %v11932_v25 = vld [vmem:[#allocation2 + $0x6a0] sm:$0xf]  ;;  %v4325_v45 = vadd.f32 %v4324_v42, %v4311_v13  ;;  %v4269_v53 = vadd.f32 %v16611_v1, %v4255_v39 }
 0x22d   :  { %4610 = vmatpush.bf16.msra.mxu2 %v11241_v49  ;;  %v14967_v49 = vld [vmem:[#allocation2 + $0x6b4] sm:$0xf0] }
 0x22e   :  { %4624 = vmatpush.bf16.msra.mxu3 %v11433_v20  ;;  %v15015_v20 = vld [vmem:[#allocation2 + $0x834] sm:$0xf0]  ;;  %v11933_v14 = vor.u32 %v14967_v49, %v11932_v25  ;;  %v4339_v5 = vadd.f32 %v4338_v6, %v4325_v45  ;;  %v12076_v25 = vld [vmem:[#allocation2 + $0x7c0] sm:$0xf]  ;;  %v11337_v49 = vor.u32 %v14814_v37, %v11334_v12  ;;  %v14997_v45 = vld [vmem:[#allocation2 + $0x7a4] sm:$0xf0] }
 0x22f   :  { %4583 = vmatpush.bf16.msra.mxu0 %v11981_v57  ;;  %v12125_v57 = vor.u32 %v15015_v20, %v12124_v47  ;;  %v15003_v47 = vld [vmem:[#allocation2 + $0x7d4] sm:$0xf0]  ;;  %v14808_v20 = vld [vmem:[#allocation2 + $0x1c4] sm:$0xf]  ;;  %v11646_v6 = vld [vmem:[#allocation2 + $0x478] sm:$0xf0] }
 0x230   :  { %4597 = vmatpush.bf16.msra.mxu1 %v12173_v22  ;;  %v11169_v22 = vor.u32 %v14772_v62, %v11166_v4  ;;  %v11310_v62 = vld [vmem:[#allocation2 + $0x1d8] sm:$0xf0]  ;;  %v11860_v4 = vld [vmem:[#allocation2 + $0x610] sm:$0xf]  ;;  %v12077_v3 = vor.u32 %v15003_v47, %v12076_v25  ;;  %v14988_v37 = vld [vmem:[#allocation2 + $0x764] sm:$0xf] }
 0x231   :  { %4611 = vmatpush.bf16.msra.mxu2 %v11217_v21  ;;  %v11908_v21 = vld [vmem:[#allocation2 + $0x670] sm:$0xf]  ;;  %v12030_v12 = vld [vmem:[#allocation2 + $0x778] sm:$0xf0]  ;;  %v14886_v25 = vld [vmem:[#allocation2 + $0x434] sm:$0xf] }
 0x232   :  { %4625 = vmatpush.bf16.msra.mxu3 %v11409_v17  ;;  %v14766_v17 = vld [vmem:[#allocation2 + $0x74] sm:$0xf]  ;;  %v4352_v43 = vpop.f32.mrf.mxu3  ;;  %v11909_v63 = vor.u32 %v14961_v10, %v11908_v21  ;;  %v11094_v21 = vld [vmem:[#allocation2 + $0x28] sm:$0xf0] }
 0x233   :  { %4584 = vmatpush.bf16.msra.mxu0 %v11957_v50  ;;  %v4353_v58 = vadd.f32 %v4352_v43, %v4339_v5  ;;  %v12101_v50 = vor.u32 %v15009_v33, %v12100_v9  ;;  %v11145_v13 = vor.u32 %v14766_v17, %v11142_v31  ;;  %v14802_v10 = vld [vmem:[#allocation2 + $0x194] sm:$0xf]  ;;  %v11286_v9 = vld [vmem:[#allocation2 + $0x1a8] sm:$0xf0]  ;;  %v14940_v33 = vld [vmem:[#allocation2 + $0x5e4] sm:$0xf]  ;;  %v2241_v17 = vadd.f32 %v16407_v26, %v16405_v15 }
 0x234   :  { %4598 = vmatpush.bf16.msra.mxu1 %v12149_v59  ;;  %v11884_v59 = vld [vmem:[#allocation2 + $0x640] sm:$0xf]  ;;  %v2325_v31 = vadd.f32 %v16432_v48, %v16429_v41  ;;  %v11861_v5 = vor.u32 %v14949_v27, %v11860_v4  ;;  %v11838_v43 = vld [vmem:[#allocation2 + $0x5f8] sm:$0xf0]  ;;  %v12033_v26 = vor.u32 %v14988_v37, %v12030_v12  ;;  %v11622_v41 = vld [vmem:[#allocation2 + $0x448] sm:$0xf0] }
 0x235   :  { %4612 = vmatpush.bf16.msra.mxu2 %v11193_v8  ;;  %v14955_v8 = vld [vmem:[#allocation2 + $0x654] sm:$0xf0]  ;;  %v16633_v42 = vpack.c.bf16 %v4353_v58, %v4269_v53  ;;  %v15036_v58 = vld [vmem:[#allocation2 + $0x8e4] sm:$0xf]  ;;  %v11841_v15 = vor.u32 %v14940_v33, %v11838_v43  ;;  %v14934_v48 = vld [vmem:[#allocation2 + $0x5b4] sm:$0xf]  ;;  %v11625_v4 = vor.u32 %v14886_v25, %v11622_v41 }
 0x236   :  { %4626 = vmatpush.bf16.msra.mxu3 %v11385_v56  ;;  %v11118_v56 = vld [vmem:[#allocation2 + $0x58] sm:$0xf0]  ;;  %v11885_v1 = vor.u32 %v14955_v8, %v11884_v59  ;;  %v11289_v59 = vor.u32 %v14802_v10, %v11286_v9  ;;  %v15024_v9 = vld [vmem:[#allocation2 + $0x884] sm:$0xf]  ;;  %v11766_v37 = vld [vmem:[#allocation2 + $0x568] sm:$0xf0] }
 0x237   :  { %4585 = vmatpush.bf16.msra.mxu0 %v11933_v14  ;;  %v11121_v39 = vor.u32 %v14760_v44, %v11118_v56  ;;  %v12052_v14 = vld [vmem:[#allocation2 + $0x790] sm:$0xf]  ;;  %v11814_v44 = vld [vmem:[#allocation2 + $0x5c8] sm:$0xf0]  ;;  %v14982_v56 = vld [vmem:[#allocation2 + $0x734] sm:$0xf] }
 0x238   :  { %4599 = vmatpush.bf16.msra.mxu1 %v12125_v57  ;;  %v14754_v57 = vld [vmem:[#allocation2 + $0x14] sm:$0xf]  ;;  %v12053_v53 = vor.u32 %v14997_v45, %v12052_v14  ;;  %v11817_v27 = vor.u32 %v14934_v48, %v11814_v44  ;;  %v14928_v14 = vld [vmem:[#allocation2 + $0x584] sm:$0xf]  ;;  %v11982_v10 = vld [vmem:[#allocation2 + $0x718] sm:$0xf0] }
 0x239   :  { %4613 = vmatpush.bf16.msra.mxu2 %v11169_v22  ;;  %v11313_v22 = vor.u32 %v14808_v20, %v11310_v62  ;;  %v12006_v20 = vld [vmem:[#allocation2 + $0x748] sm:$0xf0]  ;;  %v15030_v62 = vld [vmem:[#allocation2 + $0x8b4] sm:$0xf]  ;;  %v11742_v41 = vld [vmem:[#allocation2 + $0x538] sm:$0xf0] }
 0x23a   :  { %4627 = vmatpush.bf16.msra.mxu3 %v11361_v28  ;;  %v14892_v28 = vld [vmem:[#allocation2 + $0x464] sm:$0xf]  ;;  %v14970_v12 = vld [vmem:[#allocation2 + $0x6d4] sm:$0xf]  ;;  %v12126_v44 = vld [vmem:[#allocation2 + $0x838] sm:$0xf0] }
 0x23b   :  { %4586 = vmatpush.bf16.msra.mxu0 %v11909_v63  ;;  %v11097_v63 = vor.u32 %v14754_v57, %v11094_v21  ;;  %v11649_v8 = vor.u32 %v14892_v28, %v11646_v6  ;;  %v11790_v21 = vld [vmem:[#allocation2 + $0x598] sm:$0xf0]  ;;  %v14964_v48 = vld [vmem:[#allocation2 + $0x6a4] sm:$0xf] }
 0x23c   :  { %4600 = vmatpush.bf16.msra.mxu1 %v12101_v50  ;;  %v12222_v50 = vld [vmem:[#allocation2 + $0x8f8] sm:$0xf0] }
 0x23d   :  { %4614 = vmatpush.bf16.msra.mxu2 %v11145_v13  ;;  %v2339_v13 = vadd.f32 %v16437_v32, %v2325_v31  ;;  %v12225_v47 = vor.u32 %v15036_v58, %v12222_v50  ;;  %v12174_v28 = vld [vmem:[#allocation2 + $0x898] sm:$0xf0]  ;;  %v11574_v31 = vld [vmem:[#allocation2 + $0x3e8] sm:$0xf0] }
 0x23e   :  { %4628 = vmatpush.bf16.msra.mxu3 %v11337_v49  ;;  %v2255_v49 = vadd.f32 %v16413_v51, %v2241_v17  ;;  %v11598_v51 = vld [vmem:[#allocation2 + $0x418] sm:$0xf0]  ;;  %v14874_v17 = vld [vmem:[#allocation2 + $0x3d4] sm:$0xf] }
 0x23f   :  { %4587 = vmatpush.bf16.msra.mxu0 %v11885_v1  ;;  %v12198_v1 = vld [vmem:[#allocation2 + $0x8c8] sm:$0xf0]  ;;  %v2353_v32 = vadd.f32 %v16439_v34, %v2339_v13  ;;  %v14976_v34 = vld [vmem:[#allocation2 + $0x704] sm:$0xf]  ;;  %v11577_v50 = vor.u32 %v14874_v17, %v11574_v31  ;;  %v11886_v31 = vld [vmem:[#allocation2 + $0x658] sm:$0xf0] }
 0x240   :  { %4601 = vmatpush.bf16.msra.mxu1 %v12077_v3  ;;  %v12009_v3 = vor.u32 %v14982_v56, %v12006_v20  ;;  %v2269_v45 = vadd.f32 %v16415_v55, %v2255_v49  ;;  %v11985_v33 = vor.u32 %v14976_v34, %v11982_v10  ;;  %v11934_v49 = vld [vmem:[#allocation2 + $0x6b8] sm:$0xf0]  ;;  %v4340_v34 = vpop.f32.mrf.mxu2  ;;  %v14952_v17 = vld [vmem:[#allocation2 + $0x644] sm:$0xf] }
 0x241   :  { %4615 = vmatpush.bf16.msra.mxu2 %v11121_v39  ;;  %v14880_v39 = vld [vmem:[#allocation2 + $0x404] sm:$0xf]  ;;  %v2367_v57 = vadd.f32 %v16445_v60, %v2353_v32  ;;  %v11793_v60 = vor.u32 %v14928_v14, %v11790_v21  ;;  %v11526_v32 = vld [vmem:[#allocation2 + $0x388] sm:$0xf0] }
 0x242   :  { %4629 = vmatpush.bf16.msra.mxu3 %v11313_v22  ;;  %v12201_v22 = vor.u32 %v15030_v62, %v12198_v1  ;;  %v2283_v6 = vadd.f32 %v16422_v19, %v2269_v45  ;;  %v11601_v55 = vor.u32 %v14880_v39, %v11598_v51  ;;  %v12150_v19 = vld [vmem:[#allocation2 + $0x868] sm:$0xf0]  ;;  %v11937_v62 = vor.u32 %v14964_v48, %v11934_v49  ;;  %v14862_v1 = vld [vmem:[#allocation2 + $0x374] sm:$0xf]  ;;  %v4326_v45 = vpop.f32.mrf.mxu1 }
 0x243   :  { %4588 = vmatpush.bf16.msra.mxu0 %v11861_v5  ;;  %v14922_v5 = vld [vmem:[#allocation2 + $0x554] sm:$0xf]  ;;  %v2381_v43 = vadd.f32 %v16447_v2, %v2367_v57  ;;  %v14916_v2 = vld [vmem:[#allocation2 + $0x524] sm:$0xf]  ;;  %v11718_v39 = vld [vmem:[#allocation2 + $0x508] sm:$0xf0]  ;;  %v11529_v21 = vor.u32 %v14862_v1, %v11526_v32 }
 0x244   :  { %4602 = vmatpush.bf16.msra.mxu1 %v12053_v53  ;;  %v11958_v53 = vld [vmem:[#allocation2 + $0x6e8] sm:$0xf0]  ;;  %v11769_v13 = vor.u32 %v14922_v5, %v11766_v37  ;;  %v11745_v20 = vor.u32 %v14916_v2, %v11742_v41  ;;  %v14958_v51 = vld [vmem:[#allocation2 + $0x674] sm:$0xf]  ;;  %v15000_v5 = vld [vmem:[#allocation2 + $0x7c4] sm:$0xf] }
 0x245   :  { %4616 = vmatpush.bf16.msra.mxu2 %v11097_v63  ;;  %v15018_v63 = vld [vmem:[#allocation2 + $0x854] sm:$0xf]  ;;  %v4285_v58 = vadd.f32 %v16626_v36, %v2381_v43  ;;  %v11910_v14 = vld [vmem:[#allocation2 + $0x688] sm:$0xf0]  ;;  %v12078_v43 = vld [vmem:[#allocation2 + $0x7d8] sm:$0xf0] }
 0x246   :  { %4630 = vmatpush.bf16.msra.mxu3 %v11289_v59  ;;  %4589 = vmatmul.bf16.vlgmr.msra.gmra.mxu0 %v16527_v0  ;;  %v11961_v59 = vor.u32 %v14970_v12, %v11958_v53  ;;  %v12153_v25 = vor.u32 %v15018_v63, %v12150_v19  ;;  %v15006_v57 = vld [vmem:[#allocation2 + $0x7f4] sm:$0xf]  ;;  %v4703_v37 = vld [vmem:[#allocation1 + $0x9] sm:$0xff]  ;;  %v4354_v19 = vpop.f32.mrf.mxu3  ;;  %v15673_v48 = vld [vmem:[#allocation9 + $0x164] sm:$0xf0] }
 0x247   :  { %4637 = vmatpush.bf16.msrb.mxu0 %v11649_v8  ;;  %4603 = vmatmul.bf16.vlgmr.msra.gmra.mxu1 %v16529_v16  ;;  %v14868_v8 = vld [vmem:[#allocation2 + $0x3a4] sm:$0xf]  ;;  %v4299_v36 = vadd.f32 %v16628_v46, %v4285_v58  ;;  %v12102_v46 = vld [vmem:[#allocation2 + $0x808] sm:$0xf0]  ;;  %v14850_v63 = vld [vmem:[#allocation2 + $0x314] sm:$0xf]  ;;  %v11889_v58 = vor.u32 %v14952_v17, %v11886_v31 }
 0x248   :  { %4651 = vmatpush.bf16.msrb.mxu1 %v11841_v15  ;;  %4617 = vmatmul.bf16.vlgmr.msra.gmra.mxu2 %v16492_v11  ;;  %v12177_v11 = vor.u32 %v15024_v9, %v12174_v28  ;;  %v11550_v15 = vld [vmem:[#allocation2 + $0x3b8] sm:$0xf0]  ;;  %v11913_v9 = vor.u32 %v14958_v51, %v11910_v14  ;;  %v14856_v28 = vld [vmem:[#allocation2 + $0x344] sm:$0xf]  ;;  %v14946_v2 = vld [vmem:[#allocation2 + $0x614] sm:$0xf] }
 0x249   :  { %4665 = vmatpush.bf16.msrb.mxu2 %v12033_v26  ;;  %4631 = vmatmul.bf16.vlgmr.msra.gmra.mxu3 %v16498_v23  ;;  %v2297_v23 = vadd.f32 %v16424_v24, %v2283_v6  ;;  %v15012_v24 = vld [vmem:[#allocation2 + $0x824] sm:$0xf]  ;;  %v11553_v56 = vor.u32 %v14868_v8, %v11550_v15  ;;  %v12081_v15 = vor.u32 %v15000_v5, %v12078_v43  ;;  %v12396_v41 = vld [vmem:[#allocation9 + $0x150] sm:$0xf]  ;;  %v15715_v51 = vld [vmem:[#allocation9 + $0x2b4] sm:$0xf0] }
 0x24a   :  { %4679 = vmatpush.bf16.msrb.mxu3 %v12225_v47  ;;  %v4312_v47 = vpop.f32.mrf.mxu0  ;;  %v14904_v6 = vld [vmem:[#allocation2 + $0x4c4] sm:$0xf]  ;;  %v12397_v32 = vor.u32 %v15673_v48, %v12396_v41  ;;  %v16662_v17 = vpop.f32.mrf.mxu1  ;;  %v15709_v31 = vld [vmem:[#allocation9 + $0x284] sm:$0xf0] }
 0x24b   :  { %4638 = vmatpush.bf16.msrb.mxu0 %v11625_v4  ;;  %v4201_v26 = vadd.f32 %v16601_v54, %v2297_v23  ;;  %v14910_v4 = vld [vmem:[#allocation2 + $0x4f4] sm:$0xf]  ;;  %v12948_v43 = vld [vmem:[#allocation9 + $0x5a0] sm:$0xf] }
 0x24c   :  { %4652 = vmatpush.bf16.msrb.mxu1 %v11817_v27  ;;  %v4313_v27 = vadd.f32 %v4312_v47, %v4299_v36  ;;  %v11721_v10 = vor.u32 %v14910_v4, %v11718_v39  ;;  %v15721_v36 = vld [vmem:[#allocation9 + $0x2e4] sm:$0xf0]  ;;  %v12564_v39 = vld [vmem:[#allocation9 + $0x2a0] sm:$0xf] }
 0x24d   :  { %4666 = vmatpush.bf16.msrb.mxu2 %v12009_v3  ;;  %v4215_v54 = vadd.f32 %v16603_v40, %v4201_v26  ;;  %v12129_v3 = vor.u32 %v15012_v24, %v12126_v44  ;;  %v11502_v40 = vld [vmem:[#allocation2 + $0x358] sm:$0xf0]  ;;  %v14994_v26 = vld [vmem:[#allocation2 + $0x794] sm:$0xf] }
 0x24e   :  { %4680 = vmatpush.bf16.msrb.mxu3 %v12201_v22  ;;  %v11505_v53 = vor.u32 %v14856_v28, %v11502_v40  ;;  %v12588_v44 = vld [vmem:[#allocation9 + $0x2d0] sm:$0xf]  ;;  %v12565_v28 = vor.u32 %v15715_v51, %v12564_v39  ;;  %v16671_v41 = vpop.f32.mrf.mxu3  ;;  %v12276_v51 = vld [vmem:[#allocation9 + $0x60] sm:$0xf] }
 0x24f   :  { %4639 = vmatpush.bf16.msrb.mxu0 %v11601_v55  ;;  %v4229_v22 = vadd.f32 %v16605_v29, %v4215_v54  ;;  %v4327_v55 = vadd.f32 %v4326_v45, %v4313_v27  ;;  %v12589_v4 = vor.u32 %v15721_v36, %v12588_v44  ;;  %v12372_v54 = vld [vmem:[#allocation9 + $0x120] sm:$0xf]  ;;  %v15667_v27 = vld [vmem:[#allocation9 + $0x134] sm:$0xf0]  ;;  %v15805_v44 = vld [vmem:[#allocation9 + $0x584] sm:$0xf0] }
 0x250   :  { %4653 = vmatpush.bf16.msrb.mxu1 %v11793_v60  ;;  %v12105_v60 = vor.u32 %v15006_v57, %v12102_v46  ;;  %v12348_v57 = vld [vmem:[#allocation9 + $0xf0] sm:$0xf]  ;;  %v15661_v46 = vld [vmem:[#allocation9 + $0x104] sm:$0xf0] }
 0x251   :  { %4667 = vmatpush.bf16.msrb.mxu2 %v11985_v33  ;;  %v11694_v33 = vld [vmem:[#allocation2 + $0x4d8] sm:$0xf0]  ;;  %v4243_v29 = vadd.f32 %v16607_v30, %v4229_v22  ;;  %v4341_v12 = vadd.f32 %v4340_v34, %v4327_v55  ;;  %v11862_v30 = vld [vmem:[#allocation2 + $0x628] sm:$0xf0]  ;;  %v12373_v22 = vor.u32 %v15667_v27, %v12372_v54  ;;  %v12756_v55 = vld [vmem:[#allocation9 + $0x420] sm:$0xf] }
 0x252   :  { %4681 = vmatpush.bf16.msrb.mxu3 %v12177_v11  ;;  %v4702_v11 = vld [vmem:[#allocation1] sm:$0xff]  ;;  %v11697_v23 = vor.u32 %v14904_v6, %v11694_v33  ;;  %v15769_v34 = vld [vmem:[#allocation9 + $0x464] sm:$0xf0]  ;;  %v12708_v54 = vld [vmem:[#allocation9 + $0x3c0] sm:$0xf] }
 0x253   :  { %4640 = vmatpush.bf16.msrb.mxu0 %v11577_v50  ;;  %v11478_v50 = vld [vmem:[#allocation2 + $0x328] sm:$0xf0]  ;;  %v4257_v8 = vadd.f32 %v16613_v61, %v4243_v29  ;;  %v4708_v49 = vpack.i.b16 %v4702_v11, %v4702_v11  ;;  %v4355_v47 = vadd.f32 %v4354_v19, %v4341_v12  ;;  %v15811_v29 = vld [vmem:[#allocation9 + $0x5b4] sm:$0xf0] }
 0x254   :  { %4654 = vmatpush.bf16.msrb.mxu1 %v11769_v13  ;;  %v14898_v13 = vld [vmem:[#allocation2 + $0x494] sm:$0xf]  ;;  %v11481_v24 = vor.u32 %v14850_v63, %v11478_v50  ;;  %v15817_v6 = vld [vmem:[#allocation9 + $0x5e4] sm:$0xf0]  ;;  %v12949_v63 = vor.u32 %v15811_v29, %v12948_v43  ;;  %v15751_v27 = vld [vmem:[#allocation9 + $0x3d4] sm:$0xf0] }
 0x255   :  { %4668 = vmatpush.bf16.msrb.mxu2 %v11961_v59  ;;  %v11670_v59 = vld [vmem:[#allocation2 + $0x4a8] sm:$0xf0]  ;;  %v4271_v61 = vadd.f32 %v16617_v7, %v4257_v8  ;;  %v4710_v14 = vperm.slane %v4708_v49, 0  ;;  %v12540_v7 = vld [vmem:[#allocation9 + $0x270] sm:$0xf] }
 0x256   :  { %4682 = vmatpush.bf16.msrb.mxu3 %v12153_v25  ;;  %v12054_v25 = vld [vmem:[#allocation2 + $0x7a8] sm:$0xf0]  ;;  %v12300_v49 = vld [vmem:[#allocation9 + $0x90] sm:$0xf] }
 0x257   :  { %4641 = vmatpush.bf16.msrb.mxu0 %v11553_v56  ;;  %v4711_v56 = vpack.i.b16 %v4703_v37, %v4703_v37  ;;  %v12057_v1 = vor.u32 %v14994_v26, %v12054_v25  ;;  %v4726_v37 = vunpack.c.l.bf16 %v16633_v42  ;;  %v4738_v12 = vunpack.c.l.bf16 %v4710_v14  ;;  %v15757_v26 = vld [vmem:[#allocation9 + $0x404] sm:$0xf0]  ;;  %v12924_v25 = vld [vmem:[#allocation9 + $0x570] sm:$0xf]  ;;  %v15643_v14 = vld [vmem:[#allocation9 + $0x74] sm:$0xf0] }
 0x258   :  { %4655 = vmatpush.bf16.msrb.mxu1 %v11745_v20  ;;  %v11673_v20 = vor.u32 %v14898_v13, %v11670_v59  ;;  %v12516_v13 = vld [vmem:[#allocation9 + $0x240] sm:$0xf]  ;;  %v15703_v59 = vld [vmem:[#allocation9 + $0x254] sm:$0xf0]  ;;  %v15793_v29 = vld [vmem:[#allocation9 + $0x524] sm:$0xf0] }
 0x259   :  { %4669 = vmatpush.bf16.msrb.mxu2 %v11937_v62  ;;  %v11865_v62 = vor.u32 %v14946_v2, %v11862_v30  ;;  %v4713_v45 = vperm.slane %v4711_v56, 0  ;;  %v4744_v8 = vadd.f32 %v4738_v12, %v4726_v37  ;;  %v12732_v30 = vld [vmem:[#allocation9 + $0x3f0] sm:$0xf]  ;;  %v12517_v48 = vor.u32 %v15703_v59, %v12516_v13  ;;  %v15685_v37 = vld [vmem:[#allocation9 + $0x1c4] sm:$0xf0] }
 0x25a   :  { %4683 = vmatpush.bf16.msrb.mxu3 %v12129_v3  ;;  %v4696_v3 = vpack.c.bf16 %v4355_v47, %v4271_v61  ;;  %v15649_v47 = vld [vmem:[#allocation9 + $0xa4] sm:$0xf0]  ;;  %v12492_v56 = vld [vmem:[#allocation9 + $0x210] sm:$0xf]  ;;  %v15631_v13 = vld [vmem:[#allocation9 + $0x14] sm:$0xf0] }
 0x25b   :  { %4642 = vmatpush.bf16.msrb.mxu0 %v11529_v21  ;;  %v12780_v21 = vld [vmem:[#allocation9 + $0x450] sm:$0xf]  ;;  %v4739_v19 = vunpack.c.l.bf16 %v4713_v45  ;;  %v12709_v45 = vor.u32 %v15751_v27, %v12708_v54  ;;  %v17187_v27 = vld [vmem:[#allocation20_spill] sm:$0xff] }
 0x25c   :  { %4656 = vmatpush.bf16.msrb.mxu1 %v11721_v10  ;;  %v12972_v10 = vld [vmem:[#allocation9 + $0x5d0] sm:$0xf]  ;;  %v12781_v40 = vor.u32 %v15769_v34, %v12780_v21  ;;  %v4732_v33 = vunpack.c.l.bf16 %v4696_v3  ;;  %v4733_v11 = vunpack.c.h.bf16 %v4696_v3  ;;  %v12900_v3 = vld [vmem:[#allocation9 + $0x540] sm:$0xf] }
 0x25d   :  { %4670 = vmatpush.bf16.msrb.mxu2 %v11913_v9  ;;  %v16659_v9 = vpop.f32.mrf.mxu0  ;;  %v12973_v5 = vor.u32 %v15817_v6, %v12972_v10  ;;  %v15745_v6 = vld [vmem:[#allocation9 + $0x3a4] sm:$0xf0] }
 0x25e   :  { %4684 = vmatpush.bf16.msrb.mxu3 %v12105_v60  ;;  %v15763_v60 = vld [vmem:[#allocation9 + $0x434] sm:$0xf0]  ;;  %v4750_v50 = vadd.f32 %v4738_v12, %v4732_v33 }
 0x25f   :  { %4643 = vmatpush.bf16.msrb.mxu0 %v11505_v53  ;;  %v12349_v53 = vor.u32 %v15661_v46, %v12348_v57  ;;  %v15799_v57 = vld [vmem:[#allocation9 + $0x554] sm:$0xf0] }
 0x260   :  { %4657 = vmatpush.bf16.msrb.mxu1 %v11697_v23  ;;  %v12324_v23 = vld [vmem:[#allocation9 + $0xc0] sm:$0xf]  ;;  %v4756_v36 = vpack.c.bf16 %v4750_v50, %v4744_v8  ;;  %v12901_v21 = vor.u32 %v15799_v57, %v12900_v3  ;;  %v15787_v8 = vld [vmem:[#allocation9 + $0x4f4] sm:$0xf0] }
 0x261   :  { %4671 = vmatpush.bf16.msrb.mxu2 %v11889_v58  ;;  %v15655_v58 = vld [vmem:[#allocation9 + $0xd4] sm:$0xf0]  ;;  %v12804_v57 = vld [vmem:[#allocation9 + $0x480] sm:$0xf] }
 0x262   :  { %4685 = vmatpush.bf16.msrb.mxu3 %v12081_v15  ;;  %v16669_v15 = vpop.f32.mrf.mxu2  ;;  %v12325_v2 = vor.u32 %v15655_v58, %v12324_v23  ;;  %v4762_v46 = vunpack.c.l.bf16 %v4756_v36  ;;  %v4768_v10 = vunpack.c.h.bf16 %v4756_v36  ;;  %v12660_v23 = vld [vmem:[#allocation9 + $0x360] sm:$0xf]  ;;  %v15739_v58 = vld [vmem:[#allocation9 + $0x374] sm:$0xf0] }
 0x263   :  { %4644 = vmatpush.bf16.msrb.mxu0 %v11481_v24  ;;  %v12733_v24 = vor.u32 %v15757_v26, %v12732_v30  ;;  %v12661_v59 = vor.u32 %v15739_v58, %v12660_v23  ;;  %v15679_v30 = vld [vmem:[#allocation9 + $0x194] sm:$0xf0]  ;;  %v17194_v23 = vld [vmem:[#allocation29_spill] sm:$0xff] }
 0x264   :  { %4658 = vmatpush.bf16.msrb.mxu1 %v11673_v20  ;;  %v15697_v20 = vld [vmem:[#allocation9 + $0x224] sm:$0xf0]  ;;  %15977 = vtanh.f32 %v4762_v46 }
 0x265   :  { %4672 = vmatpush.bf16.msrb.mxu2 %v11865_v62  ;;  %v12925_v62 = vor.u32 %v15805_v44, %v12924_v25  ;;  %v12493_v39 = vor.u32 %v15697_v20, %v12492_v56  ;;  %v2409_v25 = vadd.f32 %v16453_v52, %v16451_v38  ;;  %v15781_v20 = vld [vmem:[#allocation9 + $0x4c4] sm:$0xf0]  ;;  %v17188_v38 = vld [vmem:[#allocation25_spill] sm:$0xff]  ;;  %v17189_v52 = vld [vmem:[#allocation26_spill] sm:$0xff] }
 0x266   :  { %4686 = vmatpush.bf16.msrb.mxu3 %v12057_v1  ;;  %4645 = vmatmul.bf16.vlgmr.msrb.gmra.mxu0 %v16496_v35  ;;  %v12757_v35 = vor.u32 %v15763_v60, %v12756_v55  ;;  %v16673_v1 = vpop.f32.mrf.mxu0  ;;  %v12876_v55 = vld [vmem:[#allocation9 + $0x510] sm:$0xf]  ;;  %v17190_v46 = vld [vmem:[#allocation28_spill] sm:$0xff] }
 0x267   :  { %6814 = vmatpush.bf16.msra.mxu0 %v12397_v32  ;;  %4659 = vmatmul.bf16.vlgmr.msrb.gmra.mxu1 %v16500_v18  ;;  %v4727_v18 = vunpack.c.h.bf16 %v16633_v42  ;;  %v16675_v32 = vpop.f32.mrf.mxu1  ;;  %v12877_v12 = vor.u32 %v15793_v29, %v12876_v55  ;;  %v2423_v3 = vadd.f32 %v17187_v27, %v2409_v25  ;;  %v12542_v27 = vld [vmem:[#allocation9 + $0x288] sm:$0xf0] }
 0x268   :  { %6828 = vmatpush.bf16.msra.mxu1 %v12589_v4  ;;  %4673 = vmatmul.bf16.vlgmr.msrb.gmra.mxu2 %v16527_v0  ;;  %v12541_v0 = vor.u32 %v15709_v31, %v12540_v7  ;;  %v12301_v4 = vor.u32 %v15649_v47, %v12300_v49  ;;  %v15691_v7 = vld [vmem:[#allocation9 + $0x1f4] sm:$0xf0]  ;;  %v12252_v31 = vld [vmem:[#allocation9 + $0x30] sm:$0xf]  ;;  %v15733_v47 = vld [vmem:[#allocation9 + $0x344] sm:$0xf0] }
 0x269   :  { %4687 = vmatmul.bf16.vlgmr.msrb.gmra.mxu3 %v16529_v16  ;;  %6842 = vmatpush.bf16.msra.mxu2 %v12781_v40  ;;  %v4751_v16 = vadd.f32 %v4739_v19, %v4733_v11  ;;  %v4745_v42 = vadd.f32 %v4739_v19, %v4727_v18  ;;  %v12684_v40 = vld [vmem:[#allocation9 + $0x390] sm:$0xf] }
 0x26a   :  { %6856 = vmatpush.bf16.msra.mxu3 %v12973_v5  ;;  %v15637_v5 = vld [vmem:[#allocation9 + $0x44] sm:$0xf0]  ;;  %v12685_v43 = vor.u32 %v15745_v6, %v12684_v40  ;;  %v16677_v11 = vpop.f32.mrf.mxu2  ;;  %v12636_v49 = vld [vmem:[#allocation9 + $0x330] sm:$0xf]  ;;  %v12398_v40 = vld [vmem:[#allocation9 + $0x168] sm:$0xf0] }
 0x26b   :  { %6815 = vmatpush.bf16.msra.mxu0 %v12373_v22  ;;  %v4757_v61 = vpack.c.bf16 %v4751_v16, %v4745_v42  ;;  %v12468_v22 = vld [vmem:[#allocation9 + $0x1e0] sm:$0xf]  ;;  %v12253_v19 = vor.u32 %v15637_v5, %v12252_v31  ;;  %v15978_v42 = vpop.eup %15977  ;;  %v12637_v56 = vor.u32 %v15733_v47, %v12636_v49  ;;  %v15718_v31 = vld [vmem:[#allocation9 + $0x2d4] sm:$0xf]  ;;  %v12590_v5 = vld [vmem:[#allocation9 + $0x2e8] sm:$0xf0] }
 0x26c   :  { %6829 = vmatpush.bf16.msra.mxu1 %v12565_v28  ;;  %v12277_v28 = vor.u32 %v15643_v14, %v12276_v51  ;;  %v12469_v33 = vor.u32 %v15691_v7, %v12468_v22  ;;  %v12852_v16 = vld [vmem:[#allocation9 + $0x4e0] sm:$0xf]  ;;  %v17197_v49 = vld [vmem:[#allocation24_spill] sm:$0xff] }
 0x26d   :  { %6843 = vmatpush.bf16.msra.mxu2 %v12757_v35  ;;  %v4763_v34 = vunpack.c.l.bf16 %v4757_v61  ;;  %v4769_v60 = vunpack.c.h.bf16 %v4757_v61  ;;  %v12444_v35 = vld [vmem:[#allocation9 + $0x1b0] sm:$0xf]  ;;  %v12853_v26 = vor.u32 %v15787_v8, %v12852_v16  ;;  %v12612_v14 = vld [vmem:[#allocation9 + $0x300] sm:$0xf]  ;;  %v12374_v16 = vld [vmem:[#allocation9 + $0x138] sm:$0xf0] }
 0x26e   :  { %6857 = vmatpush.bf16.msra.mxu3 %v12949_v63  ;;  %v16681_v63 = vpop.f32.mrf.mxu0  ;;  %v12445_v50 = vor.u32 %v15685_v37, %v12444_v35  ;;  %v17192_v35 = vld [vmem:[#allocation22_spill] sm:$0xff]  ;;  %v15712_v8 = vld [vmem:[#allocation9 + $0x2a4] sm:$0xf] }
 0x26f   :  { %6816 = vmatpush.bf16.msra.mxu0 %v12349_v53  ;;  %15979 = vtanh.f32 %v4763_v34  ;;  %v16679_v53 = vpop.f32.mrf.mxu3  ;;  %v16683_v18 = vpop.f32.mrf.mxu1  ;;  %v4367_v37 = vadd.f32 %v16659_v9, %v17192_v35  ;;  %v12566_v9 = vld [vmem:[#allocation9 + $0x2b8] sm:$0xf0]  ;;  %v15646_v35 = vld [vmem:[#allocation9 + $0x94] sm:$0xf] }
 0x270   :  { %6830 = vmatpush.bf16.msra.mxu1 %v12541_v0  ;;  %15981 = vtanh.f32 %v4768_v10  ;;  %v12228_v0 = vld [vmem:[#allocation9] sm:$0xf]  ;;  %v15775_v10 = vld [vmem:[#allocation9 + $0x494] sm:$0xf0] }
 0x271   :  { %6844 = vmatpush.bf16.msra.mxu2 %v12733_v24  ;;  %15983 = vtanh.f32 %v4769_v60  ;;  %v12828_v24 = vld [vmem:[#allocation9 + $0x4b0] sm:$0xf]  ;;  %v12805_v60 = vor.u32 %v15775_v10, %v12804_v57  ;;  %v4381_v25 = vadd.f32 %v16662_v17, %v4367_v37  ;;  %v15700_v57 = vld [vmem:[#allocation9 + $0x244] sm:$0xf]  ;;  %v12302_v37 = vld [vmem:[#allocation9 + $0xa8] sm:$0xf0] }
 0x272   :  { %6858 = vmatpush.bf16.msra.mxu3 %v12925_v62  ;;  %v4450_v61 = vpop.f32.mrf.mxu2 }
 0x273   :  { %6817 = vmatpush.bf16.msra.mxu0 %v12325_v2  ;;  %v12420_v2 = vld [vmem:[#allocation9 + $0x180] sm:$0xf] }
 0x274   :  { %6831 = vmatpush.bf16.msra.mxu1 %v12517_v48  ;;  %v12229_v48 = vor.u32 %v15631_v13, %v12228_v0  ;;  %v12421_v36 = vor.u32 %v15679_v30, %v12420_v2  ;;  %v17196_v30 = vld [vmem:[#allocation30_spill] sm:$0xff] }
 0x275   :  { %6845 = vmatpush.bf16.msra.mxu2 %v12709_v45  ;;  %v15980_v44 = vpop.eup %15979  ;;  %v15727_v45 = vld [vmem:[#allocation9 + $0x314] sm:$0xf0] }
 0x276   :  { %6859 = vmatpush.bf16.msra.mxu3 %v12901_v21  ;;  %v15982_v62 = vpop.eup %15981  ;;  %v16691_v7 = vpop.f32.mrf.mxu0  ;;  %v12613_v34 = vor.u32 %v15727_v45, %v12612_v14  ;;  %v12326_v45 = vld [vmem:[#allocation9 + $0xd8] sm:$0xf0] }
 0x277   :  { %6818 = vmatpush.bf16.msra.mxu0 %v12301_v4  ;;  %v12829_v4 = vor.u32 %v15781_v20, %v12828_v24  ;;  %v15984_v54 = vpop.eup %15983  ;;  %v4464_v51 = vpop.f32.mrf.mxu3  ;;  %v16693_v21 = vpack.c.bf16 %v15982_v62, %v15978_v42  ;;  %v12569_v42 = vor.u32 %v15712_v8, %v12566_v9  ;;  %v4395_v24 = vadd.f32 %v16669_v15, %v4381_v25  ;;  %v15658_v20 = vld [vmem:[#allocation9 + $0xf4] sm:$0xf]  ;;  %v12350_v62 = vld [vmem:[#allocation9 + $0x108] sm:$0xf0]  ;;  %v15640_v8 = vld [vmem:[#allocation9 + $0x64] sm:$0xf] }
 0x278   :  { %6832 = vmatpush.bf16.msra.mxu1 %v12493_v39  ;;  %v2493_v39 = vadd.f32 %v17189_v52, %v17188_v38  ;;  %v16695_v6 = vpop.f32.mrf.mxu1  ;;  %v16697_v55 = vpack.c.bf16 %v15984_v54, %v15980_v44  ;;  %v12353_v54 = vor.u32 %v15658_v20, %v12350_v62  ;;  %v15688_v9 = vld [vmem:[#allocation9 + $0x1e4] sm:$0xf]  ;;  %v12446_v62 = vld [vmem:[#allocation9 + $0x1c8] sm:$0xf0] }
 0x279   :  { %6846 = vmatpush.bf16.msra.mxu2 %v12685_v43  ;;  %v17191_v43 = vld [vmem:[#allocation21_spill] sm:$0xff]  ;;  %v4409_v14 = vadd.f32 %v16671_v41, %v4395_v24 }
 0x27a   :  { %6860 = vmatpush.bf16.msra.mxu3 %v12877_v12  ;;  %v2507_v22 = vadd.f32 %v17190_v46, %v2493_v39  ;;  %v2437_v29 = vadd.f32 %v17191_v43, %v2423_v3  ;;  %v12593_v12 = vor.u32 %v15718_v31, %v12590_v5  ;;  %v17198_v3 = vld [vmem:[#allocation31_spill] sm:$0xff] }
 0x27b   :  { %6819 = vmatpush.bf16.msra.mxu0 %v12277_v28  ;;  %v15670_v28 = vld [vmem:[#allocation9 + $0x154] sm:$0xf]  ;;  %v4423_v10 = vadd.f32 %v16681_v63, %v4409_v14 }
 0x27c   :  { %6833 = vmatpush.bf16.msra.mxu1 %v12469_v33  ;;  %v12401_v33 = vor.u32 %v15670_v28, %v12398_v40  ;;  %v2521_v58 = vadd.f32 %v17194_v23, %v2507_v22  ;;  %v12518_v22 = vld [vmem:[#allocation9 + $0x258] sm:$0xf0] }
 0x27d   :  { %6847 = vmatpush.bf16.msra.mxu2 %v12661_v59  ;;  %v15664_v59 = vld [vmem:[#allocation9 + $0x124] sm:$0xf]  ;;  %v12521_v40 = vor.u32 %v15700_v57, %v12518_v22  ;;  %v4437_v63 = vadd.f32 %v16683_v18, %v4423_v10 }
 0x27e   :  { %6861 = vmatpush.bf16.msra.mxu3 %v12853_v26  ;;  %v12377_v2 = vor.u32 %v15664_v59, %v12374_v16  ;;  %v2535_v26 = vadd.f32 %v17196_v30, %v2521_v58 }
 0x27f   :  { %6820 = vmatpush.bf16.msra.mxu0 %v12253_v19  ;;  %v17193_v19 = vld [vmem:[#allocation23_spill] sm:$0xff] }
 0x280   :  { %6834 = vmatpush.bf16.msra.mxu1 %v12445_v50  ;;  %v2451_v0 = vadd.f32 %v17193_v19, %v2437_v29  ;;  %v17195_v50 = vld [vmem:[#allocation27_spill] sm:$0xff]  ;;  %v2549_v38 = vadd.f32 %v17198_v3, %v2535_v26  ;;  %v12305_v19 = vor.u32 %v15646_v35, %v12302_v37  ;;  %v12470_v26 = vld [vmem:[#allocation9 + $0x1f8] sm:$0xf0] }
 0x281   :  { %6848 = vmatpush.bf16.msra.mxu2 %v12637_v56  ;;  %v4451_v13 = vadd.f32 %v4450_v61, %v17195_v50  ;;  %v15706_v61 = vld [vmem:[#allocation9 + $0x274] sm:$0xf]  ;;  %v12473_v18 = vor.u32 %v15688_v9, %v12470_v26  ;;  %v15676_v3 = vld [vmem:[#allocation9 + $0x184] sm:$0xf]  ;;  %v15907_v26 = vld [vmem:[#allocation9 + $0x8b4] sm:$0xf0] }
 0x282   :  { %6862 = vmatpush.bf16.msra.mxu3 %v12829_v4  ;;  %v2465_v47 = vadd.f32 %v17197_v49, %v2451_v0  ;;  %v12545_v39 = vor.u32 %v15706_v61, %v12542_v27  ;;  %v15628_v61 = vld [vmem:[#allocation9 + $0x4] sm:$0xf] }
 0x283   :  { %6821 = vmatpush.bf16.msra.mxu0 %v12229_v48  ;;  %v4452_v48 = vpop.f32.mrf.mxu2  ;;  %v4465_v44 = vadd.f32 %v4464_v51, %v4451_v13  ;;  %v4478_v56 = vpop.f32.mrf.mxu0  ;;  %v15652_v51 = vld [vmem:[#allocation9 + $0xc4] sm:$0xf] }
 0x284   :  { %6835 = vmatpush.bf16.msra.mxu1 %v12421_v36  ;;  %v4466_v36 = vpop.f32.mrf.mxu3  ;;  %v4492_v4 = vpop.f32.mrf.mxu1  ;;  %v4369_v17 = vadd.f32 %v16673_v1, %v2465_v47  ;;  %v4453_v15 = vadd.f32 %v4452_v48, %v2549_v38  ;;  %v12329_v46 = vor.u32 %v15652_v51, %v12326_v45  ;;  %v4704_v1 = vld [vmem:[#allocation1 + $0x12] sm:$0xff]  ;;  %v12422_v38 = vld [vmem:[#allocation9 + $0x198] sm:$0xf0] }
 0x285   :  { %6849 = vmatpush.bf16.msra.mxu2 %v12613_v34  ;;  %v4479_v52 = vadd.f32 %v4478_v56, %v4465_v44  ;;  %v4714_v50 = vpack.i.b16 %v4704_v1, %v4704_v1  ;;  %v15682_v56 = vld [vmem:[#allocation9 + $0x1b4] sm:$0xf]  ;;  %v12425_v45 = vor.u32 %v15676_v3, %v12422_v38  ;;  %v13092_v3 = vld [vmem:[#allocation9 + $0x6c0] sm:$0xf] }
 0x286   :  { %6822 = vmatmul.bf16.vlgmr.msra.gmra.mxu0 %v16693_v21  ;;  %6863 = vmatpush.bf16.msra.mxu3 %v12805_v60  ;;  %v4383_v34 = vadd.f32 %v16675_v32, %v4369_v17  ;;  %v4467_v41 = vadd.f32 %v4466_v36, %v4453_v15  ;;  %v12494_v32 = vld [vmem:[#allocation9 + $0x228] sm:$0xf0] }
 0x287   :  { %6836 = vmatmul.bf16.vlgmr.msra.gmra.mxu1 %v16697_v55  ;;  %v4493_v28 = vadd.f32 %v4492_v4, %v4479_v52  ;;  %v4716_v48 = vperm.slane %v4714_v50, 0  ;;  %v12254_v36 = vld [vmem:[#allocation9 + $0x48] sm:$0xf0]  ;;  %v12230_v4 = vld [vmem:[#allocation9 + $0x18] sm:$0xf0] }
 0x288   :  { %v4397_v31 = vadd.f32 %v16677_v11, %v4383_v34  ;;  %v12233_v51 = vor.u32 %v15628_v61, %v12230_v4  ;;  %v13358_v50 = vld [vmem:[#allocation9 + $0x8e8] sm:$0xf0] }
 0x289   :  { %6898 = vmatpush.bf16.msrb.mxu2 %v12401_v33  ;;  %v4705_v33 = vld [vmem:[#allocation1 + $0x1b] sm:$0xff]  ;;  %v4740_v52 = vunpack.c.l.bf16 %v4716_v48  ;;  %v15904_v48 = vld [vmem:[#allocation9 + $0x8a4] sm:$0xf] }
 0x28a   :  { %6912 = vmatpush.bf16.msrb.mxu3 %v12593_v12  ;;  %v15694_v12 = vld [vmem:[#allocation9 + $0x214] sm:$0xf]  ;;  %v4717_v13 = vpack.i.b16 %v4705_v33, %v4705_v33  ;;  %v4411_v11 = vadd.f32 %v16679_v53, %v4397_v31  ;;  %v13118_v61 = vld [vmem:[#allocation9 + $0x708] sm:$0xf0] }
 0x28b   :  { %v4506_v60 = vpop.f32.mrf.mxu2  ;;  %v4480_v43 = vpop.f32.mrf.mxu0  ;;  %v12497_v58 = vor.u32 %v15694_v12, %v12494_v32  ;;  %v15634_v53 = vld [vmem:[#allocation9 + $0x34] sm:$0xf]  ;;  %v15913_v12 = vld [vmem:[#allocation9 + $0x8e4] sm:$0xf0]  ;;  %v13166_v32 = vld [vmem:[#allocation9 + $0x768] sm:$0xf0] }
 0x28c   :  { %v4507_v5 = vadd.f32 %v4506_v60, %v4493_v28  ;;  %v4520_v29 = vpop.f32.mrf.mxu3  ;;  %v4481_v0 = vadd.f32 %v4480_v43, %v4467_v41  ;;  %v4494_v59 = vpop.f32.mrf.mxu1  ;;  %v4425_v25 = vadd.f32 %v16691_v7, %v4411_v11  ;;  %v4719_v49 = vperm.slane %v4717_v13, 0  ;;  %v15865_v43 = vld [vmem:[#allocation9 + $0x764] sm:$0xf0] }
 0x28d   :  { %6899 = vmatpush.bf16.msrb.mxu2 %v12377_v2  ;;  %v12278_v2 = vld [vmem:[#allocation9 + $0x78] sm:$0xf0]  ;;  %v12257_v20 = vor.u32 %v15634_v53, %v12254_v36  ;;  %v12449_v7 = vor.u32 %v15682_v56, %v12446_v62  ;;  %v15853_v53 = vld [vmem:[#allocation9 + $0x704] sm:$0xf0]  ;;  %v13308_v36 = vld [vmem:[#allocation9 + $0x870] sm:$0xf] }
 0x28e   :  { %6913 = vmatpush.bf16.msrb.mxu3 %v12569_v42  ;;  %v4521_v23 = vadd.f32 %v4520_v29, %v4507_v5  ;;  %v12281_v30 = vor.u32 %v15640_v8, %v12278_v2  ;;  %v4495_v42 = vadd.f32 %v4494_v59, %v4481_v0  ;;  %v13164_v5 = vld [vmem:[#allocation9 + $0x750] sm:$0xf]  ;;  %v15859_v8 = vld [vmem:[#allocation9 + $0x734] sm:$0xf0]  ;;  %v13332_v2 = vld [vmem:[#allocation9 + $0x8a0] sm:$0xf] }
 0x28f   :  { %v13356_v29 = vld [vmem:[#allocation9 + $0x8d0] sm:$0xf]  ;;  %v13165_v37 = vor.u32 %v15865_v43, %v13164_v5  ;;  %v15850_v62 = vld [vmem:[#allocation9 + $0x6f4] sm:$0xf]  ;;  %v13262_v5 = vld [vmem:[#allocation9 + $0x828] sm:$0xf0] }
 0x290   :  { %v4694_v16 = vpack.c.bf16 %v4521_v23, %v4437_v63  ;;  %v13357_v0 = vor.u32 %v15913_v12, %v13356_v29  ;;  %v13044_v12 = vld [vmem:[#allocation9 + $0x660] sm:$0xf] }
 0x291   :  { %6900 = vmatpush.bf16.msrb.mxu2 %v12353_v54  ;;  %v4439_v54 = vadd.f32 %v16695_v6, %v4425_v25  ;;  %6870 = vmatpush.bf16.msrb.mxu0 %v13165_v37  ;;  %v15856_v25 = vld [vmem:[#allocation9 + $0x724] sm:$0xf] }
 0x292   :  { %6914 = vmatpush.bf16.msrb.mxu3 %v12545_v39  ;;  %v4728_v17 = vunpack.c.l.bf16 %v4694_v16  ;;  %v4741_v39 = vunpack.c.l.bf16 %v4719_v49  ;;  %v4729_v14 = vunpack.c.h.bf16 %v4694_v16  ;;  %v13140_v16 = vld [vmem:[#allocation9 + $0x720] sm:$0xf]  ;;  %6884 = vmatpush.bf16.msrb.mxu1 %v13357_v0  ;;  %v13334_v49 = vld [vmem:[#allocation9 + $0x8b8] sm:$0xf0]  ;;  %v15883_v0 = vld [vmem:[#allocation9 + $0x7f4] sm:$0xf0] }
 0x293   :  { %v4508_v47 = vpop.f32.mrf.mxu2 }
 0x294   :  { %v4509_v24 = vadd.f32 %v4508_v47, %v4495_v42  ;;  %v4522_v44 = vpop.f32.mrf.mxu3  ;;  %v4746_v22 = vadd.f32 %v4740_v52, %v4728_v17  ;;  %v4747_v34 = vadd.f32 %v4741_v39, %v4729_v14  ;;  %v13142_v42 = vld [vmem:[#allocation9 + $0x738] sm:$0xf0]  ;;  %v15847_v17 = vld [vmem:[#allocation9 + $0x6d4] sm:$0xf0] }
 0x295   :  { %6901 = vmatpush.bf16.msrb.mxu2 %v12329_v46  ;;  %v13145_v47 = vor.u32 %v15856_v25, %v13142_v42  ;;  %v13093_v14 = vor.u32 %v15847_v17, %v13092_v3  ;;  %v13212_v25 = vld [vmem:[#allocation9 + $0x7b0] sm:$0xf]  ;;  %v12998_v3 = vld [vmem:[#allocation9 + $0x618] sm:$0xf0] }
 0x296   :  { %6915 = vmatpush.bf16.msrb.mxu3 %v12521_v40  ;;  %v4523_v27 = vadd.f32 %v4522_v44, %v4509_v24  ;;  %v13337_v24 = vor.u32 %v15904_v48, %v13334_v49  ;;  %v13116_v44 = vld [vmem:[#allocation9 + $0x6f0] sm:$0xf]  ;;  %v15877_v48 = vld [vmem:[#allocation9 + $0x7c4] sm:$0xf0]  ;;  %v15826_v49 = vld [vmem:[#allocation9 + $0x634] sm:$0xf] }
 0x297   :  { %v13117_v56 = vor.u32 %v15853_v53, %v13116_v44  ;;  %v15874_v53 = vld [vmem:[#allocation9 + $0x7b4] sm:$0xf] }
 0x298   :  { %v4697_v15 = vpack.c.bf16 %v4523_v27, %v4439_v54  ;;  %v13121_v54 = vor.u32 %v15850_v62, %v13118_v61  ;;  %v15898_v27 = vld [vmem:[#allocation9 + $0x874] sm:$0xf]  ;;  %v12996_v62 = vld [vmem:[#allocation9 + $0x600] sm:$0xf]  ;;  %v15823_v61 = vld [vmem:[#allocation9 + $0x614] sm:$0xf0] }
 0x299   :  { %6902 = vmatpush.bf16.msrb.mxu2 %v12305_v19  ;;  %v15862_v19 = vld [vmem:[#allocation9 + $0x754] sm:$0xf] }
 0x29a   :  { %6916 = vmatpush.bf16.msrb.mxu3 %v12497_v58  ;;  %v4734_v57 = vunpack.c.l.bf16 %v4697_v15  ;;  %v4735_v46 = vunpack.c.h.bf16 %v4697_v15  ;;  %v13169_v23 = vor.u32 %v15862_v19, %v13166_v32  ;;  %v15910_v58 = vld [vmem:[#allocation9 + $0x8d4] sm:$0xf]  ;;  %v15835_v19 = vld [vmem:[#allocation9 + $0x674] sm:$0xf0]  ;;  %v13236_v32 = vld [vmem:[#allocation9 + $0x7e0] sm:$0xf] }
 0x29b   :  { %v13361_v11 = vor.u32 %v15910_v58, %v13358_v50  ;;  %v13046_v58 = vld [vmem:[#allocation9 + $0x678] sm:$0xf0]  ;;  %v13237_v50 = vor.u32 %v15883_v0, %v13236_v32  ;;  %v12764_v32 = vld [vmem:[#allocation9 + $0x428] sm:$0xf]  ;;  %v15764_v0 = vld [vmem:[#allocation9 + $0x43c] sm:$0xf0] }
 0x29c   :  { %v4752_v10 = vadd.f32 %v4740_v52, %v4734_v57  ;;  %v4753_v28 = vadd.f32 %v4741_v39, %v4735_v46  ;;  %v13284_v52 = vld [vmem:[#allocation9 + $0x840] sm:$0xf]  ;;  %v15895_v39 = vld [vmem:[#allocation9 + $0x854] sm:$0xf0]  ;;  %v15892_v57 = vld [vmem:[#allocation9 + $0x844] sm:$0xf] }
 0x29d   :  { %6903 = vmatpush.bf16.msrb.mxu2 %v12281_v30  ;;  %v13141_v30 = vor.u32 %v15859_v8, %v13140_v16  ;;  %v13285_v15 = vor.u32 %v15895_v39, %v13284_v52  ;;  %v13286_v46 = vld [vmem:[#allocation9 + $0x858] sm:$0xf0]  ;;  %v15868_v39 = vld [vmem:[#allocation9 + $0x784] sm:$0xf] }
 0x29e   :  { %6917 = vmatpush.bf16.msrb.mxu3 %v12473_v18  ;;  %v4758_v6 = vpack.c.bf16 %v4752_v10, %v4746_v22  ;;  %v4759_v40 = vpack.c.bf16 %v4753_v28, %v4747_v34  ;;  %v13333_v18 = vor.u32 %v15907_v26, %v13332_v2  ;;  %v13068_v22 = vld [vmem:[#allocation9 + $0x690] sm:$0xf]  ;;  %v15841_v34 = vld [vmem:[#allocation9 + $0x6a4] sm:$0xf0]  ;;  %v13238_v16 = vld [vmem:[#allocation9 + $0x7f8] sm:$0xf0] }
 0x29f   :  { %6871 = vmatpush.bf16.msrb.mxu0 %v13141_v30  ;;  %v13260_v28 = vld [vmem:[#allocation9 + $0x810] sm:$0xf]  ;;  %v15829_v26 = vld [vmem:[#allocation9 + $0x644] sm:$0xf0] }
 0x2a0   :  { %v4764_v60 = vunpack.c.l.bf16 %v4758_v6  ;;  %v4765_v1 = vunpack.c.l.bf16 %v4759_v40  ;;  %v4770_v33 = vunpack.c.h.bf16 %v4758_v6  ;;  %v4771_v31 = vunpack.c.h.bf16 %v4759_v40  ;;  %6885 = vmatpush.bf16.msrb.mxu1 %v13333_v18  ;;  %v15889_v6 = vld [vmem:[#allocation9 + $0x824] sm:$0xf0]  ;;  %v13020_v30 = vld [vmem:[#allocation9 + $0x630] sm:$0xf] }
 0x2a1   :  { %6904 = vmatpush.bf16.msrb.mxu2 %v12257_v20  ;;  %v15901_v20 = vld [vmem:[#allocation9 + $0x884] sm:$0xf0]  ;;  %v13289_v40 = vor.u32 %v15892_v57, %v13286_v46  ;;  %v13021_v18 = vor.u32 %v15829_v26, %v13020_v30  ;;  %v15814_v46 = vld [vmem:[#allocation9 + $0x5d4] sm:$0xf] }
 0x2a2   :  { %6918 = vmatpush.bf16.msrb.mxu3 %v12449_v7  ;;  %15985 = vtanh.f32 %v4764_v60  ;;  %v13309_v4 = vor.u32 %v15901_v20, %v13308_v36  ;;  %v13310_v7 = vld [vmem:[#allocation9 + $0x888] sm:$0xf0]  ;;  %v13069_v60 = vor.u32 %v15841_v34, %v13068_v22  ;;  %v12788_v34 = vld [vmem:[#allocation9 + $0x458] sm:$0xf]  ;;  %v17200_v26 = vld [vmem:[#allocation33_spill] sm:$0xff] }
 0x2a3   :  { %15987 = vtanh.f32 %v4765_v1  ;;  %6872 = vmatpush.bf16.msrb.mxu0 %v13117_v56  ;;  %v13313_v38 = vor.u32 %v15898_v27, %v13310_v7  ;;  %v15838_v1 = vld [vmem:[#allocation9 + $0x694] sm:$0xf]  ;;  %v16727_v43 = vpop.f32.mrf.mxu0  ;;  %v13214_v36 = vld [vmem:[#allocation9 + $0x7c8] sm:$0xf0]  ;;  %v15871_v27 = vld [vmem:[#allocation9 + $0x794] sm:$0xf0] }
 0x2a4   :  { %15989 = vtanh.f32 %v4770_v33  ;;  %6886 = vmatpush.bf16.msrb.mxu1 %v13309_v4  ;;  %v13070_v33 = vld [vmem:[#allocation9 + $0x6a8] sm:$0xf0]  ;;  %v16729_v37 = vpop.f32.mrf.mxu1  ;;  %v13217_v20 = vor.u32 %v15874_v53, %v13214_v36  ;;  %v13188_v4 = vld [vmem:[#allocation9 + $0x780] sm:$0xf]  ;;  %v15820_v7 = vld [vmem:[#allocation9 + $0x604] sm:$0xf] }
 0x2a5   :  { %6905 = vmatpush.bf16.msrb.mxu2 %v12233_v51  ;;  %15991 = vtanh.f32 %v4771_v31  ;;  %v15844_v51 = vld [vmem:[#allocation9 + $0x6c4] sm:$0xf]  ;;  %v13261_v31 = vor.u32 %v15889_v6, %v13260_v28  ;;  %v13073_v29 = vor.u32 %v15838_v1, %v13070_v33  ;;  %v13189_v17 = vor.u32 %v15871_v27, %v13188_v4  ;;  %v12974_v22 = vld [vmem:[#allocation9 + $0x5e8] sm:$0xf0]  ;;  %v15770_v28 = vld [vmem:[#allocation9 + $0x46c] sm:$0xf0] }
 0x2a6   :  { %6919 = vmatpush.bf16.msrb.mxu3 %v12425_v45  ;;  %v13094_v45 = vld [vmem:[#allocation9 + $0x6d8] sm:$0xf0]  ;;  %v13001_v52 = vor.u32 %v15820_v7, %v12998_v3  ;;  %v12980_v6 = vld [vmem:[#allocation9 + $0x5d8] sm:$0xf]  ;;  %v12789_v1 = vor.u32 %v15770_v28, %v12788_v34  ;;  %v15760_v33 = vld [vmem:[#allocation9 + $0x424] sm:$0xf] }
 0x2a7   :  { %v13097_v10 = vor.u32 %v15844_v51, %v13094_v45  ;;  %6873 = vmatpush.bf16.msrb.mxu0 %v13093_v14  ;;  %v13190_v14 = vld [vmem:[#allocation9 + $0x798] sm:$0xf0]  ;;  %v12782_v45 = vld [vmem:[#allocation9 + $0x468] sm:$0xf0]  ;;  %v12740_v53 = vld [vmem:[#allocation9 + $0x3f8] sm:$0xf] }
 0x2a8   :  { %v15986_v41 = vpop.eup %15985  ;;  %6887 = vmatpush.bf16.msrb.mxu1 %v13285_v15  ;;  %v15766_v15 = vld [vmem:[#allocation9 + $0x454] sm:$0xf]  ;;  %v13193_v51 = vor.u32 %v15868_v39, %v13190_v14  ;;  %v17199_v30 = vld [vmem:[#allocation32_spill] sm:$0xff]  ;;  %v15758_v36 = vld [vmem:[#allocation9 + $0x40c] sm:$0xf0] }
 0x2a9   :  { %v15988_v35 = vpop.eup %15987  ;;  %v12785_v57 = vor.u32 %v15766_v15, %v12782_v45  ;;  %v15806_v4 = vld [vmem:[#allocation9 + $0x58c] sm:$0xf0]  ;;  %v15748_v15 = vld [vmem:[#allocation9 + $0x3c4] sm:$0xf]  ;;  %v15752_v34 = vld [vmem:[#allocation9 + $0x3dc] sm:$0xf0] }
 0x2aa   :  { %v15990_v63 = vpop.eup %15989  ;;  %v15796_v45 = vld [vmem:[#allocation9 + $0x544] sm:$0xf] }
 0x2ab   :  { %v15992_v13 = vpop.eup %15991  ;;  %v16721_v59 = vpack.c.bf16 %v15990_v63, %v15986_v41  ;;  %v15886_v41 = vld [vmem:[#allocation9 + $0x814] sm:$0xf]  ;;  %6874 = vmatpush.bf16.msrb.mxu0 %v13069_v60  ;;  %v13045_v63 = vor.u32 %v15835_v19, %v13044_v12  ;;  %v16733_v2 = vpop.f32.mrf.mxu2  ;;  %v15808_v12 = vld [vmem:[#allocation9 + $0x5a4] sm:$0xf]  ;;  %v12950_v19 = vld [vmem:[#allocation9 + $0x5b8] sm:$0xf0] }
 0x2ac   :  { %v16723_v9 = vpack.c.bf16 %v15992_v13, %v15988_v35  ;;  %v13265_v35 = vor.u32 %v15886_v41, %v13262_v5  ;;  %6888 = vmatpush.bf16.msrb.mxu1 %v13261_v31  ;;  %v16735_v42 = vpop.f32.mrf.mxu3  ;;  %v16737_v56 = vpop.f32.mrf.mxu0  ;;  %v12758_v31 = vld [vmem:[#allocation9 + $0x438] sm:$0xf0] }
 0x2ad   :  { %6850 = vmatmul.bf16.vlgmr.msra.gmra.mxu2 %v16721_v59 }
 0x2ae   :  { %6864 = vmatmul.bf16.vlgmr.msra.gmra.mxu3 %v16723_v9  ;;  %6954 = vmatpush.bf16.msra.mxu2 %v13169_v23  ;;  %v15832_v23 = vld [vmem:[#allocation9 + $0x664] sm:$0xf] }
 0x2af   :  { %6968 = vmatpush.bf16.msra.mxu3 %v13361_v11  ;;  %v13049_v13 = vor.u32 %v15832_v23, %v13046_v58  ;;  %v15880_v11 = vld [vmem:[#allocation9 + $0x7e4] sm:$0xf]  ;;  %6875 = vmatpush.bf16.msrb.mxu0 %v13045_v63  ;;  %v12953_v63 = vor.u32 %v15808_v12, %v12950_v19  ;;  %v12956_v23 = vld [vmem:[#allocation9 + $0x5a8] sm:$0xf]  ;;  %v15812_v58 = vld [vmem:[#allocation9 + $0x5bc] sm:$0xf0] }
 0x2b0   :  { %v13241_v8 = vor.u32 %v15880_v11, %v13238_v16  ;;  %6889 = vmatpush.bf16.msrb.mxu1 %v13237_v50  ;;  %v16747_v50 = vld [vmem:[#allocation1 + $0x24] sm:$0xff]  ;;  %v9298_v11 = vld [vmem:[#allocation10] sm:$0x3f]  ;;  %v12765_v16 = vor.u32 %v15764_v0, %v12764_v32  ;;  %v17206_v19 = vld [vmem:[#allocation36_spill] sm:$0xff] }
 0x2b1   :  { %v4535_v32 = vadd.f32 %v16727_v43, %v17206_v19  ;;  %v12686_v0 = vld [vmem:[#allocation9 + $0x3a8] sm:$0xf0] }
 0x2b2   :  { %6955 = vmatpush.bf16.msra.mxu2 %v13145_v47  ;;  %v13022_v47 = vld [vmem:[#allocation9 + $0x648] sm:$0xf0] }
 0x2b3   :  { %6969 = vmatpush.bf16.msra.mxu3 %v13337_v24  ;;  %v13213_v24 = vor.u32 %v15877_v48, %v13212_v25  ;;  %v13025_v44 = vor.u32 %v15826_v49, %v13022_v47  ;;  %6876 = vmatpush.bf16.msrb.mxu0 %v13021_v18  ;;  %v16741_v60 = vpop.f32.mrf.mxu2  ;;  %v2577_v25 = vadd.f32 %v17200_v26, %v17199_v30  ;;  %v15754_v48 = vld [vmem:[#allocation9 + $0x3f4] sm:$0xf]  ;;  %v12734_v49 = vld [vmem:[#allocation9 + $0x408] sm:$0xf0]  ;;  %v12692_v26 = vld [vmem:[#allocation9 + $0x398] sm:$0xf] }
 0x2b4   :  { %v16743_v41 = vpop.f32.mrf.mxu3  ;;  %v15802_v47 = vld [vmem:[#allocation9 + $0x574] sm:$0xf]  ;;  %v12878_v30 = vld [vmem:[#allocation9 + $0x528] sm:$0xf0] }
 0x2b5   :  { %6890 = vmatpush.bf16.msrb.mxu1 %v13213_v24  ;;  %v12737_v24 = vor.u32 %v15754_v48, %v12734_v49  ;;  %v17208_v48 = vld [vmem:[#allocation43_spill] sm:$0xff] }
 0x2b6   :  { %6956 = vmatpush.bf16.msra.mxu2 %v13121_v54  ;;  %v12997_v54 = vor.u32 %v15823_v61, %v12996_v62  ;;  %v12741_v62 = vor.u32 %v15758_v36, %v12740_v53  ;;  %v12932_v61 = vld [vmem:[#allocation9 + $0x578] sm:$0xf]  ;;  %v15794_v36 = vld [vmem:[#allocation9 + $0x52c] sm:$0xf0] }
 0x2b7   :  { %6970 = vmatpush.bf16.msra.mxu3 %v13313_v38  ;;  %v16739_v38 = vpop.f32.mrf.mxu1  ;;  %v12933_v3 = vor.u32 %v15806_v4, %v12932_v61  ;;  %v12884_v53 = vld [vmem:[#allocation9 + $0x518] sm:$0xf]  ;;  %v4549_v4 = vadd.f32 %v16729_v37, %v4535_v32 }
 0x2b8   :  { %6877 = vmatpush.bf16.msrb.mxu0 %v12997_v54  ;;  %v17201_v54 = vld [vmem:[#allocation34_spill] sm:$0xff] }
 0x2b9   :  { %6891 = vmatpush.bf16.msrb.mxu1 %v13189_v17  ;;  %v2591_v27 = vadd.f32 %v17201_v54, %v2577_v25  ;;  %v17202_v17 = vld [vmem:[#allocation39_spill] sm:$0xff]  ;;  %v15746_v25 = vld [vmem:[#allocation9 + $0x3ac] sm:$0xf0] }
 0x2ba   :  { %6957 = vmatpush.bf16.msra.mxu2 %v13097_v10  ;;  %v12977_v10 = vor.u32 %v15814_v46, %v12974_v22  ;;  %v12902_v46 = vld [vmem:[#allocation9 + $0x558] sm:$0xf0]  ;;  %v12716_v22 = vld [vmem:[#allocation9 + $0x3c8] sm:$0xf]  ;;  %v12693_v43 = vor.u32 %v15746_v25, %v12692_v26  ;;  %v15736_v54 = vld [vmem:[#allocation9 + $0x364] sm:$0xf] }
 0x2bb   :  { %6971 = vmatpush.bf16.msra.mxu3 %v13289_v40  ;;  %v15818_v40 = vld [vmem:[#allocation9 + $0x5ec] sm:$0xf0] }
 0x2bc   :  { %6926 = vmatpush.bf16.msra.mxu0 %v12785_v57 }
 0x2bd   :  { %6906 = vmatmul.bf16.vlgmr.msrb.gmra.mxu2 %v16693_v21  ;;  %6940 = vmatpush.bf16.msra.mxu1 %v12977_v10  ;;  %v17204_v10 = vld [vmem:[#allocation42_spill] sm:$0xff] }
 0x2be   :  { %6920 = vmatmul.bf16.vlgmr.msrb.gmra.mxu3 %v16697_v55  ;;  %6958 = vmatpush.bf16.msra.mxu2 %v13073_v29  ;;  %v12981_v29 = vor.u32 %v15818_v40, %v12980_v6  ;;  %v12905_v40 = vor.u32 %v15796_v45, %v12902_v46  ;;  %v15740_v45 = vld [vmem:[#allocation9 + $0x37c] sm:$0xf0] }
 0x2bf   :  { %6972 = vmatpush.bf16.msra.mxu3 %v13265_v35  ;;  %v12761_v35 = vor.u32 %v15760_v33, %v12758_v31  ;;  %v12908_v33 = vld [vmem:[#allocation9 + $0x548] sm:$0xf]  ;;  %v15800_v31 = vld [vmem:[#allocation9 + $0x55c] sm:$0xf0] }
 0x2c0   :  { %v12909_v12 = vor.u32 %v15800_v31, %v12908_v33  ;;  %v15730_v31 = vld [vmem:[#allocation9 + $0x334] sm:$0xf] }
 0x2c1   :  { %6927 = vmatpush.bf16.msra.mxu0 %v12761_v35  ;;  %6941 = vmatpush.bf16.msra.mxu1 %v12953_v63  ;;  %v15742_v63 = vld [vmem:[#allocation9 + $0x394] sm:$0xf] }
 0x2c2   :  { %6959 = vmatpush.bf16.msra.mxu2 %v13049_v13  ;;  %v16749_v13 = vld [vmem:[#allocation1 + $0x2d] sm:$0xff] }
 0x2c3   :  { %6973 = vmatpush.bf16.msra.mxu3 %v13241_v8  ;;  %v16745_v5 = vpop.f32.mrf.mxu0  ;;  %v12957_v8 = vor.u32 %v15812_v58, %v12956_v23  ;;  %9300 = vst [vmem:[#allocation1] ss:$9 sm:$0xff] %v9298_v11  ;;  %v15790_v23 = vld [vmem:[#allocation9 + $0x514] sm:$0xf] }
 0x2c4   :  { %v16753_v18 = vpop.f32.mrf.mxu1  ;;  %v17207_v58 = vld [vmem:[#allocation37_spill] sm:$0xff] }
 0x2c5   :  { %6928 = vmatpush.bf16.msra.mxu0 %v12737_v24 }
 0x2c6   :  { %6960 = vmatpush.bf16.msra.mxu2 %v13025_v44  ;;  %v12926_v44 = vld [vmem:[#allocation9 + $0x588] sm:$0xf0] }
 0x2c7   :  { %6974 = vmatpush.bf16.msra.mxu3 %v13217_v20  ;;  %v12929_v20 = vor.u32 %v15802_v47, %v12926_v44  ;;  %v17209_v47 = vld [vmem:[#allocation41_spill] sm:$0xff]  ;;  %v12881_v44 = vor.u32 %v15790_v23, %v12878_v30 }
 0x2c8   :  { %v15782_v30 = vld [vmem:[#allocation9 + $0x4cc] sm:$0xf0] }
 0x2c9   :  { %6942 = vmatpush.bf16.msra.mxu1 %v12929_v20  ;;  %v12885_v20 = vor.u32 %v15794_v36, %v12884_v53 }
 0x2ca   :  { %6961 = vmatpush.bf16.msra.mxu2 %v13001_v52  ;;  %v17203_v52 = vld [vmem:[#allocation40_spill] sm:$0xff] }
 0x2cb   :  { %6975 = vmatpush.bf16.msra.mxu3 %v13193_v51  ;;  %v4618_v7 = vpop.f32.mrf.mxu2  ;;  %v2661_v39 = vadd.f32 %v17203_v52, %v17202_v17  ;;  %v12710_v51 = vld [vmem:[#allocation9 + $0x3d8] sm:$0xf0]  ;;  %v16759_v6 = vpop.f32.mrf.mxu0 }
 0x2cc   :  { %v4632_v14 = vpop.f32.mrf.mxu3  ;;  %v12713_v57 = vor.u32 %v15748_v15, %v12710_v51  ;;  %v4619_v24 = vadd.f32 %v4618_v7, %v17209_v47  ;;  %v17211_v17 = vld [vmem:[#allocation38_spill] sm:$0xff]  ;;  %v12668_v51 = vld [vmem:[#allocation9 + $0x368] sm:$0xf] }
 0x2cd   :  { %v2675_v28 = vadd.f32 %v17204_v10, %v2661_v39  ;;  %6943 = vmatpush.bf16.msra.mxu1 %v12905_v40  ;;  %v12854_v15 = vld [vmem:[#allocation9 + $0x4f8] sm:$0xf0]  ;;  %v12669_v37 = vor.u32 %v15740_v45, %v12668_v51  ;;  %v15788_v40 = vld [vmem:[#allocation9 + $0x4fc] sm:$0xf0]  ;;  %v4720_v51 = vpack.i.b16 %v16747_v50, %v16747_v50 }
 0x2ce   :  { %7010 = vmatpush.bf16.msrb.mxu2 %v12789_v1  ;;  %v12717_v1 = vor.u32 %v15752_v34, %v12716_v22  ;;  %6929 = vmatpush.bf16.msra.mxu0 %v12713_v57  ;;  %v4563_v57 = vadd.f32 %v16733_v2, %v4549_v4  ;;  %v4633_v46 = vadd.f32 %v4632_v14, %v4619_v24  ;;  %v12830_v14 = vld [vmem:[#allocation9 + $0x4c8] sm:$0xf0]  ;;  %v15724_v24 = vld [vmem:[#allocation9 + $0x304] sm:$0xf] }
 0x2cf   :  { %7024 = vmatpush.bf16.msrb.mxu3 %v12981_v29  ;;  %v17205_v29 = vld [vmem:[#allocation35_spill] sm:$0xff]  ;;  %v2689_v49 = vadd.f32 %v17208_v48, %v2675_v28  ;;  %v12860_v28 = vld [vmem:[#allocation9 + $0x4e8] sm:$0xf] }
 0x2d0   :  { %v2605_v35 = vadd.f32 %v17205_v29, %v2591_v27  ;;  %v12662_v27 = vld [vmem:[#allocation9 + $0x378] sm:$0xf0]  ;;  %v12861_v33 = vor.u32 %v15788_v40, %v12860_v28  ;;  %v12638_v29 = vld [vmem:[#allocation9 + $0x348] sm:$0xf0] }
 0x2d1   :  { %6944 = vmatpush.bf16.msra.mxu1 %v12881_v44  ;;  %v12665_v7 = vor.u32 %v15736_v54, %v12662_v27  ;;  %v12641_v2 = vor.u32 %v15730_v31, %v12638_v29  ;;  %v12614_v44 = vld [vmem:[#allocation9 + $0x318] sm:$0xf0] }
 0x2d2   :  { %7011 = vmatpush.bf16.msrb.mxu2 %v12765_v16  ;;  %v2619_v11 = vadd.f32 %v17207_v58, %v2605_v35  ;;  %v16765_v16 = vpop.f32.mrf.mxu1  ;;  %v15778_v35 = vld [vmem:[#allocation9 + $0x4b4] sm:$0xf] }
 0x2d3   :  { %7025 = vmatpush.bf16.msrb.mxu3 %v12957_v8  ;;  %v12689_v8 = vor.u32 %v15742_v63, %v12686_v0  ;;  %v4620_v39 = vpop.f32.mrf.mxu2  ;;  %v12644_v63 = vld [vmem:[#allocation9 + $0x338] sm:$0xf]  ;;  %v15734_v0 = vld [vmem:[#allocation9 + $0x34c] sm:$0xf0]  ;;  %v12833_v58 = vor.u32 %v15778_v35, %v12830_v14 }
 0x2d4   :  { %v2633_v52 = vadd.f32 %v17211_v17, %v2619_v11  ;;  %v4634_v22 = vpop.f32.mrf.mxu3  ;;  %v12645_v11 = vor.u32 %v15734_v0, %v12644_v63  ;;  %v12812_v17 = vld [vmem:[#allocation9 + $0x488] sm:$0xf] }
 0x2d5   :  { %6930 = vmatpush.bf16.msra.mxu0 %v12689_v8  ;;  %v12836_v8 = vld [vmem:[#allocation9 + $0x4b8] sm:$0xf] }
 0x2d6   :  { %7012 = vmatpush.bf16.msrb.mxu2 %v12741_v62  ;;  %v17210_v62 = vld [vmem:[#allocation44_spill] sm:$0xff]  ;;  %v12837_v25 = vor.u32 %v15782_v30, %v12836_v8 }
 0x2d7   :  { %7026 = vmatpush.bf16.msrb.mxu3 %v12933_v3  ;;  %v2703_v61 = vadd.f32 %v17210_v62, %v2689_v49  ;;  %v15784_v3 = vld [vmem:[#allocation9 + $0x4e4] sm:$0xf]  ;;  %v12806_v62 = vld [vmem:[#allocation9 + $0x498] sm:$0xf0] }
 0x2d8   :  { %v12857_v10 = vor.u32 %v15784_v3, %v12854_v15 }
 0x2d9   :  { %6931 = vmatpush.bf16.msra.mxu0 %v12665_v7 }
 0x2da   :  { %7013 = vmatpush.bf16.msrb.mxu2 %v12717_v1  ;;  %v4537_v1 = vadd.f32 %v16737_v56, %v2633_v52  ;;  %6945 = vmatpush.bf16.msra.mxu1 %v12857_v10  ;;  %v4577_v56 = vadd.f32 %v16735_v42, %v4563_v57  ;;  %v12620_v42 = vld [vmem:[#allocation9 + $0x308] sm:$0xf]  ;;  %v15776_v52 = vld [vmem:[#allocation9 + $0x49c] sm:$0xf0] }
 0x2db   :  { %7027 = vmatpush.bf16.msrb.mxu3 %v12909_v12  ;;  %v17212_v12 = vld [vmem:[#allocation45_spill] sm:$0xff] }
 0x2dc   :  { %v2717_v19 = vadd.f32 %v17212_v12, %v2703_v61  ;;  %v4551_v48 = vadd.f32 %v16739_v38, %v4537_v1  ;;  %v4591_v49 = vadd.f32 %v16745_v5, %v4577_v56  ;;  %v15728_v61 = vld [vmem:[#allocation9 + $0x31c] sm:$0xf0] }
 0x2dd   :  { %6932 = vmatpush.bf16.msra.mxu0 %v12641_v2  ;;  %v12621_v5 = vor.u32 %v15728_v61, %v12620_v42 }
 0x2de   :  { %7014 = vmatpush.bf16.msrb.mxu2 %v12693_v43  ;;  %v4621_v26 = vadd.f32 %v4620_v39, %v2717_v19  ;;  %6946 = vmatpush.bf16.msra.mxu1 %v12833_v58  ;;  %v15772_v43 = vld [vmem:[#allocation9 + $0x484] sm:$0xf]  ;;  %v4565_v53 = vadd.f32 %v16741_v60, %v4551_v48  ;;  %v12813_v39 = vor.u32 %v15776_v52, %v12812_v17  ;;  %v12572_v17 = vld [vmem:[#allocation9 + $0x2a8] sm:$0xf]  ;;  %v15716_v52 = vld [vmem:[#allocation9 + $0x2bc] sm:$0xf0] }
 0x2df   :  { %7028 = vmatpush.bf16.msrb.mxu3 %v12885_v20  ;;  %v12617_v20 = vor.u32 %v15724_v24, %v12614_v44  ;;  %v12809_v3 = vor.u32 %v15772_v43, %v12806_v62  ;;  %v4605_v7 = vadd.f32 %v16753_v18, %v4591_v49  ;;  %v12596_v49 = vld [vmem:[#allocation9 + $0x2d8] sm:$0xf]  ;;  %v15671_v24 = vld [vmem:[#allocation9 + $0x15c] sm:$0xf]  ;;  %v12406_v43 = vld [vmem:[#allocation9 + $0x170] sm:$0xf0] }
 0x2e0   :  { %v4635_v4 = vadd.f32 %v4634_v22, %v4621_v26  ;;  %v4579_v45 = vadd.f32 %v16743_v41, %v4565_v53  ;;  %v12404_v26 = vld [vmem:[#allocation9 + $0x158] sm:$0xf]  ;;  %v15719_v53 = vld [vmem:[#allocation9 + $0x2dc] sm:$0xf] }
 0x2e1   :  { %6933 = vmatpush.bf16.msra.mxu0 %v12617_v20 }
 0x2e2   :  { %7015 = vmatpush.bf16.msrb.mxu2 %v12669_v37  ;;  %6947 = vmatpush.bf16.msra.mxu1 %v12809_v3  ;;  %v4722_v37 = vperm.slane %v4720_v51, 0  ;;  %v12409_v3 = vor.u32 %v15671_v24, %v12406_v43  ;;  %v12284_v24 = vld [vmem:[#allocation9 + $0x68] sm:$0xf] }
 0x2e3   :  { %v4646_v34 = vpop.f32.mrf.mxu0  ;;  %7029 = vmatpush.bf16.msrb.mxu3 %v12861_v33 }
 0x2e4   :  { %v4647_v32 = vadd.f32 %v4646_v34, %v4633_v46  ;;  %v4660_v23 = vpop.f32.mrf.mxu1  ;;  %v4723_v46 = vpack.i.b16 %v16749_v13, %v16749_v13  ;;  %v4593_v34 = vadd.f32 %v16759_v6, %v4579_v45  ;;  %v4742_v31 = vunpack.c.l.bf16 %v4722_v37  ;;  %v15710_v37 = vld [vmem:[#allocation9 + $0x28c] sm:$0xf0] }
 0x2e5   :  { %v12573_v45 = vor.u32 %v15716_v52, %v12572_v17  ;;  %v15638_v17 = vld [vmem:[#allocation9 + $0x4c] sm:$0xf0] }
 0x2e6   :  { %v4661_v47 = vadd.f32 %v4660_v23, %v4647_v32  ;;  %7016 = vmatpush.bf16.msrb.mxu2 %v12645_v11  ;;  %v4725_v28 = vperm.slane %v4723_v46, 0  ;;  %v4607_v33 = vadd.f32 %v16765_v16, %v4593_v34  ;;  %v15662_v46 = vld [vmem:[#allocation9 + $0x10c] sm:$0xf0] }
 0x2e7   :  { %7030 = vmatpush.bf16.msrb.mxu3 %v12837_v25  ;;  %v15674_v25 = vld [vmem:[#allocation9 + $0x16c] sm:$0xf0] }
 0x2e8   :  { %v4743_v35 = vunpack.c.l.bf16 %v4725_v28  ;;  %v12405_v61 = vor.u32 %v15674_v25, %v12404_v26  ;;  %v12358_v28 = vld [vmem:[#allocation9 + $0x110] sm:$0xf0]  ;;  %v15695_v25 = vld [vmem:[#allocation9 + $0x21c] sm:$0xf] }
 0x2e9   :  { %v12310_v26 = vld [vmem:[#allocation9 + $0xb0] sm:$0xf0] }
 0x2ea   :  { %7017 = vmatpush.bf16.msrb.mxu2 %v12621_v5 }
 0x2eb   :  { %v4674_v36 = vpop.f32.mrf.mxu2  ;;  %v4648_v38 = vpop.f32.mrf.mxu0  ;;  %7031 = vmatpush.bf16.msrb.mxu3 %v12813_v39  ;;  %v15665_v39 = vld [vmem:[#allocation9 + $0x12c] sm:$0xf] }
 0x2ec   :  { %v4675_v54 = vadd.f32 %v4674_v36, %v4661_v47  ;;  %v4688_v27 = vpop.f32.mrf.mxu3  ;;  %v4649_v15 = vadd.f32 %v4648_v38, %v4635_v4  ;;  %v4662_v22 = vpop.f32.mrf.mxu1  ;;  %v15722_v47 = vld [vmem:[#allocation9 + $0x2ec] sm:$0xf0]  ;;  %v12598_v36 = vld [vmem:[#allocation9 + $0x2f0] sm:$0xf0] }
 0x2ed   :  { %v12597_v4 = vor.u32 %v15722_v47, %v12596_v49  ;;  %v12601_v5 = vor.u32 %v15719_v53, %v12598_v36  ;;  %v12476_v36 = vld [vmem:[#allocation9 + $0x1e8] sm:$0xf] }
 0x2ee   :  { %v4689_v60 = vadd.f32 %v4688_v27, %v4675_v54  ;;  %v4663_v10 = vadd.f32 %v4662_v22, %v4649_v15  ;;  %v12380_v54 = vld [vmem:[#allocation9 + $0x128] sm:$0xf]  ;;  %v15668_v27 = vld [vmem:[#allocation9 + $0x13c] sm:$0xf0]  ;;  %v12574_v15 = vld [vmem:[#allocation9 + $0x2c0] sm:$0xf0] }
 0x2ef   :  { %v12381_v51 = vor.u32 %v15668_v27, %v12380_v54  ;;  %v12478_v54 = vld [vmem:[#allocation9 + $0x200] sm:$0xf0] }
 0x2f0   :  { %v4695_v57 = vpack.c.bf16 %v4689_v60, %v4605_v7  ;;  %v12382_v7 = vld [vmem:[#allocation9 + $0x140] sm:$0xf0]  ;;  %v15713_v60 = vld [vmem:[#allocation9 + $0x2ac] sm:$0xf] }
 0x2f1   :  { %v12385_v22 = vor.u32 %v15665_v39, %v12382_v7  ;;  %v12577_v34 = vor.u32 %v15713_v60, %v12574_v15  ;;  %v12452_v7 = vld [vmem:[#allocation9 + $0x1b8] sm:$0xf]  ;;  %v15686_v60 = vld [vmem:[#allocation9 + $0x1cc] sm:$0xf0]  ;;  %v15635_v15 = vld [vmem:[#allocation9 + $0x3c] sm:$0xf] }
 0x2f2   :  { %v4730_v29 = vunpack.c.l.bf16 %v4695_v57  ;;  %v4731_v41 = vunpack.c.h.bf16 %v4695_v57  ;;  %v12356_v57 = vld [vmem:[#allocation9 + $0xf8] sm:$0xf] }
 0x2f3   :  { %v4676_v18 = vpop.f32.mrf.mxu2 }
 0x2f4   :  { %v4677_v40 = vadd.f32 %v4676_v18, %v4663_v10  ;;  %v4690_v1 = vpop.f32.mrf.mxu3  ;;  %v4748_v32 = vadd.f32 %v4742_v31, %v4730_v29  ;;  %v4749_v2 = vadd.f32 %v4743_v35, %v4731_v41  ;;  %v12548_v10 = vld [vmem:[#allocation9 + $0x278] sm:$0xf]  ;;  %v15659_v18 = vld [vmem:[#allocation9 + $0xfc] sm:$0xf]  ;;  %v15656_v29 = vld [vmem:[#allocation9 + $0xdc] sm:$0xf0] }
 0x2f5   :  { %v12361_v41 = vor.u32 %v15659_v18, %v12358_v28  ;;  %v15680_v18 = vld [vmem:[#allocation9 + $0x19c] sm:$0xf0] }
 0x2f6   :  { %v4691_v50 = vadd.f32 %v4690_v1, %v4677_v40  ;;  %v15707_v40 = vld [vmem:[#allocation9 + $0x27c] sm:$0xf]  ;;  %v12550_v1 = vld [vmem:[#allocation9 + $0x290] sm:$0xf0] }
 0x2f8   :  { %v4698_v12 = vpack.c.bf16 %v4691_v50, %v4607_v33  ;;  %v12357_v33 = vor.u32 %v15662_v46, %v12356_v57  ;;  %v12549_v50 = vor.u32 %v15710_v37, %v12548_v10  ;;  %v12454_v57 = vld [vmem:[#allocation9 + $0x1d0] sm:$0xf0]  ;;  %v12236_v46 = vld [vmem:[#allocation9 + $0x8] sm:$0xf]  ;;  %v15632_v10 = vld [vmem:[#allocation9 + $0x1c] sm:$0xf0] }
 0x2f9   :  { %v12428_v37 = vld [vmem:[#allocation9 + $0x188] sm:$0xf] }
 0x2fa   :  { %v4736_v19 = vunpack.c.l.bf16 %v4698_v12  ;;  %v4737_v13 = vunpack.c.h.bf16 %v4698_v12  ;;  %v12524_v12 = vld [vmem:[#allocation9 + $0x248] sm:$0xf] }
 0x2fc   :  { %v4754_v14 = vadd.f32 %v4742_v31, %v4736_v19  ;;  %v4755_v6 = vadd.f32 %v4743_v35, %v4737_v13  ;;  %v12332_v31 = vld [vmem:[#allocation9 + $0xc8] sm:$0xf]  ;;  %v12553_v35 = vor.u32 %v15707_v40, %v12550_v1  ;;  %v15704_v19 = vld [vmem:[#allocation9 + $0x25c] sm:$0xf0]  ;;  %v15653_v13 = vld [vmem:[#allocation9 + $0xcc] sm:$0xf] }
 0x2fd   :  { %v15629_v1 = vld [vmem:[#allocation9 + $0xc] sm:$0xf] }
 0x2fe   :  { %v4760_v63 = vpack.c.bf16 %v4754_v14, %v4748_v32  ;;  %v4761_v0 = vpack.c.bf16 %v4755_v6, %v4749_v2  ;;  %v12334_v32 = vld [vmem:[#allocation9 + $0xe0] sm:$0xf0]  ;;  %v15701_v2 = vld [vmem:[#allocation9 + $0x24c] sm:$0xf]  ;;  %v12333_v6 = vor.u32 %v15656_v29, %v12332_v31  ;;  %v13172_v29 = vld [vmem:[#allocation9 + $0x758] sm:$0xf] }
 0x2ff   :  { %v12526_v14 = vld [vmem:[#allocation9 + $0x260] sm:$0xf0] }
 0x300   :  { %v4766_v23 = vunpack.c.l.bf16 %v4760_v63  ;;  %v4767_v58 = vunpack.c.l.bf16 %v4761_v0  ;;  %v4772_v11 = vunpack.c.h.bf16 %v4760_v63  ;;  %v4773_v8 = vunpack.c.h.bf16 %v4761_v0  ;;  %v12308_v0 = vld [vmem:[#allocation9 + $0x98] sm:$0xf]  ;;  %v12430_v31 = vld [vmem:[#allocation9 + $0x1a0] sm:$0xf0] }
 0x301   :  { %v12525_v63 = vor.u32 %v15704_v19, %v12524_v12  ;;  %v15914_v12 = vld [vmem:[#allocation9 + $0x8ec] sm:$0xf0]  ;;  %v15863_v19 = vld [vmem:[#allocation9 + $0x75c] sm:$0xf] }
 0x302   :  { %15993 = vtanh.f32 %v4766_v23  ;;  %v15650_v23 = vld [vmem:[#allocation9 + $0xac] sm:$0xf0] }
 0x303   :  { %v6823_v16 = vpop.f32.mrf.mxu0  ;;  %15995 = vtanh.f32 %v4767_v58  ;;  %v12337_v58 = vor.u32 %v15653_v13, %v12334_v32  ;;  %v12309_v49 = vor.u32 %v15650_v23, %v12308_v0  ;;  %v12237_v13 = vor.u32 %v15632_v10, %v12236_v46  ;;  %v13102_v46 = vld [vmem:[#allocation9 + $0x6e0] sm:$0xf0] }
 0x304   :  { %v6837_v30 = vpop.f32.mrf.mxu1  ;;  %15997 = vtanh.f32 %v4772_v11  ;;  %v12529_v11 = vor.u32 %v15701_v2, %v12526_v14  ;;  %v12429_v32 = vor.u32 %v15680_v18, %v12428_v37  ;;  %v13174_v2 = vld [vmem:[#allocation9 + $0x770] sm:$0xf0]  ;;  %v15911_v14 = vld [vmem:[#allocation9 + $0x8dc] sm:$0xf]  ;;  %v13076_v18 = vld [vmem:[#allocation9 + $0x698] sm:$0xf] }
 0x305   :  { %v16787_v56 = vadd.f32 %v6837_v30, %v6823_v16  ;;  %15999 = vtanh.f32 %v4773_v8  ;;  %v12500_v8 = vld [vmem:[#allocation9 + $0x218] sm:$0xf]  ;;  %v15698_v16 = vld [vmem:[#allocation9 + $0x22c] sm:$0xf0]  ;;  %v15647_v30 = vld [vmem:[#allocation9 + $0x9c] sm:$0xf] }
 0x306   :  { %v12501_v47 = vor.u32 %v15698_v16, %v12500_v8  ;;  %v12313_v43 = vor.u32 %v15647_v30, %v12310_v26  ;;  %v15860_v8 = vld [vmem:[#allocation9 + $0x73c] sm:$0xf0]  ;;  %v13177_v16 = vor.u32 %v15863_v19, %v13174_v2  ;;  %v13340_v26 = vld [vmem:[#allocation9 + $0x8a8] sm:$0xf] }
 0x308   :  { %v15994_v48 = vpop.eup %15993 }
 0x309   :  { %v15996_v44 = vpop.eup %15995 }
 0x30a   :  { %v15998_v20 = vpop.eup %15997 }
 0x30b   :  { %v16000_v62 = vpop.eup %15999  ;;  %v16789_v42 = vpack.c.bf16 %v15998_v20, %v15994_v48  ;;  %v12502_v48 = vld [vmem:[#allocation9 + $0x230] sm:$0xf0]  ;;  %v15692_v20 = vld [vmem:[#allocation9 + $0x1fc] sm:$0xf0] }
 0x30c   :  { %v16791_v38 = vpack.c.bf16 %v16000_v62, %v15996_v44  ;;  %v15644_v44 = vld [vmem:[#allocation9 + $0x7c] sm:$0xf0]  ;;  %v12505_v53 = vor.u32 %v15695_v25, %v12502_v48  ;;  %v15641_v62 = vld [vmem:[#allocation9 + $0x6c] sm:$0xf] }
 0x30d   :  { %6878 = vmatmul.bf16.vlgmr.msrb.gmra.mxu0 %v16789_v42  ;;  %6962 = vmatmul.bf16.vlgmr.msra.gmra.mxu2 %v16789_v42  ;;  %v12285_v27 = vor.u32 %v15644_v44, %v12284_v24  ;;  %v15908_v25 = vld [vmem:[#allocation9 + $0x8bc] sm:$0xf0]  ;;  %v15857_v48 = vld [vmem:[#allocation9 + $0x72c] sm:$0xf]  ;;  %v13342_v24 = vld [vmem:[#allocation9 + $0x8c0] sm:$0xf0] }
 0x30e   :  { %6892 = vmatmul.bf16.vlgmr.msrb.gmra.mxu1 %v16791_v38  ;;  %6976 = vmatmul.bf16.vlgmr.msra.gmra.mxu3 %v16791_v38 }
 0x30f   :  { %6982 = vmatpush.bf16.msrb.mxu0 %v12405_v61  ;;  %6996 = vmatpush.bf16.msrb.mxu1 %v12597_v4  ;;  %v12286_v61 = vld [vmem:[#allocation9 + $0x80] sm:$0xf0]  ;;  %v15689_v4 = vld [vmem:[#allocation9 + $0x1ec] sm:$0xf] }
 0x310   :  { %7066 = vmatpush.bf16.msra.mxu2 %v12409_v3  ;;  %7080 = vmatpush.bf16.msra.mxu3 %v12601_v5  ;;  %v12477_v3 = vor.u32 %v15692_v20, %v12476_v36  ;;  %v12260_v5 = vld [vmem:[#allocation9 + $0x38] sm:$0xf]  ;;  %v12289_v52 = vor.u32 %v15641_v62, %v12286_v61  ;;  %v12481_v39 = vor.u32 %v15689_v4, %v12478_v54  ;;  %v15854_v36 = vld [vmem:[#allocation9 + $0x70c] sm:$0xf0]  ;;  %v15851_v54 = vld [vmem:[#allocation9 + $0x6fc] sm:$0xf] }
 0x311   :  { %v13316_v61 = vld [vmem:[#allocation9 + $0x878] sm:$0xf]  ;;  %v15902_v4 = vld [vmem:[#allocation9 + $0x88c] sm:$0xf0] }
 0x313   :  { %6983 = vmatpush.bf16.msrb.mxu0 %v12381_v51  ;;  %6997 = vmatpush.bf16.msrb.mxu1 %v12573_v45  ;;  %v12262_v51 = vld [vmem:[#allocation9 + $0x50] sm:$0xf0]  ;;  %v15683_v45 = vld [vmem:[#allocation9 + $0x1bc] sm:$0xf] }
 0x314   :  { %7067 = vmatpush.bf16.msra.mxu2 %v12385_v22  ;;  %7081 = vmatpush.bf16.msra.mxu3 %v12577_v34  ;;  %v12261_v22 = vor.u32 %v15638_v17, %v12260_v5  ;;  %v12453_v34 = vor.u32 %v15686_v60, %v12452_v7  ;;  %v12265_v28 = vor.u32 %v15635_v15, %v12262_v51  ;;  %v13318_v5 = vld [vmem:[#allocation9 + $0x890] sm:$0xf0]  ;;  %v15848_v7 = vld [vmem:[#allocation9 + $0x6dc] sm:$0xf0]  ;;  %v13292_v51 = vld [vmem:[#allocation9 + $0x848] sm:$0xf] }
 0x315   :  { %v12457_v40 = vor.u32 %v15683_v45, %v12454_v57  ;;  %v15896_v45 = vld [vmem:[#allocation9 + $0x85c] sm:$0xf0]  ;;  %v15845_v57 = vld [vmem:[#allocation9 + $0x6cc] sm:$0xf] }
 0x316   :  { %v13293_v37 = vor.u32 %v15896_v45, %v13292_v51  ;;  %v15869_v51 = vld [vmem:[#allocation9 + $0x78c] sm:$0xf]  ;;  %v13198_v45 = vld [vmem:[#allocation9 + $0x7a0] sm:$0xf0] }
 0x317   :  { %6984 = vmatpush.bf16.msrb.mxu0 %v12357_v33  ;;  %6998 = vmatpush.bf16.msrb.mxu1 %v12549_v50  ;;  %v12238_v33 = vld [vmem:[#allocation9 + $0x20] sm:$0xf0]  ;;  %v15677_v50 = vld [vmem:[#allocation9 + $0x18c] sm:$0xf] }
 0x318   :  { %7068 = vmatpush.bf16.msra.mxu2 %v12361_v41  ;;  %7082 = vmatpush.bf16.msra.mxu3 %v12553_v35  ;;  %v15866_v41 = vld [vmem:[#allocation9 + $0x76c] sm:$0xf0]  ;;  %v13364_v35 = vld [vmem:[#allocation9 + $0x8d8] sm:$0xf]  ;;  %v12433_v0 = vor.u32 %v15677_v50, %v12430_v31  ;;  %v15839_v31 = vld [vmem:[#allocation9 + $0x69c] sm:$0xf] }
 0x319   :  { %v13173_v23 = vor.u32 %v15866_v41, %v13172_v29  ;;  %v15890_v50 = vld [vmem:[#allocation9 + $0x82c] sm:$0xf0]  ;;  %v13078_v41 = vld [vmem:[#allocation9 + $0x6b0] sm:$0xf0] }
 0x31b   :  { %6985 = vmatpush.bf16.msrb.mxu0 %v12333_v6  ;;  %6999 = vmatpush.bf16.msrb.mxu1 %v12525_v63  ;;  %v13366_v6 = vld [vmem:[#allocation9 + $0x8f0] sm:$0xf0]  ;;  %v12241_v63 = vor.u32 %v15629_v1, %v12238_v33  ;;  %v13268_v33 = vld [vmem:[#allocation9 + $0x818] sm:$0xf] }
 0x31c   :  { %7069 = vmatpush.bf16.msra.mxu2 %v12337_v58  ;;  %7083 = vmatpush.bf16.msra.mxu3 %v12529_v11  ;;  %v13365_v58 = vor.u32 %v15914_v12, %v13364_v35  ;;  %v13148_v11 = vld [vmem:[#allocation9 + $0x728] sm:$0xf]  ;;  %v13369_v30 = vor.u32 %v15911_v14, %v13366_v6  ;;  %v15887_v35 = vld [vmem:[#allocation9 + $0x81c] sm:$0xf]  ;;  %v13270_v12 = vld [vmem:[#allocation9 + $0x830] sm:$0xf0]  ;;  %v13269_v2 = vor.u32 %v15890_v50, %v13268_v33 }
 0x31d   :  { %6934 = vmatmul.bf16.vlgmr.msra.gmra.mxu0 %v16721_v59  ;;  %7018 = vmatmul.bf16.vlgmr.msrb.gmra.mxu2 %v16721_v59  ;;  %v13149_v44 = vor.u32 %v15860_v8, %v13148_v11  ;;  %v13052_v14 = vld [vmem:[#allocation9 + $0x668] sm:$0xf]  ;;  %v15836_v6 = vld [vmem:[#allocation9 + $0x67c] sm:$0xf0]  ;;  %v15833_v8 = vld [vmem:[#allocation9 + $0x66c] sm:$0xf]  ;;  %v13201_v50 = vor.u32 %v15869_v51, %v13198_v45 }
 0x31e   :  { %6948 = vmatmul.bf16.vlgmr.msra.gmra.mxu1 %v16723_v9  ;;  %7032 = vmatmul.bf16.vlgmr.msrb.gmra.mxu3 %v16723_v9  ;;  %v15884_v11 = vld [vmem:[#allocation9 + $0x7fc] sm:$0xf0]  ;;  %v15743_v51 = vld [vmem:[#allocation9 + $0x39c] sm:$0xf]  ;;  %v12694_v45 = vld [vmem:[#allocation9 + $0x3b0] sm:$0xf0] }
 0x31f   :  { %6986 = vmatpush.bf16.msrb.mxu0 %v12309_v49  ;;  %7000 = vmatpush.bf16.msrb.mxu1 %v12501_v47  ;;  %v13150_v49 = vld [vmem:[#allocation9 + $0x740] sm:$0xf0]  ;;  %v15905_v47 = vld [vmem:[#allocation9 + $0x8ac] sm:$0xf] }
 0x320   :  { %7070 = vmatpush.bf16.msra.mxu2 %v12313_v43  ;;  %7084 = vmatpush.bf16.msra.mxu3 %v12505_v53  ;;  %v13341_v43 = vor.u32 %v15908_v25, %v13340_v26  ;;  %v13124_v53 = vld [vmem:[#allocation9 + $0x6f8] sm:$0xf]  ;;  %v13153_v20 = vor.u32 %v15857_v48, %v13150_v49  ;;  %v13345_v62 = vor.u32 %v15905_v47, %v13342_v24  ;;  %v13246_v26 = vld [vmem:[#allocation9 + $0x800] sm:$0xf0]  ;;  %v15830_v49 = vld [vmem:[#allocation9 + $0x64c] sm:$0xf0] }
 0x321   :  { %v13125_v17 = vor.u32 %v15854_v36, %v13124_v53  ;;  %v13028_v48 = vld [vmem:[#allocation9 + $0x638] sm:$0xf]  ;;  %v15827_v53 = vld [vmem:[#allocation9 + $0x63c] sm:$0xf] }
 0x323   :  { %6987 = vmatpush.bf16.msrb.mxu0 %v12285_v27  ;;  %7001 = vmatpush.bf16.msrb.mxu1 %v12477_v3  ;;  %v13126_v27 = vld [vmem:[#allocation9 + $0x710] sm:$0xf0]  ;;  %v15899_v3 = vld [vmem:[#allocation9 + $0x87c] sm:$0xf] }
 0x324   :  { %7071 = vmatpush.bf16.msra.mxu2 %v12289_v52  ;;  %7085 = vmatpush.bf16.msra.mxu3 %v12481_v39  ;;  %v13317_v52 = vor.u32 %v15902_v4, %v13316_v61  ;;  %v13100_v39 = vld [vmem:[#allocation9 + $0x6c8] sm:$0xf]  ;;  %v13129_v60 = vor.u32 %v15851_v54, %v13126_v27  ;;  %v13321_v15 = vor.u32 %v15899_v3, %v13318_v5  ;;  %v13222_v61 = vld [vmem:[#allocation9 + $0x7d0] sm:$0xf0]  ;;  %v15824_v5 = vld [vmem:[#allocation9 + $0x61c] sm:$0xf0] }
 0x325   :  { %v13101_v10 = vor.u32 %v15848_v7, %v13100_v39  ;;  %v13004_v54 = vld [vmem:[#allocation9 + $0x608] sm:$0xf]  ;;  %v13029_v27 = vor.u32 %v15830_v49, %v13028_v48  ;;  %v15803_v48 = vld [vmem:[#allocation9 + $0x57c] sm:$0xf]  ;;  %v12934_v49 = vld [vmem:[#allocation9 + $0x590] sm:$0xf0] }
 0x327   :  { %6988 = vmatpush.bf16.msrb.mxu0 %v12261_v22  ;;  %7002 = vmatpush.bf16.msrb.mxu1 %v12453_v34  ;;  %v15893_v22 = vld [vmem:[#allocation9 + $0x84c] sm:$0xf]  ;;  %v13294_v34 = vld [vmem:[#allocation9 + $0x860] sm:$0xf0] }
 0x328   :  { %7072 = vmatpush.bf16.msra.mxu2 %v12265_v28  ;;  %7086 = vmatpush.bf16.msra.mxu3 %v12457_v40  ;;  %v15842_v28 = vld [vmem:[#allocation9 + $0x6ac] sm:$0xf0]  ;;  %v13105_v40 = vor.u32 %v15845_v57, %v13102_v46  ;;  %v13297_v1 = vor.u32 %v15893_v22, %v13294_v34  ;;  %v15767_v57 = vld [vmem:[#allocation9 + $0x45c] sm:$0xf]  ;;  %v12790_v46 = vld [vmem:[#allocation9 + $0x470] sm:$0xf0] }
 0x329   :  { %v15815_v22 = vld [vmem:[#allocation9 + $0x5dc] sm:$0xf]  ;;  %v12982_v34 = vld [vmem:[#allocation9 + $0x5f0] sm:$0xf0] }
 0x32b   :  { %6989 = vmatpush.bf16.msrb.mxu0 %v12237_v13  ;;  %7003 = vmatpush.bf16.msrb.mxu1 %v12429_v32  ;;  %v13077_v32 = vor.u32 %v15842_v28, %v13076_v18  ;;  %v15771_v28 = vld [vmem:[#allocation9 + $0x474] sm:$0xf0] }
 0x32c   :  { %7073 = vmatpush.bf16.msra.mxu2 %v12241_v63  ;;  %7087 = vmatpush.bf16.msra.mxu3 %v12433_v0  ;;  %v13081_v0 = vor.u32 %v15839_v31, %v13078_v41  ;;  %v12793_v31 = vor.u32 %v15767_v57, %v12790_v46 }
 0x32e   :  { %6990 = vmatmul.bf16.vlgmr.msrb.gmra.mxu0 %v16693_v21  ;;  %7004 = vmatmul.bf16.vlgmr.msrb.gmra.mxu1 %v16697_v55 }
 0x32f   :  { %7038 = vmatpush.bf16.msra.mxu0 %v13173_v23  ;;  %7052 = vmatpush.bf16.msra.mxu1 %v13365_v58  ;;  %v13273_v23 = vor.u32 %v15887_v35, %v13270_v12  ;;  %v13244_v58 = vld [vmem:[#allocation9 + $0x7e8] sm:$0xf]  ;;  %v15761_v35 = vld [vmem:[#allocation9 + $0x42c] sm:$0xf]  ;;  %v12766_v12 = vld [vmem:[#allocation9 + $0x440] sm:$0xf0] }
 0x330   :  { %7122 = vmatpush.bf16.msrb.mxu2 %v13177_v16  ;;  %7136 = vmatpush.bf16.msrb.mxu3 %v13369_v30  ;;  %v6851_v29 = vpop.f32.mrf.mxu2  ;;  %v13054_v16 = vld [vmem:[#allocation9 + $0x680] sm:$0xf0]  ;;  %v15881_v30 = vld [vmem:[#allocation9 + $0x7ec] sm:$0xf]  ;;  %v13245_v25 = vor.u32 %v15884_v11, %v13244_v58  ;;  %v12964_v58 = vld [vmem:[#allocation9 + $0x5b0] sm:$0xf] }
 0x331   :  { %7074 = vmatmul.bf16.vlgmr.msra.gmra.mxu2 %v16693_v21  ;;  %7088 = vmatmul.bf16.vlgmr.msra.gmra.mxu3 %v16697_v55  ;;  %v6852_v19 = vadd.f32 %v6851_v29, %v16787_v56  ;;  %v6865_v13 = vpop.f32.mrf.mxu3  ;;  %v13053_v56 = vor.u32 %v15836_v6, %v13052_v14  ;;  %v13057_v47 = vor.u32 %v15833_v8, %v13054_v16  ;;  %v12958_v14 = vld [vmem:[#allocation9 + $0x5c0] sm:$0xf0]  ;;  %v12772_v6 = vld [vmem:[#allocation9 + $0x430] sm:$0xf]  ;;  %v15813_v11 = vld [vmem:[#allocation9 + $0x5c4] sm:$0xf0] }
 0x332   :  { %v13249_v24 = vor.u32 %v15881_v30, %v13246_v26  ;;  %v12985_v29 = vor.u32 %v15815_v22, %v12982_v34  ;;  %v12769_v8 = vor.u32 %v15761_v35, %v12766_v12  ;;  %v15755_v30 = vld [vmem:[#allocation9 + $0x3fc] sm:$0xf]  ;;  %v12742_v26 = vld [vmem:[#allocation9 + $0x410] sm:$0xf0]  ;;  %v12862_v35 = vld [vmem:[#allocation9 + $0x500] sm:$0xf0] }
 0x333   :  { %7039 = vmatpush.bf16.msra.mxu0 %v13149_v44  ;;  %7053 = vmatpush.bf16.msra.mxu1 %v13341_v43  ;;  %v16806_v63 = vadd.f32 %v6865_v13, %v6852_v19  ;;  %v13220_v44 = vld [vmem:[#allocation9 + $0x7b8] sm:$0xf]  ;;  %v15878_v43 = vld [vmem:[#allocation9 + $0x7cc] sm:$0xf0]  ;;  %v15791_v22 = vld [vmem:[#allocation9 + $0x51c] sm:$0xf] }
 0x334   :  { %7123 = vmatpush.bf16.msrb.mxu2 %v13153_v20  ;;  %7137 = vmatpush.bf16.msrb.mxu3 %v13345_v62  ;;  %v13030_v20 = vld [vmem:[#allocation9 + $0x650] sm:$0xf0]  ;;  %v15875_v62 = vld [vmem:[#allocation9 + $0x7bc] sm:$0xf]  ;;  %v13221_v3 = vor.u32 %v15878_v43, %v13220_v44  ;;  %v12940_v44 = vld [vmem:[#allocation9 + $0x580] sm:$0xf] }
 0x335   :  { %v13033_v39 = vor.u32 %v15827_v53, %v13030_v20  ;;  %v13225_v7 = vor.u32 %v15875_v62, %v13222_v61  ;;  %v15807_v43 = vld [vmem:[#allocation9 + $0x594] sm:$0xf0]  ;;  %v12745_v53 = vor.u32 %v15755_v30, %v12742_v26  ;;  %v12937_v20 = vor.u32 %v15803_v48, %v12934_v49  ;;  %v15749_v62 = vld [vmem:[#allocation9 + $0x3cc] sm:$0xf]  ;;  %v12718_v61 = vld [vmem:[#allocation9 + $0x3e0] sm:$0xf0] }
 0x336   :  { %v12886_v34 = vld [vmem:[#allocation9 + $0x530] sm:$0xf0]  ;;  %v12676_v12 = vld [vmem:[#allocation9 + $0x370] sm:$0xf]  ;;  %v12652_v30 = vld [vmem:[#allocation9 + $0x340] sm:$0xf] }
 0x337   :  { %7040 = vmatpush.bf16.msra.mxu0 %v13125_v17  ;;  %7054 = vmatpush.bf16.msra.mxu1 %v13317_v52  ;;  %v13196_v17 = vld [vmem:[#allocation9 + $0x788] sm:$0xf]  ;;  %v15872_v52 = vld [vmem:[#allocation9 + $0x79c] sm:$0xf0]  ;;  %v15735_v26 = vld [vmem:[#allocation9 + $0x354] sm:$0xf0] }
 0x338   :  { %7124 = vmatpush.bf16.msrb.mxu2 %v13129_v60  ;;  %7138 = vmatpush.bf16.msrb.mxu3 %v13321_v15  ;;  %v16808_v36 = vpop.f32.mrf.mxu2  ;;  %v15821_v60 = vld [vmem:[#allocation9 + $0x60c] sm:$0xf]  ;;  %v13006_v15 = vld [vmem:[#allocation9 + $0x620] sm:$0xf0]  ;;  %v13197_v18 = vor.u32 %v15872_v52, %v13196_v17  ;;  %v12724_v17 = vld [vmem:[#allocation9 + $0x3d0] sm:$0xf] }
 0x339   :  { %v16810_v4 = vpop.f32.mrf.mxu3  ;;  %v13009_v33 = vor.u32 %v15821_v60, %v13006_v15  ;;  %v15753_v52 = vld [vmem:[#allocation9 + $0x3e4] sm:$0xf0]  ;;  %v12721_v60 = vor.u32 %v15749_v62, %v12718_v61  ;;  %v15725_v48 = vld [vmem:[#allocation9 + $0x30c] sm:$0xf]  ;;  %v12628_v62 = vld [vmem:[#allocation9 + $0x310] sm:$0xf] }
 0x33a   :  { %v12725_v57 = vor.u32 %v15753_v52, %v12724_v17  ;;  %v15729_v61 = vld [vmem:[#allocation9 + $0x324] sm:$0xf0]  ;;  %v12604_v17 = vld [vmem:[#allocation9 + $0x2e0] sm:$0xf]  ;;  %v15723_v52 = vld [vmem:[#allocation9 + $0x2f4] sm:$0xf0] }
 0x33b   :  { %7041 = vmatpush.bf16.msra.mxu0 %v13101_v10  ;;  %7055 = vmatpush.bf16.msra.mxu1 %v13293_v37  ;;  %v12796_v10 = vld [vmem:[#allocation9 + $0x460] sm:$0xf]  ;;  %v13005_v37 = vor.u32 %v15824_v5, %v13004_v54  ;;  %v12910_v5 = vld [vmem:[#allocation9 + $0x560] sm:$0xf0] }
 0x33c   :  { %7125 = vmatpush.bf16.msrb.mxu2 %v13105_v40  ;;  %7139 = vmatpush.bf16.msrb.mxu3 %v13297_v1  ;;  %v12988_v40 = vld [vmem:[#allocation9 + $0x5e0] sm:$0xf]  ;;  %v15819_v1 = vld [vmem:[#allocation9 + $0x5f4] sm:$0xf0]  ;;  %v12797_v19 = vor.u32 %v15771_v28, %v12796_v10 }
 0x33d   :  { %v12989_v13 = vor.u32 %v15819_v1, %v12988_v40  ;;  %v12700_v10 = vld [vmem:[#allocation9 + $0x3a0] sm:$0xf]  ;;  %v15795_v28 = vld [vmem:[#allocation9 + $0x534] sm:$0xf0]  ;;  %v12697_v40 = vor.u32 %v15743_v51, %v12694_v45  ;;  %v12889_v1 = vor.u32 %v15791_v22, %v12886_v34  ;;  %v15720_v51 = vld [vmem:[#allocation9 + $0x2e4] sm:$0xf]  ;;  %v12605_v34 = vor.u32 %v15723_v52, %v12604_v17 }
 0x33e   :  { %v12606_v45 = vld [vmem:[#allocation9 + $0x2f8] sm:$0xf0]  ;;  %v15648_v17 = vld [vmem:[#allocation9 + $0xa4] sm:$0xf] }
 0x33f   :  { %7042 = vmatpush.bf16.msra.mxu0 %v13077_v32  ;;  %7056 = vmatpush.bf16.msra.mxu1 %v13269_v2  ;;  %v15809_v2 = vld [vmem:[#allocation9 + $0x5ac] sm:$0xf]  ;;  %v12318_v52 = vld [vmem:[#allocation9 + $0xb8] sm:$0xf0] }
 0x340   :  { %7126 = vmatpush.bf16.msrb.mxu2 %v13081_v0  ;;  %7140 = vmatpush.bf16.msrb.mxu3 %v13273_v23  ;;  %v6907_v41 = vpop.f32.mrf.mxu2  ;;  %v15765_v23 = vld [vmem:[#allocation9 + $0x444] sm:$0xf0]  ;;  %v12961_v16 = vor.u32 %v15809_v2, %v12958_v14 }
 0x341   :  { %v6921_v32 = vpop.f32.mrf.mxu3 }
 0x342   :  { %v16812_v0 = vadd.f32 %v6921_v32, %v6907_v41  ;;  %v15785_v41 = vld [vmem:[#allocation9 + $0x4ec] sm:$0xf]  ;;  %v15789_v32 = vld [vmem:[#allocation9 + $0x504] sm:$0xf0] }
 0x343   :  { %7043 = vmatpush.bf16.msra.mxu0 %v13053_v56  ;;  %7057 = vmatpush.bf16.msra.mxu1 %v13245_v25  ;;  %v12773_v56 = vor.u32 %v15765_v23, %v12772_v6  ;;  %v12965_v25 = vor.u32 %v15813_v11, %v12964_v58  ;;  %v12865_v14 = vor.u32 %v15785_v41, %v12862_v35  ;;  %v15731_v6 = vld [vmem:[#allocation9 + $0x33c] sm:$0xf]  ;;  %v12646_v23 = vld [vmem:[#allocation9 + $0x350] sm:$0xf0] }
 0x344   :  { %7127 = vmatpush.bf16.msrb.mxu2 %v13057_v47  ;;  %7141 = vmatpush.bf16.msrb.mxu3 %v13249_v24  ;;  %v12748_v47 = vld [vmem:[#allocation9 + $0x400] sm:$0xf]  ;;  %v15759_v24 = vld [vmem:[#allocation9 + $0x414] sm:$0xf0]  ;;  %v12649_v49 = vor.u32 %v15731_v6, %v12646_v23  ;;  %v15660_v6 = vld [vmem:[#allocation9 + $0x104] sm:$0xf] }
 0x345   :  { %v12749_v54 = vor.u32 %v15759_v24, %v12748_v47  ;;  %v12622_v24 = vld [vmem:[#allocation9 + $0x320] sm:$0xf0]  ;;  %v12366_v23 = vld [vmem:[#allocation9 + $0x118] sm:$0xf0] }
 0x347   :  { %7044 = vmatpush.bf16.msra.mxu0 %v13029_v27  ;;  %7058 = vmatpush.bf16.msra.mxu1 %v13221_v3  ;;  %v12941_v27 = vor.u32 %v15807_v43, %v12940_v44  ;;  %v15797_v3 = vld [vmem:[#allocation9 + $0x54c] sm:$0xf]  ;;  %v12814_v43 = vld [vmem:[#allocation9 + $0x4a0] sm:$0xf0] }
 0x348   :  { %7128 = vmatpush.bf16.msrb.mxu2 %v13033_v39  ;;  %7142 = vmatpush.bf16.msrb.mxu3 %v13225_v7  ;;  %v12916_v39 = vld [vmem:[#allocation9 + $0x550] sm:$0xf]  ;;  %v15801_v7 = vld [vmem:[#allocation9 + $0x564] sm:$0xf0]  ;;  %v12913_v15 = vor.u32 %v15797_v3, %v12910_v5  ;;  %v15773_v44 = vld [vmem:[#allocation9 + $0x48c] sm:$0xf] }
 0x349   :  { %v12917_v46 = vor.u32 %v15801_v7, %v12916_v39  ;;  %v12412_v3 = vld [vmem:[#allocation9 + $0x160] sm:$0xf]  ;;  %v15675_v5 = vld [vmem:[#allocation9 + $0x174] sm:$0xf0]  ;;  %v15672_v39 = vld [vmem:[#allocation9 + $0x164] sm:$0xf]  ;;  %v12625_v7 = vor.u32 %v15725_v48, %v12622_v24 }
 0x34a   :  { %v12413_v22 = vor.u32 %v15675_v5, %v12412_v3  ;;  %v12532_v48 = vld [vmem:[#allocation9 + $0x250] sm:$0xf]  ;;  %v12342_v24 = vld [vmem:[#allocation9 + $0xe8] sm:$0xf0]  ;;  %v12508_v3 = vld [vmem:[#allocation9 + $0x220] sm:$0xf] }
 0x34b   :  { %7045 = vmatpush.bf16.msra.mxu0 %v13005_v37  ;;  %7059 = vmatpush.bf16.msra.mxu1 %v13197_v18  ;;  %v15747_v37 = vld [vmem:[#allocation9 + $0x3b4] sm:$0xf0]  ;;  %v12892_v18 = vld [vmem:[#allocation9 + $0x520] sm:$0xf] }
 0x34c   :  { %7129 = vmatpush.bf16.msrb.mxu2 %v13009_v33  ;;  %7143 = vmatpush.bf16.msrb.mxu3 %v13201_v50  ;;  %v15737_v33 = vld [vmem:[#allocation9 + $0x36c] sm:$0xf]  ;;  %v12670_v50 = vld [vmem:[#allocation9 + $0x380] sm:$0xf0]  ;;  %v15699_v5 = vld [vmem:[#allocation9 + $0x234] sm:$0xf0] }
 0x34d   :  { %v12673_v2 = vor.u32 %v15737_v33, %v12670_v50  ;;  %v15666_v33 = vld [vmem:[#allocation9 + $0x134] sm:$0xf]  ;;  %v12390_v50 = vld [vmem:[#allocation9 + $0x148] sm:$0xf0] }
 0x34e   :  { %7046 = vmatmul.bf16.vlgmr.msra.gmra.mxu0 %v16789_v42  ;;  %7060 = vmatmul.bf16.vlgmr.msra.gmra.mxu1 %v16791_v38 }
 0x34f   :  { %7094 = vmatpush.bf16.msrb.mxu0 %v12793_v31  ;;  %7108 = vmatpush.bf16.msrb.mxu1 %v12985_v29  ;;  %v12701_v31 = vor.u32 %v15747_v37, %v12700_v10  ;;  %v12893_v29 = vor.u32 %v15795_v28, %v12892_v18  ;;  %v12388_v10 = vld [vmem:[#allocation9 + $0x130] sm:$0xf]  ;;  %v15669_v37 = vld [vmem:[#allocation9 + $0x144] sm:$0xf0]  ;;  %v12609_v28 = vor.u32 %v15720_v51, %v12606_v45 }
 0x350   :  { %7178 = vmatpush.bf16.msra.mxu2 %v12797_v19  ;;  %7192 = vmatpush.bf16.msra.mxu3 %v12989_v13  ;;  %v15741_v19 = vld [vmem:[#allocation9 + $0x384] sm:$0xf0]  ;;  %v12868_v13 = vld [vmem:[#allocation9 + $0x4f0] sm:$0xf]  ;;  %v12389_v41 = vor.u32 %v15669_v37, %v12388_v10  ;;  %v15642_v10 = vld [vmem:[#allocation9 + $0x74] sm:$0xf] }
 0x351   :  { %7130 = vmatmul.bf16.vlgmr.msrb.gmra.mxu2 %v16789_v42  ;;  %7144 = vmatmul.bf16.vlgmr.msrb.gmra.mxu3 %v16791_v38  ;;  %v12677_v58 = vor.u32 %v15741_v19, %v12676_v12  ;;  %v12869_v11 = vor.u32 %v15789_v32, %v12868_v13  ;;  %v12364_v12 = vld [vmem:[#allocation9 + $0x100] sm:$0xf]  ;;  %v15663_v19 = vld [vmem:[#allocation9 + $0x114] sm:$0xf0]  ;;  %v12393_v13 = vor.u32 %v15666_v33, %v12390_v50  ;;  %v12292_v51 = vld [vmem:[#allocation9 + $0x70] sm:$0xf] }
 0x352   :  { %v15645_v45 = vld [vmem:[#allocation9 + $0x84] sm:$0xf0]  ;;  %v12294_v37 = vld [vmem:[#allocation9 + $0x88] sm:$0xf0]  ;;  %v12268_v33 = vld [vmem:[#allocation9 + $0x40] sm:$0xf] }
 0x353   :  { %7095 = vmatpush.bf16.msrb.mxu0 %v12769_v8  ;;  %7109 = vmatpush.bf16.msrb.mxu1 %v12961_v16  ;;  %v15779_v8 = vld [vmem:[#allocation9 + $0x4bc] sm:$0xf]  ;;  %v12838_v16 = vld [vmem:[#allocation9 + $0x4d0] sm:$0xf0]  ;;  %v15639_v50 = vld [vmem:[#allocation9 + $0x54] sm:$0xf0] }
 0x354   :  { %7179 = vmatpush.bf16.msra.mxu2 %v12773_v56  ;;  %7193 = vmatpush.bf16.msra.mxu3 %v12965_v25  ;;  %v12844_v56 = vld [vmem:[#allocation9 + $0x4c0] sm:$0xf]  ;;  %v15783_v25 = vld [vmem:[#allocation9 + $0x4d4] sm:$0xf0]  ;;  %v12841_v47 = vor.u32 %v15779_v8, %v12838_v16  ;;  %v12365_v8 = vor.u32 %v15663_v19, %v12364_v12  ;;  %v15636_v12 = vld [vmem:[#allocation9 + $0x44] sm:$0xf] }
 0x355   :  { %v12270_v19 = vld [vmem:[#allocation9 + $0x58] sm:$0xf0] }
 0x357   :  { %7096 = vmatpush.bf16.msrb.mxu0 %v12745_v53  ;;  %7110 = vmatpush.bf16.msrb.mxu1 %v12937_v20  ;;  %v12653_v53 = vor.u32 %v15735_v26, %v12652_v30  ;;  %v12845_v20 = vor.u32 %v15783_v25, %v12844_v56  ;;  %v12340_v30 = vld [vmem:[#allocation9 + $0xd0] sm:$0xf]  ;;  %v15657_v26 = vld [vmem:[#allocation9 + $0xe4] sm:$0xf0]  ;;  %v12369_v56 = vor.u32 %v15660_v6, %v12366_v23 }
 0x358   :  { %7180 = vmatpush.bf16.msra.mxu2 %v12749_v54  ;;  %7194 = vmatpush.bf16.msra.mxu3 %v12941_v27  ;;  %v12820_v54 = vld [vmem:[#allocation9 + $0x490] sm:$0xf]  ;;  %v15777_v27 = vld [vmem:[#allocation9 + $0x4a4] sm:$0xf0] }
 0x359   :  { %v15633_v23 = vld [vmem:[#allocation9 + $0x24] sm:$0xf0] }
 0x35b   :  { %7097 = vmatpush.bf16.msrb.mxu0 %v12721_v60  ;;  %7111 = vmatpush.bf16.msrb.mxu1 %v12913_v15  ;;  %v12817_v60 = vor.u32 %v15773_v44, %v12814_v43  ;;  %v12414_v15 = vld [vmem:[#allocation9 + $0x178] sm:$0xf0]  ;;  %v15702_v44 = vld [vmem:[#allocation9 + $0x254] sm:$0xf]  ;;  %v12534_v43 = vld [vmem:[#allocation9 + $0x268] sm:$0xf0] }
 0x35c   :  { %7181 = vmatpush.bf16.msra.mxu2 %v12725_v57  ;;  %7195 = vmatpush.bf16.msra.mxu3 %v12917_v46  ;;  %v12629_v57 = vor.u32 %v15729_v61, %v12628_v62  ;;  %v12821_v46 = vor.u32 %v15777_v27, %v12820_v54  ;;  %v12417_v18 = vor.u32 %v15672_v39, %v12414_v15  ;;  %v12316_v62 = vld [vmem:[#allocation9 + $0xa0] sm:$0xf]  ;;  %v15651_v61 = vld [vmem:[#allocation9 + $0xb4] sm:$0xf0]  ;;  %v15696_v39 = vld [vmem:[#allocation9 + $0x224] sm:$0xf] }
 0x35d   :  { %v12537_v27 = vor.u32 %v15702_v44, %v12534_v43  ;;  %v12509_v15 = vor.u32 %v15699_v5, %v12508_v3  ;;  %v15864_v44 = vld [vmem:[#allocation9 + $0x764] sm:$0xf]  ;;  %v16824_v5 = vpop.f32.mrf.mxu1 }
 0x35f   :  { %7098 = vmatpush.bf16.msrb.mxu0 %v12697_v40  ;;  %7112 = vmatpush.bf16.msrb.mxu1 %v12889_v1  ;;  %v12580_v40 = vld [vmem:[#allocation9 + $0x2b0] sm:$0xf]  ;;  %v15717_v1 = vld [vmem:[#allocation9 + $0x2c4] sm:$0xf0] }
 0x360   :  { %7182 = vmatpush.bf16.msra.mxu2 %v12701_v31  ;;  %7196 = vmatpush.bf16.msra.mxu3 %v12893_v29  ;;  %v15714_v31 = vld [vmem:[#allocation9 + $0x2b4] sm:$0xf]  ;;  %v12582_v29 = vld [vmem:[#allocation9 + $0x2c8] sm:$0xf0]  ;;  %v12581_v35 = vor.u32 %v15717_v1, %v12580_v40  ;;  %v12293_v40 = vor.u32 %v15645_v45, %v12292_v51  ;;  %v13348_v51 = vld [vmem:[#allocation9 + $0x8b0] sm:$0xf] }
 0x361   :  { %v12585_v32 = vor.u32 %v15714_v31, %v12582_v29  ;;  %v12297_v31 = vor.u32 %v15642_v10, %v12294_v37  ;;  %v15909_v45 = vld [vmem:[#allocation9 + $0x8c4] sm:$0xf0] }
 0x362   :  { %v13349_v37 = vor.u32 %v15909_v45, %v13348_v51  ;;  %v15837_v51 = vld [vmem:[#allocation9 + $0x684] sm:$0xf0] }
 0x363   :  { %7099 = vmatpush.bf16.msrb.mxu0 %v12673_v2  ;;  %7113 = vmatpush.bf16.msrb.mxu1 %v12865_v14  ;;  %v12556_v2 = vld [vmem:[#allocation9 + $0x280] sm:$0xf]  ;;  %v15711_v14 = vld [vmem:[#allocation9 + $0x294] sm:$0xf0] }
 0x364   :  { %7183 = vmatpush.bf16.msra.mxu2 %v12677_v58  ;;  %7197 = vmatpush.bf16.msra.mxu3 %v12869_v11  ;;  %v15708_v58 = vld [vmem:[#allocation9 + $0x284] sm:$0xf]  ;;  %v12558_v11 = vld [vmem:[#allocation9 + $0x298] sm:$0xf0]  ;;  %v12557_v16 = vor.u32 %v15711_v14, %v12556_v2  ;;  %v12244_v2 = vld [vmem:[#allocation9 + $0x10] sm:$0xf]  ;;  %v12269_v14 = vor.u32 %v15639_v50, %v12268_v33 }
 0x365   :  { %v12561_v25 = vor.u32 %v15708_v58, %v12558_v11  ;;  %v12436_v58 = vld [vmem:[#allocation9 + $0x190] sm:$0xf]  ;;  %v15681_v11 = vld [vmem:[#allocation9 + $0x1a4] sm:$0xf0]  ;;  %v12245_v43 = vor.u32 %v15633_v23, %v12244_v2  ;;  %v13324_v50 = vld [vmem:[#allocation9 + $0x880] sm:$0xf] }
 0x366   :  { %v13108_v23 = vld [vmem:[#allocation9 + $0x6d0] sm:$0xf] }
 0x367   :  { %7100 = vmatpush.bf16.msrb.mxu0 %v12649_v49  ;;  %7114 = vmatpush.bf16.msrb.mxu1 %v12841_v47  ;;  %v15705_v49 = vld [vmem:[#allocation9 + $0x264] sm:$0xf0]  ;;  %v15654_v47 = vld [vmem:[#allocation9 + $0xd4] sm:$0xf] }
 0x368   :  { %7184 = vmatpush.bf16.msra.mxu2 %v12653_v53  ;;  %7198 = vmatpush.bf16.msra.mxu3 %v12845_v20  ;;  %v12341_v53 = vor.u32 %v15657_v26, %v12340_v30  ;;  %v12533_v20 = vor.u32 %v15705_v49, %v12532_v48  ;;  %v12345_v54 = vor.u32 %v15654_v47, %v12342_v24  ;;  %v15630_v30 = vld [vmem:[#allocation9 + $0x14] sm:$0xf]  ;;  %v12246_v26 = vld [vmem:[#allocation9 + $0x28] sm:$0xf0]  ;;  %v13180_v48 = vld [vmem:[#allocation9 + $0x760] sm:$0xf] }
 0x369   :  { %v15867_v49 = vld [vmem:[#allocation9 + $0x774] sm:$0xf0]  ;;  %v13372_v47 = vld [vmem:[#allocation9 + $0x8e0] sm:$0xf] }
 0x36a   :  { %v15915_v24 = vld [vmem:[#allocation9 + $0x8f4] sm:$0xf0] }
 0x36b   :  { %7101 = vmatpush.bf16.msrb.mxu0 %v12625_v7  ;;  %7115 = vmatpush.bf16.msrb.mxu1 %v12817_v60  ;;  %v12510_v7 = vld [vmem:[#allocation9 + $0x238] sm:$0xf0]  ;;  %v12317_v60 = vor.u32 %v15651_v61, %v12316_v62  ;;  %v15912_v62 = vld [vmem:[#allocation9 + $0x8e4] sm:$0xf] }
 0x36c   :  { %7185 = vmatpush.bf16.msra.mxu2 %v12629_v57  ;;  %7199 = vmatpush.bf16.msra.mxu3 %v12821_v46  ;;  %v12321_v57 = vor.u32 %v15648_v17, %v12318_v52  ;;  %v12513_v46 = vor.u32 %v15696_v39, %v12510_v7  ;;  %v13374_v61 = vld [vmem:[#allocation9 + $0x8f8] sm:$0xf0]  ;;  %v13181_v17 = vor.u32 %v15867_v49, %v13180_v48  ;;  %v13156_v39 = vld [vmem:[#allocation9 + $0x730] sm:$0xf]  ;;  %v15861_v7 = vld [vmem:[#allocation9 + $0x744] sm:$0xf0] }
 0x36d   :  { %v13373_v52 = vor.u32 %v15915_v24, %v13372_v47  ;;  %v13157_v10 = vor.u32 %v15861_v7, %v13156_v39  ;;  %v15843_v47 = vld [vmem:[#allocation9 + $0x6b4] sm:$0xf0] }
 0x36e   :  { %7102 = vmatmul.bf16.vlgmr.msrb.gmra.mxu0 %v16721_v59  ;;  %7116 = vmatmul.bf16.vlgmr.msrb.gmra.mxu1 %v16723_v9 }
 0x36f   :  { %7150 = vmatpush.bf16.msra.mxu0 %v12413_v22  ;;  %7164 = vmatpush.bf16.msra.mxu1 %v12605_v34  ;;  %v12484_v22 = vld [vmem:[#allocation9 + $0x1f0] sm:$0xf]  ;;  %v15693_v34 = vld [vmem:[#allocation9 + $0x204] sm:$0xf0] }
 0x370   :  { %7234 = vmatpush.bf16.msrb.mxu2 %v12417_v18  ;;  %7248 = vmatpush.bf16.msrb.mxu3 %v12609_v28  ;;  %v15690_v18 = vld [vmem:[#allocation9 + $0x1f4] sm:$0xf]  ;;  %v12486_v28 = vld [vmem:[#allocation9 + $0x208] sm:$0xf0]  ;;  %v12485_v1 = vor.u32 %v15693_v34, %v12484_v22 }
 0x371   :  { %7186 = vmatmul.bf16.vlgmr.msra.gmra.mxu2 %v16721_v59  ;;  %7200 = vmatmul.bf16.vlgmr.msra.gmra.mxu3 %v16723_v9  ;;  %v12489_v29 = vor.u32 %v15690_v18, %v12486_v28  ;;  %v15906_v22 = vld [vmem:[#allocation9 + $0x8b4] sm:$0xf]  ;;  %v13350_v34 = vld [vmem:[#allocation9 + $0x8c8] sm:$0xf0]  ;;  %v13132_v18 = vld [vmem:[#allocation9 + $0x700] sm:$0xf] }
 0x372   :  { %v15855_v28 = vld [vmem:[#allocation9 + $0x714] sm:$0xf0]  ;;  %v13353_v33 = vor.u32 %v15906_v22, %v13350_v34  ;;  %v15885_v22 = vld [vmem:[#allocation9 + $0x804] sm:$0xf0]  ;;  %v15834_v34 = vld [vmem:[#allocation9 + $0x674] sm:$0xf] }
 0x373   :  { %7151 = vmatpush.bf16.msra.mxu0 %v12389_v41  ;;  %7165 = vmatpush.bf16.msra.mxu1 %v12581_v35  ;;  %v12460_v41 = vld [vmem:[#allocation9 + $0x1c0] sm:$0xf]  ;;  %v15687_v35 = vld [vmem:[#allocation9 + $0x1d4] sm:$0xf0] }
 0x374   :  { %7235 = vmatpush.bf16.msrb.mxu2 %v12393_v13  ;;  %7249 = vmatpush.bf16.msrb.mxu3 %v12585_v32  ;;  %v15684_v13 = vld [vmem:[#allocation9 + $0x1c4] sm:$0xf]  ;;  %v12462_v32 = vld [vmem:[#allocation9 + $0x1d8] sm:$0xf0]  ;;  %v12461_v6 = vor.u32 %v15687_v35, %v12460_v41  ;;  %v16828_v41 = vpop.f32.mrf.mxu3 }
 0x375   :  { %v13134_v35 = vld [vmem:[#allocation9 + $0x718] sm:$0xf0] }
 0x377   :  { %7152 = vmatpush.bf16.msra.mxu0 %v12365_v8  ;;  %7166 = vmatpush.bf16.msra.mxu1 %v12557_v16  ;;  %v12273_v8 = vor.u32 %v15636_v12, %v12270_v19  ;;  %v12465_v16 = vor.u32 %v15684_v13, %v12462_v32  ;;  %v15900_v12 = vld [vmem:[#allocation9 + $0x884] sm:$0xf]  ;;  %v13326_v19 = vld [vmem:[#allocation9 + $0x898] sm:$0xf0]  ;;  %v13133_v32 = vor.u32 %v15855_v28, %v13132_v18  ;;  %v13254_v18 = vld [vmem:[#allocation9 + $0x808] sm:$0xf0] }
 0x378   :  { %7236 = vmatpush.bf16.msrb.mxu2 %v12369_v56  ;;  %7250 = vmatpush.bf16.msrb.mxu3 %v12561_v25  ;;  %v15678_v56 = vld [vmem:[#allocation9 + $0x194] sm:$0xf]  ;;  %v12438_v25 = vld [vmem:[#allocation9 + $0x1a8] sm:$0xf0] }
 0x379   :  { %v12441_v3 = vor.u32 %v15678_v56, %v12438_v25  ;;  %v15894_v56 = vld [vmem:[#allocation9 + $0x854] sm:$0xf]  ;;  %v13302_v25 = vld [vmem:[#allocation9 + $0x868] sm:$0xf0] }
 0x37b   :  { %7153 = vmatpush.bf16.msra.mxu0 %v12341_v53  ;;  %7167 = vmatpush.bf16.msra.mxu1 %v12533_v20  ;;  %v12437_v53 = vor.u32 %v15681_v11, %v12436_v58  ;;  %v13182_v20 = vld [vmem:[#allocation9 + $0x778] sm:$0xf0]  ;;  %v15849_v58 = vld [vmem:[#allocation9 + $0x6e4] sm:$0xf0] }
 0x37c   :  { %7237 = vmatpush.bf16.msrb.mxu2 %v12345_v54  ;;  %7251 = vmatpush.bf16.msrb.mxu3 %v12537_v27  ;;  %v16822_v54 = vpop.f32.mrf.mxu0  ;;  %v12249_v27 = vor.u32 %v15630_v30, %v12246_v26  ;;  %v15897_v30 = vld [vmem:[#allocation9 + $0x864] sm:$0xf0]  ;;  %v15846_v26 = vld [vmem:[#allocation9 + $0x6d4] sm:$0xf]  ;;  %v13109_v48 = vor.u32 %v15849_v58, %v13108_v23 }
 0x37f   :  { %7154 = vmatpush.bf16.msra.mxu0 %v12317_v60  ;;  %7168 = vmatpush.bf16.msra.mxu1 %v12509_v15  ;;  %v13185_v60 = vor.u32 %v15864_v44, %v13182_v20  ;;  %v13377_v15 = vor.u32 %v15912_v62, %v13374_v61  ;;  %v13305_v44 = vor.u32 %v15894_v56, %v13302_v25  ;;  %v15891_v20 = vld [vmem:[#allocation9 + $0x834] sm:$0xf0]  ;;  %v15840_v62 = vld [vmem:[#allocation9 + $0x6a4] sm:$0xf] }
 0x380   :  { %7238 = vmatpush.bf16.msrb.mxu2 %v12321_v57  ;;  %7252 = vmatpush.bf16.msrb.mxu3 %v12513_v46  ;;  %v15858_v57 = vld [vmem:[#allocation9 + $0x734] sm:$0xf]  ;;  %v13158_v46 = vld [vmem:[#allocation9 + $0x748] sm:$0xf0] }
 0x383   :  { %7155 = vmatpush.bf16.msra.mxu0 %v12293_v40  ;;  %7169 = vmatpush.bf16.msra.mxu1 %v12485_v1  ;;  %v16826_v40 = vpop.f32.mrf.mxu2  ;;  %v13161_v1 = vor.u32 %v15858_v57, %v13158_v46  ;;  %v13252_v46 = vld [vmem:[#allocation9 + $0x7f0] sm:$0xf] }
 0x384   :  { %7239 = vmatpush.bf16.msrb.mxu2 %v12297_v31  ;;  %7253 = vmatpush.bf16.msrb.mxu3 %v12489_v29  ;;  %v15903_v31 = vld [vmem:[#allocation9 + $0x894] sm:$0xf0]  ;;  %v15852_v29 = vld [vmem:[#allocation9 + $0x704] sm:$0xf] }
 0x385   :  { %v13325_v2 = vor.u32 %v15903_v31, %v13324_v50  ;;  %v13137_v11 = vor.u32 %v15852_v29, %v13134_v35  ;;  %v15831_v50 = vld [vmem:[#allocation9 + $0x654] sm:$0xf0] }
 0x387   :  { %7156 = vmatpush.bf16.msra.mxu0 %v12269_v14  ;;  %7170 = vmatpush.bf16.msra.mxu1 %v12461_v6 }
 0x388   :  { %7240 = vmatpush.bf16.msrb.mxu2 %v12273_v8  ;;  %7254 = vmatpush.bf16.msrb.mxu3 %v12465_v16  ;;  %v13329_v8 = vor.u32 %v15900_v12, %v13326_v19  ;;  %v13300_v16 = vld [vmem:[#allocation9 + $0x850] sm:$0xf]  ;;  %v13228_v12 = vld [vmem:[#allocation9 + $0x7c0] sm:$0xf]  ;;  %v15879_v19 = vld [vmem:[#allocation9 + $0x7d4] sm:$0xf0] }
 0x389   :  { %v13301_v49 = vor.u32 %v15897_v30, %v13300_v16  ;;  %v13012_v30 = vld [vmem:[#allocation9 + $0x610] sm:$0xf] }
 0x38a   :  { %v6879_v13 = vpop.f32.mrf.mxu0 }
 0x38b   :  { %7157 = vmatpush.bf16.msra.mxu0 %v12245_v43  ;;  %7171 = vmatpush.bf16.msra.mxu1 %v12437_v53  ;;  %v6880_v14 = vadd.f32 %v6879_v13, %v16806_v63  ;;  %v6893_v6 = vpop.f32.mrf.mxu1  ;;  %v13084_v63 = vld [vmem:[#allocation9 + $0x6a0] sm:$0xf]  ;;  %v15828_v13 = vld [vmem:[#allocation9 + $0x644] sm:$0xf] }
 0x38c   :  { %7241 = vmatpush.bf16.msrb.mxu2 %v12249_v27  ;;  %7255 = vmatpush.bf16.msrb.mxu3 %v12441_v3  ;;  %v13276_v53 = vld [vmem:[#allocation9 + $0x820] sm:$0xf]  ;;  %v13086_v27 = vld [vmem:[#allocation9 + $0x6b8] sm:$0xf0]  ;;  %v15888_v3 = vld [vmem:[#allocation9 + $0x824] sm:$0xf]  ;;  %v13085_v39 = vor.u32 %v15843_v47, %v13084_v63 }
 0x38d   :  { %v13277_v7 = vor.u32 %v15891_v20, %v13276_v53  ;;  %v13089_v45 = vor.u32 %v15840_v62, %v13086_v27  ;;  %v13014_v63 = vld [vmem:[#allocation9 + $0x628] sm:$0xf0]  ;;  %v15768_v53 = vld [vmem:[#allocation9 + $0x464] sm:$0xf]  ;;  %v12798_v20 = vld [vmem:[#allocation9 + $0x478] sm:$0xf0] }
 0x38e   :  { %7158 = vmatmul.bf16.vlgmr.msra.gmra.mxu0 %v16693_v21  ;;  %7172 = vmatmul.bf16.vlgmr.msra.gmra.mxu1 %v16697_v55  ;;  %v15816_v62 = vld [vmem:[#allocation9 + $0x5e4] sm:$0xf]  ;;  %v12990_v27 = vld [vmem:[#allocation9 + $0x5f8] sm:$0xf0] }
 0x38f   :  { %7206 = vmatpush.bf16.msrb.mxu0 %v13181_v17  ;;  %7220 = vmatpush.bf16.msrb.mxu1 %v13373_v52  ;;  %v13278_v17 = vld [vmem:[#allocation9 + $0x838] sm:$0xf0] }
 0x390   :  { %7290 = vmatpush.bf16.msra.mxu2 %v13185_v60  ;;  %7304 = vmatpush.bf16.msra.mxu3 %v13377_v15  ;;  %v16837_v43 = vpop.f32.mrf.mxu2  ;;  %v13060_v15 = vld [vmem:[#allocation9 + $0x670] sm:$0xf]  ;;  %v13281_v57 = vor.u32 %v15888_v3, %v13278_v17 }
 0x391   :  { %7242 = vmatmul.bf16.vlgmr.msrb.gmra.mxu2 %v16693_v21  ;;  %7256 = vmatmul.bf16.vlgmr.msrb.gmra.mxu3 %v16697_v55  ;;  %v16835_v21 = vadd.f32 %v6893_v6, %v6880_v14  ;;  %v13110_v55 = vld [vmem:[#allocation9 + $0x6e8] sm:$0xf0]  ;;  %v16839_v61 = vpop.f32.mrf.mxu3  ;;  %v13061_v28 = vor.u32 %v15837_v51, %v13060_v15  ;;  %v15876_v14 = vld [vmem:[#allocation9 + $0x7c4] sm:$0xf]  ;;  %v13230_v6 = vld [vmem:[#allocation9 + $0x7d8] sm:$0xf0] }
 0x392   :  { %v13113_v24 = vor.u32 %v15846_v26, %v13110_v55  ;;  %v16841_v52 = vpop.f32.mrf.mxu0  ;;  %v15825_v26 = vld [vmem:[#allocation9 + $0x624] sm:$0xf0]  ;;  %v13204_v55 = vld [vmem:[#allocation9 + $0x790] sm:$0xf]  ;;  %v13233_v25 = vor.u32 %v15876_v14, %v13230_v6 }
 0x393   :  { %7207 = vmatpush.bf16.msrb.mxu0 %v13157_v10  ;;  %7221 = vmatpush.bf16.msrb.mxu1 %v13349_v37  ;;  %v16843_v60 = vpop.f32.mrf.mxu1  ;;  %v13062_v10 = vld [vmem:[#allocation9 + $0x688] sm:$0xf0]  ;;  %v15882_v37 = vld [vmem:[#allocation9 + $0x7f4] sm:$0xf]  ;;  %v13013_v3 = vor.u32 %v15825_v26, %v13012_v30  ;;  %v15469_v30 = vld [vmem:[#allocation7 + $0x404] sm:$0xf0] }
 0x394   :  { %7291 = vmatpush.bf16.msra.mxu2 %v13161_v1  ;;  %7305 = vmatpush.bf16.msra.mxu3 %v13353_v33  ;;  %v13253_v1 = vor.u32 %v15885_v22, %v13252_v46  ;;  %v13036_v33 = vld [vmem:[#allocation9 + $0x640] sm:$0xf]  ;;  %v13065_v31 = vor.u32 %v15834_v34, %v13062_v10  ;;  %v13257_v29 = vor.u32 %v15882_v37, %v13254_v18  ;;  %v14148_v34 = vld [vmem:[#allocation7 + $0x5d0] sm:$0xf]  ;;  %v15529_v10 = vld [vmem:[#allocation7 + $0x5e4] sm:$0xf0] }
 0x395   :  { %v13037_v58 = vor.u32 %v15831_v50, %v13036_v33  ;;  %v12993_v46 = vor.u32 %v15816_v62, %v12990_v27  ;;  %v15810_v33 = vld [vmem:[#allocation9 + $0x5b4] sm:$0xf] }
 0x397   :  { %7208 = vmatpush.bf16.msrb.mxu0 %v13133_v32  ;;  %7222 = vmatpush.bf16.msrb.mxu1 %v13325_v2  ;;  %v13038_v2 = vld [vmem:[#allocation9 + $0x658] sm:$0xf0] }
 0x398   :  { %7292 = vmatpush.bf16.msra.mxu2 %v13137_v11  ;;  %7306 = vmatpush.bf16.msra.mxu3 %v13329_v8  ;;  %v16845_v35 = vpop.f32.mrf.mxu2  ;;  %v13229_v11 = vor.u32 %v15879_v19, %v13228_v12  ;;  %v13041_v56 = vor.u32 %v15828_v13, %v13038_v2  ;;  %v15475_v12 = vld [vmem:[#allocation7 + $0x434] sm:$0xf0]  ;;  %v14149_v19 = vor.u32 %v15529_v10, %v14148_v34  ;;  %v14124_v13 = vld [vmem:[#allocation7 + $0x5a0] sm:$0xf]  ;;  %v15792_v34 = vld [vmem:[#allocation9 + $0x524] sm:$0xf] }
 0x399   :  { %v16847_v32 = vpop.f32.mrf.mxu3  ;;  %v15523_v2 = vld [vmem:[#allocation7 + $0x5b4] sm:$0xf0] }
 0x39a   :  { %v6935_v23 = vpop.f32.mrf.mxu0  ;;  %v14125_v26 = vor.u32 %v15523_v2, %v14124_v13  ;;  %v15738_v2 = vld [vmem:[#allocation9 + $0x374] sm:$0xf] }
 0x39b   :  { %7209 = vmatpush.bf16.msrb.mxu0 %v13109_v48  ;;  %7223 = vmatpush.bf16.msrb.mxu1 %v13301_v49  ;;  %v6936_v8 = vadd.f32 %v6935_v23, %v16812_v0  ;;  %v6949_v16 = vpop.f32.mrf.mxu1  ;;  %v15873_v48 = vld [vmem:[#allocation9 + $0x7a4] sm:$0xf0]  ;;  %v15822_v49 = vld [vmem:[#allocation9 + $0x614] sm:$0xf]  ;;  %v15756_v23 = vld [vmem:[#allocation9 + $0x404] sm:$0xf] }
 0x39c   :  { %7293 = vmatpush.bf16.msra.mxu2 %v13113_v24  ;;  %7307 = vmatpush.bf16.msra.mxu3 %v13305_v44  ;;  %v15870_v24 = vld [vmem:[#allocation9 + $0x794] sm:$0xf]  ;;  %v13206_v44 = vld [vmem:[#allocation9 + $0x7a8] sm:$0xf0]  ;;  %v13205_v17 = vor.u32 %v15873_v48, %v13204_v55  ;;  %v13017_v15 = vor.u32 %v15822_v49, %v13014_v63  ;;  %v14100_v48 = vld [vmem:[#allocation7 + $0x570] sm:$0xf] }
 0x39d   :  { %v6950_v47 = vadd.f32 %v6949_v16, %v6936_v8  ;;  %v13209_v51 = vor.u32 %v15870_v24, %v13206_v44  ;;  %v12942_v8 = vld [vmem:[#allocation9 + $0x598] sm:$0xf0]  ;;  %v13908_v16 = vld [vmem:[#allocation7 + $0x3f0] sm:$0xf]  ;;  %v15517_v49 = vld [vmem:[#allocation7 + $0x584] sm:$0xf0] }
 0x39e   :  { %v12726_v24 = vld [vmem:[#allocation9 + $0x3e8] sm:$0xf0]  ;;  %v15798_v44 = vld [vmem:[#allocation9 + $0x554] sm:$0xf] }
 0x39f   :  { %7210 = vmatpush.bf16.msrb.mxu0 %v13085_v39  ;;  %7224 = vmatpush.bf16.msrb.mxu1 %v13277_v7  ;;  %v6964_v0 = vadd.f32 %v16837_v43, %v6950_v47  ;;  %v13956_v39 = vld [vmem:[#allocation7 + $0x450] sm:$0xf]  ;;  %v15481_v7 = vld [vmem:[#allocation7 + $0x464] sm:$0xf0]  ;;  %v13909_v47 = vor.u32 %v15469_v30, %v13908_v16 }
 0x3a0   :  { %7294 = vmatpush.bf16.msra.mxu2 %v13089_v45  ;;  %7308 = vmatpush.bf16.msra.mxu3 %v13281_v57  ;;  %v16851_v45 = vpop.f32.mrf.mxu2  ;;  %v12801_v57 = vor.u32 %v15768_v53, %v12798_v20  ;;  %v13957_v43 = vor.u32 %v15481_v7, %v13956_v39  ;;  %v12918_v53 = vld [vmem:[#allocation9 + $0x568] sm:$0xf0]  ;;  %v13884_v20 = vld [vmem:[#allocation7 + $0x3c0] sm:$0xf]  ;;  %v15511_v7 = vld [vmem:[#allocation7 + $0x554] sm:$0xf0] }
 0x3a1   :  { %v16853_v22 = vpop.f32.mrf.mxu3  ;;  %v16856_v37 = vadd.f32 %v16839_v61, %v6964_v0  ;;  %v14101_v0 = vor.u32 %v15517_v49, %v14100_v48  ;;  %v14076_v39 = vld [vmem:[#allocation7 + $0x540] sm:$0xf] }
 0x3a2   :  { %v16858_v18 = vpop.f32.mrf.mxu0 }
 0x3a3   :  { %7211 = vmatpush.bf16.msrb.mxu0 %v13061_v28  ;;  %7225 = vmatpush.bf16.msrb.mxu1 %v13253_v1  ;;  %v15762_v28 = vld [vmem:[#allocation9 + $0x434] sm:$0xf]  ;;  %v12774_v1 = vld [vmem:[#allocation9 + $0x448] sm:$0xf0]  ;;  %v16860_v50 = vpop.f32.mrf.mxu1 }
 0x3a4   :  { %7295 = vmatpush.bf16.msra.mxu2 %v13065_v31  ;;  %7309 = vmatpush.bf16.msra.mxu3 %v13257_v29  ;;  %v12966_v31 = vld [vmem:[#allocation9 + $0x5c8] sm:$0xf0]  ;;  %v13932_v29 = vld [vmem:[#allocation7 + $0x420] sm:$0xf]  ;;  %v12777_v61 = vor.u32 %v15762_v28, %v12774_v1  ;;  %v13860_v28 = vld [vmem:[#allocation7 + $0x390] sm:$0xf] }
 0x3a5   :  { %v12969_v14 = vor.u32 %v15810_v33, %v12966_v31  ;;  %v13933_v6 = vor.u32 %v15475_v12, %v13932_v29  ;;  %v15457_v1 = vld [vmem:[#allocation7 + $0x3a4] sm:$0xf0]  ;;  %v14077_v33 = vor.u32 %v15511_v7, %v14076_v39  ;;  %v14052_v29 = vld [vmem:[#allocation7 + $0x510] sm:$0xf]  ;;  %v15774_v7 = vld [vmem:[#allocation9 + $0x494] sm:$0xf] }
 0x3a6   :  { %v15505_v12 = vld [vmem:[#allocation7 + $0x524] sm:$0xf0]  ;;  %v13861_v13 = vor.u32 %v15457_v1, %v13860_v28  ;;  %v15382_v28 = vld [vmem:[#allocation7 + $0x154] sm:$0xf] }
 0x3a7   :  { %7212 = vmatpush.bf16.msrb.mxu0 %v13037_v58  ;;  %7226 = vmatpush.bf16.msrb.mxu1 %v13229_v11  ;;  %v12750_v58 = vld [vmem:[#allocation9 + $0x418] sm:$0xf0]  ;;  %v15804_v11 = vld [vmem:[#allocation9 + $0x584] sm:$0xf]  ;;  %v14053_v30 = vor.u32 %v15505_v12, %v14052_v29  ;;  %v13980_v29 = vld [vmem:[#allocation7 + $0x480] sm:$0xf] }
 0x3a8   :  { %7296 = vmatpush.bf16.msra.mxu2 %v13041_v56  ;;  %7310 = vmatpush.bf16.msra.mxu3 %v13233_v25  ;;  %v12753_v55 = vor.u32 %v15756_v23, %v12750_v58  ;;  %v16866_v56 = vpop.f32.mrf.mxu2  ;;  %v12945_v63 = vor.u32 %v15804_v11, %v12942_v8  ;;  %v12870_v58 = vld [vmem:[#allocation9 + $0x508] sm:$0xf0]  ;;  %v13836_v11 = vld [vmem:[#allocation7 + $0x360] sm:$0xf]  ;;  %v15451_v8 = vld [vmem:[#allocation7 + $0x374] sm:$0xf0] }
 0x3a9   :  { %v16868_v25 = vpop.f32.mrf.mxu3  ;;  %v13837_v49 = vor.u32 %v15451_v8, %v13836_v11  ;;  %v15487_v12 = vld [vmem:[#allocation7 + $0x494] sm:$0xf0]  ;;  %v15338_v8 = vld [vmem:[%s17151_s2 + $0x1c] sm:$0xf0] }
 0x3aa   :  { %17213 = vst [vmem:[#allocation20_spill] sm:$0xff] %v16868_v25  ;;  %v13388_v11 = vld [vmem:[%s17151_s2 + $0x8] sm:$0xf]  ;;  %v14524_v25 = vld [vmem:[#allocation7 + $0x8b0] sm:$0xf] }
 0x3ab   :  { %7213 = vmatpush.bf16.msrb.mxu0 %v13013_v3  ;;  %7227 = vmatpush.bf16.msrb.mxu1 %v13205_v17  ;;  %v6991_v62 = vpop.f32.mrf.mxu0  ;;  %v7005_v27 = vpop.f32.mrf.mxu1 }
 0x3ac   :  { %7297 = vmatpush.bf16.msra.mxu2 %v13017_v15  ;;  %7311 = vmatpush.bf16.msra.mxu3 %v13209_v51  ;;  %v7006_v3 = vadd.f32 %v7005_v27, %v6991_v62  ;;  %v12921_v15 = vor.u32 %v15798_v44, %v12918_v53  ;;  %v13812_v44 = vld [vmem:[#allocation7 + $0x330] sm:$0xf]  ;;  %v15445_v53 = vld [vmem:[#allocation7 + $0x344] sm:$0xf0] }
 0x3ad   :  { %v15493_v27 = vld [vmem:[#allocation7 + $0x4c4] sm:$0xf0]  ;;  %v13813_v39 = vor.u32 %v15445_v53, %v13812_v44  ;;  %v16890_v44 = vor.u32 %v15338_v8, %v13388_v11 }
 0x3ae   :  { %7214 = vmatmul.bf16.vlgmr.msrb.gmra.mxu0 %v16789_v42  ;;  %7228 = vmatmul.bf16.vlgmr.msrb.gmra.mxu1 %v16791_v38  ;;  %v7020_v10 = vadd.f32 %v16851_v45, %v7006_v3  ;;  %v12630_v3 = vld [vmem:[#allocation9 + $0x328] sm:$0xf0] }
 0x3af   :  { %7262 = vmatpush.bf16.msra.mxu0 %v12801_v57  ;;  %7276 = vmatpush.bf16.msra.mxu1 %v12993_v46  ;;  %v15744_v57 = vld [vmem:[#allocation9 + $0x3a4] sm:$0xf]  ;;  %v12702_v46 = vld [vmem:[#allocation9 + $0x3b8] sm:$0xf0] }
 0x3b0   :  { %8816 = vmatpush.bf16.msrb.mxu2 %v13957_v43  ;;  %7312 = vmatmul.bf16.vlgmr.msra.gmra.mxu3 %v16791_v38  ;;  %v15463_v38 = vld [vmem:[#allocation7 + $0x3d4] sm:$0xf0]  ;;  %v12894_v43 = vld [vmem:[#allocation9 + $0x538] sm:$0xf0]  ;;  %v12705_v31 = vor.u32 %v15744_v57, %v12702_v46  ;;  %v13572_v46 = vld [vmem:[#allocation7 + $0x150] sm:$0xf] }
 0x3b1   :  { %7298 = vmatmul.bf16.vlgmr.msra.gmra.mxu2 %v16789_v42  ;;  %8830 = vmatpush.bf16.msrb.mxu3 %v14149_v19  ;;  %v15750_v42 = vld [vmem:[#allocation9 + $0x3d4] sm:$0xf]  ;;  %v13885_v51 = vor.u32 %v15463_v38, %v13884_v20  ;;  %v16872_v19 = vadd.f32 %v16853_v22, %v7020_v10  ;;  %v14028_v22 = vld [vmem:[#allocation7 + $0x4e0] sm:$0xf]  ;;  %v14004_v20 = vld [vmem:[#allocation7 + $0x4b0] sm:$0xf] }
 0x3b2   :  { %v12729_v17 = vor.u32 %v15750_v42, %v12726_v24  ;;  %v15780_v42 = vld [vmem:[#allocation9 + $0x4c4] sm:$0xf]  ;;  %v12846_v24 = vld [vmem:[#allocation9 + $0x4d8] sm:$0xf0]  ;;  %v15439_v57 = vld [vmem:[#allocation7 + $0x314] sm:$0xf0]  ;;  %v14005_v1 = vor.u32 %v15493_v27, %v14004_v20 }
 0x3b3   :  { %7263 = vmatpush.bf16.msra.mxu0 %v12777_v61  ;;  %7277 = vmatpush.bf16.msra.mxu1 %v12969_v14  ;;  %v12897_v61 = vor.u32 %v15792_v34, %v12894_v43  ;;  %v12678_v14 = vld [vmem:[#allocation9 + $0x388] sm:$0xf0]  ;;  %v15385_v34 = vld [vmem:[#allocation7 + $0x164] sm:$0xf0]  ;;  %v13764_v10 = vld [vmem:[#allocation7 + $0x2d0] sm:$0xf] }
 0x3b4   :  { %8817 = vmatpush.bf16.msrb.mxu2 %v13933_v6  ;;  %v15786_v6 = vld [vmem:[#allocation9 + $0x4f4] sm:$0xf]  ;;  %v7075_v45 = vpop.f32.mrf.mxu2  ;;  %v7089_v23 = vpop.f32.mrf.mxu3  ;;  %v15433_v43 = vld [vmem:[#allocation7 + $0x2e4] sm:$0xf0]  ;;  %v13524_v27 = vld [vmem:[#allocation7 + $0xf0] sm:$0xf] }
 0x3b5   :  { %8831 = vmatpush.bf16.msrb.mxu3 %v14125_v26  ;;  %v16874_v16 = vadd.f32 %v7089_v23, %v7075_v45  ;;  %v12681_v26 = vor.u32 %v15738_v2, %v12678_v14  ;;  %v12873_v48 = vor.u32 %v15786_v6, %v12870_v58  ;;  %v15430_v2 = vld [vmem:[#allocation7 + $0x2d4] sm:$0xf]  ;;  %v13766_v14 = vld [vmem:[#allocation7 + $0x2e8] sm:$0xf0]  ;;  %v13548_v6 = vld [vmem:[#allocation7 + $0x120] sm:$0xf]  ;;  %v13573_v45 = vor.u32 %v15385_v34, %v13572_v46 }
 0x3b6   :  { %v13765_v23 = vor.u32 %v15433_v43, %v13764_v10  ;;  %v15379_v58 = vld [vmem:[#allocation7 + $0x134] sm:$0xf0]  ;;  %v13718_v43 = vld [vmem:[#allocation7 + $0x288] sm:$0xf0] }
 0x3b7   :  { %7264 = vmatpush.bf16.msra.mxu0 %v12753_v55  ;;  %7278 = vmatpush.bf16.msra.mxu1 %v12945_v63  ;;  %v15499_v55 = vld [vmem:[#allocation7 + $0x4f4] sm:$0xf0]  ;;  %v15732_v63 = vld [vmem:[#allocation9 + $0x344] sm:$0xf]  ;;  %v13549_v53 = vor.u32 %v15379_v58, %v13548_v6  ;;  %v13476_v58 = vld [vmem:[#allocation7 + $0x90] sm:$0xf] }
 0x3b8   :  { %8818 = vmatpush.bf16.msrb.mxu2 %v13909_v47  ;;  %v12654_v47 = vld [vmem:[#allocation9 + $0x358] sm:$0xf0]  ;;  %v14029_v38 = vor.u32 %v15499_v55, %v14028_v22  ;;  %v15427_v22 = vld [vmem:[#allocation7 + $0x2b4] sm:$0xf0]  ;;  %v15376_v55 = vld [vmem:[#allocation7 + $0x124] sm:$0xf] }
 0x3b9   :  { %8832 = vmatpush.bf16.msrb.mxu3 %v14101_v0  ;;  %v12657_v62 = vor.u32 %v15732_v63, %v12654_v47  ;;  %v15726_v0 = vld [vmem:[#allocation9 + $0x314] sm:$0xf]  ;;  %v15335_v63 = vld [vmem:[%s17151_s2 + $0xc] sm:$0xf] }
 0x3ba   :  { %v13390_v47 = vld [vmem:[%s17151_s2 + $0x20] sm:$0xf0] }
 0x3bb   :  { %7265 = vmatpush.bf16.msra.mxu0 %v12729_v17  ;;  %7279 = vmatpush.bf16.msra.mxu1 %v12921_v15  ;;  %v12849_v17 = vor.u32 %v15780_v42, %v12846_v24  ;;  %v12822_v15 = vld [vmem:[#allocation9 + $0x4a8] sm:$0xf0]  ;;  %v16888_v42 = vpop.f32.mrf.mxu0  ;;  %v13769_v24 = vor.u32 %v15430_v2, %v13766_v14 }
 0x3bc   :  { %8819 = vmatpush.bf16.msrb.mxu2 %v13885_v51  ;;  %v13788_v51 = vld [vmem:[#allocation7 + $0x300] sm:$0xf] }
 0x3bd   :  { %8833 = vmatpush.bf16.msrb.mxu3 %v14077_v33  ;;  %v12633_v33 = vor.u32 %v15726_v0, %v12630_v3  ;;  %v16892_v0 = vpop.f32.mrf.mxu1 }
 0x3bf   :  { %7266 = vmatpush.bf16.msra.mxu0 %v12705_v31  ;;  %7280 = vmatpush.bf16.msra.mxu1 %v12897_v61  ;;  %v13574_v31 = vld [vmem:[#allocation7 + $0x168] sm:$0xf0]  ;;  %v12825_v61 = vor.u32 %v15774_v7, %v12822_v15  ;;  %v15421_v7 = vld [vmem:[#allocation7 + $0x284] sm:$0xf0]  ;;  %v16895_v15 = vor.u32 %v15335_v63, %v13390_v47 }
 0x3c0   :  { %8820 = vmatpush.bf16.msrb.mxu2 %v13861_v13  ;;  %v13789_v13 = vor.u32 %v15439_v57, %v13788_v51  ;;  %v15370_v51 = vld [vmem:[#allocation7 + $0xf4] sm:$0xf]  ;;  %v13526_v57 = vld [vmem:[#allocation7 + $0x108] sm:$0xf0] }
 0x3c1   :  { %8834 = vmatpush.bf16.msrb.mxu3 %v14053_v30  ;;  %v13577_v30 = vor.u32 %v15382_v28, %v13574_v31  ;;  %v13500_v28 = vld [vmem:[#allocation7 + $0xc0] sm:$0xf] }
 0x3c2   :  { %v13692_v31 = vld [vmem:[#allocation7 + $0x240] sm:$0xf] }
 0x3c3   :  { %7267 = vmatpush.bf16.msra.mxu0 %v12681_v26  ;;  %7281 = vmatpush.bf16.msra.mxu1 %v12873_v48  ;;  %v13740_v26 = vld [vmem:[#allocation7 + $0x2a0] sm:$0xf]  ;;  %v13981_v48 = vor.u32 %v15487_v12, %v13980_v29  ;;  %v15415_v29 = vld [vmem:[#allocation7 + $0x254] sm:$0xf0]  ;;  %v13502_v12 = vld [vmem:[#allocation7 + $0xd8] sm:$0xf0] }
 0x3c4   :  { %8821 = vmatpush.bf16.msrb.mxu2 %v13837_v49  ;;  %v13550_v49 = vld [vmem:[#allocation7 + $0x138] sm:$0xf0]  ;;  %v13741_v20 = vor.u32 %v15427_v22, %v13740_v26  ;;  %v13693_v6 = vor.u32 %v15415_v29, %v13692_v31  ;;  %v13668_v26 = vld [vmem:[#allocation7 + $0x210] sm:$0xf]  ;;  %v15409_v22 = vld [vmem:[#allocation7 + $0x224] sm:$0xf0] }
 0x3c5   :  { %8835 = vmatpush.bf16.msrb.mxu3 %v14029_v38  ;;  %v15424_v38 = vld [vmem:[#allocation7 + $0x2a4] sm:$0xf]  ;;  %v13553_v3 = vor.u32 %v15376_v55, %v13550_v49  ;;  %v13478_v49 = vld [vmem:[#allocation7 + $0xa8] sm:$0xf0]  ;;  %v13669_v47 = vor.u32 %v15409_v22, %v13668_v26  ;;  %v14532_v26 = vld [vmem:[#allocation7 + $0x8d0] sm:$0xf] }
 0x3c6   :  { %v13430_v31 = vld [vmem:[#allocation7 + $0x48] sm:$0xf0]  ;;  %v15625_v22 = vld [vmem:[#allocation7 + $0x8e4] sm:$0xf0] }
 0x3c7   :  { %7268 = vmatpush.bf16.msra.mxu0 %v12657_v62  ;;  %7282 = vmatpush.bf16.msra.mxu1 %v12849_v17  ;;  %v13742_v62 = vld [vmem:[#allocation7 + $0x2b8] sm:$0xf0]  ;;  %v15373_v17 = vld [vmem:[#allocation7 + $0x104] sm:$0xf0] }
 0x3c8   :  { %8822 = vmatpush.bf16.msrb.mxu2 %v13813_v39  ;;  %v13716_v39 = vld [vmem:[#allocation7 + $0x270] sm:$0xf]  ;;  %v13745_v46 = vor.u32 %v15424_v38, %v13742_v62  ;;  %v13525_v34 = vor.u32 %v15373_v17, %v13524_v27  ;;  %v15355_v62 = vld [vmem:[#allocation7 + $0x74] sm:$0xf0]  ;;  %v13644_v27 = vld [vmem:[#allocation7 + $0x1e0] sm:$0xf] }
 0x3c9   :  { %8836 = vmatpush.bf16.msrb.mxu3 %v14005_v1  ;;  %v13717_v10 = vor.u32 %v15421_v7, %v13716_v39  ;;  %v13529_v1 = vor.u32 %v15370_v51, %v13526_v57  ;;  %v15352_v17 = vld [vmem:[#allocation7 + $0x64] sm:$0xf]  ;;  %v13454_v39 = vld [vmem:[#allocation7 + $0x78] sm:$0xf0] }
 0x3cb   :  { %7269 = vmatpush.bf16.msra.mxu0 %v12633_v33  ;;  %7283 = vmatpush.bf16.msra.mxu1 %v12825_v61  ;;  %v15367_v33 = vld [vmem:[#allocation7 + $0xd4] sm:$0xf0]  ;;  %v7061_v11 = vpop.f32.mrf.mxu1 }
 0x3cc   :  { %8823 = vmatpush.bf16.msrb.mxu2 %v13789_v13  ;;  %v7047_v13 = vpop.f32.mrf.mxu0  ;;  %v13501_v14 = vor.u32 %v15367_v33, %v13500_v28  ;;  %v13620_v28 = vld [vmem:[#allocation7 + $0x1b0] sm:$0xf]  ;;  %v15346_v33 = vld [vmem:[#allocation7 + $0x34] sm:$0xf] }
 0x3cd   :  { %8837 = vmatpush.bf16.msrb.mxu3 %v13981_v48  ;;  %v7048_v2 = vadd.f32 %v7047_v13, %v16872_v19  ;;  %v15358_v48 = vld [vmem:[#allocation7 + $0x94] sm:$0xf] }
 0x3ce   :  { %7270 = vmatmul.bf16.vlgmr.msra.gmra.mxu0 %v16721_v59  ;;  %7284 = vmatmul.bf16.vlgmr.msra.gmra.mxu1 %v16723_v9  ;;  %v15418_v59 = vld [vmem:[#allocation7 + $0x274] sm:$0xf]  ;;  %v15364_v9 = vld [vmem:[#allocation7 + $0xc4] sm:$0xf]  ;;  %v13481_v38 = vor.u32 %v15358_v48, %v13478_v49 }
 0x3cf   :  { %8788 = vmatpush.bf16.msrb.mxu0 %v13573_v45  ;;  %8802 = vmatpush.bf16.msrb.mxu1 %v13765_v23  ;;  %v13721_v61 = vor.u32 %v15418_v59, %v13718_v43  ;;  %v15412_v45 = vld [vmem:[#allocation7 + $0x244] sm:$0xf]  ;;  %v13694_v23 = vld [vmem:[#allocation7 + $0x258] sm:$0xf0]  ;;  %v13505_v8 = vor.u32 %v15364_v9, %v13502_v12  ;;  %v16901_v55 = vadd.f32 %v7061_v11, %v7048_v2  ;;  %v15349_v43 = vld [vmem:[#allocation7 + $0x44] sm:$0xf0] }
 0x3d0   :  { %8872 = vmatpush.bf16.msra.mxu2 %v13577_v30  ;;  %8838 = vmatmul.bf16.vlgmr.msrb.gmra.mxu3 %v16895_v15  ;;  %v15361_v30 = vld [vmem:[#allocation7 + $0xa4] sm:$0xf0]  ;;  %v13697_v63 = vor.u32 %v15412_v45, %v13694_v23  ;;  %v13457_v59 = vor.u32 %v15352_v17, %v13454_v39  ;;  %v15394_v9 = vld [vmem:[#allocation7 + $0x1b4] sm:$0xf]  ;;  %v13622_v12 = vld [vmem:[#allocation7 + $0x1c8] sm:$0xf0]  ;;  %v13433_v23 = vor.u32 %v15346_v33, %v13430_v31 }
 0x3d1   :  { %8886 = vmatpush.bf16.msra.mxu3 %v13769_v24  ;;  %8824 = vmatmul.bf16.vlgmr.msrb.gmra.mxu2 %v16890_v44  ;;  %17214 = vst [vmem:[#allocation25_spill] sm:$0xff] %v16901_v55  ;;  %v13477_v19 = vor.u32 %v15361_v30, %v13476_v58  ;;  %v15406_v24 = vld [vmem:[#allocation7 + $0x214] sm:$0xf]  ;;  %v15391_v45 = vld [vmem:[#allocation7 + $0x194] sm:$0xf0]  ;;  %v13625_v48 = vor.u32 %v15394_v9, %v13622_v12 }
 0x3d2   :  { %v15340_v58 = vld [vmem:[#allocation7 + $0x4] sm:$0xf]  ;;  %v13406_v11 = vld [vmem:[#allocation7 + $0x18] sm:$0xf0]  ;;  %v15577_v30 = vld [vmem:[#allocation7 + $0x764] sm:$0xf0] }
 0x3d3   :  { %8789 = vmatpush.bf16.msrb.mxu0 %v13549_v53  ;;  %8803 = vmatpush.bf16.msrb.mxu1 %v13741_v20  ;;  %v13670_v53 = vld [vmem:[#allocation7 + $0x228] sm:$0xf0]  ;;  %v13452_v20 = vld [vmem:[#allocation7 + $0x60] sm:$0xf]  ;;  %v15574_v49 = vld [vmem:[#allocation7 + $0x754] sm:$0xf] }
 0x3d4   :  { %8873 = vmatpush.bf16.msra.mxu2 %v13553_v3  ;;  %v15403_v3 = vld [vmem:[#allocation7 + $0x1f4] sm:$0xf0]  ;;  %v13673_v7 = vor.u32 %v15406_v24, %v13670_v53  ;;  %v13453_v51 = vor.u32 %v15355_v62, %v13452_v20  ;;  %v13598_v53 = vld [vmem:[#allocation7 + $0x198] sm:$0xf0]  ;;  %v13380_v20 = vld [vmem:[%s17151_s2] sm:$0xf]  ;;  %v13409_v62 = vor.u32 %v15340_v58, %v13406_v11  ;;  %v16925_v58 = vpop.f32.mrf.mxu1 }
 0x3d5   :  { %8887 = vmatpush.bf16.msra.mxu3 %v13745_v46  ;;  %v13645_v57 = vor.u32 %v15403_v3, %v13644_v27  ;;  %v15400_v46 = vld [vmem:[#allocation7 + $0x1e4] sm:$0xf]  ;;  %v15622_v3 = vld [vmem:[#allocation7 + $0x8d4] sm:$0xf]  ;;  %v14534_v17 = vld [vmem:[#allocation7 + $0x8e8] sm:$0xf0] }
 0x3d6   :  { %v15334_v39 = vld [vmem:[%s17151_s2 + $0x4] sm:$0xf]  ;;  %v15568_v33 = vld [vmem:[#allocation7 + $0x724] sm:$0xf]  ;;  %v14318_v31 = vld [vmem:[#allocation7 + $0x738] sm:$0xf0] }
 0x3d7   :  { %8790 = vmatpush.bf16.msrb.mxu0 %v13525_v34  ;;  %8804 = vmatpush.bf16.msrb.mxu1 %v13717_v10  ;;  %v13646_v34 = vld [vmem:[#allocation7 + $0x1f8] sm:$0xf0]  ;;  %v13428_v10 = vld [vmem:[#allocation7 + $0x30] sm:$0xf]  ;;  %17217 = vst [vmem:[#allocation21_spill] sm:$0xff] %v16925_v58  ;;  %v14321_v11 = vor.u32 %v15568_v33, %v14318_v31 }
 0x3d8   :  { %8874 = vmatpush.bf16.msra.mxu2 %v13529_v1  ;;  %v15397_v1 = vld [vmem:[#allocation7 + $0x1c4] sm:$0xf0]  ;;  %v13649_v29 = vor.u32 %v15400_v46, %v13646_v34  ;;  %v13429_v13 = vor.u32 %v15349_v43, %v13428_v10  ;;  %v14316_v46 = vld [vmem:[#allocation7 + $0x720] sm:$0xf]  ;;  %v15571_v34 = vld [vmem:[#allocation7 + $0x734] sm:$0xf0] }
 0x3d9   :  { %8888 = vmatpush.bf16.msra.mxu3 %v13721_v61  ;;  %v13404_v61 = vld [vmem:[#allocation7] sm:$0xf]  ;;  %v13621_v2 = vor.u32 %v15397_v1, %v13620_v28  ;;  %v15619_v28 = vld [vmem:[#allocation7 + $0x8b4] sm:$0xf0]  ;;  %v14537_v1 = vor.u32 %v15622_v3, %v14534_v17  ;;  %v14317_v12 = vor.u32 %v15571_v34, %v14316_v46  ;;  %v15556_v3 = vld [vmem:[#allocation7 + $0x6c4] sm:$0xf] }
 0x3da   :  { %v14508_v43 = vld [vmem:[#allocation7 + $0x8a0] sm:$0xf]  ;;  %v14270_v17 = vld [vmem:[#allocation7 + $0x6d8] sm:$0xf0]  ;;  %v13748_v58 = vld [vmem:[#allocation7 + $0x2a8] sm:$0xf] }
 0x3db   :  { %8791 = vmatpush.bf16.msrb.mxu0 %v13501_v14  ;;  %8805 = vmatpush.bf16.msrb.mxu1 %v13693_v6  ;;  %v15343_v14 = vld [vmem:[#allocation7 + $0x14] sm:$0xf0]  ;;  %v13596_v6 = vld [vmem:[#allocation7 + $0x180] sm:$0xf]  ;;  %v14273_v31 = vor.u32 %v15556_v3, %v14270_v17  ;;  %v14196_v17 = vld [vmem:[#allocation7 + $0x630] sm:$0xf] }
 0x3dc   :  { %8875 = vmatpush.bf16.msra.mxu2 %v13505_v8  ;;  %v14340_v8 = vld [vmem:[#allocation7 + $0x750] sm:$0xf]  ;;  %v13597_v24 = vor.u32 %v15391_v45, %v13596_v6  ;;  %v14509_v6 = vor.u32 %v15619_v28, %v14508_v43  ;;  %v14550_v55 = vld [vmem:[#allocation7 + $0x8f8] sm:$0xf0] }
 0x3dd   :  { %8889 = vmatpush.bf16.msra.mxu3 %v13697_v63  ;;  %v14342_v63 = vld [vmem:[#allocation7 + $0x768] sm:$0xf0]  ;;  %v14341_v27 = vor.u32 %v15577_v30, %v14340_v8  ;;  %v14292_v45 = vld [vmem:[#allocation7 + $0x6f0] sm:$0xf]  ;;  %v15613_v30 = vld [vmem:[#allocation7 + $0x884] sm:$0xf0] }
 0x3de   :  { %v14484_v8 = vld [vmem:[#allocation7 + $0x870] sm:$0xf] }
 0x3df   :  { %8792 = vmatpush.bf16.msrb.mxu0 %v13477_v19  ;;  %8806 = vmatpush.bf16.msrb.mxu1 %v13669_v47  ;;  %v15388_v19 = vld [vmem:[#allocation7 + $0x184] sm:$0xf]  ;;  %v13405_v47 = vor.u32 %v15343_v14, %v13404_v61  ;;  %v16923_v14 = vpop.f32.mrf.mxu3  ;;  %v14244_v28 = vld [vmem:[#allocation7 + $0x690] sm:$0xf] }
 0x3e0   :  { %8876 = vmatpush.bf16.msra.mxu2 %v13481_v38  ;;  %v15337_v38 = vld [vmem:[%s17151_s2 + $0x14] sm:$0xf0]  ;;  %v13601_v10 = vor.u32 %v15388_v19, %v13598_v53  ;;  %v15616_v61 = vld [vmem:[#allocation7 + $0x8a4] sm:$0xf]  ;;  %17216 = vst [vmem:[#allocation28_spill] sm:$0xff] %v16923_v14 }
 0x3e1   :  { %8890 = vmatpush.bf16.msra.mxu3 %v13673_v7  ;;  %v14533_v7 = vor.u32 %v15625_v22, %v14532_v26  ;;  %v15562_v22 = vld [vmem:[#allocation7 + $0x6f4] sm:$0xf]  ;;  %v14486_v19 = vld [vmem:[#allocation7 + $0x888] sm:$0xf0]  ;;  %v15559_v53 = vld [vmem:[#allocation7 + $0x6d4] sm:$0xf0] }
 0x3e3   :  { %8793 = vmatpush.bf16.msrb.mxu0 %v13453_v51  ;;  %8807 = vmatpush.bf16.msrb.mxu1 %v13645_v57  ;;  %v14345_v51 = vor.u32 %v15574_v49, %v14342_v63  ;;  %v13382_v57 = vld [vmem:[%s17151_s2 + $0x18] sm:$0xf0]  ;;  %v15610_v63 = vld [vmem:[#allocation7 + $0x874] sm:$0xf] }
 0x3e4   :  { %8877 = vmatpush.bf16.msra.mxu2 %v13457_v59  ;;  %v16915_v59 = vor.u32 %v15337_v38, %v13380_v20  ;;  %v16919_v9 = vor.u32 %v15334_v39, %v13382_v57  ;;  %v14460_v38 = vld [vmem:[#allocation7 + $0x840] sm:$0xf]  ;;  %v14462_v57 = vld [vmem:[#allocation7 + $0x858] sm:$0xf0] }
 0x3e5   :  { %8891 = vmatpush.bf16.msra.mxu3 %v13649_v29  ;;  %v16917_v29 = vpop.f32.mrf.mxu0 }
 0x3e6   :  { %17215 = vst [vmem:[#allocation26_spill] sm:$0xff] %v16917_v29  ;;  %v15624_v29 = vld [vmem:[#allocation7 + $0x8e4] sm:$0xf] }
 0x3e7   :  { %8794 = vmatpush.bf16.msrb.mxu0 %v13429_v13  ;;  %8808 = vmatpush.bf16.msrb.mxu1 %v13621_v2  ;;  %v14510_v13 = vld [vmem:[#allocation7 + $0x8b8] sm:$0xf0]  ;;  %v16921_v2 = vpop.f32.mrf.mxu2  ;;  %v7145_v34 = vpop.f32.mrf.mxu3 }
 0x3e8   :  { %8878 = vmatpush.bf16.msra.mxu2 %v13433_v23  ;;  %v15565_v23 = vld [vmem:[#allocation7 + $0x704] sm:$0xf0]  ;;  %v14513_v26 = vor.u32 %v15616_v61, %v14510_v13 }
 0x3e9   :  { %8892 = vmatpush.bf16.msra.mxu3 %v13625_v48  ;;  %v14294_v48 = vld [vmem:[#allocation7 + $0x708] sm:$0xf0]  ;;  %v14293_v49 = vor.u32 %v15565_v23, %v14292_v45  ;;  %v15601_v61 = vld [vmem:[#allocation7 + $0x824] sm:$0xf0]  ;;  %v15550_v45 = vld [vmem:[#allocation7 + $0x694] sm:$0xf] }
 0x3ea   :  { %v14297_v20 = vor.u32 %v15562_v22, %v14294_v48  ;;  %v14246_v23 = vld [vmem:[#allocation7 + $0x6a8] sm:$0xf0]  ;;  %v14220_v22 = vld [vmem:[#allocation7 + $0x660] sm:$0xf]  ;;  %v15547_v48 = vld [vmem:[#allocation7 + $0x674] sm:$0xf0] }
 0x3eb   :  { %8795 = vmatpush.bf16.msrb.mxu0 %v13405_v47  ;;  %8809 = vmatpush.bf16.msrb.mxu1 %v13597_v24  ;;  %v14485_v47 = vor.u32 %v15613_v30, %v14484_v8  ;;  %v14268_v24 = vld [vmem:[#allocation7 + $0x6c0] sm:$0xf]  ;;  %v7117_v33 = vpop.f32.mrf.mxu1  ;;  %v15598_v8 = vld [vmem:[#allocation7 + $0x814] sm:$0xf]  ;;  %v14438_v30 = vld [vmem:[#allocation7 + $0x828] sm:$0xf0] }
 0x3ec   :  { %8879 = vmatpush.bf16.msra.mxu2 %v13409_v62  ;;  %v15607_v62 = vld [vmem:[#allocation7 + $0x854] sm:$0xf0] }
 0x3ed   :  { %8893 = vmatpush.bf16.msra.mxu3 %v13601_v10  ;;  %v7103_v39 = vpop.f32.mrf.mxu0  ;;  %v14461_v43 = vor.u32 %v15607_v62, %v14460_v38  ;;  %v14221_v38 = vor.u32 %v15547_v48, %v14220_v22  ;;  %v15592_v62 = vld [vmem:[#allocation7 + $0x7e4] sm:$0xf]  ;;  %v14150_v22 = vld [vmem:[#allocation7 + $0x5e8] sm:$0xf0] }
 0x3ee   :  { %8796 = vmatmul.bf16.vlgmr.msrb.gmra.mxu0 %v16915_v59  ;;  %8810 = vmatmul.bf16.vlgmr.msrb.gmra.mxu1 %v16919_v9  ;;  %v7104_v10 = vadd.f32 %v7103_v39, %v16874_v16  ;;  %v15541_v39 = vld [vmem:[#allocation7 + $0x644] sm:$0xf0] }
 0x3ef   :  { %8844 = vmatpush.bf16.msra.mxu0 %v14341_v27  ;;  %8858 = vmatpush.bf16.msra.mxu1 %v14533_v7  ;;  %v14489_v27 = vor.u32 %v15610_v63, %v14486_v19  ;;  %v14269_v7 = vor.u32 %v15559_v53, %v14268_v24  ;;  %v7131_v46 = vpop.f32.mrf.mxu2  ;;  %v14412_v63 = vld [vmem:[#allocation7 + $0x7e0] sm:$0xf]  ;;  %v15595_v19 = vld [vmem:[#allocation7 + $0x7f4] sm:$0xf0]  ;;  %v15544_v24 = vld [vmem:[#allocation7 + $0x664] sm:$0xf] }
 0x3f0   :  { %8928 = vmatpush.bf16.msrb.mxu2 %v14345_v51  ;;  %8894 = vmatmul.bf16.vlgmr.msra.gmra.mxu3 %v16919_v9  ;;  %v15604_v51 = vld [vmem:[#allocation7 + $0x844] sm:$0xf]  ;;  %v7118_v13 = vadd.f32 %v7117_v33, %v7104_v10  ;;  %v14222_v53 = vld [vmem:[#allocation7 + $0x678] sm:$0xf0]  ;;  %v14413_v3 = vor.u32 %v15595_v19, %v14412_v63  ;;  %v14198_v10 = vld [vmem:[#allocation7 + $0x648] sm:$0xf0] }
 0x3f1   :  { %8880 = vmatmul.bf16.vlgmr.msra.gmra.mxu2 %v16915_v59  ;;  %8942 = vmatpush.bf16.msrb.mxu3 %v14537_v1  ;;  %v15553_v1 = vld [vmem:[#allocation7 + $0x6a4] sm:$0xf0]  ;;  %v14390_v33 = vld [vmem:[#allocation7 + $0x7c8] sm:$0xf0]  ;;  %v15482_v63 = vld [vmem:[#allocation7 + $0x46c] sm:$0xf0] }
 0x3f2   :  { %v15580_v19 = vld [vmem:[#allocation7 + $0x784] sm:$0xf] }
 0x3f3   :  { %8845 = vmatpush.bf16.msra.mxu0 %v14317_v12  ;;  %8859 = vmatpush.bf16.msra.mxu1 %v14509_v6  ;;  %v14436_v12 = vld [vmem:[#allocation7 + $0x810] sm:$0xf]  ;;  %v14465_v6 = vor.u32 %v15604_v51, %v14462_v57  ;;  %v14225_v51 = vor.u32 %v15544_v24, %v14222_v53  ;;  %v15589_v57 = vld [vmem:[#allocation7 + $0x7c4] sm:$0xf0]  ;;  %v14366_v24 = vld [vmem:[#allocation7 + $0x798] sm:$0xf0] }
 0x3f4   :  { %8929 = vmatpush.bf16.msrb.mxu2 %v14321_v11  ;;  %v14245_v11 = vor.u32 %v15553_v1, %v14244_v28  ;;  %v14437_v16 = vor.u32 %v15601_v61, %v14436_v12  ;;  %v16936_v28 = vpop.f32.mrf.mxu3  ;;  %v15586_v1 = vld [vmem:[#allocation7 + $0x7b4] sm:$0xf]  ;;  %v14197_v12 = vor.u32 %v15541_v39, %v14196_v17  ;;  %v15535_v61 = vld [vmem:[#allocation7 + $0x614] sm:$0xf0]  ;;  %v13396_v53 = vld [vmem:[%s17151_s2 + $0x10] sm:$0xf] }
 0x3f5   :  { %8943 = vmatpush.bf16.msrb.mxu3 %v14513_v26  ;;  %v7132_v26 = vadd.f32 %v7131_v46, %v7118_v13  ;;  %v15538_v46 = vld [vmem:[#allocation7 + $0x634] sm:$0xf]  ;;  %17220 = vst [vmem:[#allocation29_spill] sm:$0xff] %v16936_v28  ;;  %v14364_v13 = vld [vmem:[#allocation7 + $0x780] sm:$0xf]  ;;  %v14393_v48 = vor.u32 %v15586_v1, %v14390_v33 }
 0x3f6   :  { %v15530_v17 = vld [vmem:[#allocation7 + $0x5ec] sm:$0xf0]  ;;  %v15336_v39 = vld [vmem:[%s17151_s2 + $0x14] sm:$0xf]  ;;  %v13774_v28 = vld [vmem:[#allocation7 + $0x2f0] sm:$0xf0] }
 0x3f7   :  { %8846 = vmatpush.bf16.msra.mxu0 %v14293_v49  ;;  %8860 = vmatpush.bf16.msra.mxu1 %v14485_v47  ;;  %v14249_v49 = vor.u32 %v15550_v45, %v14246_v23  ;;  %v14441_v47 = vor.u32 %v15598_v8, %v14438_v30  ;;  %v15532_v23 = vld [vmem:[#allocation7 + $0x604] sm:$0xf]  ;;  %v15478_v8 = vld [vmem:[#allocation7 + $0x454] sm:$0xf]  ;;  %v14201_v30 = vor.u32 %v15538_v46, %v14198_v10  ;;  %v13934_v10 = vld [vmem:[#allocation7 + $0x438] sm:$0xf0] }
 0x3f8   :  { %8930 = vmatpush.bf16.msrb.mxu2 %v14297_v20  ;;  %v16932_v20 = vadd.f32 %v7145_v34, %v7132_v26  ;;  %v13958_v26 = vld [vmem:[#allocation7 + $0x468] sm:$0xf0]  ;;  %v15472_v46 = vld [vmem:[#allocation7 + $0x424] sm:$0xf] }
 0x3f9   :  { %8944 = vmatpush.bf16.msrb.mxu3 %v14489_v27  ;;  %v14414_v27 = vld [vmem:[#allocation7 + $0x7f8] sm:$0xf0] }
 0x3fa   :  { %17218 = vst [vmem:[#allocation22_spill] sm:$0xff] %v16932_v20  ;;  %v14417_v34 = vor.u32 %v15592_v62, %v14414_v27  ;;  %v13961_v27 = vor.u32 %v15478_v8, %v13958_v26  ;;  %v13937_v8 = vor.u32 %v15472_v46, %v13934_v10  ;;  %v15524_v26 = vld [vmem:[#allocation7 + $0x5bc] sm:$0xf0]  ;;  %v15508_v46 = vld [vmem:[#allocation7 + $0x544] sm:$0xf] }
 0x3fb   :  { %8847 = vmatpush.bf16.msra.mxu0 %v14269_v7  ;;  %8861 = vmatpush.bf16.msra.mxu1 %v14461_v43  ;;  %v14388_v7 = vld [vmem:[#allocation7 + $0x7b0] sm:$0xf]  ;;  %v16934_v43 = vpop.f32.mrf.mxu2  ;;  %v14078_v10 = vld [vmem:[#allocation7 + $0x558] sm:$0xf0] }
 0x3fc   :  { %8931 = vmatpush.bf16.msrb.mxu2 %v14273_v31  ;;  %17219 = vst [vmem:[#allocation23_spill] sm:$0xff] %v16934_v43  ;;  %v14172_v31 = vld [vmem:[#allocation7 + $0x600] sm:$0xf]  ;;  %v14389_v45 = vor.u32 %v15589_v57, %v14388_v7  ;;  %v16952_v1 = vpop.f32.mrf.mxu3 }
 0x3fd   :  { %8945 = vmatpush.bf16.msrb.mxu3 %v14465_v6  ;;  %v15583_v6 = vld [vmem:[#allocation7 + $0x794] sm:$0xf0]  ;;  %v13398_v57 = vld [vmem:[%s17151_s2 + $0x28] sm:$0xf0] }
 0x3fe   :  { %v14365_v62 = vor.u32 %v15583_v6, %v14364_v13  ;;  %v15380_v43 = vld [vmem:[#allocation7 + $0x13c] sm:$0xf0] }
 0x3ff   :  { %8848 = vmatpush.bf16.msra.mxu0 %v14245_v11  ;;  %8862 = vmatpush.bf16.msra.mxu1 %v14437_v16  ;;  %v14174_v11 = vld [vmem:[#allocation7 + $0x618] sm:$0xf0]  ;;  %v15526_v16 = vld [vmem:[#allocation7 + $0x5d4] sm:$0xf] }
 0x400   :  { %8932 = vmatpush.bf16.msrb.mxu2 %v14249_v49  ;;  %v13964_v49 = vld [vmem:[#allocation7 + $0x458] sm:$0xf]  ;;  %v14177_v7 = vor.u32 %v15532_v23, %v14174_v11  ;;  %v15476_v23 = vld [vmem:[#allocation7 + $0x43c] sm:$0xf0]  ;;  %v16956_v11 = vor.u32 %v15336_v39, %v13398_v57 }
 0x401   :  { %8946 = vmatpush.bf16.msrb.mxu3 %v14441_v47  ;;  %v14173_v47 = vor.u32 %v15535_v61, %v14172_v31  ;;  %v13965_v33 = vor.u32 %v15482_v63, %v13964_v49  ;;  %v14369_v31 = vor.u32 %v15580_v19, %v14366_v24  ;;  %v14126_v61 = vld [vmem:[#allocation7 + $0x5b8] sm:$0xf0]  ;;  %v15466_v49 = vld [vmem:[#allocation7 + $0x3f4] sm:$0xf]  ;;  %v13910_v63 = vld [vmem:[#allocation7 + $0x408] sm:$0xf0] }
 0x402   :  { %v14102_v24 = vld [vmem:[#allocation7 + $0x588] sm:$0xf0] }
 0x403   :  { %8849 = vmatpush.bf16.msra.mxu0 %v14221_v38  ;;  %8863 = vmatpush.bf16.msra.mxu1 %v14413_v3  ;;  %v15339_v38 = vld [vmem:[%s17151_s2 + $0x24] sm:$0xf0] }
 0x404   :  { %8933 = vmatpush.bf16.msrb.mxu2 %v14225_v51  ;;  %v14156_v3 = vld [vmem:[#allocation7 + $0x5d8] sm:$0xf]  ;;  %v14153_v51 = vor.u32 %v15526_v16, %v14150_v22  ;;  %v16954_v13 = vor.u32 %v15339_v38, %v13396_v53  ;;  %v16958_v16 = vpop.f32.mrf.mxu0  ;;  %v16960_v22 = vpop.f32.mrf.mxu1 }
 0x405   :  { %8947 = vmatpush.bf16.msrb.mxu3 %v14417_v34  ;;  %v16950_v34 = vpop.f32.mrf.mxu2  ;;  %v14157_v6 = vor.u32 %v15530_v17, %v14156_v3  ;;  %17221 = vst [vmem:[#allocation27_spill] sm:$0xff] %v16958_v16  ;;  %v13916_v38 = vld [vmem:[#allocation7 + $0x3f8] sm:$0xf]  ;;  %v15518_v17 = vld [vmem:[#allocation7 + $0x58c] sm:$0xf0] }
 0x406   :  { %17222 = vst [vmem:[#allocation30_spill] sm:$0xff] %v16960_v22  ;;  %v14108_v3 = vld [vmem:[#allocation7 + $0x578] sm:$0xf]  ;;  %v15377_v22 = vld [vmem:[#allocation7 + $0x12c] sm:$0xf] }
 0x407   :  { %8850 = vmatpush.bf16.msra.mxu0 %v14197_v12  ;;  %8864 = vmatpush.bf16.msra.mxu1 %v14389_v45  ;;  %v15520_v12 = vld [vmem:[#allocation7 + $0x5a4] sm:$0xf]  ;;  %v13940_v45 = vld [vmem:[#allocation7 + $0x428] sm:$0xf] }
 0x408   :  { %8934 = vmatpush.bf16.msrb.mxu2 %v14201_v30  ;;  %v14132_v30 = vld [vmem:[#allocation7 + $0x5a8] sm:$0xf]  ;;  %v13941_v19 = vor.u32 %v15476_v23, %v13940_v45 }
 0x409   :  { %8948 = vmatpush.bf16.msrb.mxu3 %v14393_v48  ;;  %v14129_v48 = vor.u32 %v15520_v12, %v14126_v61  ;;  %v14133_v53 = vor.u32 %v15524_v26, %v14132_v30  ;;  %v15464_v12 = vld [vmem:[#allocation7 + $0x3dc] sm:$0xf0]  ;;  %v14084_v23 = vld [vmem:[#allocation7 + $0x548] sm:$0xf] }
 0x40a   :  { %v15573_v16 = vld [vmem:[#allocation7 + $0x744] sm:$0xf0] }
 0x40b   :  { %8851 = vmatpush.bf16.msra.mxu0 %v14173_v47  ;;  %8865 = vmatpush.bf16.msra.mxu1 %v14365_v62  ;;  %v15514_v47 = vld [vmem:[#allocation7 + $0x574] sm:$0xf]  ;;  %v15470_v62 = vld [vmem:[#allocation7 + $0x40c] sm:$0xf0] }
 0x40c   :  { %8935 = vmatpush.bf16.msrb.mxu2 %v14177_v7  ;;  %v14105_v39 = vor.u32 %v15514_v47, %v14102_v24  ;;  %v15460_v7 = vld [vmem:[#allocation7 + $0x3c4] sm:$0xf]  ;;  %v13917_v57 = vor.u32 %v15470_v62, %v13916_v38  ;;  %v7159_v30 = vpop.f32.mrf.mxu0  ;;  %v7173_v26 = vpop.f32.mrf.mxu1  ;;  %v15502_v24 = vld [vmem:[#allocation7 + $0x514] sm:$0xf]  ;;  %v13868_v62 = vld [vmem:[#allocation7 + $0x398] sm:$0xf] }
 0x40d   :  { %8949 = vmatpush.bf16.msrb.mxu3 %v14369_v31  ;;  %v13892_v31 = vld [vmem:[#allocation7 + $0x3c8] sm:$0xf]  ;;  %v16966_v61 = vpop.f32.mrf.mxu2 }
 0x40e   :  { %8852 = vmatmul.bf16.vlgmr.msra.gmra.mxu0 %v16954_v13  ;;  %8866 = vmatmul.bf16.vlgmr.msra.gmra.mxu1 %v16956_v11  ;;  %17223 = vst [vmem:[#allocation24_spill] sm:$0xff] %v16966_v61  ;;  %v13893_v47 = vor.u32 %v15464_v12, %v13892_v31  ;;  %v14030_v31 = vld [vmem:[#allocation7 + $0x4f8] sm:$0xf0]  ;;  %v13582_v61 = vld [vmem:[#allocation7 + $0x170] sm:$0xf0] }
 0x40f   :  { %8900 = vmatpush.bf16.msrb.mxu0 %v13961_v27  ;;  %8914 = vmatpush.bf16.msrb.mxu1 %v14153_v51  ;;  %v13913_v27 = vor.u32 %v15466_v49, %v13910_v63  ;;  %v13886_v51 = vld [vmem:[#allocation7 + $0x3d8] sm:$0xf0]  ;;  %v15454_v49 = vld [vmem:[#allocation7 + $0x394] sm:$0xf]  ;;  %v13862_v63 = vld [vmem:[#allocation7 + $0x3a8] sm:$0xf0] }
 0x410   :  { %8984 = vmatpush.bf16.msra.mxu2 %v13965_v33  ;;  %8950 = vmatmul.bf16.vlgmr.msrb.gmra.mxu3 %v16956_v11  ;;  %v14109_v33 = vor.u32 %v15518_v17, %v14108_v3  ;;  %v13889_v45 = vor.u32 %v15460_v7, %v13886_v51  ;;  %v15458_v3 = vld [vmem:[#allocation7 + $0x3ac] sm:$0xf0]  ;;  %v13865_v17 = vor.u32 %v15454_v49, %v13862_v63  ;;  %v14060_v7 = vld [vmem:[#allocation7 + $0x518] sm:$0xf]  ;;  %v14036_v49 = vld [vmem:[#allocation7 + $0x4e8] sm:$0xf] }
 0x411   :  { %8998 = vmatpush.bf16.msra.mxu3 %v14157_v6  ;;  %8936 = vmatmul.bf16.vlgmr.msrb.gmra.mxu2 %v16954_v13  ;;  %v16968_v6 = vpop.f32.mrf.mxu3 }
 0x412   :  { %17224 = vst [vmem:[#allocation31_spill] sm:$0xff] %v16968_v6  ;;  %v15383_v6 = vld [vmem:[#allocation7 + $0x15c] sm:$0xf] }
 0x413   :  { %8901 = vmatpush.bf16.msrb.mxu0 %v13937_v8  ;;  %8915 = vmatpush.bf16.msrb.mxu1 %v14129_v48  ;;  %v15512_v8 = vld [vmem:[#allocation7 + $0x55c] sm:$0xf0]  ;;  %v14081_v48 = vor.u32 %v15508_v46, %v14078_v10  ;;  %v15448_v46 = vld [vmem:[#allocation7 + $0x364] sm:$0xf]  ;;  %v13838_v10 = vld [vmem:[#allocation7 + $0x378] sm:$0xf0] }
 0x414   :  { %8985 = vmatpush.bf16.msra.mxu2 %v13941_v19  ;;  %v7174_v19 = vadd.f32 %v7173_v26, %v7159_v30  ;;  %v14085_v38 = vor.u32 %v15512_v8, %v14084_v23  ;;  %v15496_v30 = vld [vmem:[#allocation7 + $0x4e4] sm:$0xf]  ;;  %v13844_v23 = vld [vmem:[#allocation7 + $0x368] sm:$0xf]  ;;  %v15452_v8 = vld [vmem:[#allocation7 + $0x37c] sm:$0xf0]  ;;  %v13841_v26 = vor.u32 %v15448_v46, %v13838_v10 }
 0x415   :  { %8999 = vmatpush.bf16.msra.mxu3 %v14133_v53  ;;  %v14054_v53 = vld [vmem:[#allocation7 + $0x528] sm:$0xf0]  ;;  %v15436_v46 = vld [vmem:[#allocation7 + $0x304] sm:$0xf]  ;;  %v13790_v10 = vld [vmem:[#allocation7 + $0x318] sm:$0xf0] }
 0x416   :  { %v14057_v51 = vor.u32 %v15502_v24, %v14054_v53  ;;  %v13814_v24 = vld [vmem:[#allocation7 + $0x348] sm:$0xf0]  ;;  %v13845_v53 = vor.u32 %v15452_v8, %v13844_v23  ;;  %v15440_v23 = vld [vmem:[#allocation7 + $0x31c] sm:$0xf0]  ;;  %v13580_v8 = vld [vmem:[#allocation7 + $0x158] sm:$0xf] }
 0x417   :  { %8902 = vmatpush.bf16.msrb.mxu0 %v13913_v27  ;;  %8916 = vmatpush.bf16.msrb.mxu1 %v14105_v39  ;;  %v7188_v27 = vadd.f32 %v16950_v34, %v7174_v19  ;;  %v15506_v39 = vld [vmem:[#allocation7 + $0x52c] sm:$0xf0]  ;;  %v7243_v34 = vpop.f32.mrf.mxu2  ;;  %v14033_v19 = vor.u32 %v15496_v30, %v14030_v31  ;;  %v13982_v30 = vld [vmem:[#allocation7 + $0x498] sm:$0xf0]  ;;  %v13796_v31 = vld [vmem:[#allocation7 + $0x308] sm:$0xf] }
 0x418   :  { %8986 = vmatpush.bf16.msra.mxu2 %v13917_v57  ;;  %v13869_v57 = vor.u32 %v15458_v3, %v13868_v62  ;;  %v14006_v62 = vld [vmem:[#allocation7 + $0x4c8] sm:$0xf0]  ;;  %v13820_v3 = vld [vmem:[#allocation7 + $0x338] sm:$0xf] }
 0x419   :  { %9000 = vmatpush.bf16.msra.mxu3 %v14109_v33  ;;  %v16972_v12 = vadd.f32 %v16952_v1, %v7188_v27  ;;  %v14061_v33 = vor.u32 %v15506_v39, %v14060_v7  ;;  %v15490_v1 = vld [vmem:[#allocation7 + $0x4b4] sm:$0xf]  ;;  %v15446_v27 = vld [vmem:[#allocation7 + $0x34c] sm:$0xf0] }
 0x41a   :  { %v15494_v39 = vld [vmem:[#allocation7 + $0x4cc] sm:$0xf0] }
 0x41b   :  { %8903 = vmatpush.bf16.msrb.mxu0 %v13889_v45  ;;  %8917 = vmatpush.bf16.msrb.mxu1 %v14081_v48  ;;  %v7257_v45 = vpop.f32.mrf.mxu3  ;;  %v15500_v48 = vld [vmem:[#allocation7 + $0x4fc] sm:$0xf0] }
 0x41c   :  { %8987 = vmatpush.bf16.msra.mxu2 %v13893_v47  ;;  %v16974_v63 = vadd.f32 %v7257_v45, %v7243_v34  ;;  %v15442_v47 = vld [vmem:[#allocation7 + $0x334] sm:$0xf]  ;;  %v15484_v34 = vld [vmem:[#allocation7 + $0x484] sm:$0xf]  ;;  %v15386_v45 = vld [vmem:[#allocation7 + $0x16c] sm:$0xf0] }
 0x41d   :  { %9001 = vmatpush.bf16.msra.mxu3 %v14085_v38  ;;  %v14037_v38 = vor.u32 %v15500_v48, %v14036_v49  ;;  %v13817_v7 = vor.u32 %v15442_v47, %v13814_v24  ;;  %v13772_v49 = vld [vmem:[#allocation7 + $0x2d8] sm:$0xf]  ;;  %v15434_v48 = vld [vmem:[#allocation7 + $0x2ec] sm:$0xf0]  ;;  %v13793_v24 = vor.u32 %v15436_v46, %v13790_v10  ;;  %v15428_v46 = vld [vmem:[#allocation7 + $0x2bc] sm:$0xf0] }
 0x41f   :  { %8904 = vmatpush.bf16.msrb.mxu0 %v13865_v17  ;;  %8918 = vmatpush.bf16.msrb.mxu1 %v14057_v51  ;;  %v14012_v17 = vld [vmem:[#allocation7 + $0x4b8] sm:$0xf]  ;;  %v14009_v51 = vor.u32 %v15490_v1, %v14006_v62  ;;  %v15488_v1 = vld [vmem:[#allocation7 + $0x49c] sm:$0xf0] }
 0x420   :  { %8988 = vmatpush.bf16.msra.mxu2 %v13869_v57  ;;  %v13821_v57 = vor.u32 %v15446_v27, %v13820_v3  ;;  %v13581_v3 = vor.u32 %v15386_v45, %v13580_v8  ;;  %v15431_v27 = vld [vmem:[#allocation7 + $0x2dc] sm:$0xf]  ;;  %v13750_v8 = vld [vmem:[#allocation7 + $0x2c0] sm:$0xf0]  ;;  %v16978_v45 = vpop.f32.mrf.mxu0 }
 0x421   :  { %9002 = vmatpush.bf16.msra.mxu3 %v14061_v33  ;;  %v14013_v33 = vor.u32 %v15494_v39, %v14012_v17  ;;  %v13773_v17 = vor.u32 %v15434_v48, %v13772_v49  ;;  %v13556_v39 = vld [vmem:[#allocation7 + $0x128] sm:$0xf]  ;;  %v13777_v10 = vor.u32 %v15431_v27, %v13774_v28  ;;  %17225 = vst [vmem:[#allocation32_spill] sm:$0xff] %v16978_v45  ;;  %v16980_v28 = vpop.f32.mrf.mxu1  ;;  %v15371_v49 = vld [vmem:[#allocation7 + $0xfc] sm:$0xf] }
 0x422   :  { %17226 = vst [vmem:[#allocation33_spill] sm:$0xff] %v16980_v28  ;;  %v13534_v48 = vld [vmem:[#allocation7 + $0x110] sm:$0xf0]  ;;  %v15365_v27 = vld [vmem:[#allocation7 + $0xcc] sm:$0xf] }
 0x423   :  { %8905 = vmatpush.bf16.msrb.mxu0 %v13841_v26  ;;  %8919 = vmatpush.bf16.msrb.mxu1 %v14033_v19  ;;  %v7245_v26 = vpop.f32.mrf.mxu2  ;;  %v7259_v47 = vpop.f32.mrf.mxu3  ;;  %v13988_v19 = vld [vmem:[#allocation7 + $0x488] sm:$0xf] }
 0x424   :  { %8989 = vmatpush.bf16.msra.mxu2 %v13845_v53  ;;  %v16976_v62 = vadd.f32 %v7259_v47, %v7245_v26  ;;  %v13985_v53 = vor.u32 %v15484_v34, %v13982_v30  ;;  %v13989_v20 = vor.u32 %v15488_v1, %v13988_v19  ;;  %v13557_v34 = vor.u32 %v15380_v43, %v13556_v39  ;;  %v15425_v30 = vld [vmem:[#allocation7 + $0x2ac] sm:$0xf]  ;;  %v13726_v47 = vld [vmem:[#allocation7 + $0x290] sm:$0xf0]  ;;  %v13700_v1 = vld [vmem:[#allocation7 + $0x248] sm:$0xf] }
 0x425   :  { %9003 = vmatpush.bf16.msra.mxu3 %v14037_v38  ;;  %v13797_v38 = vor.u32 %v15440_v23, %v13796_v31  ;;  %v13749_v31 = vor.u32 %v15428_v46, %v13748_v58  ;;  %v15374_v23 = vld [vmem:[#allocation7 + $0x10c] sm:$0xf0]  ;;  %v13753_v43 = vor.u32 %v15425_v30, %v13750_v8  ;;  %v15419_v58 = vld [vmem:[#allocation7 + $0x27c] sm:$0xf]  ;;  %v13537_v19 = vor.u32 %v15371_v49, %v13534_v48  ;;  %v15413_v39 = vld [vmem:[#allocation7 + $0x24c] sm:$0xf] }
 0x426   :  { %v15407_v48 = vld [vmem:[#allocation7 + $0x21c] sm:$0xf] }
 0x427   :  { %8906 = vmatpush.bf16.msrb.mxu0 %v13817_v7  ;;  %8920 = vmatpush.bf16.msrb.mxu1 %v14009_v51  ;;  %v13585_v7 = vor.u32 %v15383_v6, %v13582_v61  ;;  %v13558_v51 = vld [vmem:[#allocation7 + $0x140] sm:$0xf0]  ;;  %v13724_v6 = vld [vmem:[#allocation7 + $0x278] sm:$0xf] }
 0x428   :  { %8990 = vmatpush.bf16.msra.mxu2 %v13821_v57  ;;  %v13532_v57 = vld [vmem:[#allocation7 + $0xf8] sm:$0xf]  ;;  %v13561_v61 = vor.u32 %v15377_v22, %v13558_v51  ;;  %v15368_v22 = vld [vmem:[#allocation7 + $0xdc] sm:$0xf0] }
 0x429   :  { %9004 = vmatpush.bf16.msra.mxu3 %v14013_v33  ;;  %v15422_v33 = vld [vmem:[#allocation7 + $0x28c] sm:$0xf0]  ;;  %v13533_v26 = vor.u32 %v15374_v23, %v13532_v57  ;;  %v13484_v51 = vld [vmem:[#allocation7 + $0x98] sm:$0xf] }
 0x42a   :  { %v15410_v57 = vld [vmem:[#allocation7 + $0x22c] sm:$0xf0] }
 0x42b   :  { %8907 = vmatpush.bf16.msrb.mxu0 %v13793_v24  ;;  %8921 = vmatpush.bf16.msrb.mxu1 %v13985_v53  ;;  %v13725_v24 = vor.u32 %v15422_v33, %v13724_v6  ;;  %v15416_v53 = vld [vmem:[#allocation7 + $0x25c] sm:$0xf0]  ;;  %v7215_v46 = vpop.f32.mrf.mxu0  ;;  %v7229_v23 = vpop.f32.mrf.mxu1  ;;  %v15359_v6 = vld [vmem:[#allocation7 + $0x9c] sm:$0xf]  ;;  %v13486_v33 = vld [vmem:[#allocation7 + $0xb0] sm:$0xf0] }
 0x42c   :  { %8991 = vmatpush.bf16.msra.mxu2 %v13797_v38  ;;  %v13510_v38 = vld [vmem:[#allocation7 + $0xe0] sm:$0xf0]  ;;  %v7216_v30 = vadd.f32 %v7215_v46, %v16972_v12  ;;  %v13489_v12 = vor.u32 %v15359_v6, %v13486_v33  ;;  %v15344_v6 = vld [vmem:[#allocation7 + $0x1c] sm:$0xf0] }
 0x42d   :  { %9005 = vmatpush.bf16.msra.mxu3 %v13989_v20  ;;  %v13508_v20 = vld [vmem:[#allocation7 + $0xc8] sm:$0xf]  ;;  %v13513_v8 = vor.u32 %v15365_v27, %v13510_v38  ;;  %v15401_v27 = vld [vmem:[#allocation7 + $0x1ec] sm:$0xf]  ;;  %v13654_v38 = vld [vmem:[#allocation7 + $0x200] sm:$0xf0] }
 0x42e   :  { %8908 = vmatmul.bf16.vlgmr.msrb.gmra.mxu0 %v16890_v44  ;;  %8922 = vmatmul.bf16.vlgmr.msrb.gmra.mxu1 %v16895_v15 }
 0x42f   :  { %8956 = vmatpush.bf16.msra.mxu0 %v13581_v3  ;;  %8970 = vmatpush.bf16.msra.mxu1 %v13773_v17  ;;  %v13729_v3 = vor.u32 %v15419_v58, %v13726_v47  ;;  %v13509_v17 = vor.u32 %v15368_v22, %v13508_v20  ;;  %v13460_v47 = vld [vmem:[#allocation7 + $0x68] sm:$0xf]  ;;  %v15404_v22 = vld [vmem:[#allocation7 + $0x1fc] sm:$0xf0] }
 0x430   :  { %9040 = vmatpush.bf16.msrb.mxu2 %v13585_v7  ;;  %9006 = vmatmul.bf16.vlgmr.msra.gmra.mxu3 %v16895_v15  ;;  %v13702_v7 = vld [vmem:[#allocation7 + $0x260] sm:$0xf0]  ;;  %v13652_v20 = vld [vmem:[#allocation7 + $0x1e8] sm:$0xf] }
 0x431   :  { %9054 = vmatpush.bf16.msrb.mxu3 %v13777_v10  ;;  %8992 = vmatmul.bf16.vlgmr.msra.gmra.mxu2 %v16890_v44  ;;  %v13701_v10 = vor.u32 %v15416_v53, %v13700_v1  ;;  %v15353_v1 = vld [vmem:[#allocation7 + $0x6c] sm:$0xf]  ;;  %v13462_v53 = vld [vmem:[#allocation7 + $0x80] sm:$0xf0] }
 0x432   :  { %v13465_v46 = vor.u32 %v15353_v1, %v13462_v53  ;;  %v15575_v1 = vld [vmem:[#allocation7 + $0x75c] sm:$0xf] }
 0x433   :  { %8957 = vmatpush.bf16.msra.mxu0 %v13557_v34  ;;  %8971 = vmatpush.bf16.msra.mxu1 %v13749_v31  ;;  %v15362_v34 = vld [vmem:[#allocation7 + $0xac] sm:$0xf0]  ;;  %v13676_v31 = vld [vmem:[#allocation7 + $0x218] sm:$0xf] }
 0x434   :  { %9041 = vmatpush.bf16.msrb.mxu2 %v13561_v61  ;;  %v13705_v61 = vor.u32 %v15413_v39, %v13702_v7  ;;  %v13485_v49 = vor.u32 %v15362_v34, %v13484_v51  ;;  %v13677_v58 = vor.u32 %v15410_v57, %v13676_v31  ;;  %v13436_v39 = vld [vmem:[#allocation7 + $0x38] sm:$0xf]  ;;  %v15350_v7 = vld [vmem:[#allocation7 + $0x4c] sm:$0xf0]  ;;  %v13657_v34 = vor.u32 %v15401_v27, %v13654_v38  ;;  %v15395_v31 = vld [vmem:[#allocation7 + $0x1bc] sm:$0xf] }
 0x435   :  { %9055 = vmatpush.bf16.msrb.mxu3 %v13753_v43  ;;  %v16987_v43 = vadd.f32 %v7229_v23, %v7216_v30  ;;  %v15398_v51 = vld [vmem:[#allocation7 + $0x1cc] sm:$0xf0]  ;;  %v15347_v30 = vld [vmem:[#allocation7 + $0x3c] sm:$0xf]  ;;  %v13437_v57 = vor.u32 %v15350_v7, %v13436_v39  ;;  %v13630_v23 = vld [vmem:[#allocation7 + $0x1d0] sm:$0xf0] }
 0x436   :  { %v15389_v27 = vld [vmem:[#allocation7 + $0x18c] sm:$0xf]  ;;  %v13606_v38 = vld [vmem:[#allocation7 + $0x1a0] sm:$0xf0]  ;;  %v15623_v7 = vld [vmem:[#allocation7 + $0x8dc] sm:$0xf] }
 0x437   :  { %8958 = vmatpush.bf16.msra.mxu0 %v13533_v26  ;;  %8972 = vmatpush.bf16.msra.mxu1 %v13725_v24  ;;  %17227 = vst [vmem:[#allocation34_spill] sm:$0xff] %v16987_v43  ;;  %v13678_v26 = vld [vmem:[#allocation7 + $0x230] sm:$0xf0]  ;;  %v15356_v24 = vld [vmem:[#allocation7 + $0x7c] sm:$0xf0] }
 0x438   :  { %9042 = vmatpush.bf16.msrb.mxu2 %v13537_v19  ;;  %v13681_v19 = vor.u32 %v15407_v48, %v13678_v26  ;;  %v15392_v48 = vld [vmem:[#allocation7 + $0x19c] sm:$0xf0]  ;;  %v15341_v26 = vld [vmem:[#allocation7 + $0xc] sm:$0xf] }
 0x439   :  { %9056 = vmatpush.bf16.msrb.mxu3 %v13729_v3  ;;  %v13461_v3 = vor.u32 %v15356_v24, %v13460_v47  ;;  %v13414_v47 = vld [vmem:[#allocation7 + $0x20] sm:$0xf0]  ;;  %v14348_v24 = vld [vmem:[#allocation7 + $0x758] sm:$0xf]  ;;  %v15620_v43 = vld [vmem:[#allocation7 + $0x8bc] sm:$0xf0] }
 0x43b   :  { %8959 = vmatpush.bf16.msra.mxu0 %v13509_v17  ;;  %8973 = vmatpush.bf16.msra.mxu1 %v13701_v10  ;;  %v13653_v17 = vor.u32 %v15404_v22, %v13652_v20  ;;  %v13628_v10 = vld [vmem:[#allocation7 + $0x1b8] sm:$0xf]  ;;  %v13633_v20 = vor.u32 %v15395_v31, %v13630_v23  ;;  %v15572_v31 = vld [vmem:[#allocation7 + $0x73c] sm:$0xf0]  ;;  %v14516_v23 = vld [vmem:[#allocation7 + $0x8a8] sm:$0xf] }
 0x43c   :  { %9043 = vmatpush.bf16.msrb.mxu2 %v13513_v8  ;;  %v13438_v8 = vld [vmem:[#allocation7 + $0x50] sm:$0xf0]  ;;  %v13629_v33 = vor.u32 %v15398_v51, %v13628_v10  ;;  %v14540_v22 = vld [vmem:[#allocation7 + $0x8d8] sm:$0xf] }
 0x43d   :  { %9057 = vmatpush.bf16.msrb.mxu3 %v13705_v61  ;;  %v13412_v61 = vld [vmem:[#allocation7 + $0x8] sm:$0xf]  ;;  %v14542_v10 = vld [vmem:[#allocation7 + $0x8f0] sm:$0xf0] }
 0x43e   :  { %v13413_v53 = vor.u32 %v15344_v6, %v13412_v61  ;;  %v15569_v61 = vld [vmem:[#allocation7 + $0x72c] sm:$0xf]  ;;  %v14326_v6 = vld [vmem:[#allocation7 + $0x740] sm:$0xf0] }
 0x43f   :  { %8960 = vmatpush.bf16.msra.mxu0 %v13485_v49  ;;  %8974 = vmatpush.bf16.msra.mxu1 %v13677_v58  ;;  %v13604_v49 = vld [vmem:[#allocation7 + $0x188] sm:$0xf]  ;;  %v13441_v58 = vor.u32 %v15347_v30, %v13438_v8  ;;  %v13609_v8 = vor.u32 %v15389_v27, %v13606_v38  ;;  %v14494_v27 = vld [vmem:[#allocation7 + $0x890] sm:$0xf0] }
 0x440   :  { %9044 = vmatpush.bf16.msrb.mxu2 %v13489_v12  ;;  %v15578_v12 = vld [vmem:[#allocation7 + $0x76c] sm:$0xf0]  ;;  %v14324_v30 = vld [vmem:[#allocation7 + $0x728] sm:$0xf] }
 0x441   :  { %9058 = vmatpush.bf16.msrb.mxu3 %v13681_v19  ;;  %v15626_v19 = vld [vmem:[#allocation7 + $0x8ec] sm:$0xf0]  ;;  %v14349_v39 = vor.u32 %v15578_v12, %v14348_v24  ;;  %v14329_v24 = vor.u32 %v15569_v61, %v14326_v6  ;;  %v14252_v6 = vld [vmem:[#allocation7 + $0x698] sm:$0xf] }
 0x442   :  { %v14541_v51 = vor.u32 %v15626_v19, %v14540_v22  ;;  %v15566_v12 = vld [vmem:[#allocation7 + $0x70c] sm:$0xf0]  ;;  %v16991_v19 = vpop.f32.mrf.mxu1 }
 0x443   :  { %8961 = vmatpush.bf16.msra.mxu0 %v13461_v3  ;;  %8975 = vmatpush.bf16.msra.mxu1 %v13653_v17  ;;  %v14350_v3 = vld [vmem:[#allocation7 + $0x770] sm:$0xf0]  ;;  %v13605_v17 = vor.u32 %v15392_v48, %v13604_v49  ;;  %v14518_v49 = vld [vmem:[#allocation7 + $0x8c0] sm:$0xf0]  ;;  %v14325_v48 = vor.u32 %v15572_v31, %v14324_v30  ;;  %v15614_v22 = vld [vmem:[#allocation7 + $0x88c] sm:$0xf0] }
 0x444   :  { %9045 = vmatpush.bf16.msrb.mxu2 %v13465_v46  ;;  %v13417_v46 = vor.u32 %v15341_v26, %v13414_v47  ;;  %v14517_v26 = vor.u32 %v15620_v43, %v14516_v23  ;;  %v16989_v47 = vpop.f32.mrf.mxu0  ;;  %17229 = vst [vmem:[#allocation40_spill] sm:$0xff] %v16991_v19  ;;  %v15611_v43 = vld [vmem:[#allocation7 + $0x87c] sm:$0xf]  ;;  %v15605_v31 = vld [vmem:[#allocation7 + $0x84c] sm:$0xf] }
 0x445   :  { %9059 = vmatpush.bf16.msrb.mxu3 %v13657_v34  ;;  %v14353_v34 = vor.u32 %v15575_v1, %v14350_v3  ;;  %17228 = vst [vmem:[#allocation39_spill] sm:$0xff] %v16989_v47  ;;  %v14302_v3 = vld [vmem:[#allocation7 + $0x710] sm:$0xf0]  ;;  %v14497_v30 = vor.u32 %v15611_v43, %v14494_v27  ;;  %v14470_v23 = vld [vmem:[#allocation7 + $0x860] sm:$0xf0] }
 0x446   :  { %v14446_v43 = vld [vmem:[#allocation7 + $0x830] sm:$0xf0]  ;;  %v15521_v19 = vld [vmem:[#allocation7 + $0x5ac] sm:$0xf] }
 0x447   :  { %8962 = vmatpush.bf16.msra.mxu0 %v13437_v57  ;;  %8976 = vmatpush.bf16.msra.mxu1 %v13629_v33  ;;  %v14545_v57 = vor.u32 %v15623_v7, %v14542_v10  ;;  %v15617_v33 = vld [vmem:[#allocation7 + $0x8ac] sm:$0xf]  ;;  %v15560_v10 = vld [vmem:[#allocation7 + $0x6dc] sm:$0xf0] }
 0x448   :  { %9046 = vmatpush.bf16.msrb.mxu2 %v13441_v58  ;;  %v14300_v58 = vld [vmem:[#allocation7 + $0x6f8] sm:$0xf]  ;;  %v14521_v1 = vor.u32 %v15617_v33, %v14518_v49 }
 0x449   :  { %9060 = vmatpush.bf16.msrb.mxu3 %v13633_v20  ;;  %v14492_v20 = vld [vmem:[#allocation7 + $0x878] sm:$0xf]  ;;  %v14301_v38 = vor.u32 %v15566_v12, %v14300_v58  ;;  %v15602_v58 = vld [vmem:[#allocation7 + $0x82c] sm:$0xf0] }
 0x44b   :  { %8963 = vmatpush.bf16.msra.mxu0 %v13413_v53  ;;  %8977 = vmatpush.bf16.msra.mxu1 %v13605_v17  ;;  %v15563_v53 = vld [vmem:[#allocation7 + $0x6fc] sm:$0xf]  ;;  %v14493_v17 = vor.u32 %v15614_v22, %v14492_v20  ;;  %v7285_v12 = vpop.f32.mrf.mxu1  ;;  %v14473_v20 = vor.u32 %v15605_v31, %v14470_v23  ;;  %v14230_v31 = vld [vmem:[#allocation7 + $0x680] sm:$0xf0]  ;;  %v15593_v23 = vld [vmem:[#allocation7 + $0x7ec] sm:$0xf] }
 0x44c   :  { %9047 = vmatpush.bf16.msrb.mxu2 %v13417_v46  ;;  %v14305_v7 = vor.u32 %v15563_v53, %v14302_v3  ;;  %v14468_v46 = vld [vmem:[#allocation7 + $0x848] sm:$0xf]  ;;  %v7271_v33 = vpop.f32.mrf.mxu0  ;;  %v15551_v22 = vld [vmem:[#allocation7 + $0x69c] sm:$0xf]  ;;  %v7299_v53 = vpop.f32.mrf.mxu2 }
 0x44d   :  { %9061 = vmatpush.bf16.msrb.mxu3 %v13609_v8  ;;  %v14278_v8 = vld [vmem:[#allocation7 + $0x6e0] sm:$0xf0]  ;;  %v15599_v3 = vld [vmem:[#allocation7 + $0x81c] sm:$0xf] }
 0x44e   :  { %8964 = vmatmul.bf16.vlgmr.msra.gmra.mxu0 %v16915_v59  ;;  %8978 = vmatmul.bf16.vlgmr.msra.gmra.mxu1 %v16919_v9 }
 0x44f   :  { %9012 = vmatpush.bf16.msrb.mxu0 %v14349_v39  ;;  %9026 = vmatpush.bf16.msrb.mxu1 %v14541_v51  ;;  %v14276_v39 = vld [vmem:[#allocation7 + $0x6c8] sm:$0xf]  ;;  %v15608_v51 = vld [vmem:[#allocation7 + $0x85c] sm:$0xf0] }
 0x450   :  { %9096 = vmatpush.bf16.msra.mxu2 %v14353_v34  ;;  %9062 = vmatmul.bf16.vlgmr.msrb.gmra.mxu3 %v16919_v9  ;;  %v15557_v34 = vld [vmem:[#allocation7 + $0x6cc] sm:$0xf]  ;;  %v14469_v61 = vor.u32 %v15608_v51, %v14468_v46  ;;  %v15548_v46 = vld [vmem:[#allocation7 + $0x67c] sm:$0xf0]  ;;  %v14420_v51 = vld [vmem:[#allocation7 + $0x7e8] sm:$0xf] }
 0x451   :  { %9110 = vmatpush.bf16.msra.mxu3 %v14545_v57  ;;  %9048 = vmatmul.bf16.vlgmr.msrb.gmra.mxu2 %v16915_v59  ;;  %v14277_v57 = vor.u32 %v15560_v10, %v14276_v39  ;;  %v14281_v49 = vor.u32 %v15557_v34, %v14278_v8  ;;  %v14228_v39 = vld [vmem:[#allocation7 + $0x668] sm:$0xf]  ;;  %v14449_v34 = vor.u32 %v15599_v3, %v14446_v43  ;;  %v15545_v8 = vld [vmem:[#allocation7 + $0x66c] sm:$0xf]  ;;  %v15587_v43 = vld [vmem:[#allocation7 + $0x7bc] sm:$0xf] }
 0x453   :  { %9013 = vmatpush.bf16.msrb.mxu0 %v14325_v48  ;;  %9027 = vmatpush.bf16.msrb.mxu1 %v14517_v26  ;;  %v15554_v48 = vld [vmem:[#allocation7 + $0x6ac] sm:$0xf0]  ;;  %v14444_v26 = vld [vmem:[#allocation7 + $0x818] sm:$0xf]  ;;  %v7287_v3 = vpop.f32.mrf.mxu1 }
 0x454   :  { %9097 = vmatpush.bf16.msra.mxu2 %v14329_v24  ;;  %v7272_v24 = vadd.f32 %v7271_v33, %v16974_v63  ;;  %v14422_v33 = vld [vmem:[#allocation7 + $0x800] sm:$0xf0] }
 0x455   :  { %9111 = vmatpush.bf16.msra.mxu3 %v14521_v1  ;;  %v14254_v1 = vld [vmem:[#allocation7 + $0x6b0] sm:$0xf0] }
 0x456   :  { %v7286_v27 = vadd.f32 %v7285_v12, %v7272_v24  ;;  %v14257_v10 = vor.u32 %v15551_v22, %v14254_v1  ;;  %v14396_v24 = vld [vmem:[#allocation7 + $0x7b8] sm:$0xf]  ;;  %v15590_v12 = vld [vmem:[#allocation7 + $0x7cc] sm:$0xf0]  ;;  %v14425_v22 = vor.u32 %v15593_v23, %v14422_v33  ;;  %v15539_v1 = vld [vmem:[#allocation7 + $0x63c] sm:$0xf] }
 0x457   :  { %9014 = vmatpush.bf16.msrb.mxu0 %v14301_v38  ;;  %9028 = vmatpush.bf16.msrb.mxu1 %v14493_v17  ;;  %v14253_v38 = vor.u32 %v15554_v48, %v14252_v6  ;;  %v14445_v17 = vor.u32 %v15602_v58, %v14444_v26  ;;  %v14204_v6 = vld [vmem:[#allocation7 + $0x638] sm:$0xf]  ;;  %v14233_v26 = vor.u32 %v15545_v8, %v14230_v31  ;;  %v15542_v58 = vld [vmem:[#allocation7 + $0x64c] sm:$0xf0]  ;;  %v15479_v23 = vld [vmem:[#allocation7 + $0x45c] sm:$0xf] }
 0x458   :  { %9098 = vmatpush.bf16.msra.mxu2 %v14305_v7  ;;  %v7313_v7 = vpop.f32.mrf.mxu3  ;;  %v7300_v63 = vadd.f32 %v7299_v53, %v7286_v27  ;;  %v14206_v53 = vld [vmem:[#allocation7 + $0x650] sm:$0xf0] }
 0x459   :  { %9112 = vmatpush.bf16.msra.mxu3 %v14497_v30  ;;  %v15596_v30 = vld [vmem:[#allocation7 + $0x7fc] sm:$0xf0]  ;;  %v14398_v27 = vld [vmem:[#allocation7 + $0x7d0] sm:$0xf0] }
 0x45a   :  { %v16998_v48 = vadd.f32 %v7313_v7, %v7300_v63  ;;  %v14180_v7 = vld [vmem:[#allocation7 + $0x608] sm:$0xf]  ;;  %v15584_v63 = vld [vmem:[#allocation7 + $0x79c] sm:$0xf0]  ;;  %v14401_v31 = vor.u32 %v15587_v43, %v14398_v27  ;;  %v13966_v33 = vld [vmem:[#allocation7 + $0x470] sm:$0xf0] }
 0x45b   :  { %9015 = vmatpush.bf16.msrb.mxu0 %v14277_v57  ;;  %9029 = vmatpush.bf16.msrb.mxu1 %v14469_v61  ;;  %v14229_v57 = vor.u32 %v15548_v46, %v14228_v39  ;;  %v14421_v61 = vor.u32 %v15596_v30, %v14420_v51  ;;  %v14397_v39 = vor.u32 %v15590_v12, %v14396_v24  ;;  %v14372_v46 = vld [vmem:[#allocation7 + $0x788] sm:$0xf]  ;;  %v7301_v51 = vpop.f32.mrf.mxu2  ;;  %v15581_v12 = vld [vmem:[#allocation7 + $0x78c] sm:$0xf]  ;;  %v15531_v43 = vld [vmem:[#allocation7 + $0x5f4] sm:$0xf0] }
 0x45c   :  { %9099 = vmatpush.bf16.msra.mxu2 %v14281_v49  ;;  %17230 = vst [vmem:[#allocation42_spill] sm:$0xff] %v16998_v48  ;;  %v7273_v49 = vpop.f32.mrf.mxu0  ;;  %v14209_v30 = vor.u32 %v15539_v1, %v14206_v53  ;;  %v14373_v24 = vor.u32 %v15584_v63, %v14372_v46  ;;  %v13942_v48 = vld [vmem:[#allocation7 + $0x440] sm:$0xf0]  ;;  %v15525_v63 = vld [vmem:[#allocation7 + $0x5c4] sm:$0xf0] }
 0x45d   :  { %9113 = vmatpush.bf16.msra.mxu3 %v14473_v20  ;;  %v7274_v20 = vadd.f32 %v7273_v49, %v16976_v62  ;;  %v14182_v62 = vld [vmem:[#allocation7 + $0x620] sm:$0xf0]  ;;  %v15527_v49 = vld [vmem:[#allocation7 + $0x5dc] sm:$0xf] }
 0x45f   :  { %9016 = vmatpush.bf16.msrb.mxu0 %v14253_v38  ;;  %9030 = vmatpush.bf16.msrb.mxu1 %v14445_v17  ;;  %v7288_v38 = vadd.f32 %v7287_v3, %v7274_v20  ;;  %v14205_v17 = vor.u32 %v15542_v58, %v14204_v6  ;;  %v15483_v6 = vld [vmem:[#allocation7 + $0x474] sm:$0xf0]  ;;  %v13969_v3 = vor.u32 %v15479_v23, %v13966_v33  ;;  %v15515_v23 = vld [vmem:[#allocation7 + $0x57c] sm:$0xf]  ;;  %v14110_v33 = vld [vmem:[#allocation7 + $0x590] sm:$0xf0] }
 0x460   :  { %9100 = vmatpush.bf16.msra.mxu2 %v14257_v10  ;;  %v15536_v10 = vld [vmem:[#allocation7 + $0x61c] sm:$0xf0]  ;;  %v7315_v20 = vpop.f32.mrf.mxu3 }
 0x461   :  { %9114 = vmatpush.bf16.msra.mxu3 %v14449_v34  ;;  %v15533_v34 = vld [vmem:[#allocation7 + $0x60c] sm:$0xf]  ;;  %v7302_v8 = vadd.f32 %v7301_v51, %v7288_v38  ;;  %v14181_v58 = vor.u32 %v15536_v10, %v14180_v7  ;;  %v15477_v7 = vld [vmem:[#allocation7 + $0x444] sm:$0xf0] }
 0x462   :  { %v14185_v53 = vor.u32 %v15533_v34, %v14182_v62  ;;  %v15473_v51 = vld [vmem:[#allocation7 + $0x42c] sm:$0xf] }
 0x463   :  { %9017 = vmatpush.bf16.msrb.mxu0 %v14229_v57  ;;  %9031 = vmatpush.bf16.msrb.mxu1 %v14421_v61  ;;  %v14158_v57 = vld [vmem:[#allocation7 + $0x5f0] sm:$0xf0]  ;;  %v13972_v61 = vld [vmem:[#allocation7 + $0x460] sm:$0xf]  ;;  %v17001_v1 = vadd.f32 %v7315_v20, %v7302_v8  ;;  %v13945_v46 = vor.u32 %v15473_v51, %v13942_v48  ;;  %v15467_v8 = vld [vmem:[#allocation7 + $0x3fc] sm:$0xf] }
 0x464   :  { %9101 = vmatpush.bf16.msra.mxu2 %v14233_v26  ;;  %v14374_v26 = vld [vmem:[#allocation7 + $0x7a0] sm:$0xf0]  ;;  %v14161_v27 = vor.u32 %v15527_v49, %v14158_v57  ;;  %v13973_v38 = vor.u32 %v15483_v6, %v13972_v61  ;;  %v13924_v49 = vld [vmem:[#allocation7 + $0x400] sm:$0xf]  ;;  %v15471_v20 = vld [vmem:[#allocation7 + $0x414] sm:$0xf0] }
 0x465   :  { %9115 = vmatpush.bf16.msra.mxu3 %v14425_v22  ;;  %17231 = vst [vmem:[#allocation35_spill] sm:$0xff] %v17001_v1  ;;  %v14164_v22 = vld [vmem:[#allocation7 + $0x5e0] sm:$0xf]  ;;  %v14377_v47 = vor.u32 %v15581_v12, %v14374_v26  ;;  %v15519_v6 = vld [vmem:[#allocation7 + $0x594] sm:$0xf0] }
 0x466   :  { %v14165_v10 = vor.u32 %v15531_v43, %v14164_v22  ;;  %v14116_v61 = vld [vmem:[#allocation7 + $0x580] sm:$0xf]  ;;  %v15509_v12 = vld [vmem:[#allocation7 + $0x54c] sm:$0xf]  ;;  %v14086_v26 = vld [vmem:[#allocation7 + $0x560] sm:$0xf0] }
 0x467   :  { %9018 = vmatpush.bf16.msrb.mxu0 %v14205_v17  ;;  %9032 = vmatpush.bf16.msrb.mxu1 %v14397_v39  ;;  %v14134_v17 = vld [vmem:[#allocation7 + $0x5c0] sm:$0xf0]  ;;  %v13948_v39 = vld [vmem:[#allocation7 + $0x430] sm:$0xf]  ;;  %v14117_v22 = vor.u32 %v15519_v6, %v14116_v61  ;;  %v14089_v51 = vor.u32 %v15509_v12, %v14086_v26  ;;  %v15453_v6 = vld [vmem:[#allocation7 + $0x384] sm:$0xf0] }
 0x468   :  { %9102 = vmatpush.bf16.msra.mxu2 %v14209_v30  ;;  %v14140_v30 = vld [vmem:[#allocation7 + $0x5b0] sm:$0xf]  ;;  %v14137_v34 = vor.u32 %v15521_v19, %v14134_v17  ;;  %v13949_v62 = vor.u32 %v15477_v7, %v13948_v39  ;;  %v14113_v19 = vor.u32 %v15515_v23, %v14110_v33  ;;  %v15455_v39 = vld [vmem:[#allocation7 + $0x39c] sm:$0xf]  ;;  %v13870_v7 = vld [vmem:[#allocation7 + $0x3b0] sm:$0xf0] }
 0x469   :  { %9116 = vmatpush.bf16.msra.mxu3 %v14401_v31  ;;  %v13918_v31 = vld [vmem:[#allocation7 + $0x410] sm:$0xf0]  ;;  %v14141_v57 = vor.u32 %v15525_v63, %v14140_v30  ;;  %v13876_v30 = vld [vmem:[#allocation7 + $0x3a0] sm:$0xf]  ;;  %v15459_v63 = vld [vmem:[#allocation7 + $0x3b4] sm:$0xf0] }
 0x46a   :  { %v13921_v48 = vor.u32 %v15467_v8, %v13918_v31  ;;  %v14068_v8 = vld [vmem:[#allocation7 + $0x520] sm:$0xf]  ;;  %v15507_v31 = vld [vmem:[#allocation7 + $0x534] sm:$0xf0]  ;;  %v13877_v33 = vor.u32 %v15459_v63, %v13876_v30  ;;  %v13852_v61 = vld [vmem:[#allocation7 + $0x370] sm:$0xf] }
 0x46b   :  { %9019 = vmatpush.bf16.msrb.mxu0 %v14181_v58  ;;  %9033 = vmatpush.bf16.msrb.mxu1 %v14373_v24  ;;  %v13925_v58 = vor.u32 %v15471_v20, %v13924_v49  ;;  %v13894_v24 = vld [vmem:[#allocation7 + $0x3e0] sm:$0xf0]  ;;  %v15449_v49 = vld [vmem:[#allocation7 + $0x36c] sm:$0xf]  ;;  %v13853_v26 = vor.u32 %v15453_v6, %v13852_v61  ;;  %v13590_v6 = vld [vmem:[#allocation7 + $0x178] sm:$0xf0] }
 0x46c   :  { %9103 = vmatpush.bf16.msra.mxu2 %v14185_v53  ;;  %v13900_v53 = vld [vmem:[#allocation7 + $0x3d0] sm:$0xf]  ;;  %v13846_v20 = vld [vmem:[#allocation7 + $0x380] sm:$0xf0] }
 0x46d   :  { %9117 = vmatpush.bf16.msra.mxu3 %v14377_v47  ;;  %v15461_v47 = vld [vmem:[#allocation7 + $0x3cc] sm:$0xf] }
 0x46e   :  { %9020 = vmatmul.bf16.vlgmr.msrb.gmra.mxu0 %v16954_v13  ;;  %9034 = vmatmul.bf16.vlgmr.msrb.gmra.mxu1 %v16956_v11  ;;  %v13897_v43 = vor.u32 %v15461_v47, %v13894_v24  ;;  %v14044_v47 = vld [vmem:[#allocation7 + $0x4f0] sm:$0xf]  ;;  %v15501_v24 = vld [vmem:[#allocation7 + $0x504] sm:$0xf0] }
 0x46f   :  { %9068 = vmatpush.bf16.msra.mxu0 %v13969_v3  ;;  %9082 = vmatpush.bf16.msra.mxu1 %v14161_v27  ;;  %v15465_v3 = vld [vmem:[#allocation7 + $0x3e4] sm:$0xf0]  ;;  %v14092_v27 = vld [vmem:[#allocation7 + $0x550] sm:$0xf] }
 0x470   :  { %9152 = vmatpush.bf16.msrb.mxu2 %v13973_v38  ;;  %9118 = vmatmul.bf16.vlgmr.msra.gmra.mxu3 %v16956_v11  ;;  %v15513_v38 = vld [vmem:[#allocation7 + $0x564] sm:$0xf0]  ;;  %v13901_v17 = vor.u32 %v15465_v3, %v13900_v53  ;;  %v15443_v53 = vld [vmem:[#allocation7 + $0x33c] sm:$0xf]  ;;  %v13822_v3 = vld [vmem:[#allocation7 + $0x350] sm:$0xf0] }
 0x471   :  { %9166 = vmatpush.bf16.msrb.mxu3 %v14165_v10  ;;  %9104 = vmatmul.bf16.vlgmr.msra.gmra.mxu2 %v16954_v13  ;;  %v15503_v10 = vld [vmem:[#allocation7 + $0x51c] sm:$0xf] }
 0x473   :  { %9069 = vmatpush.bf16.msra.mxu0 %v13945_v46  ;;  %9083 = vmatpush.bf16.msra.mxu1 %v14137_v34  ;;  %v14062_v46 = vld [vmem:[#allocation7 + $0x530] sm:$0xf0]  ;;  %v14093_v34 = vor.u32 %v15513_v38, %v14092_v27  ;;  %v13828_v27 = vld [vmem:[#allocation7 + $0x340] sm:$0xf]  ;;  %v15447_v38 = vld [vmem:[#allocation7 + $0x354] sm:$0xf0] }
 0x474   :  { %9153 = vmatpush.bf16.msrb.mxu2 %v13949_v62  ;;  %v13873_v62 = vor.u32 %v15455_v39, %v13870_v7  ;;  %v14065_v23 = vor.u32 %v15503_v10, %v14062_v46  ;;  %v13825_v39 = vor.u32 %v15443_v53, %v13822_v3  ;;  %v15495_v7 = vld [vmem:[#allocation7 + $0x4d4] sm:$0xf0]  ;;  %v15437_v10 = vld [vmem:[#allocation7 + $0x30c] sm:$0xf]  ;;  %v13798_v46 = vld [vmem:[#allocation7 + $0x320] sm:$0xf0]  ;;  %v13829_v63 = vor.u32 %v15447_v38, %v13828_v27 }
 0x475   :  { %9167 = vmatpush.bf16.msrb.mxu3 %v14141_v57  ;;  %v15497_v57 = vld [vmem:[#allocation7 + $0x4ec] sm:$0xf]  ;;  %v13801_v61 = vor.u32 %v15437_v10, %v13798_v46  ;;  %v15381_v38 = vld [vmem:[#allocation7 + $0x144] sm:$0xf0]  ;;  %v15426_v46 = vld [vmem:[#allocation7 + $0x2b4] sm:$0xf] }
 0x476   :  { %v13566_v10 = vld [vmem:[#allocation7 + $0x148] sm:$0xf0] }
 0x477   :  { %9070 = vmatpush.bf16.msra.mxu0 %v13921_v48  ;;  %9084 = vmatpush.bf16.msra.mxu1 %v14113_v19  ;;  %v14038_v48 = vld [vmem:[#allocation7 + $0x500] sm:$0xf0]  ;;  %v14069_v19 = vor.u32 %v15507_v31, %v14068_v8  ;;  %v13804_v8 = vld [vmem:[#allocation7 + $0x310] sm:$0xf]  ;;  %v15441_v31 = vld [vmem:[#allocation7 + $0x324] sm:$0xf0] }
 0x478   :  { %9154 = vmatpush.bf16.msrb.mxu2 %v13925_v58  ;;  %v13849_v58 = vor.u32 %v15449_v49, %v13846_v20  ;;  %v14041_v12 = vor.u32 %v15497_v57, %v14038_v48  ;;  %v13780_v20 = vld [vmem:[#allocation7 + $0x2e0] sm:$0xf]  ;;  %v15435_v57 = vld [vmem:[#allocation7 + $0x2f4] sm:$0xf0]  ;;  %v15384_v48 = vld [vmem:[#allocation7 + $0x164] sm:$0xf] }
 0x479   :  { %9168 = vmatpush.bf16.msrb.mxu3 %v14117_v22  ;;  %v15491_v22 = vld [vmem:[#allocation7 + $0x4bc] sm:$0xf]  ;;  %v13781_v3 = vor.u32 %v15435_v57, %v13780_v20  ;;  %v15372_v20 = vld [vmem:[#allocation7 + $0x104] sm:$0xf] }
 0x47a   :  { %v13542_v57 = vld [vmem:[#allocation7 + $0x118] sm:$0xf0] }
 0x47b   :  { %9071 = vmatpush.bf16.msra.mxu0 %v13897_v43  ;;  %9085 = vmatpush.bf16.msra.mxu1 %v14089_v51  ;;  %v14014_v43 = vld [vmem:[#allocation7 + $0x4d0] sm:$0xf0]  ;;  %v14045_v51 = vor.u32 %v15501_v24, %v14044_v47  ;;  %v13805_v24 = vor.u32 %v15441_v31, %v13804_v8  ;;  %v15375_v31 = vld [vmem:[#allocation7 + $0x114] sm:$0xf0] }
 0x47c   :  { %9155 = vmatpush.bf16.msrb.mxu2 %v13901_v17  ;;  %v14020_v17 = vld [vmem:[#allocation7 + $0x4c0] sm:$0xf]  ;;  %v14017_v30 = vor.u32 %v15491_v22, %v14014_v43  ;;  %v13564_v22 = vld [vmem:[#allocation7 + $0x130] sm:$0xf]  ;;  %v13593_v43 = vor.u32 %v15384_v48, %v13590_v6  ;;  %v17008_v48 = vpop.f32.mrf.mxu2  ;;  %v15420_v6 = vld [vmem:[#allocation7 + $0x284] sm:$0xf] }
 0x47d   :  { %9169 = vmatpush.bf16.msrb.mxu3 %v14093_v34  ;;  %v15485_v34 = vld [vmem:[#allocation7 + $0x48c] sm:$0xf]  ;;  %v14021_v49 = vor.u32 %v15495_v7, %v14020_v17  ;;  %v15429_v17 = vld [vmem:[#allocation7 + $0x2c4] sm:$0xf0]  ;;  %v15378_v7 = vld [vmem:[#allocation7 + $0x134] sm:$0xf] }
 0x47e   :  { %v13569_v8 = vor.u32 %v15378_v7, %v13566_v10 }
 0x47f   :  { %9072 = vmatpush.bf16.msra.mxu0 %v13873_v62  ;;  %9086 = vmatpush.bf16.msra.mxu1 %v14065_v23  ;;  %v13990_v62 = vld [vmem:[#allocation7 + $0x4a0] sm:$0xf0]  ;;  %v13588_v23 = vld [vmem:[#allocation7 + $0x160] sm:$0xf] }
 0x480   :  { %9156 = vmatpush.bf16.msrb.mxu2 %v13877_v33  ;;  %v15387_v33 = vld [vmem:[#allocation7 + $0x174] sm:$0xf0]  ;;  %v13993_v47 = vor.u32 %v15485_v34, %v13990_v62  ;;  %v13540_v62 = vld [vmem:[#allocation7 + $0x100] sm:$0xf] }
 0x481   :  { %9170 = vmatpush.bf16.msrb.mxu3 %v14069_v19  ;;  %v13996_v19 = vld [vmem:[#allocation7 + $0x490] sm:$0xf]  ;;  %v13589_v53 = vor.u32 %v15387_v33, %v13588_v23  ;;  %v13732_v23 = vld [vmem:[#allocation7 + $0x280] sm:$0xf]  ;;  %v15423_v33 = vld [vmem:[#allocation7 + $0x294] sm:$0xf0] }
 0x483   :  { %9073 = vmatpush.bf16.msra.mxu0 %v13849_v58  ;;  %9087 = vmatpush.bf16.msra.mxu1 %v14041_v12  ;;  %v15489_v58 = vld [vmem:[#allocation7 + $0x4a4] sm:$0xf0]  ;;  %v15432_v12 = vld [vmem:[#allocation7 + $0x2e4] sm:$0xf] }
 0x484   :  { %9157 = vmatpush.bf16.msrb.mxu2 %v13853_v26  ;;  %v13782_v26 = vld [vmem:[#allocation7 + $0x2f8] sm:$0xf0]  ;;  %v13997_v27 = vor.u32 %v15489_v58, %v13996_v19  ;;  %v17014_v58 = vpop.f32.mrf.mxu1 }
 0x485   :  { %9171 = vmatpush.bf16.msrb.mxu3 %v14045_v51  ;;  %v13756_v51 = vld [vmem:[#allocation7 + $0x2b0] sm:$0xf]  ;;  %v13734_v19 = vld [vmem:[#allocation7 + $0x298] sm:$0xf0] }
 0x486   :  { %v13757_v34 = vor.u32 %v15429_v17, %v13756_v51  ;;  %v13518_v51 = vld [vmem:[#allocation7 + $0xe8] sm:$0xf0]  ;;  %v15414_v17 = vld [vmem:[#allocation7 + $0x254] sm:$0xf] }
 0x487   :  { %9074 = vmatpush.bf16.msra.mxu0 %v13825_v39  ;;  %9088 = vmatpush.bf16.msra.mxu1 %v14017_v30  ;;  %v13785_v39 = vor.u32 %v15432_v12, %v13782_v26  ;;  %v13758_v30 = vld [vmem:[#allocation7 + $0x2c8] sm:$0xf0]  ;;  %v13516_v12 = vld [vmem:[#allocation7 + $0xd0] sm:$0xf]  ;;  %v17016_v26 = vpop.f32.mrf.mxu3 }
 0x488   :  { %9158 = vmatpush.bf16.msrb.mxu2 %v13829_v63  ;;  %v13565_v63 = vor.u32 %v15381_v38, %v13564_v22  ;;  %v13708_v22 = vld [vmem:[#allocation7 + $0x250] sm:$0xf]  ;;  %v15366_v38 = vld [vmem:[#allocation7 + $0xd4] sm:$0xf] }
 0x489   :  { %9172 = vmatpush.bf16.msrb.mxu3 %v14021_v49  ;;  %v13761_v49 = vor.u32 %v15426_v46, %v13758_v30  ;;  %v13492_v46 = vld [vmem:[#allocation7 + $0xa0] sm:$0xf]  ;;  %v13521_v30 = vor.u32 %v15366_v38, %v13518_v51  ;;  %v13470_v38 = vld [vmem:[#allocation7 + $0x88] sm:$0xf0] }
 0x48b   :  { %9075 = vmatpush.bf16.msra.mxu0 %v13801_v61  ;;  %9089 = vmatpush.bf16.msra.mxu1 %v13993_v47  ;;  %v17010_v61 = vpop.f32.mrf.mxu0  ;;  %v13541_v47 = vor.u32 %v15375_v31, %v13540_v62  ;;  %v15411_v62 = vld [vmem:[#allocation7 + $0x234] sm:$0xf0]  ;;  %v15360_v31 = vld [vmem:[#allocation7 + $0xa4] sm:$0xf] }
 0x48c   :  { %9159 = vmatpush.bf16.msrb.mxu2 %v13805_v24  ;;  %v13733_v24 = vor.u32 %v15423_v33, %v13732_v23  ;;  %v13494_v23 = vld [vmem:[#allocation7 + $0xb8] sm:$0xf0]  ;;  %v15408_v33 = vld [vmem:[#allocation7 + $0x224] sm:$0xf]  ;;  %v8798_v14 = vadd.f32 %v17010_v61, %v16835_v21 }
 0x48d   :  { %9173 = vmatpush.bf16.msrb.mxu3 %v13997_v27  ;;  %v13737_v27 = vor.u32 %v15420_v6, %v13734_v19  ;;  %v13468_v6 = vld [vmem:[#allocation7 + $0x70] sm:$0xf]  ;;  %v17019_v19 = vpop.f32.mrf.mxu2 }
 0x48e   :  { %9076 = vmatmul.bf16.vlgmr.msra.gmra.mxu0 %v16890_v44  ;;  %9090 = vmatmul.bf16.vlgmr.msra.gmra.mxu1 %v16895_v15  ;;  %v8812_v21 = vadd.f32 %v17014_v58, %v8798_v14  ;;  %v15612_v58 = vld [vmem:[#allocation7 + $0x884] sm:$0xf] }
 0x48f   :  { %9124 = vmatpush.bf16.msrb.mxu0 %v13589_v53  ;;  %9138 = vmatpush.bf16.msrb.mxu1 %v13781_v3  ;;  %v13545_v53 = vor.u32 %v15372_v20, %v13542_v57  ;;  %v15369_v3 = vld [vmem:[#allocation7 + $0xe4] sm:$0xf0]  ;;  %v17025_v51 = vpop.f32.mrf.mxu3 }
 0x490   :  { %9208 = vmatpush.bf16.msra.mxu2 %v13593_v43  ;;  %v15417_v43 = vld [vmem:[#allocation7 + $0x264] sm:$0xf0]  ;;  %9174 = vmatmul.bf16.vlgmr.msrb.gmra.mxu3 %v16895_v15  ;;  %v13517_v7 = vor.u32 %v15369_v3, %v13516_v12 }
 0x491   :  { %9222 = vmatpush.bf16.msra.mxu3 %v13785_v39  ;;  %9160 = vmatmul.bf16.vlgmr.msrb.gmra.mxu2 %v16890_v44  ;;  %v13710_v39 = vld [vmem:[#allocation7 + $0x268] sm:$0xf0]  ;;  %v13709_v10 = vor.u32 %v15417_v43, %v13708_v22  ;;  %v15357_v12 = vld [vmem:[#allocation7 + $0x84] sm:$0xf0]  ;;  %v17023_v22 = vpop.f32.mrf.mxu1 }
 0x492   :  { %v15405_v3 = vld [vmem:[#allocation7 + $0x204] sm:$0xf0] }
 0x493   :  { %9125 = vmatpush.bf16.msrb.mxu0 %v13565_v63  ;;  %9139 = vmatpush.bf16.msrb.mxu1 %v13757_v34  ;;  %v15363_v63 = vld [vmem:[#allocation7 + $0xb4] sm:$0xf0]  ;;  %v13684_v34 = vld [vmem:[#allocation7 + $0x220] sm:$0xf] }
 0x494   :  { %9209 = vmatpush.bf16.msra.mxu2 %v13569_v8  ;;  %v13713_v8 = vor.u32 %v15414_v17, %v13710_v39  ;;  %v13493_v20 = vor.u32 %v15363_v63, %v13492_v46  ;;  %v13685_v57 = vor.u32 %v15411_v62, %v13684_v34  ;;  %v15402_v17 = vld [vmem:[#allocation7 + $0x1f4] sm:$0xf]  ;;  %v13662_v39 = vld [vmem:[#allocation7 + $0x208] sm:$0xf0]  ;;  %v13444_v46 = vld [vmem:[#allocation7 + $0x40] sm:$0xf] }
 0x495   :  { %9223 = vmatpush.bf16.msra.mxu3 %v13761_v49  ;;  %v13686_v49 = vld [vmem:[#allocation7 + $0x238] sm:$0xf0]  ;;  %v15351_v63 = vld [vmem:[#allocation7 + $0x54] sm:$0xf0]  ;;  %v13636_v34 = vld [vmem:[#allocation7 + $0x1c0] sm:$0xf] }
 0x496   :  { %v13689_v43 = vor.u32 %v15408_v33, %v13686_v49  ;;  %v15399_v62 = vld [vmem:[#allocation7 + $0x1d4] sm:$0xf0]  ;;  %v15396_v33 = vld [vmem:[#allocation7 + $0x1c4] sm:$0xf]  ;;  %v13638_v49 = vld [vmem:[#allocation7 + $0x1d8] sm:$0xf0]  ;;  %v13445_v1 = vor.u32 %v15351_v63, %v13444_v46 }
 0x497   :  { %9126 = vmatpush.bf16.msrb.mxu0 %v13541_v47  ;;  %9140 = vmatpush.bf16.msrb.mxu1 %v13733_v24  ;;  %v17021_v47 = vpop.f32.mrf.mxu0  ;;  %v13497_v24 = vor.u32 %v15360_v31, %v13494_v23  ;;  %v13665_v31 = vor.u32 %v15402_v17, %v13662_v39  ;;  %v13446_v23 = vld [vmem:[#allocation7 + $0x58] sm:$0xf0]  ;;  %v13637_v28 = vor.u32 %v15399_v62, %v13636_v34  ;;  %v14356_v17 = vld [vmem:[#allocation7 + $0x760] sm:$0xf]  ;;  %v15579_v39 = vld [vmem:[#allocation7 + $0x774] sm:$0xf0] }
 0x498   :  { %9210 = vmatpush.bf16.msra.mxu2 %v13545_v53  ;;  %v13660_v53 = vld [vmem:[#allocation7 + $0x1f0] sm:$0xf]  ;;  %v15627_v46 = vld [vmem:[#allocation7 + $0x8f4] sm:$0xf0]  ;;  %v15390_v63 = vld [vmem:[#allocation7 + $0x194] sm:$0xf] }
 0x499   :  { %9224 = vmatpush.bf16.msra.mxu3 %v13737_v27  ;;  %v15354_v27 = vld [vmem:[#allocation7 + $0x74] sm:$0xf]  ;;  %v13614_v34 = vld [vmem:[#allocation7 + $0x1a8] sm:$0xf0] }
 0x49b   :  { %9127 = vmatpush.bf16.msrb.mxu0 %v13517_v7  ;;  %9141 = vmatpush.bf16.msrb.mxu1 %v13709_v10  ;;  %v13469_v7 = vor.u32 %v15357_v12, %v13468_v6  ;;  %v13661_v10 = vor.u32 %v15405_v3, %v13660_v53  ;;  %v13612_v6 = vld [vmem:[#allocation7 + $0x190] sm:$0xf]  ;;  %v15393_v53 = vld [vmem:[#allocation7 + $0x1a4] sm:$0xf0]  ;;  %v15342_v3 = vld [vmem:[#allocation7 + $0x14] sm:$0xf] }
 0x49c   :  { %9211 = vmatpush.bf16.msra.mxu2 %v13521_v30  ;;  %v13473_v30 = vor.u32 %v15354_v27, %v13470_v38  ;;  %v13422_v27 = vld [vmem:[#allocation7 + $0x28] sm:$0xf0]  ;;  %v13641_v38 = vor.u32 %v15396_v33, %v13638_v49  ;;  %v13613_v45 = vor.u32 %v15393_v53, %v13612_v6  ;;  %v13617_v33 = vor.u32 %v15390_v63, %v13614_v34  ;;  %v14332_v49 = vld [vmem:[#allocation7 + $0x730] sm:$0xf] }
 0x49d   :  { %9225 = vmatpush.bf16.msra.mxu3 %v13713_v8  ;;  %v15348_v8 = vld [vmem:[#allocation7 + $0x44] sm:$0xf]  ;;  %v14333_v6 = vor.u32 %v15573_v16, %v14332_v49  ;;  %v14526_v53 = vld [vmem:[#allocation7 + $0x8c8] sm:$0xf0]  ;;  %v15609_v49 = vld [vmem:[#allocation7 + $0x864] sm:$0xf0] }
 0x49e   :  { %v14334_v16 = vld [vmem:[#allocation7 + $0x748] sm:$0xf0] }
 0x49f   :  { %9128 = vmatpush.bf16.msrb.mxu0 %v13493_v20  ;;  %9142 = vmatpush.bf16.msrb.mxu1 %v13685_v57  ;;  %v13420_v20 = vld [vmem:[#allocation7 + $0x10] sm:$0xf]  ;;  %v15345_v57 = vld [vmem:[#allocation7 + $0x24] sm:$0xf0]  ;;  %v17027_v12 = vpop.f32.mrf.mxu0 }
 0x4a0   :  { %9212 = vmatpush.bf16.msra.mxu2 %v13497_v24  ;;  %v13449_v24 = vor.u32 %v15348_v8, %v13446_v23  ;;  %v13421_v62 = vor.u32 %v15345_v57, %v13420_v20  ;;  %v13425_v8 = vor.u32 %v15342_v3, %v13422_v27  ;;  %v14357_v23 = vor.u32 %v15579_v39, %v14356_v17  ;;  %v14358_v20 = vld [vmem:[#allocation7 + $0x778] sm:$0xf0]  ;;  %v14308_v27 = vld [vmem:[#allocation7 + $0x700] sm:$0xf] }
 0x4a1   :  { %9226 = vmatpush.bf16.msra.mxu3 %v13689_v43  ;;  %v17029_v43 = vpop.f32.mrf.mxu1  ;;  %v14553_v57 = vor.u32 %v15624_v29, %v14550_v55  ;;  %v14500_v17 = vld [vmem:[#allocation7 + $0x880] sm:$0xf]  ;;  %v15615_v55 = vld [vmem:[#allocation7 + $0x894] sm:$0xf0]  ;;  %v15570_v29 = vld [vmem:[#allocation7 + $0x734] sm:$0xf] }
 0x4a2   :  { %v14501_v34 = vor.u32 %v15615_v55, %v14500_v17  ;;  %v15603_v17 = vld [vmem:[#allocation7 + $0x834] sm:$0xf0] }
 0x4a3   :  { %9129 = vmatpush.bf16.msrb.mxu0 %v13469_v7  ;;  %9143 = vmatpush.bf16.msrb.mxu1 %v13661_v10  ;;  %v14548_v7 = vld [vmem:[#allocation7 + $0x8e0] sm:$0xf]  ;;  %v8881_v10 = vpop.f32.mrf.mxu2 }
 0x4a4   :  { %9213 = vmatpush.bf16.msra.mxu2 %v13473_v30  ;;  %v17031_v30 = vpop.f32.mrf.mxu3  ;;  %v8882_v63 = vadd.f32 %v8881_v10, %v16856_v37  ;;  %v14478_v37 = vld [vmem:[#allocation7 + $0x868] sm:$0xf0] }
 0x4a5   :  { %9227 = vmatpush.bf16.msra.mxu3 %v13665_v31  ;;  %v14549_v31 = vor.u32 %v15627_v46, %v14548_v7  ;;  %v14502_v46 = vld [vmem:[#allocation7 + $0x898] sm:$0xf0] }
 0x4a6   :  { %v8896_v10 = vadd.f32 %v17031_v30, %v8882_v63 }
 0x4a7   :  { %9130 = vmatpush.bf16.msrb.mxu0 %v13445_v1  ;;  %9144 = vmatpush.bf16.msrb.mxu1 %v13637_v28  ;;  %v15621_v1 = vld [vmem:[#allocation7 + $0x8c4] sm:$0xf0]  ;;  %v15576_v28 = vld [vmem:[#allocation7 + $0x764] sm:$0xf]  ;;  %v17036_v61 = vpop.f32.mrf.mxu0 }
 0x4a8   :  { %9214 = vmatpush.bf16.msra.mxu2 %v13449_v24  ;;  %v15618_v24 = vld [vmem:[#allocation7 + $0x8b4] sm:$0xf]  ;;  %v14525_v3 = vor.u32 %v15621_v1, %v14524_v25  ;;  %v14361_v39 = vor.u32 %v15576_v28, %v14358_v20  ;;  %v15564_v1 = vld [vmem:[#allocation7 + $0x704] sm:$0xf]  ;;  %v14310_v28 = vld [vmem:[#allocation7 + $0x718] sm:$0xf0] }
 0x4a9   :  { %9228 = vmatpush.bf16.msra.mxu3 %v13641_v38  ;;  %v15567_v38 = vld [vmem:[#allocation7 + $0x714] sm:$0xf0]  ;;  %v14529_v25 = vor.u32 %v15618_v24, %v14526_v53  ;;  %v14260_v24 = vld [vmem:[#allocation7 + $0x6a0] sm:$0xf] }
 0x4aa   :  { %v14309_v14 = vor.u32 %v15567_v38, %v14308_v27  ;;  %v15555_v53 = vld [vmem:[#allocation7 + $0x6b4] sm:$0xf0] }
 0x4ab   :  { %9131 = vmatpush.bf16.msrb.mxu0 %v13421_v62  ;;  %9145 = vmatpush.bf16.msrb.mxu1 %v13613_v45  ;;  %v17040_v45 = vpop.f32.mrf.mxu1  ;;  %v17043_v7 = vpop.f32.mrf.mxu2  ;;  %v14284_v62 = vld [vmem:[#allocation7 + $0x6d0] sm:$0xf] }
 0x4ac   :  { %9215 = vmatpush.bf16.msra.mxu2 %v13425_v8  ;;  %v15561_v8 = vld [vmem:[#allocation7 + $0x6e4] sm:$0xf0] }
 0x4ad   :  { %9229 = vmatpush.bf16.msra.mxu3 %v13617_v33  ;;  %v17048_v33 = vpop.f32.mrf.mxu3  ;;  %v14285_v20 = vor.u32 %v15561_v8, %v14284_v62  ;;  %v14236_v62 = vld [vmem:[#allocation7 + $0x670] sm:$0xf] }
 0x4ae   :  { %9132 = vmatmul.bf16.vlgmr.msrb.gmra.mxu0 %v16915_v59  ;;  %9146 = vmatmul.bf16.vlgmr.msrb.gmra.mxu1 %v16919_v9  ;;  %v14428_v8 = vld [vmem:[#allocation7 + $0x7f0] sm:$0xf] }
 0x4af   :  { %9180 = vmatpush.bf16.msra.mxu0 %v14357_v23  ;;  %9194 = vmatpush.bf16.msra.mxu1 %v14549_v31  ;;  %v14476_v23 = vld [vmem:[#allocation7 + $0x850] sm:$0xf]  ;;  %v14337_v31 = vor.u32 %v15570_v29, %v14334_v16  ;;  %v8909_v38 = vpop.f32.mrf.mxu0 }
 0x4b0   :  { %9216 = vmatmul.bf16.vlgmr.msra.gmra.mxu2 %v16915_v59  ;;  %9230 = vmatmul.bf16.vlgmr.msra.gmra.mxu3 %v16919_v9  ;;  %v8826_v59 = vadd.f32 %v17008_v48, %v8812_v21  ;;  %v14505_v9 = vor.u32 %v15612_v58, %v14502_v46  ;;  %v14313_v48 = vor.u32 %v15564_v1, %v14310_v28  ;;  %v14286_v21 = vld [vmem:[#allocation7 + $0x6e8] sm:$0xf0]  ;;  %v15600_v58 = vld [vmem:[#allocation7 + $0x824] sm:$0xf]  ;;  %v14454_v46 = vld [vmem:[#allocation7 + $0x838] sm:$0xf0] }
 0x4b1   :  { %9278 = vmatpush.bf16.msrb.mxu3 %v14553_v57  ;;  %9264 = vmatpush.bf16.msrb.mxu2 %v14361_v39  ;;  %v15606_v57 = vld [vmem:[#allocation7 + $0x854] sm:$0xf]  ;;  %v8910_v55 = vadd.f32 %v8909_v38, %v8896_v10  ;;  %v14262_v1 = vld [vmem:[#allocation7 + $0x6b8] sm:$0xf0]  ;;  %v15591_v38 = vld [vmem:[#allocation7 + $0x7d4] sm:$0xf0] }
 0x4b2   :  { %v8840_v27 = vadd.f32 %v17016_v26, %v8826_v59  ;;  %v15558_v39 = vld [vmem:[#allocation7 + $0x6d4] sm:$0xf]  ;;  %v14481_v16 = vor.u32 %v15606_v57, %v14478_v37  ;;  %v15549_v26 = vld [vmem:[#allocation7 + $0x684] sm:$0xf0]  ;;  %v14430_v37 = vld [vmem:[#allocation7 + $0x808] sm:$0xf0] }
 0x4b3   :  { %9181 = vmatpush.bf16.msra.mxu0 %v14333_v6  ;;  %9195 = vmatpush.bf16.msra.mxu1 %v14525_v3  ;;  %v14477_v6 = vor.u32 %v15609_v49, %v14476_v23  ;;  %v14452_v3 = vld [vmem:[#allocation7 + $0x820] sm:$0xf]  ;;  %v8923_v29 = vpop.f32.mrf.mxu1  ;;  %v8937_v30 = vpop.f32.mrf.mxu2  ;;  %v14289_v23 = vor.u32 %v15558_v39, %v14286_v21  ;;  %v15597_v59 = vld [vmem:[#allocation7 + $0x804] sm:$0xf0]  ;;  %v15552_v49 = vld [vmem:[#allocation7 + $0x6a4] sm:$0xf] }
 0x4b4   :  { %v8924_v63 = vadd.f32 %v8923_v29, %v8910_v55  ;;  %v15594_v57 = vld [vmem:[#allocation7 + $0x7f4] sm:$0xf]  ;;  %v14238_v39 = vld [vmem:[#allocation7 + $0x688] sm:$0xf0] }
 0x4b5   :  { %9279 = vmatpush.bf16.msrb.mxu3 %v14529_v25  ;;  %9265 = vmatpush.bf16.msrb.mxu2 %v14337_v31  ;;  %v8854_v25 = vadd.f32 %v17027_v12, %v8840_v27  ;;  %v8951_v31 = vpop.f32.mrf.mxu3  ;;  %v14457_v12 = vor.u32 %v15600_v58, %v14454_v46  ;;  %v6924_v27 = vadd.f32 %v16828_v41, %v16826_v40  ;;  %v15537_v58 = vld [vmem:[#allocation7 + $0x624] sm:$0xf0]  ;;  %v14380_v46 = vld [vmem:[#allocation7 + $0x790] sm:$0xf] }
 0x4b6   :  { %v8938_v28 = vadd.f32 %v8937_v30, %v8924_v63  ;;  %v14406_v30 = vld [vmem:[#allocation7 + $0x7d8] sm:$0xf0]  ;;  %v15585_v63 = vld [vmem:[#allocation7 + $0x7a4] sm:$0xf0]  ;;  %v6840_v41 = vadd.f32 %v16824_v5, %v16822_v54  ;;  %v15474_v5 = vld [vmem:[#allocation7 + $0x434] sm:$0xf] }
 0x4b7   :  { %9182 = vmatpush.bf16.msra.mxu0 %v14309_v14  ;;  %9196 = vmatpush.bf16.msra.mxu1 %v14501_v34  ;;  %v14261_v14 = vor.u32 %v15555_v53, %v14260_v24  ;;  %v14453_v34 = vor.u32 %v15603_v17, %v14452_v3  ;;  %v14212_v24 = vld [vmem:[#allocation7 + $0x640] sm:$0xf]  ;;  %v15543_v53 = vld [vmem:[#allocation7 + $0x654] sm:$0xf0]  ;;  %v15546_v17 = vld [vmem:[#allocation7 + $0x674] sm:$0xf]  ;;  %v6938_v55 = vadd.f32 %v16858_v18, %v6924_v27 }
 0x4b8   :  { %v8952_v10 = vadd.f32 %v8951_v31, %v8938_v28  ;;  %v14404_v3 = vld [vmem:[#allocation7 + $0x7c0] sm:$0xf]  ;;  %v14213_v29 = vor.u32 %v15543_v53, %v14212_v24  ;;  %v14241_v40 = vor.u32 %v15546_v17, %v14238_v39  ;;  %v15540_v18 = vld [vmem:[#allocation7 + $0x644] sm:$0xf]  ;;  %v15582_v28 = vld [vmem:[#allocation7 + $0x794] sm:$0xf] }
 0x4b9   :  { %9280 = vmatpush.bf16.msrb.mxu3 %v14505_v9  ;;  %9266 = vmatpush.bf16.msrb.mxu2 %v14313_v48  ;;  %v8868_v9 = vadd.f32 %v17029_v43, %v8854_v25  ;;  %v14265_v48 = vor.u32 %v15552_v49, %v14262_v1  ;;  %v14433_v43 = vor.u32 %v15594_v57, %v14430_v37  ;;  %v15588_v25 = vld [vmem:[#allocation7 + $0x7c4] sm:$0xf]  ;;  %v13950_v57 = vld [vmem:[#allocation7 + $0x448] sm:$0xf0]  ;;  %v15522_v37 = vld [vmem:[#allocation7 + $0x5b4] sm:$0xf] }
 0x4ba   :  { %v14409_v31 = vor.u32 %v15588_v25, %v14406_v30  ;;  %v6952_v49 = vadd.f32 %v16860_v50, %v6938_v55  ;;  %v15534_v24 = vld [vmem:[#allocation7 + $0x614] sm:$0xf]  ;;  %v14190_v53 = vld [vmem:[#allocation7 + $0x628] sm:$0xf0]  ;;  %v15468_v17 = vld [vmem:[#allocation7 + $0x404] sm:$0xf] }
 0x4bb   :  { %9183 = vmatpush.bf16.msra.mxu0 %v14285_v20  ;;  %9197 = vmatpush.bf16.msra.mxu1 %v14477_v6  ;;  %v14237_v20 = vor.u32 %v15549_v26, %v14236_v62  ;;  %v14429_v6 = vor.u32 %v15597_v59, %v14428_v8  ;;  %v17056_v21 = vpack.c.bf16 %v8952_v10, %v8868_v9  ;;  %v13974_v62 = vld [vmem:[#allocation7 + $0x478] sm:$0xf0]  ;;  %v15528_v26 = vld [vmem:[#allocation7 + $0x5e4] sm:$0xf]  ;;  %v15462_v30 = vld [vmem:[#allocation7 + $0x3d4] sm:$0xf] }
 0x4bc   :  { %v14166_v8 = vld [vmem:[#allocation7 + $0x5f8] sm:$0xf0]  ;;  %v6854_v59 = vadd.f32 %v16808_v36, %v6840_v41  ;;  %v14381_v9 = vor.u32 %v15585_v63, %v14380_v46  ;;  %v15516_v55 = vld [vmem:[#allocation7 + $0x584] sm:$0xf]  ;;  %v14094_v46 = vld [vmem:[#allocation7 + $0x568] sm:$0xf0] }
 0x4bd   :  { %9281 = vmatpush.bf16.msrb.mxu3 %v14481_v16  ;;  %9267 = vmatpush.bf16.msrb.mxu2 %v14289_v23  ;;  %v14188_v16 = vld [vmem:[#allocation7 + $0x610] sm:$0xf]  ;;  %v14214_v23 = vld [vmem:[#allocation7 + $0x658] sm:$0xf0]  ;;  %v14169_v54 = vor.u32 %v15528_v26, %v14166_v8  ;;  %v15456_v41 = vld [vmem:[#allocation7 + $0x3a4] sm:$0xf] }
 0x4be   :  { %v14189_v1 = vor.u32 %v15537_v58, %v14188_v16  ;;  %v14217_v10 = vor.u32 %v15540_v18, %v14214_v23  ;;  %v6868_v50 = vadd.f32 %v16810_v4, %v6854_v59  ;;  %v13926_v39 = vld [vmem:[#allocation7 + $0x418] sm:$0xf0]  ;;  %v15510_v58 = vld [vmem:[#allocation7 + $0x554] sm:$0xf]  ;;  %v8925_v23 = vpop.f32.mrf.mxu1  ;;  %v13854_v59 = vld [vmem:[#allocation7 + $0x388] sm:$0xf0] }
 0x4bf   :  { %9184 = vmatpush.bf16.msra.mxu0 %v14261_v14  ;;  %9198 = vmatpush.bf16.msra.mxu1 %v14453_v34  ;;  %v14405_v14 = vor.u32 %v15591_v38, %v14404_v3  ;;  %v15480_v34 = vld [vmem:[#allocation7 + $0x464] sm:$0xf]  ;;  %v6966_v3 = vadd.f32 %v16845_v35, %v6952_v49  ;;  %v13929_v35 = vor.u32 %v15468_v17, %v13926_v39  ;;  %v14070_v26 = vld [vmem:[#allocation7 + $0x538] sm:$0xf0]  ;;  %v15498_v49 = vld [vmem:[#allocation7 + $0x4f4] sm:$0xf] }
 0x4c0   :  { %v6882_v27 = vadd.f32 %v16841_v52, %v6868_v50  ;;  %v9301_v50 = vld [vmem:[#allocation1] sm:$0xff] }
 0x4c1   :  { %9282 = vmatpush.bf16.msrb.mxu3 %v14457_v12  ;;  %9268 = vmatpush.bf16.msrb.mxu2 %v14265_v48  ;;  %v14382_v12 = vld [vmem:[#allocation7 + $0x7a8] sm:$0xf0]  ;;  %v13953_v48 = vor.u32 %v15474_v5, %v13950_v57  ;;  %v6980_v4 = vadd.f32 %v16847_v32, %v6966_v3  ;;  %v8911_v32 = vpop.f32.mrf.mxu0  ;;  %v14022_v5 = vld [vmem:[#allocation7 + $0x4d8] sm:$0xf0]  ;;  %v15486_v3 = vld [vmem:[#allocation7 + $0x494] sm:$0xf] }
 0x4c2   :  { %v14385_v36 = vor.u32 %v15582_v28, %v14382_v12  ;;  %v6896_v16 = vadd.f32 %v16843_v60, %v6882_v27  ;;  %v8939_v28 = vpop.f32.mrf.mxu2  ;;  %v9302_v27 = vld [vmem:[#allocation1 + $0x9] sm:$0xff] }
 0x4c3   :  { %9185 = vmatpush.bf16.msra.mxu0 %v14237_v20  ;;  %9199 = vmatpush.bf16.msra.mxu1 %v14429_v6  ;;  %v13977_v20 = vor.u32 %v15480_v34, %v13974_v62  ;;  %v14142_v6 = vld [vmem:[#allocation7 + $0x5c8] sm:$0xf0]  ;;  %v8884_v52 = vadd.f32 %v17043_v7, %v6980_v4  ;;  %v14097_v7 = vor.u32 %v15510_v58, %v14094_v46  ;;  %v13878_v34 = vld [vmem:[#allocation7 + $0x3b8] sm:$0xf0]  ;;  %v15504_v62 = vld [vmem:[#allocation7 + $0x524] sm:$0xf]  ;;  %v9325_v58 = vunpack.c.l.bf16 %v17056_v21 }
 0x4c4   :  { %v14145_v38 = vor.u32 %v15522_v37, %v14142_v6  ;;  %v8800_v63 = vadd.f32 %v17021_v47, %v6896_v16  ;;  %v14073_v47 = vor.u32 %v15504_v62, %v14070_v26  ;;  %v15931_v4 = vld [vmem:[#allocation12 + $0x78] sm:$0xff]  ;;  %v15922_v16 = vld [vmem:[#allocation12 + $0x30] sm:$0xff] }
 0x4c5   :  { %9283 = vmatpush.bf16.msrb.mxu3 %v14433_v43  ;;  %9269 = vmatpush.bf16.msrb.mxu2 %v14241_v40  ;;  %v14193_v43 = vor.u32 %v15534_v24, %v14190_v53  ;;  %v8898_v60 = vadd.f32 %v17048_v33, %v8884_v52  ;;  %v15438_v53 = vld [vmem:[#allocation7 + $0x314] sm:$0xf] }
 0x4c6   :  { %v8814_v8 = vadd.f32 %v17023_v22, %v8800_v63  ;;  %v13830_v22 = vld [vmem:[#allocation7 + $0x358] sm:$0xf0] }
 0x4c7   :  { %9186 = vmatpush.bf16.msra.mxu0 %v14213_v29  ;;  %9200 = vmatpush.bf16.msra.mxu1 %v14405_v14  ;;  %v14118_v29 = vld [vmem:[#allocation7 + $0x598] sm:$0xf0]  ;;  %v13902_v14 = vld [vmem:[#allocation7 + $0x3e8] sm:$0xf0]  ;;  %v8912_v18 = vadd.f32 %v8911_v32, %v8898_v60  ;;  %v9326_v60 = vunpack.c.h.bf16 %v17056_v21 }
 0x4c8   :  { %v14121_v25 = vor.u32 %v15516_v55, %v14118_v29  ;;  %v13905_v40 = vor.u32 %v15462_v30, %v13902_v14  ;;  %v8828_v33 = vadd.f32 %v17019_v19, %v8814_v8  ;;  %v15923_v55 = vld [vmem:[#allocation12 + $0x38] sm:$0xff]  ;;  %v9310_v29 = vpack.i.b16 %v9302_v27, %v9302_v27 }
 0x4c9   :  { %9284 = vmatpush.bf16.msrb.mxu3 %v14409_v31  ;;  %9270 = vmatpush.bf16.msrb.mxu2 %v14217_v10  ;;  %v15450_v31 = vld [vmem:[#allocation7 + $0x374] sm:$0xf]  ;;  %v8953_v10 = vpop.f32.mrf.mxu3  ;;  %v15927_v21 = vld [vmem:[#allocation12 + $0x58] sm:$0xff] }
 0x4ca   :  { %v13857_v12 = vor.u32 %v15450_v31, %v13854_v59  ;;  %v8842_v57 = vadd.f32 %v17025_v51, %v8828_v33  ;;  %v9307_v51 = vpack.i.b16 %v9301_v50, %v9301_v50  ;;  %v9312_v52 = vperm.slane %v9310_v29, 0  ;;  %v17080_v14 = vpop.f32.mrf.mxu2  ;;  %v15919_v31 = vld [vmem:[#allocation12 + $0x18] sm:$0xff] }
 0x4cb   :  { %9187 = vmatpush.bf16.msra.mxu0 %v14189_v1  ;;  %9201 = vmatpush.bf16.msra.mxu1 %v14381_v9  ;;  %v8926_v1 = vadd.f32 %v8925_v23, %v8912_v18  ;;  %v17087_v32 = vpop.f32.mrf.mxu0  ;;  %v15928_v18 = vld [vmem:[#allocation12 + $0x60] sm:$0xff]  ;;  %v15939_v59 = vld [vmem:[#allocation12 + $0xb8] sm:$0xff] }
 0x4cc   :  { %v8856_v24 = vadd.f32 %v17036_v61, %v8842_v57  ;;  %v15946_v57 = vld [vmem:[#allocation12 + $0xf0] sm:$0xff] }
 0x4cd   :  { %9285 = vmatpush.bf16.msrb.mxu3 %v14385_v36  ;;  %9271 = vmatpush.bf16.msrb.mxu2 %v14193_v43  ;;  %v8940_v37 = vadd.f32 %v8939_v28, %v8926_v1  ;;  %v13806_v36 = vld [vmem:[#allocation7 + $0x328] sm:$0xf0] }
 0x4ce   :  { %9188 = vmatmul.bf16.vlgmr.msra.gmra.mxu0 %v16954_v13  ;;  %9202 = vmatmul.bf16.vlgmr.msra.gmra.mxu1 %v16956_v11  ;;  %v13809_v17 = vor.u32 %v15438_v53, %v13806_v36  ;;  %v8870_v39 = vadd.f32 %v17040_v45, %v8856_v24  ;;  %v15937_v53 = vld [vmem:[#allocation12 + $0xa8] sm:$0xff] }
 0x4cf   :  { %9236 = vmatpush.bf16.msrb.mxu0 %v13977_v20  ;;  %9250 = vmatpush.bf16.msrb.mxu1 %v14169_v54  ;;  %v15444_v20 = vld [vmem:[#allocation7 + $0x344] sm:$0xf]  ;;  %v15945_v36 = vld [vmem:[#allocation12 + $0xe8] sm:$0xff] }
 0x4d0   :  { %9286 = vmatmul.bf16.vlgmr.msrb.gmra.mxu3 %v16956_v11  ;;  %9272 = vmatmul.bf16.vlgmr.msrb.gmra.mxu2 %v16954_v13  ;;  %v13881_v11 = vor.u32 %v15456_v41, %v13878_v34  ;;  %v14046_v13 = vld [vmem:[#allocation7 + $0x508] sm:$0xf0]  ;;  %v15492_v54 = vld [vmem:[#allocation7 + $0x4c4] sm:$0xf]  ;;  %v13833_v6 = vor.u32 %v15444_v20, %v13830_v22  ;;  %v17090_v41 = vpop.f32.mrf.mxu1  ;;  %v15918_v20 = vld [vmem:[#allocation12 + $0x10] sm:$0xff] }
 0x4d1   :  { %v14049_v9 = vor.u32 %v15498_v49, %v14046_v13  ;;  %v14025_v19 = vor.u32 %v15492_v54, %v14022_v5  ;;  %v17085_v63 = vpop.f32.mrf.mxu3  ;;  %v15929_v34 = vld [vmem:[#allocation12 + $0x68] sm:$0xff]  ;;  %v15947_v49 = vld [vmem:[#allocation12 + $0xf8] sm:$0xff]  ;;  %9807 = vmatpush.bf16.msra.mxu2 %v15939_v59  ;;  %v15926_v54 = vld [vmem:[#allocation12 + $0x50] sm:$0xff] }
 0x4d2   :  { %9821 = vmatpush.bf16.msra.mxu3 %v15947_v49  ;;  %v15938_v5 = vld [vmem:[#allocation12 + $0xb0] sm:$0xff] }
 0x4d3   :  { %9237 = vmatpush.bf16.msrb.mxu0 %v13953_v48  ;;  %9251 = vmatpush.bf16.msrb.mxu1 %v14145_v38  ;;  %v13998_v48 = vld [vmem:[#allocation7 + $0x4a8] sm:$0xf0]  ;;  %v8954_v38 = vadd.f32 %v8953_v10, %v8940_v37  ;;  %v17096_v1 = vpop.f32.mrf.mxu0  ;;  %v7008_v37 = vadd.f32 %v16892_v0, %v16888_v42 }
 0x4d4   :  { %v14001_v43 = vor.u32 %v15486_v3, %v13998_v48  ;;  %v15917_v10 = vld [vmem:[#allocation12 + $0x8] sm:$0xff]  ;;  %v15924_v0 = vld [vmem:[#allocation12 + $0x40] sm:$0xff] }
 0x4d5   :  { %v9295_v61 = vpack.c.bf16 %v8954_v38, %v8870_v39  ;;  %9808 = vmatpush.bf16.msra.mxu2 %v15938_v5  ;;  %v7022_v48 = vadd.f32 %v16866_v56, %v7008_v37  ;;  %v15916_v38 = vld [vmem:[#allocation12] sm:$0xff] }
 0x4d6   :  { %9822 = vmatpush.bf16.msra.mxu3 %v15946_v57  ;;  %v15936_v39 = vld [vmem:[#allocation12 + $0xa0] sm:$0xff] }
 0x4d7   :  { %9238 = vmatpush.bf16.msrb.mxu0 %v13929_v35  ;;  %9252 = vmatpush.bf16.msrb.mxu1 %v14121_v25  ;;  %v9309_v35 = vperm.slane %v9307_v51, 0  ;;  %v15930_v25 = vld [vmem:[#allocation12 + $0x70] sm:$0xff]  ;;  %v9331_v30 = vunpack.c.l.bf16 %v9295_v61  ;;  %v9332_v45 = vunpack.c.h.bf16 %v9295_v61  ;;  %v15944_v51 = vld [vmem:[#allocation12 + $0xe0] sm:$0xff] }
 0x4d8   :  { %v17234_v56 = vld [vmem:[#allocation27_spill] sm:$0xff] }
 0x4d9   :  { %v9337_v46 = vunpack.c.l.bf16 %v9309_v35  ;;  %v17094_v33 = vpop.f32.mrf.mxu3  ;;  %9809 = vmatpush.bf16.msra.mxu2 %v15937_v53 }
 0x4da   :  { %9823 = vmatpush.bf16.msra.mxu3 %v15945_v36 }
 0x4db   :  { %9239 = vmatpush.bf16.msrb.mxu0 %v13905_v40  ;;  %9253 = vmatpush.bf16.msrb.mxu1 %v14097_v7  ;;  %v15921_v40 = vld [vmem:[#allocation12 + $0x28] sm:$0xff]  ;;  %v9338_v7 = vunpack.c.l.bf16 %v9312_v52  ;;  %v9343_v26 = vadd.f32 %v9337_v46, %v9325_v58  ;;  %v15943_v58 = vld [vmem:[#allocation12 + $0xd8] sm:$0xff] }
 0x4dd   :  { %v9350_v62 = vadd.f32 %v9338_v7, %v9332_v45  ;;  %v9344_v8 = vadd.f32 %v9338_v7, %v9326_v60  ;;  %9810 = vmatpush.bf16.msra.mxu2 %v15936_v39  ;;  %v15935_v45 = vld [vmem:[#allocation12 + $0x98] sm:$0xff] }
 0x4de   :  { %9824 = vmatpush.bf16.msra.mxu3 %v15944_v51  ;;  %v17237_v7 = vld [vmem:[#allocation30_spill] sm:$0xff] }
 0x4df   :  { %9240 = vmatpush.bf16.msrb.mxu0 %v13881_v11  ;;  %9254 = vmatpush.bf16.msrb.mxu1 %v14073_v47  ;;  %v9356_v11 = vpack.c.bf16 %v9350_v62, %v9344_v8  ;;  %v17092_v47 = vpop.f32.mrf.mxu2  ;;  %v17238_v8 = vld [vmem:[#allocation21_spill] sm:$0xff] }
 0x4e1   :  { %v9362_v28 = vunpack.c.l.bf16 %v9356_v11  ;;  %v9368_v22 = vunpack.c.h.bf16 %v9356_v11  ;;  %v9063_v27 = vpop.f32.mrf.mxu3  ;;  %9811 = vmatpush.bf16.msra.mxu2 %v15935_v45 }
 0x4e2   :  { %9825 = vmatpush.bf16.msra.mxu3 %v15943_v58 }
 0x4e3   :  { %9241 = vmatpush.bf16.msrb.mxu0 %v13857_v12  ;;  %9255 = vmatpush.bf16.msrb.mxu1 %v14049_v9  ;;  %v17098_v12 = vpop.f32.mrf.mxu1 }
 0x4e7   :  { %9242 = vmatpush.bf16.msrb.mxu0 %v13833_v6  ;;  %9256 = vmatpush.bf16.msrb.mxu1 %v14025_v19  ;;  %v15925_v6 = vld [vmem:[#allocation12 + $0x48] sm:$0xff]  ;;  %v9049_v24 = vpop.f32.mrf.mxu2 }
 0x4eb   :  { %9243 = vmatpush.bf16.msrb.mxu0 %v13809_v17  ;;  %9257 = vmatpush.bf16.msrb.mxu1 %v14001_v43  ;;  %v17102_v19 = vpop.f32.mrf.mxu0  ;;  %v17104_v50 = vpop.f32.mrf.mxu1 }
 0x4ee   :  { %9244 = vmatmul.bf16.vlgmr.msrb.gmra.mxu0 %v16890_v44  ;;  %9258 = vmatmul.bf16.vlgmr.msrb.gmra.mxu1 %v16895_v15  ;;  %v9349_v44 = vadd.f32 %v9337_v46, %v9331_v30  ;;  %v15920_v15 = vld [vmem:[#allocation12 + $0x20] sm:$0xff]  ;;  %v17236_v46 = vld [vmem:[#allocation26_spill] sm:$0xff] }
 0x4ef   :  { %9779 = vmatpush.bf16.msra.mxu0 %v15923_v55  ;;  %9793 = vmatpush.bf16.msra.mxu1 %v15931_v4  ;;  %v17232_v55 = vld [vmem:[#allocation28_spill] sm:$0xff]  ;;  %v9051_v60 = vpop.f32.mrf.mxu2 }
 0x4f0   :  { %v9355_v23 = vpack.c.bf16 %v9349_v44, %v9343_v26  ;;  %v7092_v29 = vadd.f32 %v17232_v55, %v16921_v2  ;;  %v17233_v4 = vld [vmem:[#allocation20_spill] sm:$0xff]  ;;  %v15934_v26 = vld [vmem:[#allocation12 + $0x90] sm:$0xff] }
 0x4f1   :  { %v7036_v61 = vadd.f32 %v17233_v4, %v7022_v48  ;;  %9812 = vmatpush.bf16.msra.mxu2 %v15934_v26 }
 0x4f2   :  { %v9361_v13 = vunpack.c.l.bf16 %v9355_v23  ;;  %v9367_v9 = vunpack.c.h.bf16 %v9355_v23  ;;  %v7106_v35 = vadd.f32 %v17234_v56, %v7092_v29  ;;  %v17239_v23 = vld [vmem:[#allocation22_spill] sm:$0xff] }
 0x4f3   :  { %9780 = vmatpush.bf16.msra.mxu0 %v15922_v16  ;;  %9794 = vmatpush.bf16.msra.mxu1 %v15930_v25  ;;  %v17235_v16 = vld [vmem:[#allocation25_spill] sm:$0xff]  ;;  %v9023_v2 = vpop.f32.mrf.mxu0  ;;  %v9037_v62 = vpop.f32.mrf.mxu1  ;;  %v9050_v11 = vadd.f32 %v9049_v24, %v17239_v23  ;;  %v15940_v24 = vld [vmem:[#allocation12 + $0xc0] sm:$0xff] }
 0x4f4   :  { %16001 = vtanh.f32 %v9361_v13  ;;  %v8966_v52 = vadd.f32 %v17087_v32, %v17235_v16  ;;  %v9065_v32 = vpop.f32.mrf.mxu3  ;;  %v15933_v13 = vld [vmem:[#allocation12 + $0x88] sm:$0xff] }
 0x4f5   :  { %16003 = vtanh.f32 %v9362_v28  ;;  %v15941_v28 = vld [vmem:[#allocation12 + $0xc8] sm:$0xff]  ;;  %9813 = vmatpush.bf16.msra.mxu2 %v15933_v13 }
 0x4f6   :  { %16005 = vtanh.f32 %v9367_v9  ;;  %v8980_v44 = vadd.f32 %v17090_v41, %v8966_v52  ;;  %v9064_v41 = vadd.f32 %v9063_v27, %v9050_v11  ;;  %v9303_v27 = vld [vmem:[#allocation1 + $0x12] sm:$0xff] }
 0x4f7   :  { %9781 = vmatpush.bf16.msra.mxu0 %v15921_v40  ;;  %9795 = vmatpush.bf16.msra.mxu1 %v15929_v34  ;;  %16007 = vtanh.f32 %v9368_v22  ;;  %v7050_v40 = vadd.f32 %v17236_v46, %v7036_v61  ;;  %v7120_v34 = vadd.f32 %v17237_v7, %v7106_v35 }
 0x4f8   :  { %v8994_v59 = vadd.f32 %v17080_v14, %v8980_v44  ;;  %v15932_v14 = vld [vmem:[#allocation12 + $0x80] sm:$0xff] }
 0x4f9   :  { %9814 = vmatpush.bf16.msra.mxu2 %v15932_v14  ;;  %v17243_v14 = vld [vmem:[#allocation33_spill] sm:$0xff] }
 0x4fa   :  { %v16002_v3 = vpop.eup %16001  ;;  %v9008_v57 = vadd.f32 %v17085_v63, %v8994_v59 }
 0x4fb   :  { %9782 = vmatpush.bf16.msra.mxu0 %v15920_v15  ;;  %9796 = vmatpush.bf16.msra.mxu1 %v15928_v18  ;;  %v16004_v42 = vpop.eup %16003  ;;  %v15942_v15 = vld [vmem:[#allocation12 + $0xd0] sm:$0xff]  ;;  %v7064_v18 = vadd.f32 %v17238_v8, %v7050_v40 }
 0x4fc   :  { %v16006_v17 = vpop.eup %16005  ;;  %9826 = vmatpush.bf16.msra.mxu3 %v15942_v15  ;;  %v9022_v53 = vadd.f32 %v17102_v19, %v9008_v57 }
 0x4fd   :  { %v16008_v43 = vpop.eup %16007  ;;  %v9385_v25 = vpack.c.bf16 %v16006_v17, %v16002_v3  ;;  %v8968_v49 = vadd.f32 %v17096_v1, %v7064_v18 }
 0x4fe   :  { %v9386_v30 = vpack.c.bf16 %v16008_v43, %v16004_v42  ;;  %v9036_v63 = vadd.f32 %v17104_v50, %v9022_v53  ;;  %v15953_v53 = vld [vmem:[#allocation12 + $0x128] sm:$0xff] }
 0x4ff   :  { %9783 = vmatpush.bf16.msra.mxu0 %v15919_v31  ;;  %9797 = vmatpush.bf16.msra.mxu1 %v15927_v21  ;;  %v17240_v31 = vld [vmem:[#allocation23_spill] sm:$0xff]  ;;  %v8982_v22 = vadd.f32 %v17098_v12, %v8968_v49  ;;  %v9304_v12 = vld [vmem:[#allocation1 + $0x1b] sm:$0xff] }
 0x500   :  { %v7134_v21 = vadd.f32 %v17240_v31, %v7120_v34  ;;  %9827 = vmatpush.bf16.msra.mxu3 %v15941_v28  ;;  %v9316_v43 = vpack.i.b16 %v9304_v12, %v9304_v12 }
 0x501   :  { %v8996_v3 = vadd.f32 %v17092_v47, %v8982_v22  ;;  %v15955_v22 = vld [vmem:[#allocation12 + $0x138] sm:$0xff] }
 0x502   :  { %v9318_v35 = vperm.slane %v9316_v43, 0  ;;  %v15951_v43 = vld [vmem:[#allocation12 + $0x118] sm:$0xff] }
 0x503   :  { %9784 = vmatpush.bf16.msra.mxu0 %v15918_v20  ;;  %9798 = vmatpush.bf16.msra.mxu1 %v15926_v54  ;;  %v9105_v20 = vpop.f32.mrf.mxu2  ;;  %v17241_v54 = vld [vmem:[#allocation29_spill] sm:$0xff]  ;;  %v9010_v39 = vadd.f32 %v17094_v33, %v8996_v3 }
 0x504   :  { %v7148_v5 = vadd.f32 %v17241_v54, %v7134_v21  ;;  %9828 = vmatpush.bf16.msra.mxu3 %v15940_v24  ;;  %v9340_v58 = vunpack.c.l.bf16 %v9318_v35  ;;  %v15963_v54 = vld [vmem:[#allocation12 + $0x178] sm:$0xff]  ;;  %v15950_v35 = vld [vmem:[#allocation12 + $0x110] sm:$0xff] }
 0x505   :  { %v9024_v4 = vadd.f32 %v9023_v2, %v9010_v39  ;;  %v17246_v39 = vld [vmem:[#allocation34_spill] sm:$0xff] }
 0x506   :  { %v9052_v1 = vadd.f32 %v9051_v60, %v7148_v5 }
 0x507   :  { %9785 = vmatpush.bf16.msra.mxu0 %v15917_v10  ;;  %9799 = vmatpush.bf16.msra.mxu1 %v15925_v6  ;;  %v9119_v6 = vpop.f32.mrf.mxu3  ;;  %v9038_v52 = vadd.f32 %v9037_v62, %v9024_v4 }
 0x50b   :  { %9786 = vmatpush.bf16.msra.mxu0 %v15916_v38  ;;  %9800 = vmatpush.bf16.msra.mxu1 %v15924_v0  ;;  %v9077_v9 = vpop.f32.mrf.mxu0  ;;  %v9091_v10 = vpop.f32.mrf.mxu1  ;;  %v9066_v38 = vadd.f32 %v9065_v32, %v9052_v1  ;;  %v9313_v0 = vpack.i.b16 %v9303_v27, %v9303_v27  ;;  %v17244_v27 = vld [vmem:[#allocation24_spill] sm:$0xff] }
 0x50c   :  { %v9078_v37 = vadd.f32 %v9077_v9, %v9064_v41  ;;  %v9107_v29 = vpop.f32.mrf.mxu2 }
 0x50d   :  { %v9315_v47 = vperm.slane %v9313_v0, 0  ;;  %v17245_v0 = vld [vmem:[#allocation31_spill] sm:$0xff] }
 0x50e   :  { %9787 = vmatmul.bf16.vlgmr.msra.gmra.mxu0 %v9385_v25  ;;  %9801 = vmatmul.bf16.vlgmr.msra.gmra.mxu1 %v9386_v30  ;;  %v9092_v36 = vadd.f32 %v9091_v10, %v9078_v37  ;;  %v15954_v37 = vld [vmem:[#allocation12 + $0x130] sm:$0xff] }
 0x50f   :  { %v9121_v56 = vpop.f32.mrf.mxu3  ;;  %v9339_v30 = vunpack.c.l.bf16 %v9315_v47  ;;  %9835 = vmatpush.bf16.msrb.mxu0 %v15955_v22  ;;  %9849 = vmatpush.bf16.msrb.mxu1 %v15963_v54  ;;  %v15962_v10 = vld [vmem:[#allocation12 + $0x170] sm:$0xff] }
 0x510   :  { %v9106_v48 = vadd.f32 %v9105_v20, %v9092_v36  ;;  %v15961_v36 = vld [vmem:[#allocation12 + $0x168] sm:$0xff] }
 0x512   :  { %v9120_v42 = vadd.f32 %v9119_v6, %v9106_v48  ;;  %v17242_v6 = vld [vmem:[#allocation32_spill] sm:$0xff] }
 0x513   :  { %v9079_v17 = vpop.f32.mrf.mxu0  ;;  %v9093_v19 = vpop.f32.mrf.mxu1  ;;  %9836 = vmatpush.bf16.msrb.mxu0 %v15954_v37  ;;  %9850 = vmatpush.bf16.msrb.mxu1 %v15962_v10  ;;  %v7176_v24 = vadd.f32 %v17243_v14, %v17242_v6 }
 0x514   :  { %v9293_v51 = vpack.c.bf16 %v9120_v42, %v9036_v63  ;;  %v9080_v55 = vadd.f32 %v9079_v17, %v9066_v38  ;;  %v9161_v49 = vpop.f32.mrf.mxu2  ;;  %v15952_v63 = vld [vmem:[#allocation12 + $0x120] sm:$0xff] }
 0x515   :  { %v7190_v12 = vadd.f32 %v17244_v27, %v7176_v24  ;;  %v15960_v42 = vld [vmem:[#allocation12 + $0x160] sm:$0xff] }
 0x516   :  { %v9094_v61 = vadd.f32 %v9093_v19, %v9080_v55  ;;  %v9327_v50 = vunpack.c.l.bf16 %v9293_v51  ;;  %v9328_v45 = vunpack.c.h.bf16 %v9293_v51  ;;  %v15959_v55 = vld [vmem:[#allocation12 + $0x158] sm:$0xff] }
 0x517   :  { %v9175_v41 = vpop.f32.mrf.mxu3  ;;  %9837 = vmatpush.bf16.msrb.mxu0 %v15953_v53  ;;  %9851 = vmatpush.bf16.msrb.mxu1 %v15961_v36  ;;  %v7204_v17 = vadd.f32 %v17245_v0, %v7190_v12  ;;  %v17247_v19 = vld [vmem:[#allocation39_spill] sm:$0xff] }
 0x518   :  { %v9108_v16 = vadd.f32 %v9107_v29, %v9094_v61  ;;  %v9345_v60 = vadd.f32 %v9339_v30, %v9327_v50  ;;  %v9346_v7 = vadd.f32 %v9340_v58, %v9328_v45 }
 0x519   :  { %v7218_v29 = vadd.f32 %v17247_v19, %v7204_v17 }
 0x51a   :  { %v9122_v25 = vadd.f32 %v9121_v56, %v9108_v16  ;;  %v15958_v16 = vld [vmem:[#allocation12 + $0x150] sm:$0xff] }
 0x51b   :  { %9838 = vmatpush.bf16.msrb.mxu0 %v15952_v63  ;;  %9852 = vmatpush.bf16.msrb.mxu1 %v15960_v42 }
 0x51c   :  { %v9296_v46 = vpack.c.bf16 %v9122_v25, %v9038_v52  ;;  %v17128_v9 = vpop.f32.mrf.mxu2  ;;  %v17248_v52 = vld [vmem:[#allocation40_spill] sm:$0xff] }
 0x51d   :  { %v7232_v25 = vadd.f32 %v17248_v52, %v7218_v29 }
 0x51e   :  { %v9333_v40 = vunpack.c.l.bf16 %v9296_v46  ;;  %v9334_v33 = vunpack.c.h.bf16 %v9296_v46 }
 0x51f   :  { %v17130_v57 = vpop.f32.mrf.mxu3  ;;  %9839 = vmatpush.bf16.msrb.mxu0 %v15951_v43  ;;  %9853 = vmatpush.bf16.msrb.mxu1 %v15959_v55 }
 0x520   :  { %v9351_v34 = vadd.f32 %v9339_v30, %v9333_v40  ;;  %v9352_v44 = vadd.f32 %v9340_v58, %v9334_v33  ;;  %v17249_v30 = vld [vmem:[#allocation42_spill] sm:$0xff]  ;;  %v15949_v40 = vld [vmem:[#allocation12 + $0x108] sm:$0xff] }
 0x521   :  { %v15957_v33 = vld [vmem:[#allocation12 + $0x148] sm:$0xff] }
 0x522   :  { %v9357_v32 = vpack.c.bf16 %v9351_v34, %v9345_v60  ;;  %v9358_v2 = vpack.c.bf16 %v9352_v44, %v9346_v7  ;;  %v15948_v34 = vld [vmem:[#allocation12 + $0x100] sm:$0xff] }
 0x523   :  { %9840 = vmatpush.bf16.msrb.mxu0 %v15950_v35  ;;  %9854 = vmatpush.bf16.msrb.mxu1 %v15958_v16  ;;  %v15956_v44 = vld [vmem:[#allocation12 + $0x140] sm:$0xff] }
 0x524   :  { %v9363_v26 = vunpack.c.l.bf16 %v9357_v32  ;;  %v9364_v15 = vunpack.c.l.bf16 %v9358_v2  ;;  %v9369_v8 = vunpack.c.h.bf16 %v9357_v32  ;;  %v9370_v18 = vunpack.c.h.bf16 %v9358_v2 }
 0x526   :  { %16009 = vtanh.f32 %v9363_v26 }
 0x527   :  { %16011 = vtanh.f32 %v9364_v15  ;;  %9841 = vmatpush.bf16.msrb.mxu0 %v15949_v40  ;;  %9855 = vmatpush.bf16.msrb.mxu1 %v15957_v33  ;;  %v15976_v40 = vld [vmem:[#allocation13] ss:$0 sm:$0xff] }
 0x528   :  { %16013 = vtanh.f32 %v9369_v8 }
 0x529   :  { %16015 = vtanh.f32 %v9370_v18  ;;  %v17250_v18 = vld [vmem:[#allocation35_spill] sm:$0xff] }
 0x52b   :  { %v9133_v13 = vpop.f32.mrf.mxu0  ;;  %v9147_v28 = vpop.f32.mrf.mxu1  ;;  %9842 = vmatpush.bf16.msrb.mxu0 %v15948_v34  ;;  %9856 = vmatpush.bf16.msrb.mxu1 %v15956_v44 }
 0x52c   :  { %v16010_v62 = vpop.eup %16009  ;;  %v9134_v51 = vadd.f32 %v9133_v13, %v17246_v39  ;;  %v9306_v13 = vld [vmem:[#allocation1 + $0x2d] sm:$0xff] }
 0x52d   :  { %v16012_v23 = vpop.eup %16011  ;;  %v9322_v10 = vpack.i.b16 %v9306_v13, %v9306_v13 }
 0x52e   :  { %v16014_v11 = vpop.eup %16013  ;;  %v9148_v61 = vadd.f32 %v9147_v28, %v9134_v51 }
 0x52f   :  { %v16016_v31 = vpop.eup %16015  ;;  %v9387_v21 = vpack.c.bf16 %v16014_v11, %v16010_v62 }
 0x530   :  { %v9388_v59 = vpack.c.bf16 %v16016_v31, %v16012_v23  ;;  %v9162_v58 = vadd.f32 %v9161_v49, %v9148_v61  ;;  %v9305_v49 = vld [vmem:[#allocation1 + $0x24] sm:$0xff] }
 0x531   :  { %9815 = vmatmul.bf16.vlgmr.msra.gmra.mxu2 %v9387_v21  ;;  %v9319_v54 = vpack.i.b16 %v9305_v49, %v9305_v49 }
 0x532   :  { %9829 = vmatmul.bf16.vlgmr.msra.gmra.mxu3 %v9388_v59  ;;  %v9176_v2 = vadd.f32 %v9175_v41, %v9162_v58 }
 0x533   :  { %v9135_v20 = vpop.f32.mrf.mxu0  ;;  %v9149_v5 = vpop.f32.mrf.mxu1  ;;  %v9321_v53 = vperm.slane %v9319_v54, 0 }
 0x534   :  { %v9217_v48 = vpop.f32.mrf.mxu2  ;;  %v9231_v38 = vpop.f32.mrf.mxu3  ;;  %v9136_v46 = vadd.f32 %v9135_v20, %v7232_v25 }
 0x535   :  { %v9218_v50 = vadd.f32 %v9217_v48, %v17249_v30  ;;  %v9324_v48 = vperm.slane %v9322_v10, 0  ;;  %v9341_v63 = vunpack.c.l.bf16 %v9321_v53 }
 0x536   :  { %v9150_v32 = vadd.f32 %v9149_v5, %v9136_v46 }
 0x537   :  { %v9232_v60 = vadd.f32 %v9231_v38, %v9218_v50  ;;  %v9342_v0 = vunpack.c.l.bf16 %v9324_v48 }
 0x538   :  { %v9164_v21 = vadd.f32 %v17128_v9, %v9150_v32 }
 0x53a   :  { %v9178_v5 = vadd.f32 %v17130_v57, %v9164_v21 }
 0x53c   :  { %v9219_v56 = vpop.f32.mrf.mxu2  ;;  %v9233_v45 = vpop.f32.mrf.mxu3 }
 0x53d   :  { %v9220_v62 = vadd.f32 %v9219_v56, %v17250_v18 }
 0x53f   :  { %v9234_v28 = vadd.f32 %v9233_v45, %v9220_v62 }
 0x54b   :  { %v9189_v1 = vpop.f32.mrf.mxu0  ;;  %v9203_v3 = vpop.f32.mrf.mxu1 }
 0x54c   :  { %v9190_v23 = vadd.f32 %v9189_v1, %v9176_v2 }
 0x54e   :  { %v9204_v20 = vadd.f32 %v9203_v3, %v9190_v23 }
 0x553   :  { %v9191_v4 = vpop.f32.mrf.mxu0  ;;  %v9205_v47 = vpop.f32.mrf.mxu1 }
 0x554   :  { %v9273_v8 = vpop.f32.mrf.mxu2  ;;  %v9287_v31 = vpop.f32.mrf.mxu3  ;;  %v9192_v24 = vadd.f32 %v9191_v4, %v9178_v5 }
 0x556   :  { %v9206_v12 = vadd.f32 %v9205_v47, %v9192_v24 }
 0x55c   :  { %v9275_v36 = vpop.f32.mrf.mxu2  ;;  %v9289_v27 = vpop.f32.mrf.mxu3 }
 0x56b   :  { %v9245_v7 = vpop.f32.mrf.mxu0  ;;  %v9259_v15 = vpop.f32.mrf.mxu1 }
 0x56c   :  { %v9246_v26 = vadd.f32 %v9245_v7, %v9232_v60 }
 0x56e   :  { %v9260_v11 = vadd.f32 %v9259_v15, %v9246_v26 }
 0x570   :  { %v9274_v59 = vadd.f32 %v9273_v8, %v9260_v11 }
 0x572   :  { %v9288_v22 = vadd.f32 %v9287_v31, %v9274_v59 }
 0x573   :  { %v9247_v41 = vpop.f32.mrf.mxu0  ;;  %v9261_v14 = vpop.f32.mrf.mxu1 }
 0x574   :  { %v9294_v37 = vpack.c.bf16 %v9288_v22, %v9204_v20  ;;  %v9248_v6 = vadd.f32 %v9247_v41, %v9234_v28 }
 0x576   :  { %v9262_v1 = vadd.f32 %v9261_v14, %v9248_v6  ;;  %v9329_v3 = vunpack.c.l.bf16 %v9294_v37  ;;  %v9330_v42 = vunpack.c.h.bf16 %v9294_v37 }
 0x578   :  { %v9276_v9 = vadd.f32 %v9275_v36, %v9262_v1  ;;  %v9347_v51 = vadd.f32 %v9341_v63, %v9329_v3  ;;  %v9348_v43 = vadd.f32 %v9342_v0, %v9330_v42 }
 0x57a   :  { %v9290_v38 = vadd.f32 %v9289_v27, %v9276_v9 }
 0x57c   :  { %v9297_v17 = vpack.c.bf16 %v9290_v38, %v9206_v12 }
 0x57e   :  { %v9335_v39 = vunpack.c.l.bf16 %v9297_v17  ;;  %v9336_v57 = vunpack.c.h.bf16 %v9297_v17 }
 0x580   :  { %v9353_v55 = vadd.f32 %v9341_v63, %v9335_v39  ;;  %v9354_v19 = vadd.f32 %v9342_v0, %v9336_v57 }
 0x582   :  { %v9359_v29 = vpack.c.bf16 %v9353_v55, %v9347_v51  ;;  %v9360_v4 = vpack.c.bf16 %v9354_v19, %v9348_v43 }
 0x584   :  { %v9365_v61 = vunpack.c.l.bf16 %v9359_v29  ;;  %v9366_v56 = vunpack.c.l.bf16 %v9360_v4  ;;  %v9371_v35 = vunpack.c.h.bf16 %v9359_v29  ;;  %v9372_v16 = vunpack.c.h.bf16 %v9360_v4 }
 0x586   :  { %16017 = vtanh.f32 %v9365_v61 }
 0x587   :  { %16019 = vtanh.f32 %v9366_v56 }
 0x588   :  { %16021 = vtanh.f32 %v9371_v35 }
 0x589   :  { %16023 = vtanh.f32 %v9372_v16 }
 0x58b   :  { %v9788_v58 = vpop.f32.mrf.mxu0  ;;  %v9802_v46 = vpop.f32.mrf.mxu1 }
 0x58c   :  { %v16018_v47 = vpop.eup %16017  ;;  %v9789_v33 = vadd.f32 %v15976_v40, %v9788_v58 }
 0x58d   :  { %v16020_v52 = vpop.eup %16019 }
 0x58e   :  { %v16022_v25 = vpop.eup %16021  ;;  %v9803_v34 = vadd.f32 %v9802_v46, %v9789_v33 }
 0x58f   :  { %v16024_v30 = vpop.eup %16023  ;;  %v9389_v50 = vpack.c.bf16 %v16022_v25, %v16018_v47 }
 0x590   :  { %v9390_v45 = vpack.c.bf16 %v16024_v30, %v16020_v52 }
 0x591   :  { %9843 = vmatmul.bf16.vlgmr.msrb.gmra.mxu0 %v9389_v50 }
 0x592   :  { %9857 = vmatmul.bf16.vlgmr.msrb.gmra.mxu1 %v9390_v45 }
 0x593   :  { %v9790_v7 = vpop.f32.mrf.mxu0  ;;  %v9804_v44 = vpop.f32.mrf.mxu1 }
 0x594   :  { %v9791_v26 = vadd.f32 %v15976_v40, %v9790_v7 }
 0x596   :  { %v9805_v62 = vadd.f32 %v9804_v44, %v9791_v26 }
 0x5b4   :  { %v9816_v60 = vpop.f32.mrf.mxu2 }
 0x5b5   :  { %v9817_v32 = vadd.f32 %v9816_v60, %v9803_v34  ;;  %v9830_v2 = vpop.f32.mrf.mxu3 }
 0x5b7   :  { %v9831_v15 = vadd.f32 %v9830_v2, %v9817_v32 }
 0x5bc   :  { %v9818_v8 = vpop.f32.mrf.mxu2 }
 0x5bd   :  { %v9819_v31 = vadd.f32 %v9818_v8, %v9805_v62  ;;  %v9832_v59 = vpop.f32.mrf.mxu3 }
 0x5bf   :  { %v9833_v49 = vadd.f32 %v9832_v59, %v9819_v31 }
 0x60e   :  { %v9844_v18 = vpop.f32.mrf.mxu0 }
 0x60f   :  { %v9845_v23 = vadd.f32 %v9844_v18, %v9831_v15  ;;  %v9858_v11 = vpop.f32.mrf.mxu1 }
 0x611   :  { %v9859_v21 = vadd.f32 %v9858_v11, %v9845_v23 }
 0x613   :  { %9863 = vst [vmem:[%s17160_s11] sm:$0xff] %v9859_v21 }
 0x616   :  { %v9846_v13 = vpop.f32.mrf.mxu0 }
 0x617   :  { %v9847_v28 = vadd.f32 %v9846_v13, %v9833_v49  ;;  %v9860_v20 = vpop.f32.mrf.mxu1 }
 0x619   :  { %v9861_v22 = vadd.f32 %v9860_v20, %v9847_v28 }
 0x61b   :  { %9864 = vst [vmem:[%s17160_s11 + $0x8] sm:$0xff] %v9861_v22 }
 0x61c   :  { %9869 = vsyncpa [#allocation3], 1 }
 0x61d   :  { %9870 = vsyncpa [#allocation5], 1 }
 0x61e   :  { %9871 = vsyncpa [#allocation8], 1 }
 0x61f   :  { %9872 = vsyncpa [#allocation11], 1 }
 0x620   :  { %9873 = vsyncpa [#allocation14], 1 }

</bundles_post_ra>
